<compile_context>
chip_gen: v7x
topology: tpu7x:2x2x1
jax: 0.10.0
libtpu: 0.0.40
codegen_flags: <defaults>
</compile_context>

<pallas_src>
import jax
import jax.numpy as jnp
from jax import lax
from jax.experimental import pallas as pl
from jax.experimental.pallas import tpu as pltpu


def _round_up(x, m):
    return (x + m - 1) // m * m


def _pad_to(a, shape, dtype=None):
    p = jnp.pad(a, [(0, s - d) for d, s in zip(a.shape, shape)])
    return p if dtype is None else p.astype(dtype)


# ----------------------------------- kernel ----------------------------------
def bottleneck_kernel(xm_ref, xt_ref, xb_ref, w1_ref, sh1_ref, w2_ref,
                      w3_ref, sh3_ref, o_ref, t1p_ref):
    """One (batch, row-tile) step of the fused BottleNeck.

    xm_ref : (1, TH, W, Cin)   f32   main input rows (also the residual identity)
    xt_ref : (1, 1,  W, Cin)   f32   row above the tile (clamped; masked at h==0)
    xb_ref : (1, 1,  W, Cin)   f32   row below the tile (clamped; masked at last)
    w1_ref : (Cin, Cmid)       bf16  1x1 conv1 weight, BN1 scale folded in
    sh1_ref: (1, Cmid)         f32   conv1 bias + BN1 shift
    w2_ref : (9, Cmid, Cmid)   bf16  3x3 conv2 weight (tap-major), BN2 scale folded
    w3_ref : (Cmid, Cout)      bf16  1x1 conv3 weight, BN3 scale folded in
    sh3_ref: (1, Cout)         f32   conv3 bias + BN3 shift + BN2 shift folded fwd
    o_ref  : (1, TH, W, Cout)  f32   output rows
    t1p_ref: (TH+2, W+2, Cmid) bf16  scratch: zero-padded conv2 input
    """
    _, TH, W, Cin = xm_ref.shape
    Cmid = w1_ref.shape[1]
    Cout = w3_ref.shape[1]
    h = pl.program_id(1)
    nH = pl.num_programs(1)

    xm = xm_ref[...].reshape(TH, W, Cin)               # f32, also the residual
    w1 = w1_ref[...]
    sh1 = sh1_ref[...]

    # ---- conv1 (1x1) + folded BN1: bf16 MXU operands, f32 accumulation ------
    def conv1(rows):                                   # (R, W, Cin) -> (R*W, Cmid)
        a = rows.reshape(rows.shape[0] * W, Cin).astype(jnp.bfloat16)
        return jnp.dot(a, w1, preferred_element_type=jnp.float32) + sh1

    t1_main = conv1(xm)                                              # (TH*W, Cmid)
    tmask = (h > 0).astype(jnp.float32)                # zero halo rows that fall
    bmask = (h < nH - 1).astype(jnp.float32)           # outside the image
    t1_top = conv1(xt_ref[...].reshape(1, W, Cin)) * tmask           # (W, Cmid)
    t1_bot = conv1(xb_ref[...].reshape(1, W, Cin)) * bmask           # (W, Cmid)

    # ---- stage conv2's zero-padded input directly in the VMEM scratch -------
    # (replaces three full-tile concatenates + the 9*Cmid-wide im2col buffer)
    dt = t1p_ref.dtype
    zcol = jnp.zeros((TH + 2, 1, Cmid), dt)
    t1p_ref[:, 0:1, :] = zcol                          # left  zero-pad column
    t1p_ref[:, W + 1:W + 2, :] = zcol                  # right zero-pad column
    t1p_ref[0:1, 1:W + 1, :] = t1_top.reshape(1, W, Cmid).astype(dt)
    t1p_ref[1:TH + 1, 1:W + 1, :] = t1_main.reshape(TH, W, Cmid).astype(dt)
    t1p_ref[TH + 1:TH + 2, 1:W + 1, :] = t1_bot.reshape(1, W, Cmid).astype(dt)

    # ---- conv2 (3x3, stride 1, pad 1) + folded BN2 scale ---------------------
    # Nine accumulating tap matmuls into one f32 accumulator; no im2col buffer.
    acc = None
    for dy in range(3):
        for dx in range(3):
            patch = t1p_ref[dy:dy + TH, dx:dx + W, :].reshape(TH * W, Cmid)
            part = jnp.dot(patch, w2_ref[3 * dy + dx],
                           preferred_element_type=jnp.float32)
            acc = part if acc is None else acc + part

    # ---- conv3 (1x1) + BN3 (+ folded BN2 shift) + residual + ReLU ------------
    t3 = jnp.dot(acc.astype(jnp.bfloat16), w3_ref[...],
                 preferred_element_type=jnp.float32)
    out = jnp.maximum(t3 + sh3_ref[...] + xm.reshape(TH * W, Cin), 0.0)
    o_ref[...] = out.reshape(1, TH, W, Cout)


# ---------------------------------- wrapper -----------------------------------
def _vmem_limit_bytes():
    """Per-generation VMEM limit: ~100 MiB where 128 MiB is physical
    (v4/v5e/v6e); conservative 44 MiB on parts with 64 MiB per-core VMEM."""
    try:
        kind = jax.devices()[0].device_kind.lower()
    except Exception:
        kind = ""
    if any(t in kind for t in ("v4", "v5", "v6")):
        return 100 * 1024 * 1024
    return 44 * 1024 * 1024


def _choose_row_tile(H, W, Cp_in, Cp_mid, Cp_out, vmem_limit):
    """Largest divisor of H whose estimated working set fits ~60% of the limit."""
    budget = int(vmem_limit * 0.6)
    best = 1
    for th in range(1, H + 1):
        if H % th:
            continue
        est = (
            2 * th * W * Cp_in * 4                       # x tile (dbl-buffered)
            + 4 * W * Cp_in * 4                          # halo rows
            + 2 * th * W * Cp_out * 4                    # output tile
            + 2 * (Cp_in * Cp_mid + 9 * Cp_mid * Cp_mid + Cp_mid * Cp_out) * 2
            + (th + 2) * (W + 2) * Cp_mid * 2            # conv2-input scratch
            + 6 * th * W * Cp_mid * 4                    # transients / accum
        )
        if est <= budget:
            best = th
    return best


def bottleneck_forward(x_nchw, params, stride=1, eps=1e-5, row_tile=None):
    assert stride == 1, "TODO(synk): stride>1 / i_downsample not implemented"
    x = jnp.transpose(x_nchw, (0, 2, 3, 1)).astype(jnp.float32)   # NCHW -> NHWC
    # TODO(synk): in a full network keep activations NHWC (channels already a
    #             multiple of 128) end-to-end and drop this transpose + the
    #             output slice below; they are full extra HBM passes.
    N, H, W, Cin = x.shape

    w1 = params["w1"][0, 0].astype(jnp.float32)                   # (Cin, Cmid)
    w2 = params["w2"].astype(jnp.float32)                         # (3,3,Cmid,Cmid)
    w3 = params["w3"][0, 0].astype(jnp.float32)                   # (Cmid, Cout)
    Cmid, Cout = w1.shape[1], w3.shape[1]
    assert Cin == Cout, "identity shortcut requires in_channels == out_channels*4"

    # ---- fold eval-mode BN (and conv bias) into weight scales / shifts -------
    def fold(b, bn):
        gamma, beta, mean, var = bn
        scale = gamma / jnp.sqrt(var + eps)
        return scale, (b - mean) * scale + beta

    s1, sh1 = fold(params["b1"], params["bn1"])
    s2, sh2 = fold(params["b2"], params["bn2"])
    s3, sh3 = fold(params["b3"], params["bn3"])
    w1f = w1 * s1[None, :]
    w2f = w2 * s2[None, None, None, :]
    w3f = w3 * s3[None, :]
    sh3t = sh3 + sh2 @ w3f          # BN2's additive shift folded through conv3

    # ---- pad channels to lane-dense multiples of 128; weights go to bf16 -----
    LANE = 128
    Cp_in = _round_up(Cin, LANE)
    Cp_mid = _round_up(Cmid, LANE)
    Cp_out = _round_up(Cout, LANE)

    xp = _pad_to(x, (N, H, W, Cp_in))                 # f32 (exact residual path)
    w1p = _pad_to(w1f, (Cp_in, Cp_mid), jnp.bfloat16)
    sh1p = _pad_to(sh1[None, :], (1, Cp_mid))
    w2p = _pad_to(w2f, (3, 3, Cp_mid, Cp_mid),
                  jnp.bfloat16).reshape(9, Cp_mid, Cp_mid)
    w3p = _pad_to(w3f, (Cp_mid, Cp_out), jnp.bfloat16)
    sh3p = _pad_to(sh3t[None, :], (1, Cp_out))

    vmem_limit = _vmem_limit_bytes()
    TH = row_tile if row_tile is not None else _choose_row_tile(
        H, W, Cp_in, Cp_mid, Cp_out, vmem_limit)
    assert H % TH == 0
    nH = H // TH

    flops = 2 * N * H * W * (Cp_in * Cp_mid + 9 * Cp_mid * Cp_mid
                             + Cp_mid * Cp_out)
    bytes_accessed = (N * H * W * (Cp_in + Cp_out) * 4
                      + (Cp_in * Cp_mid + 9 * Cp_mid * Cp_mid
                         + Cp_mid * Cp_out) * 2
                      + (Cp_mid + Cp_out) * 4)
    try:
        cost = pl.CostEstimate(flops=flops, transcendentals=0,
                               bytes_accessed=bytes_accessed)
    except Exception:
        cost = None

    def run(single_buffer_weights):
        def wspec(shape):
            idx = lambda n, h, _r=len(shape): (0,) * _r
            if single_buffer_weights:
                # Constant-index weight/shift blocks: single-buffer them so the
                # pipeline does not duplicate multi-MB weights (matters for
                # late ResNet stages under 64 MiB VMEM).
                return pl.BlockSpec(shape, idx, pipeline_mode=pl.Buffered(1))
            return pl.BlockSpec(shape, idx)

        return pl.pallas_call(
            bottleneck_kernel,
            out_shape=jax.ShapeDtypeStruct((N, H, W, Cp_out), jnp.float32),
            grid=(N, nH),
            in_specs=[
                # main rows of x (also the residual identity)
                pl.BlockSpec((1, TH, W, Cp_in), lambda n, h: (n, h, 0, 0)),
                # one-row halo above / below (clamped at the border, masked to
                # zero inside the kernel)
                pl.BlockSpec((1, 1, W, Cp_in),
                             lambda n, h: (n, jnp.maximum(h * TH - 1, 0), 0, 0)),
                pl.BlockSpec((1, 1, W, Cp_in),
                             lambda n, h: (n, jnp.minimum((h + 1) * TH, H - 1),
                                           0, 0)),
                wspec((Cp_in, Cp_mid)),
                wspec((1, Cp_mid)),
                wspec((9, Cp_mid, Cp_mid)),
                wspec((Cp_mid, Cp_out)),
                wspec((1, Cp_out)),
            ],
            out_specs=pl.BlockSpec((1, TH, W, Cp_out), lambda n, h: (n, h, 0, 0)),
            scratch_shapes=[pltpu.VMEM((TH + 2, W + 2, Cp_mid), jnp.bfloat16)],
            compiler_params=pltpu.CompilerParams(
                dimension_semantics=("parallel", "parallel"),
                vmem_limit_bytes=vmem_limit),
            cost_estimate=cost,
        )(xp, xp, xp, w1p, sh1p, w2p, w3p, sh3p)

    try:
        out = run(single_buffer_weights=True)
    except Exception:
        # pipeline_mode / pl.Buffered unsupported on this JAX version: fall
        # back to default (double-buffered) weight blocks.
        out = run(single_buffer_weights=False)

    out = out[..., :Cout]
    return jnp.transpose(out, (0, 3, 1, 2))                       # NHWC -> NCHW


# ----------------------------- pure-JAX reference ----------------------------
def bottleneck_reference(x_nchw, params, eps=1e-5):
    x = jnp.transpose(x_nchw, (0, 2, 3, 1)).astype(jnp.float32)

    def conv(v, w, b, pad):
        y = lax.conv_general_dilated(
            v, w, window_strides=(1, 1), padding=[(pad, pad), (pad, pad)],
            dimension_numbers=("NHWC", "HWIO", "NHWC"))
        return y + b

    def bn(v, stats):
        gamma, beta, mean, var = stats
        return (v - mean) / jnp.sqrt(var + eps) * gamma + beta

    identity = x
    y = bn(conv(x, params["w1"], params["b1"], 0), params["bn1"])
    y = bn(conv(y, params["w2"], params["b2"], 1), params["bn2"])
    y = bn(conv(y, params["w3"], params["b3"], 0), params["bn3"])
    y = jnp.maximum(y + identity, 0.0)
    return jnp.transpose(y, (0, 3, 1, 2))


if __name__ == "__main__":
    # BottleNeck(in_channels=16, out_channels=4, stride=1) -> expansion 4,
    # so the identity residual is valid (16 == 4 * 4).
    N, Cin, H, W = 2, 16, 16, 16
    Cmid = 4
    Cout = Cmid * 4

    key = jax.random.PRNGKey(0)
    ks = jax.random.split(key, 12)

    def bn_params(k, c):
        k0, k1, k2, k3 = jax.random.split(k, 4)
        return (1.0 + 0.1 * jax.random.normal(k0, (c,), jnp.float32),
                0.1 * jax.random.normal(k1, (c,), jnp.float32),
                0.1 * jax.random.normal(k2, (c,), jnp.float32),
                1.0 + 0.1 * jax.random.uniform(k3, (c,), jnp.float32))

    params = {
        # conv weights in HWIO layout
        "w1": 0.2 * jax.random.normal(ks[0], (1, 1, Cin, Cmid), jnp.float32),
        "b1": 0.1 * jax.random.normal(ks[1], (Cmid,), jnp.float32),
        "bn1": bn_params(ks[2], Cmid),
        "w2": 0.2 * jax.random.normal(ks[3], (3, 3, Cmid, Cmid), jnp.float32),
        "b2": 0.1 * jax.random.normal(ks[4], (Cmid,), jnp.float32),
        "bn2": bn_params(ks[5], Cmid),
        "w3": 0.2 * jax.random.normal(ks[6], (1, 1, Cmid, Cout), jnp.float32),
        "b3": 0.1 * jax.random.normal(ks[7], (Cout,), jnp.float32),
        "bn3": bn_params(ks[8], Cout),
    }

    x = jax.random.normal(ks[9], (N, Cin, H, W), jnp.float32)     # NCHW input

    ref = jax.block_until_ready(bottleneck_reference(x, params))

    # 1) auto-sized row tile (whole image at these shapes, grid = (N, 1))
    out_auto = jax.block_until_ready(bottleneck_forward(x, params))
    # 2) forced 8-row tile: exercises halo rows + border masking (grid = (N, 2))
    out_tiled = jax.block_until_ready(bottleneck_forward(x, params, row_tile=8))

    assert out_auto.shape == (N, Cout, H, W)
    for out in (out_auto, out_tiled):
        err = float(jnp.max(jnp.abs(out - ref)))
        # bf16 MXU operands => looser-than-f32 tolerance.
        assert jnp.allclose(out, ref, atol=5e-2, rtol=5e-2), f"max abs err {err}"

    print("KERNEL_OK")
</pallas_src>

<mosaic_0001>
module attributes {stable_mosaic.version = 11 : i64} {
  func.func @bottleneck_kernel(%arg0: i32, %arg1: i32, %arg2: memref<1x16x16x128xf32, #tpu.memory_space<vmem>>, %arg3: memref<1x1x16x128xf32, #tpu.memory_space<vmem>>, %arg4: memref<1x1x16x128xf32, #tpu.memory_space<vmem>>, %arg5: memref<128x128xbf16, #tpu.memory_space<vmem>>, %arg6: memref<1x128xf32, #tpu.memory_space<vmem>>, %arg7: memref<9x128x128xbf16, #tpu.memory_space<vmem>>, %arg8: memref<128x128xbf16, #tpu.memory_space<vmem>>, %arg9: memref<1x128xf32, #tpu.memory_space<vmem>>, %arg10: memref<1x16x16x128xf32, #tpu.memory_space<vmem>>, %arg11: memref<18x18x128xbf16, #tpu.memory_space<vmem>>) attributes {dimension_semantics = [#tpu.dimension_semantics<parallel>, #tpu.dimension_semantics<parallel>], iteration_bounds = array<i64: 2, 1>, scalar_prefetch = 0 : i64, scratch_operands = 1 : i64, tpu.core_type = #tpu.core_type<tc>, window_params = [{transform_indices = @transform_0, window_bounds = array<i64: 1, 16, 16, 128>}, {transform_indices = @transform_1, window_bounds = array<i64: 1, 1, 16, 128>}, {transform_indices = @transform_2, window_bounds = array<i64: 1, 1, 16, 128>}, {pipeline_mode = #tpu.pipeline_mode<synchronous>, transform_indices = @transform_3, window_bounds = array<i64: 128, 128>}, {pipeline_mode = #tpu.pipeline_mode<synchronous>, transform_indices = @transform_4, window_bounds = array<i64: 1, 128>}, {pipeline_mode = #tpu.pipeline_mode<synchronous>, transform_indices = @transform_5, window_bounds = array<i64: 9, 128, 128>}, {pipeline_mode = #tpu.pipeline_mode<synchronous>, transform_indices = @transform_6, window_bounds = array<i64: 128, 128>}, {pipeline_mode = #tpu.pipeline_mode<synchronous>, transform_indices = @transform_7, window_bounds = array<i64: 1, 128>}, {transform_indices = @transform_8, window_bounds = array<i64: 1, 16, 16, 128>}]} {
    %c0 = arith.constant 0 : index
    %c0_0 = arith.constant 0 : index
    %c0_1 = arith.constant 0 : index
    %c0_2 = arith.constant 0 : index
    %0 = vector.load %arg2[%c0, %c0_0, %c0_1, %c0_2] : memref<1x16x16x128xf32, #tpu.memory_space<vmem>>, vector<1x16x16x128xf32>
    %1 = vector.shape_cast %0 : vector<1x16x16x128xf32> to vector<16x16x128xf32>
    %c0_3 = arith.constant 0 : index
    %c0_4 = arith.constant 0 : index
    %2 = vector.load %arg5[%c0_3, %c0_4] : memref<128x128xbf16, #tpu.memory_space<vmem>>, vector<128x128xbf16>
    %c0_5 = arith.constant 0 : index
    %c0_6 = arith.constant 0 : index
    %3 = vector.load %arg6[%c0_5, %c0_6] : memref<1x128xf32, #tpu.memory_space<vmem>>, vector<1x128xf32>
    %4 = vector.shape_cast %1 : vector<16x16x128xf32> to vector<256x128xf32>
    %5 = arith.truncf %4 : vector<256x128xf32> to vector<256x128xbf16>
    %cst = arith.constant dense<0.000000e+00> : vector<256x128xf32>
    %6 = tpu.matmul %5, %2, %cst {dimension_numbers = #tpu.dot_dimension_numbers<[1], [0], [0], [1], [0, 0, 1, 1], [], []>} : vector<256x128xbf16>, vector<128x128xbf16>, vector<256x128xf32> -> vector<256x128xf32>
    %7 = vector.broadcast %3 : vector<1x128xf32> to vector<256x128xf32>
    %8 = arith.addf %6, %7 : vector<256x128xf32>
    %c0_i32 = arith.constant 0 : i32
    %9 = arith.cmpi sgt, %arg1, %c0_i32 : i32
    %10 = arith.extui %9 : i1 to i32
    %11 = arith.sitofp %10 : i32 to f32
    %c0_i32_7 = arith.constant 0 : i32
    %12 = arith.cmpi slt, %arg1, %c0_i32_7 : i32
    %13 = arith.extui %12 : i1 to i32
    %14 = arith.sitofp %13 : i32 to f32
    %c0_8 = arith.constant 0 : index
    %c0_9 = arith.constant 0 : index
    %c0_10 = arith.constant 0 : index
    %c0_11 = arith.constant 0 : index
    %15 = vector.load %arg3[%c0_8, %c0_9, %c0_10, %c0_11] : memref<1x1x16x128xf32, #tpu.memory_space<vmem>>, vector<1x1x16x128xf32>
    %16 = vector.shape_cast %15 : vector<1x1x16x128xf32> to vector<1x16x128xf32>
    %17 = vector.shape_cast %16 : vector<1x16x128xf32> to vector<16x128xf32>
    %18 = arith.truncf %17 : vector<16x128xf32> to vector<16x128xbf16>
    %cst_12 = arith.constant dense<0.000000e+00> : vector<16x128xf32>
    %19 = tpu.matmul %18, %2, %cst_12 {dimension_numbers = #tpu.dot_dimension_numbers<[1], [0], [0], [1], [0, 0, 1, 1], [], []>} : vector<16x128xbf16>, vector<128x128xbf16>, vector<16x128xf32> -> vector<16x128xf32>
    %20 = vector.broadcast %3 : vector<1x128xf32> to vector<16x128xf32>
    %21 = arith.addf %19, %20 : vector<16x128xf32>
    %22 = vector.broadcast %11 : f32 to vector<16x128xf32>
    %23 = arith.mulf %21, %22 : vector<16x128xf32>
    %c0_13 = arith.constant 0 : index
    %c0_14 = arith.constant 0 : index
    %c0_15 = arith.constant 0 : index
    %c0_16 = arith.constant 0 : index
    %24 = vector.load %arg4[%c0_13, %c0_14, %c0_15, %c0_16] : memref<1x1x16x128xf32, #tpu.memory_space<vmem>>, vector<1x1x16x128xf32>
    %25 = vector.shape_cast %24 : vector<1x1x16x128xf32> to vector<1x16x128xf32>
    %26 = vector.shape_cast %25 : vector<1x16x128xf32> to vector<16x128xf32>
    %27 = arith.truncf %26 : vector<16x128xf32> to vector<16x128xbf16>
    %cst_17 = arith.constant dense<0.000000e+00> : vector<16x128xf32>
    %28 = tpu.matmul %27, %2, %cst_17 {dimension_numbers = #tpu.dot_dimension_numbers<[1], [0], [0], [1], [0, 0, 1, 1], [], []>} : vector<16x128xbf16>, vector<128x128xbf16>, vector<16x128xf32> -> vector<16x128xf32>
    %29 = vector.broadcast %3 : vector<1x128xf32> to vector<16x128xf32>
    %30 = arith.addf %28, %29 : vector<16x128xf32>
    %31 = vector.broadcast %14 : f32 to vector<16x128xf32>
    %32 = arith.mulf %30, %31 : vector<16x128xf32>
    %cst_18 = arith.constant 0.000000e+00 : bf16
    %33 = vector.broadcast %cst_18 : bf16 to vector<18x1x128xbf16>
    %c0_19 = arith.constant 0 : index
    %c0_20 = arith.constant 0 : index
    %c0_21 = arith.constant 0 : index
    %34 = vector.load %arg11[%c0_19, %c0_20, %c0_21] : memref<18x18x128xbf16, #tpu.memory_space<vmem>>, vector<18x1x128xbf16>
    tpu.vector_store %arg11[%c0_19, %c0_20, %c0_21], %33 {strides = array<i32>} : memref<18x18x128xbf16, #tpu.memory_space<vmem>>, vector<18x1x128xbf16>,
    %c0_22 = arith.constant 0 : index
    %c17 = arith.constant 17 : index
    %c0_23 = arith.constant 0 : index
    %35 = vector.load %arg11[%c0_22, %c17, %c0_23] : memref<18x18x128xbf16, #tpu.memory_space<vmem>>, vector<18x1x128xbf16>
    tpu.vector_store %arg11[%c0_22, %c17, %c0_23], %33 {strides = array<i32>} : memref<18x18x128xbf16, #tpu.memory_space<vmem>>, vector<18x1x128xbf16>,
    %36 = vector.shape_cast %23 : vector<16x128xf32> to vector<1x16x128xf32>
    %37 = arith.truncf %36 : vector<1x16x128xf32> to vector<1x16x128xbf16>
    %c0_24 = arith.constant 0 : index
    %c1 = arith.constant 1 : index
    %c0_25 = arith.constant 0 : index
    %38 = vector.load %arg11[%c0_24, %c1, %c0_25] : memref<18x18x128xbf16, #tpu.memory_space<vmem>>, vector<1x16x128xbf16>
    tpu.vector_store %arg11[%c0_24, %c1, %c0_25], %37 {strides = array<i32>} : memref<18x18x128xbf16, #tpu.memory_space<vmem>>, vector<1x16x128xbf16>,
    %39 = vector.shape_cast %8 : vector<256x128xf32> to vector<16x16x128xf32>
    %40 = arith.truncf %39 : vector<16x16x128xf32> to vector<16x16x128xbf16>
    %c1_26 = arith.constant 1 : index
    %c1_27 = arith.constant 1 : index
    %c0_28 = arith.constant 0 : index
    %41 = vector.load %arg11[%c1_26, %c1_27, %c0_28] : memref<18x18x128xbf16, #tpu.memory_space<vmem>>, vector<16x16x128xbf16>
    tpu.vector_store %arg11[%c1_26, %c1_27, %c0_28], %40 {strides = array<i32>} : memref<18x18x128xbf16, #tpu.memory_space<vmem>>, vector<16x16x128xbf16>,
    %42 = vector.shape_cast %32 : vector<16x128xf32> to vector<1x16x128xf32>
    %43 = arith.truncf %42 : vector<1x16x128xf32> to vector<1x16x128xbf16>
    %c17_29 = arith.constant 17 : index
    %c1_30 = arith.constant 1 : index
    %c0_31 = arith.constant 0 : index
    %44 = vector.load %arg11[%c17_29, %c1_30, %c0_31] : memref<18x18x128xbf16, #tpu.memory_space<vmem>>, vector<1x16x128xbf16>
    tpu.vector_store %arg11[%c17_29, %c1_30, %c0_31], %43 {strides = array<i32>} : memref<18x18x128xbf16, #tpu.memory_space<vmem>>, vector<1x16x128xbf16>,
    %c0_32 = arith.constant 0 : index
    %c0_33 = arith.constant 0 : index
    %c0_34 = arith.constant 0 : index
    %45 = vector.load %arg11[%c0_32, %c0_33, %c0_34] : memref<18x18x128xbf16, #tpu.memory_space<vmem>>, vector<16x16x128xbf16>
    %46 = vector.shape_cast %45 : vector<16x16x128xbf16> to vector<256x128xbf16>
    %c0_35 = arith.constant 0 : index
    %c0_36 = arith.constant 0 : index
    %c0_37 = arith.constant 0 : index
    %47 = vector.load %arg7[%c0_35, %c0_36, %c0_37] : memref<9x128x128xbf16, #tpu.memory_space<vmem>>, vector<1x128x128xbf16>
    %48 = vector.shape_cast %47 : vector<1x128x128xbf16> to vector<128x128xbf16>
    %cst_38 = arith.constant dense<0.000000e+00> : vector<256x128xf32>
    %49 = tpu.matmul %46, %48, %cst_38 {dimension_numbers = #tpu.dot_dimension_numbers<[1], [0], [0], [1], [0, 0, 1, 1], [], []>} : vector<256x128xbf16>, vector<128x128xbf16>, vector<256x128xf32> -> vector<256x128xf32>
    %c0_39 = arith.constant 0 : index
    %c1_40 = arith.constant 1 : index
    %c0_41 = arith.constant 0 : index
    %50 = vector.load %arg11[%c0_39, %c1_40, %c0_41] : memref<18x18x128xbf16, #tpu.memory_space<vmem>>, vector<16x16x128xbf16>
    %51 = vector.shape_cast %50 : vector<16x16x128xbf16> to vector<256x128xbf16>
    %c1_42 = arith.constant 1 : index
    %c0_43 = arith.constant 0 : index
    %c0_44 = arith.constant 0 : index
    %52 = vector.load %arg7[%c1_42, %c0_43, %c0_44] : memref<9x128x128xbf16, #tpu.memory_space<vmem>>, vector<1x128x128xbf16>
    %53 = vector.shape_cast %52 : vector<1x128x128xbf16> to vector<128x128xbf16>
    %cst_45 = arith.constant dense<0.000000e+00> : vector<256x128xf32>
    %54 = tpu.matmul %51, %53, %cst_45 {dimension_numbers = #tpu.dot_dimension_numbers<[1], [0], [0], [1], [0, 0, 1, 1], [], []>} : vector<256x128xbf16>, vector<128x128xbf16>, vector<256x128xf32> -> vector<256x128xf32>
    %55 = arith.addf %49, %54 : vector<256x128xf32>
    %c0_46 = arith.constant 0 : index
    %c2 = arith.constant 2 : index
    %c0_47 = arith.constant 0 : index
    %56 = vector.load %arg11[%c0_46, %c2, %c0_47] : memref<18x18x128xbf16, #tpu.memory_space<vmem>>, vector<16x16x128xbf16>
    %57 = vector.shape_cast %56 : vector<16x16x128xbf16> to vector<256x128xbf16>
    %c2_48 = arith.constant 2 : index
    %c0_49 = arith.constant 0 : index
    %c0_50 = arith.constant 0 : index
    %58 = vector.load %arg7[%c2_48, %c0_49, %c0_50] : memref<9x128x128xbf16, #tpu.memory_space<vmem>>, vector<1x128x128xbf16>
    %59 = vector.shape_cast %58 : vector<1x128x128xbf16> to vector<128x128xbf16>
    %cst_51 = arith.constant dense<0.000000e+00> : vector<256x128xf32>
    %60 = tpu.matmul %57, %59, %cst_51 {dimension_numbers = #tpu.dot_dimension_numbers<[1], [0], [0], [1], [0, 0, 1, 1], [], []>} : vector<256x128xbf16>, vector<128x128xbf16>, vector<256x128xf32> -> vector<256x128xf32>
    %61 = arith.addf %55, %60 : vector<256x128xf32>
    %c1_52 = arith.constant 1 : index
    %c0_53 = arith.constant 0 : index
    %c0_54 = arith.constant 0 : index
    %62 = vector.load %arg11[%c1_52, %c0_53, %c0_54] : memref<18x18x128xbf16, #tpu.memory_space<vmem>>, vector<16x16x128xbf16>
    %63 = vector.shape_cast %62 : vector<16x16x128xbf16> to vector<256x128xbf16>
    %c3 = arith.constant 3 : index
    %c0_55 = arith.constant 0 : index
    %c0_56 = arith.constant 0 : index
    %64 = vector.load %arg7[%c3, %c0_55, %c0_56] : memref<9x128x128xbf16, #tpu.memory_space<vmem>>, vector<1x128x128xbf16>
    %65 = vector.shape_cast %64 : vector<1x128x128xbf16> to vector<128x128xbf16>
    %cst_57 = arith.constant dense<0.000000e+00> : vector<256x128xf32>
    %66 = tpu.matmul %63, %65, %cst_57 {dimension_numbers = #tpu.dot_dimension_numbers<[1], [0], [0], [1], [0, 0, 1, 1], [], []>} : vector<256x128xbf16>, vector<128x128xbf16>, vector<256x128xf32> -> vector<256x128xf32>
    %67 = arith.addf %61, %66 : vector<256x128xf32>
    %c1_58 = arith.constant 1 : index
    %c1_59 = arith.constant 1 : index
    %c0_60 = arith.constant 0 : index
    %68 = vector.load %arg11[%c1_58, %c1_59, %c0_60] : memref<18x18x128xbf16, #tpu.memory_space<vmem>>, vector<16x16x128xbf16>
    %69 = vector.shape_cast %68 : vector<16x16x128xbf16> to vector<256x128xbf16>
    %c4 = arith.constant 4 : index
    %c0_61 = arith.constant 0 : index
    %c0_62 = arith.constant 0 : index
    %70 = vector.load %arg7[%c4, %c0_61, %c0_62] : memref<9x128x128xbf16, #tpu.memory_space<vmem>>, vector<1x128x128xbf16>
    %71 = vector.shape_cast %70 : vector<1x128x128xbf16> to vector<128x128xbf16>
    %cst_63 = arith.constant dense<0.000000e+00> : vector<256x128xf32>
    %72 = tpu.matmul %69, %71, %cst_63 {dimension_numbers = #tpu.dot_dimension_numbers<[1], [0], [0], [1], [0, 0, 1, 1], [], []>} : vector<256x128xbf16>, vector<128x128xbf16>, vector<256x128xf32> -> vector<256x128xf32>
    %73 = arith.addf %67, %72 : vector<256x128xf32>
    %c1_64 = arith.constant 1 : index
    %c2_65 = arith.constant 2 : index
    %c0_66 = arith.constant 0 : index
    %74 = vector.load %arg11[%c1_64, %c2_65, %c0_66] : memref<18x18x128xbf16, #tpu.memory_space<vmem>>, vector<16x16x128xbf16>
    %75 = vector.shape_cast %74 : vector<16x16x128xbf16> to vector<256x128xbf16>
    %c5 = arith.constant 5 : index
    %c0_67 = arith.constant 0 : index
    %c0_68 = arith.constant 0 : index
    %76 = vector.load %arg7[%c5, %c0_67, %c0_68] : memref<9x128x128xbf16, #tpu.memory_space<vmem>>, vector<1x128x128xbf16>
    %77 = vector.shape_cast %76 : vector<1x128x128xbf16> to vector<128x128xbf16>
    %cst_69 = arith.constant dense<0.000000e+00> : vector<256x128xf32>
    %78 = tpu.matmul %75, %77, %cst_69 {dimension_numbers = #tpu.dot_dimension_numbers<[1], [0], [0], [1], [0, 0, 1, 1], [], []>} : vector<256x128xbf16>, vector<128x128xbf16>, vector<256x128xf32> -> vector<256x128xf32>
    %79 = arith.addf %73, %78 : vector<256x128xf32>
    %c2_70 = arith.constant 2 : index
    %c0_71 = arith.constant 0 : index
    %c0_72 = arith.constant 0 : index
    %80 = vector.load %arg11[%c2_70, %c0_71, %c0_72] : memref<18x18x128xbf16, #tpu.memory_space<vmem>>, vector<16x16x128xbf16>
    %81 = vector.shape_cast %80 : vector<16x16x128xbf16> to vector<256x128xbf16>
    %c6 = arith.constant 6 : index
    %c0_73 = arith.constant 0 : index
    %c0_74 = arith.constant 0 : index
    %82 = vector.load %arg7[%c6, %c0_73, %c0_74] : memref<9x128x128xbf16, #tpu.memory_space<vmem>>, vector<1x128x128xbf16>
    %83 = vector.shape_cast %82 : vector<1x128x128xbf16> to vector<128x128xbf16>
    %cst_75 = arith.constant dense<0.000000e+00> : vector<256x128xf32>
    %84 = tpu.matmul %81, %83, %cst_75 {dimension_numbers = #tpu.dot_dimension_numbers<[1], [0], [0], [1], [0, 0, 1, 1], [], []>} : vector<256x128xbf16>, vector<128x128xbf16>, vector<256x128xf32> -> vector<256x128xf32>
    %85 = arith.addf %79, %84 : vector<256x128xf32>
    %c2_76 = arith.constant 2 : index
    %c1_77 = arith.constant 1 : index
    %c0_78 = arith.constant 0 : index
    %86 = vector.load %arg11[%c2_76, %c1_77, %c0_78] : memref<18x18x128xbf16, #tpu.memory_space<vmem>>, vector<16x16x128xbf16>
    %87 = vector.shape_cast %86 : vector<16x16x128xbf16> to vector<256x128xbf16>
    %c7 = arith.constant 7 : index
    %c0_79 = arith.constant 0 : index
    %c0_80 = arith.constant 0 : index
    %88 = vector.load %arg7[%c7, %c0_79, %c0_80] : memref<9x128x128xbf16, #tpu.memory_space<vmem>>, vector<1x128x128xbf16>
    %89 = vector.shape_cast %88 : vector<1x128x128xbf16> to vector<128x128xbf16>
    %cst_81 = arith.constant dense<0.000000e+00> : vector<256x128xf32>
    %90 = tpu.matmul %87, %89, %cst_81 {dimension_numbers = #tpu.dot_dimension_numbers<[1], [0], [0], [1], [0, 0, 1, 1], [], []>} : vector<256x128xbf16>, vector<128x128xbf16>, vector<256x128xf32> -> vector<256x128xf32>
    %91 = arith.addf %85, %90 : vector<256x128xf32>
    %c2_82 = arith.constant 2 : index
    %c2_83 = arith.constant 2 : index
    %c0_84 = arith.constant 0 : index
    %92 = vector.load %arg11[%c2_82, %c2_83, %c0_84] : memref<18x18x128xbf16, #tpu.memory_space<vmem>>, vector<16x16x128xbf16>
    %93 = vector.shape_cast %92 : vector<16x16x128xbf16> to vector<256x128xbf16>
    %c8 = arith.constant 8 : index
    %c0_85 = arith.constant 0 : index
    %c0_86 = arith.constant 0 : index
    %94 = vector.load %arg7[%c8, %c0_85, %c0_86] : memref<9x128x128xbf16, #tpu.memory_space<vmem>>, vector<1x128x128xbf16>
    %95 = vector.shape_cast %94 : vector<1x128x128xbf16> to vector<128x128xbf16>
    %cst_87 = arith.constant dense<0.000000e+00> : vector<256x128xf32>
    %96 = tpu.matmul %93, %95, %cst_87 {dimension_numbers = #tpu.dot_dimension_numbers<[1], [0], [0], [1], [0, 0, 1, 1], [], []>} : vector<256x128xbf16>, vector<128x128xbf16>, vector<256x128xf32> -> vector<256x128xf32>
    %97 = arith.addf %91, %96 : vector<256x128xf32>
    %98 = arith.truncf %97 : vector<256x128xf32> to vector<256x128xbf16>
    %c0_88 = arith.constant 0 : index
    %c0_89 = arith.constant 0 : index
    %99 = vector.load %arg8[%c0_88, %c0_89] : memref<128x128xbf16, #tpu.memory_space<vmem>>, vector<128x128xbf16>
    %cst_90 = arith.constant dense<0.000000e+00> : vector<256x128xf32>
    %100 = tpu.matmul %98, %99, %cst_90 {dimension_numbers = #tpu.dot_dimension_numbers<[1], [0], [0], [1], [0, 0, 1, 1], [], []>} : vector<256x128xbf16>, vector<128x128xbf16>, vector<256x128xf32> -> vector<256x128xf32>
    %c0_91 = arith.constant 0 : index
    %c0_92 = arith.constant 0 : index
    %101 = vector.load %arg9[%c0_91, %c0_92] : memref<1x128xf32, #tpu.memory_space<vmem>>, vector<1x128xf32>
    %102 = vector.broadcast %101 : vector<1x128xf32> to vector<256x128xf32>
    %103 = arith.addf %100, %102 : vector<256x128xf32>
    %104 = vector.shape_cast %1 : vector<16x16x128xf32> to vector<256x128xf32>
    %105 = arith.addf %103, %104 : vector<256x128xf32>
    %cst_93 = arith.constant 0.000000e+00 : f32
    %106 = vector.broadcast %cst_93 : f32 to vector<256x128xf32>
    %107 = arith.maximumf %105, %106 : vector<256x128xf32>
    %108 = vector.shape_cast %107 : vector<256x128xf32> to vector<1x16x16x128xf32>
    %c0_94 = arith.constant 0 : index
    %c0_95 = arith.constant 0 : index
    %c0_96 = arith.constant 0 : index
    %c0_97 = arith.constant 0 : index
    %109 = vector.load %arg10[%c0_94, %c0_95, %c0_96, %c0_97] : memref<1x16x16x128xf32, #tpu.memory_space<vmem>>, vector<1x16x16x128xf32>
    tpu.vector_store %arg10[%c0_94, %c0_95, %c0_96, %c0_97], %108 {strides = array<i32>} : memref<1x16x16x128xf32, #tpu.memory_space<vmem>>, vector<1x16x16x128xf32>,
    return
  }
  func.func @transform_0(%arg0: i32, %arg1: i32) -> (i32, i32, i32, i32) {
    %c0_i32 = arith.constant 0 : i32
    %c0_i32_0 = arith.constant 0 : i32
    %c0_i32_1 = arith.constant 0 : i32
    return %arg0, %arg1, %c0_i32, %c0_i32_0 : i32, i32, i32, i32
  }
  func.func @transform_1(%arg0: i32, %arg1: i32) -> (i32, i32, i32, i32) {
    %c16_i32 = arith.constant 16 : i32
    %0 = arith.muli %arg1, %c16_i32 : i32
    %c1_i32 = arith.constant 1 : i32
    %1 = arith.subi %0, %c1_i32 : i32
    %c0_i32 = arith.constant 0 : i32
    %2 = arith.maxsi %1, %c0_i32 : i32
    %c0_i32_0 = arith.constant 0 : i32
    %c0_i32_1 = arith.constant 0 : i32
    %c0_i32_2 = arith.constant 0 : i32
    return %arg0, %2, %c0_i32_0, %c0_i32_1 : i32, i32, i32, i32
  }
  func.func @transform_2(%arg0: i32, %arg1: i32) -> (i32, i32, i32, i32) {
    %c1_i32 = arith.constant 1 : i32
    %0 = arith.addi %arg1, %c1_i32 : i32
    %c16_i32 = arith.constant 16 : i32
    %1 = arith.muli %0, %c16_i32 : i32
    %c15_i32 = arith.constant 15 : i32
    %2 = arith.minsi %1, %c15_i32 : i32
    %c0_i32 = arith.constant 0 : i32
    %c0_i32_0 = arith.constant 0 : i32
    %c0_i32_1 = arith.constant 0 : i32
    return %arg0, %2, %c0_i32, %c0_i32_0 : i32, i32, i32, i32
  }
  func.func @transform_3(%arg0: i32, %arg1: i32) -> (i32, i32) {
    %c0_i32 = arith.constant 0 : i32
    %c0_i32_0 = arith.constant 0 : i32
    %c0_i32_1 = arith.constant 0 : i32
    return %c0_i32, %c0_i32_0 : i32, i32
  }
  func.func @transform_4(%arg0: i32, %arg1: i32) -> (i32, i32) {
    %c0_i32 = arith.constant 0 : i32
    %c0_i32_0 = arith.constant 0 : i32
    %c0_i32_1 = arith.constant 0 : i32
    return %c0_i32, %c0_i32_0 : i32, i32
  }
  func.func @transform_5(%arg0: i32, %arg1: i32) -> (i32, i32, i32) {
    %c0_i32 = arith.constant 0 : i32
    %c0_i32_0 = arith.constant 0 : i32
    %c0_i32_1 = arith.constant 0 : i32
    %c0_i32_2 = arith.constant 0 : i32
    return %c0_i32, %c0_i32_0, %c0_i32_1 : i32, i32, i32
  }
  func.func @transform_6(%arg0: i32, %arg1: i32) -> (i32, i32) {
    %c0_i32 = arith.constant 0 : i32
    %c0_i32_0 = arith.constant 0 : i32
    %c0_i32_1 = arith.constant 0 : i32
    return %c0_i32, %c0_i32_0 : i32, i32
  }
  func.func @transform_7(%arg0: i32, %arg1: i32) -> (i32, i32) {
    %c0_i32 = arith.constant 0 : i32
    %c0_i32_0 = arith.constant 0 : i32
    %c0_i32_1 = arith.constant 0 : i32
    return %c0_i32, %c0_i32_0 : i32, i32
  }
  func.func @transform_8(%arg0: i32, %arg1: i32) -> (i32, i32, i32, i32) {
    %c0_i32 = arith.constant 0 : i32
    %c0_i32_0 = arith.constant 0 : i32
    %c0_i32_1 = arith.constant 0 : i32
    return %arg0, %arg1, %c0_i32, %c0_i32_0 : i32, i32, i32, i32
  }
}

module attributes {stable_mosaic.version = 11 : i64} {
  func.func @bottleneck_kernel(%arg0: i32, %arg1: i32, %arg2: memref<1x16x16x128xf32, #tpu.memory_space<vmem>>, %arg3: memref<1x1x16x128xf32, #tpu.memory_space<vmem>>, %arg4: memref<1x1x16x128xf32, #tpu.memory_space<vmem>>, %arg5: memref<128x128xbf16, #tpu.memory_space<vmem>>, %arg6: memref<1x128xf32, #tpu.memory_space<vmem>>, %arg7: memref<9x128x128xbf16, #tpu.memory_space<vmem>>, %arg8: memref<128x128xbf16, #tpu.memory_space<vmem>>, %arg9: memref<1x128xf32, #tpu.memory_space<vmem>>, %arg10: memref<1x16x16x128xf32, #tpu.memory_space<vmem>>, %arg11: memref<18x18x128xbf16, #tpu.memory_space<vmem>>) attributes {dimension_semantics = [#tpu.dimension_semantics<parallel>, #tpu.dimension_semantics<parallel>], iteration_bounds = array<i64: 2, 1>, scalar_prefetch = 0 : i64, scratch_operands = 1 : i64, tpu.core_type = #tpu.core_type<tc>, window_params = [{transform_indices = @transform_0, window_bounds = array<i64: 1, 16, 16, 128>}, {transform_indices = @transform_1, window_bounds = array<i64: 1, 1, 16, 128>}, {transform_indices = @transform_2, window_bounds = array<i64: 1, 1, 16, 128>}, {pipeline_mode = #tpu.pipeline_mode<synchronous>, transform_indices = @transform_3, window_bounds = array<i64: 128, 128>}, {pipeline_mode = #tpu.pipeline_mode<synchronous>, transform_indices = @transform_4, window_bounds = array<i64: 1, 128>}, {pipeline_mode = #tpu.pipeline_mode<synchronous>, transform_indices = @transform_5, window_bounds = array<i64: 9, 128, 128>}, {pipeline_mode = #tpu.pipeline_mode<synchronous>, transform_indices = @transform_6, window_bounds = array<i64: 128, 128>}, {pipeline_mode = #tpu.pipeline_mode<synchronous>, transform_indices = @transform_7, window_bounds = array<i64: 1, 128>}, {transform_indices = @transform_8, window_bounds = array<i64: 1, 16, 16, 128>}]} {
    %c0 = arith.constant 0 : index
    %c0_0 = arith.constant 0 : index
    %c0_1 = arith.constant 0 : index
    %c0_2 = arith.constant 0 : index
    %0 = vector.load %arg2[%c0, %c0_0, %c0_1, %c0_2] : memref<1x16x16x128xf32, #tpu.memory_space<vmem>>, vector<1x16x16x128xf32>
    %1 = vector.shape_cast %0 : vector<1x16x16x128xf32> to vector<16x16x128xf32>
    %c0_3 = arith.constant 0 : index
    %c0_4 = arith.constant 0 : index
    %2 = vector.load %arg5[%c0_3, %c0_4] : memref<128x128xbf16, #tpu.memory_space<vmem>>, vector<128x128xbf16>
    %c0_5 = arith.constant 0 : index
    %c0_6 = arith.constant 0 : index
    %3 = vector.load %arg6[%c0_5, %c0_6] : memref<1x128xf32, #tpu.memory_space<vmem>>, vector<1x128xf32>
    %4 = vector.shape_cast %1 : vector<16x16x128xf32> to vector<256x128xf32>
    %5 = arith.truncf %4 : vector<256x128xf32> to vector<256x128xbf16>
    %cst = arith.constant dense<0.000000e+00> : vector<256x128xf32>
    %6 = tpu.matmul %5, %2, %cst {dimension_numbers = #tpu.dot_dimension_numbers<[1], [0], [0], [1], [0, 0, 1, 1], [], []>} : vector<256x128xbf16>, vector<128x128xbf16>, vector<256x128xf32> -> vector<256x128xf32>
    %7 = vector.broadcast %3 : vector<1x128xf32> to vector<256x128xf32>
    %8 = arith.addf %6, %7 : vector<256x128xf32>
    %c0_i32 = arith.constant 0 : i32
    %9 = arith.cmpi sgt, %arg1, %c0_i32 : i32
    %10 = arith.extui %9 : i1 to i32
    %11 = arith.sitofp %10 : i32 to f32
    %c0_i32_7 = arith.constant 0 : i32
    %12 = arith.cmpi slt, %arg1, %c0_i32_7 : i32
    %13 = arith.extui %12 : i1 to i32
    %14 = arith.sitofp %13 : i32 to f32
    %c0_8 = arith.constant 0 : index
    %c0_9 = arith.constant 0 : index
    %c0_10 = arith.constant 0 : index
    %c0_11 = arith.constant 0 : index
    %15 = vector.load %arg3[%c0_8, %c0_9, %c0_10, %c0_11] : memref<1x1x16x128xf32, #tpu.memory_space<vmem>>, vector<1x1x16x128xf32>
    %16 = vector.shape_cast %15 : vector<1x1x16x128xf32> to vector<1x16x128xf32>
    %17 = vector.shape_cast %16 : vector<1x16x128xf32> to vector<16x128xf32>
    %18 = arith.truncf %17 : vector<16x128xf32> to vector<16x128xbf16>
    %cst_12 = arith.constant dense<0.000000e+00> : vector<16x128xf32>
    %19 = tpu.matmul %18, %2, %cst_12 {dimension_numbers = #tpu.dot_dimension_numbers<[1], [0], [0], [1], [0, 0, 1, 1], [], []>} : vector<16x128xbf16>, vector<128x128xbf16>, vector<16x128xf32> -> vector<16x128xf32>
    %20 = vector.broadcast %3 : vector<1x128xf32> to vector<16x128xf32>
    %21 = arith.addf %19, %20 : vector<16x128xf32>
    %22 = vector.broadcast %11 : f32 to vector<16x128xf32>
    %23 = arith.mulf %21, %22 : vector<16x128xf32>
    %c0_13 = arith.constant 0 : index
    %c0_14 = arith.constant 0 : index
    %c0_15 = arith.constant 0 : index
    %c0_16 = arith.constant 0 : index
    %24 = vector.load %arg4[%c0_13, %c0_14, %c0_15, %c0_16] : memref<1x1x16x128xf32, #tpu.memory_space<vmem>>, vector<1x1x16x128xf32>
    %25 = vector.shape_cast %24 : vector<1x1x16x128xf32> to vector<1x16x128xf32>
    %26 = vector.shape_cast %25 : vector<1x16x128xf32> to vector<16x128xf32>
    %27 = arith.truncf %26 : vector<16x128xf32> to vector<16x128xbf16>
    %cst_17 = arith.constant dense<0.000000e+00> : vector<16x128xf32>
    %28 = tpu.matmul %27, %2, %cst_17 {dimension_numbers = #tpu.dot_dimension_numbers<[1], [0], [0], [1], [0, 0, 1, 1], [], []>} : vector<16x128xbf16>, vector<128x128xbf16>, vector<16x128xf32> -> vector<16x128xf32>
    %29 = vector.broadcast %3 : vector<1x128xf32> to vector<16x128xf32>
    %30 = arith.addf %28, %29 : vector<16x128xf32>
    %31 = vector.broadcast %14 : f32 to vector<16x128xf32>
    %32 = arith.mulf %30, %31 : vector<16x128xf32>
    %cst_18 = arith.constant 0.000000e+00 : bf16
    %33 = vector.broadcast %cst_18 : bf16 to vector<18x1x128xbf16>
    %c0_19 = arith.constant 0 : index
    %c0_20 = arith.constant 0 : index
    %c0_21 = arith.constant 0 : index
    %34 = vector.load %arg11[%c0_19, %c0_20, %c0_21] : memref<18x18x128xbf16, #tpu.memory_space<vmem>>, vector<18x1x128xbf16>
    tpu.vector_store %arg11[%c0_19, %c0_20, %c0_21], %33 {strides = array<i32>} : memref<18x18x128xbf16, #tpu.memory_space<vmem>>, vector<18x1x128xbf16>,
    %c0_22 = arith.constant 0 : index
    %c17 = arith.constant 17 : index
    %c0_23 = arith.constant 0 : index
    %35 = vector.load %arg11[%c0_22, %c17, %c0_23] : memref<18x18x128xbf16, #tpu.memory_space<vmem>>, vector<18x1x128xbf16>
    tpu.vector_store %arg11[%c0_22, %c17, %c0_23], %33 {strides = array<i32>} : memref<18x18x128xbf16, #tpu.memory_space<vmem>>, vector<18x1x128xbf16>,
    %36 = vector.shape_cast %23 : vector<16x128xf32> to vector<1x16x128xf32>
    %37 = arith.truncf %36 : vector<1x16x128xf32> to vector<1x16x128xbf16>
    %c0_24 = arith.constant 0 : index
    %c1 = arith.constant 1 : index
    %c0_25 = arith.constant 0 : index
    %38 = vector.load %arg11[%c0_24, %c1, %c0_25] : memref<18x18x128xbf16, #tpu.memory_space<vmem>>, vector<1x16x128xbf16>
    tpu.vector_store %arg11[%c0_24, %c1, %c0_25], %37 {strides = array<i32>} : memref<18x18x128xbf16, #tpu.memory_space<vmem>>, vector<1x16x128xbf16>,
    %39 = vector.shape_cast %8 : vector<256x128xf32> to vector<16x16x128xf32>
    %40 = arith.truncf %39 : vector<16x16x128xf32> to vector<16x16x128xbf16>
    %c1_26 = arith.constant 1 : index
    %c1_27 = arith.constant 1 : index
    %c0_28 = arith.constant 0 : index
    %41 = vector.load %arg11[%c1_26, %c1_27, %c0_28] : memref<18x18x128xbf16, #tpu.memory_space<vmem>>, vector<16x16x128xbf16>
    tpu.vector_store %arg11[%c1_26, %c1_27, %c0_28], %40 {strides = array<i32>} : memref<18x18x128xbf16, #tpu.memory_space<vmem>>, vector<16x16x128xbf16>,
    %42 = vector.shape_cast %32 : vector<16x128xf32> to vector<1x16x128xf32>
    %43 = arith.truncf %42 : vector<1x16x128xf32> to vector<1x16x128xbf16>
    %c17_29 = arith.constant 17 : index
    %c1_30 = arith.constant 1 : index
    %c0_31 = arith.constant 0 : index
    %44 = vector.load %arg11[%c17_29, %c1_30, %c0_31] : memref<18x18x128xbf16, #tpu.memory_space<vmem>>, vector<1x16x128xbf16>
    tpu.vector_store %arg11[%c17_29, %c1_30, %c0_31], %43 {strides = array<i32>} : memref<18x18x128xbf16, #tpu.memory_space<vmem>>, vector<1x16x128xbf16>,
    %c0_32 = arith.constant 0 : index
    %c0_33 = arith.constant 0 : index
    %c0_34 = arith.constant 0 : index
    %45 = vector.load %arg11[%c0_32, %c0_33, %c0_34] : memref<18x18x128xbf16, #tpu.memory_space<vmem>>, vector<16x16x128xbf16>
    %46 = vector.shape_cast %45 : vector<16x16x128xbf16> to vector<256x128xbf16>
    %c0_35 = arith.constant 0 : index
    %c0_36 = arith.constant 0 : index
    %c0_37 = arith.constant 0 : index
    %47 = vector.load %arg7[%c0_35, %c0_36, %c0_37] : memref<9x128x128xbf16, #tpu.memory_space<vmem>>, vector<1x128x128xbf16>
    %48 = vector.shape_cast %47 : vector<1x128x128xbf16> to vector<128x128xbf16>
    %cst_38 = arith.constant dense<0.000000e+00> : vector<256x128xf32>
    %49 = tpu.matmul %46, %48, %cst_38 {dimension_numbers = #tpu.dot_dimension_numbers<[1], [0], [0], [1], [0, 0, 1, 1], [], []>} : vector<256x128xbf16>, vector<128x128xbf16>, vector<256x128xf32> -> vector<256x128xf32>
    %c0_39 = arith.constant 0 : index
    %c1_40 = arith.constant 1 : index
    %c0_41 = arith.constant 0 : index
    %50 = vector.load %arg11[%c0_39, %c1_40, %c0_41] : memref<18x18x128xbf16, #tpu.memory_space<vmem>>, vector<16x16x128xbf16>
    %51 = vector.shape_cast %50 : vector<16x16x128xbf16> to vector<256x128xbf16>
    %c1_42 = arith.constant 1 : index
    %c0_43 = arith.constant 0 : index
    %c0_44 = arith.constant 0 : index
    %52 = vector.load %arg7[%c1_42, %c0_43, %c0_44] : memref<9x128x128xbf16, #tpu.memory_space<vmem>>, vector<1x128x128xbf16>
    %53 = vector.shape_cast %52 : vector<1x128x128xbf16> to vector<128x128xbf16>
    %cst_45 = arith.constant dense<0.000000e+00> : vector<256x128xf32>
    %54 = tpu.matmul %51, %53, %cst_45 {dimension_numbers = #tpu.dot_dimension_numbers<[1], [0], [0], [1], [0, 0, 1, 1], [], []>} : vector<256x128xbf16>, vector<128x128xbf16>, vector<256x128xf32> -> vector<256x128xf32>
    %55 = arith.addf %49, %54 : vector<256x128xf32>
    %c0_46 = arith.constant 0 : index
    %c2 = arith.constant 2 : index
    %c0_47 = arith.constant 0 : index
    %56 = vector.load %arg11[%c0_46, %c2, %c0_47] : memref<18x18x128xbf16, #tpu.memory_space<vmem>>, vector<16x16x128xbf16>
    %57 = vector.shape_cast %56 : vector<16x16x128xbf16> to vector<256x128xbf16>
    %c2_48 = arith.constant 2 : index
    %c0_49 = arith.constant 0 : index
    %c0_50 = arith.constant 0 : index
    %58 = vector.load %arg7[%c2_48, %c0_49, %c0_50] : memref<9x128x128xbf16, #tpu.memory_space<vmem>>, vector<1x128x128xbf16>
    %59 = vector.shape_cast %58 : vector<1x128x128xbf16> to vector<128x128xbf16>
    %cst_51 = arith.constant dense<0.000000e+00> : vector<256x128xf32>
    %60 = tpu.matmul %57, %59, %cst_51 {dimension_numbers = #tpu.dot_dimension_numbers<[1], [0], [0], [1], [0, 0, 1, 1], [], []>} : vector<256x128xbf16>, vector<128x128xbf16>, vector<256x128xf32> -> vector<256x128xf32>
    %61 = arith.addf %55, %60 : vector<256x128xf32>
    %c1_52 = arith.constant 1 : index
    %c0_53 = arith.constant 0 : index
    %c0_54 = arith.constant 0 : index
    %62 = vector.load %arg11[%c1_52, %c0_53, %c0_54] : memref<18x18x128xbf16, #tpu.memory_space<vmem>>, vector<16x16x128xbf16>
    %63 = vector.shape_cast %62 : vector<16x16x128xbf16> to vector<256x128xbf16>
    %c3 = arith.constant 3 : index
    %c0_55 = arith.constant 0 : index
    %c0_56 = arith.constant 0 : index
    %64 = vector.load %arg7[%c3, %c0_55, %c0_56] : memref<9x128x128xbf16, #tpu.memory_space<vmem>>, vector<1x128x128xbf16>
    %65 = vector.shape_cast %64 : vector<1x128x128xbf16> to vector<128x128xbf16>
    %cst_57 = arith.constant dense<0.000000e+00> : vector<256x128xf32>
    %66 = tpu.matmul %63, %65, %cst_57 {dimension_numbers = #tpu.dot_dimension_numbers<[1], [0], [0], [1], [0, 0, 1, 1], [], []>} : vector<256x128xbf16>, vector<128x128xbf16>, vector<256x128xf32> -> vector<256x128xf32>
    %67 = arith.addf %61, %66 : vector<256x128xf32>
    %c1_58 = arith.constant 1 : index
    %c1_59 = arith.constant 1 : index
    %c0_60 = arith.constant 0 : index
    %68 = vector.load %arg11[%c1_58, %c1_59, %c0_60] : memref<18x18x128xbf16, #tpu.memory_space<vmem>>, vector<16x16x128xbf16>
    %69 = vector.shape_cast %68 : vector<16x16x128xbf16> to vector<256x128xbf16>
    %c4 = arith.constant 4 : index
    %c0_61 = arith.constant 0 : index
    %c0_62 = arith.constant 0 : index
    %70 = vector.load %arg7[%c4, %c0_61, %c0_62] : memref<9x128x128xbf16, #tpu.memory_space<vmem>>, vector<1x128x128xbf16>
    %71 = vector.shape_cast %70 : vector<1x128x128xbf16> to vector<128x128xbf16>
    %cst_63 = arith.constant dense<0.000000e+00> : vector<256x128xf32>
    %72 = tpu.matmul %69, %71, %cst_63 {dimension_numbers = #tpu.dot_dimension_numbers<[1], [0], [0], [1], [0, 0, 1, 1], [], []>} : vector<256x128xbf16>, vector<128x128xbf16>, vector<256x128xf32> -> vector<256x128xf32>
    %73 = arith.addf %67, %72 : vector<256x128xf32>
    %c1_64 = arith.constant 1 : index
    %c2_65 = arith.constant 2 : index
    %c0_66 = arith.constant 0 : index
    %74 = vector.load %arg11[%c1_64, %c2_65, %c0_66] : memref<18x18x128xbf16, #tpu.memory_space<vmem>>, vector<16x16x128xbf16>
    %75 = vector.shape_cast %74 : vector<16x16x128xbf16> to vector<256x128xbf16>
    %c5 = arith.constant 5 : index
    %c0_67 = arith.constant 0 : index
    %c0_68 = arith.constant 0 : index
    %76 = vector.load %arg7[%c5, %c0_67, %c0_68] : memref<9x128x128xbf16, #tpu.memory_space<vmem>>, vector<1x128x128xbf16>
    %77 = vector.shape_cast %76 : vector<1x128x128xbf16> to vector<128x128xbf16>
    %cst_69 = arith.constant dense<0.000000e+00> : vector<256x128xf32>
    %78 = tpu.matmul %75, %77, %cst_69 {dimension_numbers = #tpu.dot_dimension_numbers<[1], [0], [0], [1], [0, 0, 1, 1], [], []>} : vector<256x128xbf16>, vector<128x128xbf16>, vector<256x128xf32> -> vector<256x128xf32>
    %79 = arith.addf %73, %78 : vector<256x128xf32>
    %c2_70 = arith.constant 2 : index
    %c0_71 = arith.constant 0 : index
    %c0_72 = arith.constant 0 : index
    %80 = vector.load %arg11[%c2_70, %c0_71, %c0_72] : memref<18x18x128xbf16, #tpu.memory_space<vmem>>, vector<16x16x128xbf16>
    %81 = vector.shape_cast %80 : vector<16x16x128xbf16> to vector<256x128xbf16>
    %c6 = arith.constant 6 : index
    %c0_73 = arith.constant 0 : index
    %c0_74 = arith.constant 0 : index
    %82 = vector.load %arg7[%c6, %c0_73, %c0_74] : memref<9x128x128xbf16, #tpu.memory_space<vmem>>, vector<1x128x128xbf16>
    %83 = vector.shape_cast %82 : vector<1x128x128xbf16> to vector<128x128xbf16>
    %cst_75 = arith.constant dense<0.000000e+00> : vector<256x128xf32>
    %84 = tpu.matmul %81, %83, %cst_75 {dimension_numbers = #tpu.dot_dimension_numbers<[1], [0], [0], [1], [0, 0, 1, 1], [], []>} : vector<256x128xbf16>, vector<128x128xbf16>, vector<256x128xf32> -> vector<256x128xf32>
    %85 = arith.addf %79, %84 : vector<256x128xf32>
    %c2_76 = arith.constant 2 : index
    %c1_77 = arith.constant 1 : index
    %c0_78 = arith.constant 0 : index
    %86 = vector.load %arg11[%c2_76, %c1_77, %c0_78] : memref<18x18x128xbf16, #tpu.memory_space<vmem>>, vector<16x16x128xbf16>
    %87 = vector.shape_cast %86 : vector<16x16x128xbf16> to vector<256x128xbf16>
    %c7 = arith.constant 7 : index
    %c0_79 = arith.constant 0 : index
    %c0_80 = arith.constant 0 : index
    %88 = vector.load %arg7[%c7, %c0_79, %c0_80] : memref<9x128x128xbf16, #tpu.memory_space<vmem>>, vector<1x128x128xbf16>
    %89 = vector.shape_cast %88 : vector<1x128x128xbf16> to vector<128x128xbf16>
    %cst_81 = arith.constant dense<0.000000e+00> : vector<256x128xf32>
    %90 = tpu.matmul %87, %89, %cst_81 {dimension_numbers = #tpu.dot_dimension_numbers<[1], [0], [0], [1], [0, 0, 1, 1], [], []>} : vector<256x128xbf16>, vector<128x128xbf16>, vector<256x128xf32> -> vector<256x128xf32>
    %91 = arith.addf %85, %90 : vector<256x128xf32>
    %c2_82 = arith.constant 2 : index
    %c2_83 = arith.constant 2 : index
    %c0_84 = arith.constant 0 : index
    %92 = vector.load %arg11[%c2_82, %c2_83, %c0_84] : memref<18x18x128xbf16, #tpu.memory_space<vmem>>, vector<16x16x128xbf16>
    %93 = vector.shape_cast %92 : vector<16x16x128xbf16> to vector<256x128xbf16>
    %c8 = arith.constant 8 : index
    %c0_85 = arith.constant 0 : index
    %c0_86 = arith.constant 0 : index
    %94 = vector.load %arg7[%c8, %c0_85, %c0_86] : memref<9x128x128xbf16, #tpu.memory_space<vmem>>, vector<1x128x128xbf16>
    %95 = vector.shape_cast %94 : vector<1x128x128xbf16> to vector<128x128xbf16>
    %cst_87 = arith.constant dense<0.000000e+00> : vector<256x128xf32>
    %96 = tpu.matmul %93, %95, %cst_87 {dimension_numbers = #tpu.dot_dimension_numbers<[1], [0], [0], [1], [0, 0, 1, 1], [], []>} : vector<256x128xbf16>, vector<128x128xbf16>, vector<256x128xf32> -> vector<256x128xf32>
    %97 = arith.addf %91, %96 : vector<256x128xf32>
    %98 = arith.truncf %97 : vector<256x128xf32> to vector<256x128xbf16>
    %c0_88 = arith.constant 0 : index
    %c0_89 = arith.constant 0 : index
    %99 = vector.load %arg8[%c0_88, %c0_89] : memref<128x128xbf16, #tpu.memory_space<vmem>>, vector<128x128xbf16>
    %cst_90 = arith.constant dense<0.000000e+00> : vector<256x128xf32>
    %100 = tpu.matmul %98, %99, %cst_90 {dimension_numbers = #tpu.dot_dimension_numbers<[1], [0], [0], [1], [0, 0, 1, 1], [], []>} : vector<256x128xbf16>, vector<128x128xbf16>, vector<256x128xf32> -> vector<256x128xf32>
    %c0_91 = arith.constant 0 : index
    %c0_92 = arith.constant 0 : index
    %101 = vector.load %arg9[%c0_91, %c0_92] : memref<1x128xf32, #tpu.memory_space<vmem>>, vector<1x128xf32>
    %102 = vector.broadcast %101 : vector<1x128xf32> to vector<256x128xf32>
    %103 = arith.addf %100, %102 : vector<256x128xf32>
    %104 = vector.shape_cast %1 : vector<16x16x128xf32> to vector<256x128xf32>
    %105 = arith.addf %103, %104 : vector<256x128xf32>
    %cst_93 = arith.constant 0.000000e+00 : f32
    %106 = vector.broadcast %cst_93 : f32 to vector<256x128xf32>
    %107 = arith.maximumf %105, %106 : vector<256x128xf32>
    %108 = vector.shape_cast %107 : vector<256x128xf32> to vector<1x16x16x128xf32>
    %c0_94 = arith.constant 0 : index
    %c0_95 = arith.constant 0 : index
    %c0_96 = arith.constant 0 : index
    %c0_97 = arith.constant 0 : index
    %109 = vector.load %arg10[%c0_94, %c0_95, %c0_96, %c0_97] : memref<1x16x16x128xf32, #tpu.memory_space<vmem>>, vector<1x16x16x128xf32>
    tpu.vector_store %arg10[%c0_94, %c0_95, %c0_96, %c0_97], %108 {strides = array<i32>} : memref<1x16x16x128xf32, #tpu.memory_space<vmem>>, vector<1x16x16x128xf32>,
    return
  }
  func.func @transform_0(%arg0: i32, %arg1: i32) -> (i32, i32, i32, i32) {
    %c0_i32 = arith.constant 0 : i32
    %c0_i32_0 = arith.constant 0 : i32
    %c0_i32_1 = arith.constant 0 : i32
    return %arg0, %arg1, %c0_i32, %c0_i32_0 : i32, i32, i32, i32
  }
  func.func @transform_1(%arg0: i32, %arg1: i32) -> (i32, i32, i32, i32) {
    %c16_i32 = arith.constant 16 : i32
    %0 = arith.muli %arg1, %c16_i32 : i32
    %c1_i32 = arith.constant 1 : i32
    %1 = arith.subi %0, %c1_i32 : i32
    %c0_i32 = arith.constant 0 : i32
    %2 = arith.maxsi %1, %c0_i32 : i32
    %c0_i32_0 = arith.constant 0 : i32
    %c0_i32_1 = arith.constant 0 : i32
    %c0_i32_2 = arith.constant 0 : i32
    return %arg0, %2, %c0_i32_0, %c0_i32_1 : i32, i32, i32, i32
  }
  func.func @transform_2(%arg0: i32, %arg1: i32) -> (i32, i32, i32, i32) {
    %c1_i32 = arith.constant 1 : i32
    %0 = arith.addi %arg1, %c1_i32 : i32
    %c16_i32 = arith.constant 16 : i32
    %1 = arith.muli %0, %c16_i32 : i32
    %c15_i32 = arith.constant 15 : i32
    %2 = arith.minsi %1, %c15_i32 : i32
    %c0_i32 = arith.constant 0 : i32
    %c0_i32_0 = arith.constant 0 : i32
    %c0_i32_1 = arith.constant 0 : i32
    return %arg0, %2, %c0_i32, %c0_i32_0 : i32, i32, i32, i32
  }
  func.func @transform_3(%arg0: i32, %arg1: i32) -> (i32, i32) {
    %c0_i32 = arith.constant 0 : i32
    %c0_i32_0 = arith.constant 0 : i32
    %c0_i32_1 = arith.constant 0 : i32
    return %c0_i32, %c0_i32_0 : i32, i32
  }
  func.func @transform_4(%arg0: i32, %arg1: i32) -> (i32, i32) {
    %c0_i32 = arith.constant 0 : i32
    %c0_i32_0 = arith.constant 0 : i32
    %c0_i32_1 = arith.constant 0 : i32
    return %c0_i32, %c0_i32_0 : i32, i32
  }
  func.func @transform_5(%arg0: i32, %arg1: i32) -> (i32, i32, i32) {
    %c0_i32 = arith.constant 0 : i32
    %c0_i32_0 = arith.constant 0 : i32
    %c0_i32_1 = arith.constant 0 : i32
    %c0_i32_2 = arith.constant 0 : i32
    return %c0_i32, %c0_i32_0, %c0_i32_1 : i32, i32, i32
  }
  func.func @transform_6(%arg0: i32, %arg1: i32) -> (i32, i32) {
    %c0_i32 = arith.constant 0 : i32
    %c0_i32_0 = arith.constant 0 : i32
    %c0_i32_1 = arith.constant 0 : i32
    return %c0_i32, %c0_i32_0 : i32, i32
  }
  func.func @transform_7(%arg0: i32, %arg1: i32) -> (i32, i32) {
    %c0_i32 = arith.constant 0 : i32
    %c0_i32_0 = arith.constant 0 : i32
    %c0_i32_1 = arith.constant 0 : i32
    return %c0_i32, %c0_i32_0 : i32, i32
  }
  func.func @transform_8(%arg0: i32, %arg1: i32) -> (i32, i32, i32, i32) {
    %c0_i32 = arith.constant 0 : i32
    %c0_i32_0 = arith.constant 0 : i32
    %c0_i32_1 = arith.constant 0 : i32
    return %arg0, %arg1, %c0_i32, %c0_i32_0 : i32, i32, i32, i32
  }
}

</mosaic_0001>

<bundles_post_ra>
// kernel: tpu_custom_call.1
= control target key start
LH: loop header
LB: loop body
LE: loop exit
PB: predicated region body
PF: predicated region fallthrough
CT: control target
= control target key end

     0   :  { %s11246_s0 = inlined_call_operand.hbm [shape: f32[2,16,16,128], index: 0, kind: input, shape index: {}]   ;;  %s11247_s1 = inlined_call_operand.hbm [shape: f32[2,16,16,128], index: 1, kind: input, shape index: {}]   ;;  %s11248_s2 = inlined_call_operand.hbm [shape: f32[2,16,16,128], index: 2, kind: input, shape index: {}]   ;;  %s11249_s3 = inlined_call_operand.hbm [shape: bf16[128,128], index: 3, kind: input, shape index: {}]   ;;  %s11250_s4 = inlined_call_operand.vmem [shape: f32[1,128], index: 4, kind: input, shape index: {}]   ;;  %s11251_s5 = inlined_call_operand.hbm [shape: bf16[9,128,128], index: 5, kind: input, shape index: {}]   ;;  %s11252_s6 = inlined_call_operand.hbm [shape: bf16[128,128], index: 6, kind: input, shape index: {}]   ;;  %s11253_s7 = inlined_call_operand.vmem [shape: f32[1,128], index: 7, kind: input, shape index: {}]   ;;  %s11254_s8 = inlined_call_operand.hbm [shape: f32[2,16,16,128], index: 8, kind: output, shape index: {}]  }
   0x1   :  { %11295 = sst [smem:[#allocation34_spill]] %s11247_s1 }
   0x2   :  { %11296 = sst [smem:[#allocation35_spill]] %s11249_s3 }
   0x3   :  { %11297 = sst [smem:[#allocation36_spill]] %s11253_s7 }
   0x4   :  { %11298 = sst [smem:[#allocation37_spill]] %s11254_s8 }
   0x5   :  { %13 = vsyncpa [#allocation4], 0 }
   0x6   :  { %15 = vsyncpa [#allocation4 + $0x1], 0 }
   0x7   :  { %16 = vsyncpa [#allocation7], 0 }
   0x8   :  { %18 = vsyncpa [#allocation7 + $0x1], 0 }
   0x9   :  { %19 = vsyncpa [#allocation10], 0 }
   0xa   :  { %20 = vsyncpa [#allocation13], 0 }
   0xb   :  { %21 = vsyncpa [#allocation5], 0 }
   0xc   :  { %23 = vsyncpa [#allocation5 + $0x1], 0  ;;  %s9094_s27 = smov 0   ;;  %s9096_s28 = smov 0  }
   0xd   :  { %s9098_s29 = smov 0   ;;  %s9100_s30 = smov 0  }
   0xe   :  { %s9102_s9 = smov 0   ;;  %s9104_s10 = smov 0  }
   0xf LB: > { %11299 = sst [smem:[#allocation20_spill]] %s9012_s27  ;;  %s9125_s11 = sadd.s32 4294967295, %s9032_s10   ;;  %s9032_s10 = sphi %s9104_s10, %s29_s10   ;;  %s9028_s9 = sphi %s9102_s9, %s11415_s9   ;;  %s9024_s30 = sphi %s9100_s30, %s11414_s30   ;;  %s9020_s29 = sphi %s9098_s29, %s11413_s29   ;;  %s9016_s28 = sphi %s9096_s28, %s11417_s28   ;;  %s9012_s27 = sphi %s9094_s27, %s11416_s27  }
  0x10   : > { %11300 = sst [smem:[#allocation21_spill]] %s9020_s29  ;;  %s6935_s12 = sadd.s32 4294967294, %s9032_s10  }
  0x11   : > { %11301 = sst [smem:[#allocation22_spill]] %s9024_s30  ;;  %p57_p0 = scmp.ne.s32.totalorder %s9020_s29, %s9016_s28 }
  0x12   : > { %11302 = sst [smem:[#allocation23_spill]] %s9028_s9  ;;  %p58_p1 = scmp.eq.s32.totalorder %s9032_s10, 0 }
  0x13   : > { %11303 = sst [smem:[#allocation24_spill]] %s9032_s10  ;;  %p63_p2 = scmp.ne.s32.totalorder %s9016_s28, %s9012_s27 }
  0x14   : > { %p11257_p3 = scmp.eq.s32.totalorder %s9125_s11, 0  ;;  %p9134_p4 = por %p58_p1, %p57_p0 }
  0x15   : > { %p266_p5 = scmp.eq.s32.totalorder %s9125_s11, 1  ;;  %p272_p7 = scmp.eq.s32.totalorder %s6935_s12, 1 }
  0x16   : > { %p9141_p6 = por %p11257_p3, %p63_p2  ;;  %p6936_p9 = scmp.ge.s32.totalorder %s9032_s10, 1 }
  0x17   : > { %p9145_p8 = por %p266_p5, %p57_p0  ;;  %p9150_p10 = por %p272_p7, %p63_p2 }
  0x18   : > { %s11305_s14 = scalar_select %p9141_p6, 1, 0 }
  0x19   : > { %s11306_s15 = scalar_select %p9145_p8, 1, 0 }
  0x1a   : > { %s11308_s16 = scalar_select %p9150_p10, 1, 0 }
  0x1b   : > { %11307 = sst [smem:[#allocation25_spill]] %s11306_s15  ;;  %p279_p11 = scmp.lt.s32.totalorder %s9032_s10, 3 }
  0x1c   : > { %11309 = sst [smem:[#allocation26_spill]] %s11308_s16  ;;  %s9034_s18 = smov [#allocation9]  }
  0x1d   : > { %p9155_p12 = pnand %p6936_p9, %p279_p11  ;;  %s291_s19 = sshll.u32 %s9034_s18, 4  ;;  %s9159_s19 = int_to_ptr.vmem [resolvable:$true] %s291_s19 }
  0x1e   : > { %s41_s21 = sadd.s32 1, %s9028_s9  ;;  %s11313_s3 = sld [smem:[#allocation35_spill]] }
  0x1f   : > { %s11310_s17 = scalar_select %p9155_p12, 1, 0 }
  0x20   : > { %p8449_p13 = pneg %p9155_p12  ;;  %p9172_p2 = scmp.ge.s32.totalorder %s41_s21, 2 }
  0x22   : > { %p9166_p1 = pnand %p8449_p13, %p11257_p3 }
  0x24   : > { %s11311_s20 = scalar_select %p9166_p1, 1, 0 }
  0x25   : > { %s8764_s26 = scalar_lea.hbm %s11313_s3, 1024  ;;  %p9184_p7 = pneg %p9166_p1 }
  0x26   : > { %p8765_p5 = scmp.ne.s32.totalorder %s11313_s3, %s8764_s26  ;;  %p8771_p13 = scmp.lt.u32.totalorder %s8764_s26, %s11313_s3 }
  0x27   : > { %s11314_s16 = scalar_select %p9184_p7, 1, 0 }
  0x28   : > { %p8767_p9 = pnand %p9184_p7, %p8765_p5 }
  0x2a   : > { %p8768_p11 = pneg %p8767_p9 }
  0x2c   : > { %p8773_p0 = pnand %p8771_p13, %p8768_p11 }
  0x2e   : > { %8776 = shalt.err (!%p8773_p0)
}
  0x2f   : > { %s8777_s24 = scalar_lea.vmem %s9159_s19, 1024  ;;  %p8785_p6 = scmp.lt.s32.totalorder %s9159_s19, %s9159_s19 }
  0x30   : > { %p8778_p3 = scmp.ne.s32.totalorder %s9159_s19, %s8777_s24  ;;  %p8786_p12 = scmp.lt.s32.totalorder %s8777_s24, %s8777_s24 }
  0x32   : > { %p8780_p10 = pnand %p8778_p3, %p9184_p7  ;;  %p8787_p5 = por %p8786_p12, %p8785_p6 }
  0x34   : > { %p8781_p8 = pneg %p8780_p10 }
  0x36   : > { %p8788_p9 = pnand %p8787_p5, %p8781_p8 }
  0x38   : > { %8791 = shalt.err (!%p8788_p9)
}
  0x39   : > { %s11262_s25 = smov 64   ;;  %s11264_s27 = smov 4  }
  0x3a   : > { %8452 = dma.hbm_to_vmem [thread:$0]  (!%p9166_p1), %s11313_s3, 1024, %s9159_s19, [#allocation10], %s11262_s25, %s11262_s25, %s11264_s27  }
  0x3b   : > { %s11419_s21 = smov (%p9172_p2, %s41_s21), 0  ;;  %p8476_p3 = scmp.lt.s32.totalorder %s9032_s10, 2 }
  0x3c   : > { %11315 = sst [smem:[#allocation27_spill]] %s11419_s21  ;;  %s9214_s12 = sand.u32 1, %s9020_s29  }
  0x3d   : > { %s45_s18 = ssub.s32 %s9028_s9, %s11419_s21  ;;  %s9219_s24 = sshll.u32 %s9028_s9, 12 }
  0x3e   : > { %p48_p6 = scmp.eq.s32.totalorder %s45_s18, 0  ;;  %p9223_p8 = pnand %p8476_p3, %p9134_p4 }
  0x3f   : > { %s11317_s22 = sadd.s32 1, %s9020_s29  ;;  %s361_s23 = sand.u32 1, %s9032_s10  }
  0x40   : > { %s11316_s8 = scalar_select %p9223_p8, 1, 0 }
  0x41   : > { %s9230_s19 = scalar_select %p48_p6, %s9020_s29, %s11317_s22  }
  0x42   : > { %s6944_s26 = sshll.u32 %s9214_s12, 4  ;;  %s11319_s1 = sld [smem:[#allocation34_spill]] }
  0x43   : > { %11318 = sst [smem:[#allocation28_spill]] %s9230_s19  ;;  %s365_s13 = scalar_lea.vmem [#allocation6], %s6944_s26 }
  0x44   : > { %s378_s18 = sshll.u32 %s365_s13, 4  ;;  %s9242_s21 = scalar_lea.vmem [#allocation8], %s6944_s26  ;;  %s9240_s18 = int_to_ptr.vmem [resolvable:$true] %s378_s18 }
  0x45   : > { %s405_s22 = sshll.u32 %s9242_s21, 4  ;;  %s9245_s9 = scalar_lea.sflag [#allocation7], %s361_s23  ;;  %s9280_s22 = int_to_ptr.vmem [resolvable:$true] %s405_s22 }
  0x46   : > { %p9251_p10 = pneg %p9223_p8 }
  0x48   : > { %s9238_s3 = scalar_lea.hbm %s11319_s1, %s9219_s24  ;;  %s8797_s26 = scalar_lea.hbm %s11319_s1, 8192 }
  0x49   : > { %s8792_s19 = scalar_lea.hbm %s9238_s3, 256  ;;  %p8798_p2 = scmp.lt.u32.totalorder %s9238_s3, %s11319_s1 }
  0x4a   : > { %p8793_p4 = scmp.ne.s32.totalorder %s9238_s3, %s8792_s19  ;;  %p8799_p11 = scmp.lt.u32.totalorder %s8797_s26, %s8792_s19 }
  0x4b   : > { %s11320_s25 = scalar_select %p9251_p10, 1, 0 }
  0x4c   : > { %p8795_p12 = pnand %p9251_p10, %p8793_p4  ;;  %p8800_p13 = por %p8799_p11, %p8798_p2 }
  0x4d   : > { %p8801_p5 = scmp.lt.u32.totalorder %s8792_s19, %s9238_s3 }
  0x4e   : > { %p8796_p0 = pneg %p8795_p12 }
  0x4f   : > { %p8802_p9 = por %p8801_p5, %p8800_p13 }
  0x51   : > { %p8803_p3 = pnand %p8802_p9, %p8796_p0 }
  0x53   : > { %8806 = shalt.err (!%p8803_p3)
}
  0x54   : > { %s8807_s23 = scalar_lea.vmem %s9240_s18, 256  ;;  %s9037_s27 = smov [#allocation6]  }
  0x55   : > { %p8808_p6 = scmp.ne.s32.totalorder %s9240_s18, %s8807_s23  ;;  %s8812_s13 = sshll.u32 %s9037_s27, 4  ;;  %s8813_s13 = int_to_ptr.vmem [resolvable:$false] %s8812_s13 }
  0x56   : > { %s8814_s29 = scalar_lea.vmem %s8813_s13, 512  ;;  %p8815_p1 = scmp.lt.s32.totalorder %s9240_s18, %s8813_s13 }
  0x57   : > { %p8810_p4 = pnand %p8808_p6, %p9251_p10  ;;  %p8816_p7 = scmp.lt.s32.totalorder %s8814_s29, %s8807_s23 }
  0x59   : > { %p8811_p12 = pneg %p8810_p4  ;;  %p8817_p2 = por %p8816_p7, %p8815_p1 }
  0x5b   : > { %p8818_p11 = pnand %p8817_p2, %p8811_p12 }
  0x5d   : > { %8821 = shalt.err (!%p8818_p11)
}
  0x5e   : > { %s11279_s10 = smov 128   ;;  %s9039_s19 = smov 8  }
  0x5f   : > { %8465 = dma.hbm_to_vmem [thread:$0]  (!%p9223_p8), %s9238_s3, 256, %s9240_s18, %s9245_s9, %s11279_s10, %s11279_s10, %s9039_s19  }
  0x60   : > { %s9040_s26 = smov [#allocation11]   ;;  %s9041_s27 = smov [#allocation12]  }
  0x61   : > { %s307_s23 = sshll.u32 %s9040_s26, 4  ;;  %s320_s13 = sshll.u32 %s9041_s27, 4  ;;  %s308_s23 = int_to_ptr.vmem [resolvable:$true] %s307_s23  ;;  %s321_s13 = int_to_ptr.vmem [resolvable:$true] %s320_s13 }
  0x62   : > { %s8822_s15 = scalar_lea.hbm %s11251_s5, 9216  ;;  %p11321_p7 = scmp.ne.s32.totalorder %s11314_s16, 0 }
  0x63   : > { %p8823_p1 = scmp.ne.s32.totalorder %s11251_s5, %s8822_s15  ;;  %p8829_p5 = scmp.lt.u32.totalorder %s8822_s15, %s11251_s5 }
  0x65   : > { %p8825_p0 = pnand %p8823_p1, %p11321_p7 }
  0x67   : > { %p8826_p13 = pneg %p8825_p0 }
  0x69   : > { %p8831_p9 = pnand %p8829_p5, %p8826_p13 }
  0x6b   : > { %8834 = shalt.err (!%p8831_p9)
}
  0x6c   : > { %s8835_s18 = scalar_lea.vmem %s308_s23, 9216  ;;  %p8843_p12 = scmp.lt.s32.totalorder %s308_s23, %s308_s23 }
  0x6d   : > { %p8836_p3 = scmp.ne.s32.totalorder %s308_s23, %s8835_s18  ;;  %p8844_p2 = scmp.lt.s32.totalorder %s8835_s18, %s8835_s18 }
  0x6f   : > { %p8838_p6 = pnand %p8836_p3, %p11321_p7  ;;  %p8845_p11 = por %p8844_p2, %p8843_p12 }
  0x71   : > { %p8839_p4 = pneg %p8838_p6 }
  0x73   : > { %p8846_p8 = pnand %p8845_p11, %p8839_p4 }
  0x75   : > { %8849 = shalt.err (!%p8846_p8)
}
  0x76   : > { %p11322_p1 = scmp.ne.s32.totalorder %s11311_s20, 0  ;;  %s11323_s1 = smov 4  }
  0x77   : > { %s11324_s7 = smov 64   ;;  %s8850_s29 = scalar_lea.hbm %s11252_s6, 1024 }
  0x78   : > { %8455 = dma.hbm_to_vmem [thread:$0]  (!%p11322_p1), %s11251_s5, 9216, %s308_s23, [#allocation10], %s11324_s7, %s11324_s7, %s11323_s1  }
  0x79   : > { %p8851_p0 = scmp.ne.s32.totalorder %s11252_s6, %s8850_s29  ;;  %p8857_p5 = scmp.lt.u32.totalorder %s8850_s29, %s11252_s6 }
  0x7b   : > { %p8853_p8 = pnand %p8851_p0, %p11321_p7 }
  0x7d   : > { %p8854_p13 = pneg %p8853_p8 }
  0x7f   : > { %p8859_p9 = pnand %p8857_p5, %p8854_p13 }
  0x81   : > { %8862 = shalt.err (!%p8859_p9)
}
  0x82   : > { %s8863_s30 = scalar_lea.vmem %s321_s13, 1024  ;;  %p8871_p12 = scmp.lt.s32.totalorder %s321_s13, %s321_s13 }
  0x83   : > { %p8864_p3 = scmp.ne.s32.totalorder %s321_s13, %s8863_s30  ;;  %p8872_p2 = scmp.lt.s32.totalorder %s8863_s30, %s8863_s30 }
  0x85   : > { %p8866_p6 = pnand %p8864_p3, %p11321_p7  ;;  %p8873_p11 = por %p8872_p2, %p8871_p12 }
  0x87   : > { %p8867_p4 = pneg %p8866_p6 }
  0x89   : > { %p8874_p10 = pnand %p8873_p11, %p8867_p4 }
  0x8b   : > { %8877 = shalt.err (!%p8874_p10)
}
  0x8c   : > { %8458 = dma.hbm_to_vmem [thread:$0]  (!%p11322_p1), %s11252_s6, 1024, %s321_s13, [#allocation13], %s11324_s7, %s11324_s7, %s11323_s1  }
  0x8d   : > { %s6941_s16 = sshll.u32 %s9214_s12, 8  ;;  %s9329_s27 = scalar_lea.hbm %s11246_s0, %s9219_s24 }
  0x8e   : > { %s7284_s20 = sadd.s32 3840, %s9219_s24  ;;  %s341_s29 = scalar_lea.vmem [#allocation3], %s6941_s16 }
  0x8f   : > { %s351_s3 = sshll.u32 %s341_s29, 4  ;;  %s9335_s30 = scalar_lea.hbm %s11248_s2, %s7284_s20  ;;  %s9337_s3 = int_to_ptr.vmem [resolvable:$true] %s351_s3 }
  0x90   : > { %s338_s13 = scalar_lea.sflag [#allocation4], %s9214_s12  ;;  %s8878_s1 = scalar_lea.hbm %s9329_s27, 4096 }
  0x91   : > { %p8879_p10 = scmp.ne.s32.totalorder %s9329_s27, %s8878_s1  ;;  %p11325_p7 = scmp.ne.s32.totalorder %s11320_s25, 0 }
  0x92   : > { %s8883_s23 = scalar_lea.hbm %s11246_s0, 8192  ;;  %p8884_p8 = scmp.lt.u32.totalorder %s9329_s27, %s11246_s0 }
  0x93   : > { %p8881_p1 = pnand %p8879_p10, %p11325_p7  ;;  %p8885_p13 = scmp.lt.u32.totalorder %s8883_s23, %s8878_s1 }
  0x94   : > { %p8887_p9 = scmp.lt.u32.totalorder %s8878_s1, %s9329_s27 }
  0x95   : > { %p8882_p0 = pneg %p8881_p1  ;;  %p8886_p5 = por %p8885_p13, %p8884_p8 }
  0x97   : > { %p8888_p3 = por %p8887_p9, %p8886_p5 }
  0x99   : > { %p8889_p6 = pnand %p8888_p3, %p8882_p0 }
  0x9b   : > { %8892 = shalt.err (!%p8889_p6)
}
  0x9c   : > { %s8893_s15 = scalar_lea.vmem %s9337_s3, 4096  ;;  %s9042_s26 = smov [#allocation3]  }
  0x9d   : > { %p8894_p4 = scmp.ne.s32.totalorder %s9337_s3, %s8893_s15  ;;  %s8898_s20 = sshll.u32 %s9042_s26, 4  ;;  %s8899_s20 = int_to_ptr.vmem [resolvable:$false] %s8898_s20 }
  0x9e   : > { %s8900_s29 = scalar_lea.vmem %s8899_s20, 8192  ;;  %p8901_p11 = scmp.lt.s32.totalorder %s9337_s3, %s8899_s20 }
  0x9f   : > { %p8896_p12 = pnand %p8894_p4, %p11325_p7  ;;  %p8902_p10 = scmp.lt.s32.totalorder %s8900_s29, %s8893_s15 }
  0xa1   : > { %p8897_p2 = pneg %p8896_p12  ;;  %p8903_p1 = por %p8902_p10, %p8901_p11 }
  0xa3   : > { %p8904_p8 = pnand %p8903_p1, %p8897_p2 }
  0xa5   : > { %8907 = shalt.err (!%p8904_p8)
}
  0xa6   : > { %p11326_p0 = scmp.ne.s32.totalorder %s11316_s8, 0  ;;  %s11327_s21 = smov 128  }
  0xa7   : > { %s8908_s18 = scalar_lea.hbm %s9335_s30, 256  ;;  %s8913_s10 = scalar_lea.hbm %s11248_s2, 8192 }
  0xa8   : > { %8462 = dma.hbm_to_vmem [thread:$0]  (!%p11326_p0), %s9329_s27, 4096, %s9337_s3, %s338_s13, %s11327_s21, %s11327_s21, %s9039_s19  }
  0xa9   : > { %p8909_p13 = scmp.ne.s32.totalorder %s9335_s30, %s8908_s18  ;;  %p8914_p3 = scmp.lt.u32.totalorder %s9335_s30, %s11248_s2 }
  0xaa   : > { %p8915_p6 = scmp.lt.u32.totalorder %s8913_s10, %s8908_s18  ;;  %p8917_p12 = scmp.lt.u32.totalorder %s8908_s18, %s9335_s30 }
  0xab   : > { %p8911_p5 = pnand %p8909_p13, %p11325_p7 }
  0xac   : > { %p8916_p4 = por %p8915_p6, %p8914_p3 }
  0xad   : > { %p8912_p9 = pneg %p8911_p5 }
  0xae   : > { %p8918_p2 = por %p8917_p12, %p8916_p4 }
  0xb0   : > { %p8919_p11 = pnand %p8918_p2, %p8912_p9 }
  0xb2   : > { %8922 = shalt.err (!%p8919_p11)
}
  0xb3   : > { %s8923_s12 = scalar_lea.vmem %s9280_s22, 256  ;;  %s9043_s27 = smov [#allocation8]  }
  0xb4   : > { %p8924_p10 = scmp.ne.s32.totalorder %s9280_s22, %s8923_s12  ;;  %s8928_s3 = sshll.u32 %s9043_s27, 4  ;;  %s8929_s3 = int_to_ptr.vmem [resolvable:$false] %s8928_s3 }
  0xb5   : > { %s8930_s13 = scalar_lea.vmem %s8929_s3, 512  ;;  %p8931_p13 = scmp.lt.s32.totalorder %s9280_s22, %s8929_s3 }
  0xb6   : > { %p8926_p1 = pnand %p8924_p10, %p11325_p7  ;;  %p8932_p5 = scmp.lt.s32.totalorder %s8930_s13, %s8923_s12 }
  0xb8   : > { %p8927_p8 = pneg %p8926_p1  ;;  %p8933_p3 = por %p8932_p5, %p8931_p13 }
  0xba   : > { %p8934_p6 = pnand %p8933_p3, %p8927_p8 }
  0xbc   : > { %8937 = shalt.err (!%p8934_p6)
}
  0xbd   : > { %8468 = dma.hbm_to_vmem [thread:$0]  (!%p11326_p0), %s9335_s30, 256, %s9280_s22, %s9245_s9, %s11327_s21, %s11327_s21, %s9039_s19  }
  0xbe   : > { %p11328_p7 = scmp.ne.s32.totalorder %s11310_s17, 0 }
  0xc0   : > { %417 = sbr.rel (%p11328_p7) target bundleno = 1378 (0x562), region = 52 }
  0xc7   : > { %s9394_s25 = sand.u32 1, %s9016_s28   ;;  %p11329_p9 = scmp.ne.s32.totalorder %s11305_s14, 0 }
  0xc8   : > { %s6951_s16 = sshll.u32 %s9394_s25, 8  ;;  %s420_s15 = scalar_lea.sflag [#allocation4], %s9394_s25 }
  0xc9   : > { %s9400_s8 = scalar_lea.vmem [#allocation3], %s6951_s16 }
  0xca   : > { %8991 = dma.done.wait (%p11329_p9), %s420_s15, 4096  }
  0xcb   : > { %8993 = vsyncadd (%p11329_p9), %s420_s15, 4294963200  ;;  %s428_s9 = sand.u32 1, %s9125_s11   ;;  %s6952_s17 = sshll.u32 %s9394_s25, 4 }
  0xcc   : > { %s429_s22 = scalar_lea.sflag [#allocation7], %s428_s9  ;;  %s9408_s19 = scalar_lea.vmem [#allocation6], %s6952_s17 }
  0xcd   : > { %8995 = dma.done.wait (%p11329_p9), %s429_s22, 512  }
  0xce   : > { %8997 = vsyncadd (%p11329_p9), %s429_s22, 4294966784  ;;  %s9414_s30 = scalar_lea.vmem [#allocation8], %s6952_s17  ;;  %p11330_p0 = scmp.eq.s32.totalorder %s9125_s11, 0 }
  0xd0   : > { %8999 = dma.done.wait (%p11330_p0), [#allocation10], 10240   ;;  %p11331_p4 = pmov %p11330_p0 }
  0xd1   : > { %p11332_p12 = pmov %p11330_p0 }
  0xd2   : > { %9001 = vsyncadd (%p11331_p4), [#allocation10], 4294957056 }
  0xd3   : > { %9003 = dma.done.wait (%p11332_p12), [#allocation13], 1024   ;;  %p11333_p2 = pmov %p11330_p0 }
  0xd4   : > { %v9424_v0 = vld [vmem:[#allocation9] sm:$0xff]   ;;  %v9426_v1 = vld [vmem:[#allocation9 + $0x8] sm:$0xff]   ;;  %v9431_v2 = vld [vmem:[#allocation9 + $0x10] sm:$0xff]   ;;  %v9044_v19 = vmov 0.0   ;;  %vm9045_vm0 = vmmov 0   ;;  %vm887_vm1 = vcmask 1040384  }
  0xd5   : > { %9005 = vsyncadd (%p11333_p2), [#allocation13], 4294966272  ;;  %7605 = vmatprep.subr.bf16.mxu1 %v9424_v0  ;;  %v9435_v3 = vld [vmem:[#allocation9 + $0x18] sm:$0xff]   ;;  %v507_v4 = vld [vmem:[%s9400_s8] sm:$0xff]  ;;  %vm888_vm2 = vsmask.f32 256 }
  0xd6   : > { %7606 = vmatpush3.bf16.msra.mxu1 %v9424_v0  ;;  %v508_v5 = vld [vmem:[%s9400_s8 + $0x8] sm:$0xff]  ;;  %v9441_v7 = vld [vmem:[#allocation9 + $0x20] sm:$0xff]   ;;  %v9448_v9 = vld [vmem:[#allocation9 + $0x30] sm:$0xff]   ;;  %vm944_vm4 = vsmask.f32 7938  ;;  %vm1028_vm6 = vcmask 1043456  }
  0xd7   : > { %7607 = vmatprep.subr.bf16.mxu1 %v9426_v1  ;;  %v556_v6 = vpack.c.bf16 %v508_v5, %v507_v4  ;;  %v9445_v8 = vld [vmem:[#allocation9 + $0x28] sm:$0xff]   ;;  %v8548_v10 = vld [vmem:[#allocation11 + $0xc0] sm:$0xff]   ;;  %v9451_v12 = vld [vmem:[#allocation9 + $0x38] sm:$0xff]   ;;  %vm1006_vm7 = vsmask.f32 4368  ;;  %vm2694_vm13 = vcmask 1042432  }
  0xd8   : > { %v8549_v11 = vld [vmem:[#allocation11 + $0xc8] sm:$0xff]   ;;  %7837 = vmatprep.subr.bf16.mxu0 %v8548_v10  ;;  %v509_v13 = vld [vmem:[%s9400_s8 + $0x10] sm:$0xff]  ;;  %v510_v14 = vld [vmem:[%s9400_s8 + $0x18] sm:$0xff]  ;;  %vm1664_vm10 = vsmask.f32 3328  ;;  %vm2695_vm14 = vcmask 1046532  }
  0xd9   : > { %7621 = vmatprep.mubr.bf16.mxu1 %v556_v6  ;;  %7838 = vmatpush3.bf16.msra.mxu0 %v8548_v10  ;;  %v511_v15 = vld [vmem:[%s9400_s8 + $0x20] sm:$0xff]  ;;  %v512_v16 = vld [vmem:[%s9400_s8 + $0x28] sm:$0xff]  ;;  %v557_v17 = vpack.c.bf16 %v510_v14, %v509_v13  ;;  %v513_v20 = vld [vmem:[%s9400_s8 + $0x30] sm:$0xff]  ;;  %vm1665_vm11 = vsmask.f32 7440  ;;  %s11402_s18 = sld [smem:[#allocation36_spill]] }
  0xda   : > { %7608 = vmatpush3.bf16.msra.mxu1 %v9426_v1  ;;  %7839 = vmatprep.subr.bf16.mxu0 %v8549_v11  ;;  %v558_v18 = vpack.c.bf16 %v512_v16, %v511_v15  ;;  %v514_v21 = vld [vmem:[%s9400_s8 + $0x38] sm:$0xff]  ;;  %v515_v22 = vld [vmem:[%s9400_s8 + $0x40] sm:$0xff]  ;;  %v516_v23 = vld [vmem:[%s9400_s8 + $0x48] sm:$0xff]  ;;  %s11100_s1 = scalar_lea.vmem [#allocation14], %s6951_s16  ;;  %s11403_s7 = sld [smem:[#allocation22_spill]] }
  0xdb   : > { %7609 = vmatprep.subr.bf16.mxu1 %v9431_v2  ;;  %v559_v24 = vpack.c.bf16 %v514_v21, %v513_v20  ;;  %v560_v25 = vpack.c.bf16 %v516_v23, %v515_v22  ;;  %v517_v26 = vld [vmem:[%s9400_s8 + $0x50] sm:$0xff]  ;;  %v518_v27 = vld [vmem:[%s9400_s8 + $0x58] sm:$0xff]  ;;  %v519_v28 = vld [vmem:[%s9400_s8 + $0x60] sm:$0xff]  ;;  %s6769_s23 = sshll.u32 %s11100_s1, 4  ;;  %s11404_s24 = sld [smem:[#allocation25_spill]]  ;;  %s11194_s23 = int_to_ptr.vmem [resolvable:$true] %s6769_s23 }
  0xdc   : > { %v520_v29 = vld [vmem:[%s9400_s8 + $0x68] sm:$0xff]  ;;  %v561_v30 = vpack.c.bf16 %v518_v27, %v517_v26  ;;  %v521_v32 = vld [vmem:[%s9400_s8 + $0x70] sm:$0xff]  ;;  %v522_v33 = vld [vmem:[%s9400_s8 + $0x78] sm:$0xff]  ;;  %s11405_s3 = sld [smem:[#allocation37_spill]]  ;;  %s6753_s16 = scalar_lea.sflag [#allocation5], %s9394_s25 }
  0xdd   : > { %7840 = vmatpush3.bf16.msra.mxu0 %v8549_v11  ;;  %v562_v31 = vpack.c.bf16 %v520_v29, %v519_v28  ;;  %v523_v34 = vld [vmem:[%s9400_s8 + $0x80] sm:$0xff]  ;;  %v524_v35 = vld [vmem:[%s9400_s8 + $0x88] sm:$0xff]  ;;  %v563_v36 = vpack.c.bf16 %v522_v33, %v521_v32  ;;  %v525_v38 = vld [vmem:[%s9400_s8 + $0x90] sm:$0xff]  ;;  %s8938_s15 = scalar_lea.vmem %s11194_s23, 4096 }
  0xde   : > { %7610 = vmatpush3.bf16.msra.mxu1 %v9431_v2  ;;  %v564_v37 = vpack.c.bf16 %v524_v35, %v523_v34  ;;  %v526_v39 = vld [vmem:[%s9400_s8 + $0x98] sm:$0xff]  ;;  %v527_v40 = vld [vmem:[%s9400_s8 + $0xa0] sm:$0xff]  ;;  %v528_v41 = vld [vmem:[%s9400_s8 + $0xa8] sm:$0xff]  ;;  %p8939_p11 = scmp.ne.s32.totalorder %s11194_s23, %s8938_s15 }
  0xdf   : > { %7611 = vmatprep.subr.bf16.mxu1 %v9435_v3  ;;  %v565_v42 = vpack.c.bf16 %v526_v39, %v525_v38  ;;  %v566_v43 = vpack.c.bf16 %v528_v41, %v527_v40  ;;  %v529_v44 = vld [vmem:[%s9400_s8 + $0xb0] sm:$0xff]  ;;  %v530_v45 = vld [vmem:[%s9400_s8 + $0xb8] sm:$0xff]  ;;  %v531_v46 = vld [vmem:[%s9400_s8 + $0xc0] sm:$0xff] }
  0xe0   : > { %v532_v47 = vld [vmem:[%s9400_s8 + $0xc8] sm:$0xff]  ;;  %v567_v48 = vpack.c.bf16 %v530_v45, %v529_v44  ;;  %v533_v50 = vld [vmem:[%s9400_s8 + $0xd0] sm:$0xff]  ;;  %v534_v51 = vld [vmem:[%s9400_s8 + $0xd8] sm:$0xff]  ;;  %s7321_s10 = sshll.u32 %s11403_s7, 12 }
  0xe1   : > { %v568_v49 = vpack.c.bf16 %v532_v47, %v531_v46  ;;  %v535_v52 = vld [vmem:[%s9400_s8 + $0xe0] sm:$0xff]  ;;  %v536_v53 = vld [vmem:[%s9400_s8 + $0xe8] sm:$0xff]  ;;  %v569_v54 = vpack.c.bf16 %v534_v51, %v533_v50  ;;  %v537_v56 = vld [vmem:[%s9400_s8 + $0xf0] sm:$0xff]  ;;  %p11406_p10 = scmp.ne.s32.totalorder %s11404_s24, 0 }
  0xe2   : > { %7612 = vmatpush3.bf16.msra.mxu1 %v9435_v3  ;;  %v570_v55 = vpack.c.bf16 %v536_v53, %v535_v52  ;;  %v538_v57 = vld [vmem:[%s9400_s8 + $0xf8] sm:$0xff]  ;;  %v793_v59 = vld [vmem:[%s9408_s19] sm:$0xff]  ;;  %vm9520_vm3 = vmand %vm887_vm1, %vm888_vm2  ;;  %s11192_s13 = scalar_lea.hbm %s11405_s3, %s7321_s10 }
  0xe3   : > { %7613 = vmatprep.subr.bf16.mxu1 %v9441_v7  ;;  %v571_v58 = vpack.c.bf16 %v538_v57, %v537_v56  ;;  %v794_v60 = vld [vmem:[%s9408_s19 + $0x8] sm:$0xff]  ;;  %v8550_v62 = vld [vmem:[#allocation11 + $0xd0] sm:$0xff]   ;;  %vm9530_vm5 = vmand %vm887_vm1, %vm944_vm4  ;;  %p8940_p1 = pnand %p8939_p11, %p11406_p10 }
  0xe4   : > { %v795_v61 = vpack.c.bf16 %v794_v60, %v793_v59  ;;  %7841 = vmatprep.subr.bf16.mxu0 %v8550_v62  ;;  %v952_v5 = vld [vmem:[#allocation2 + $0x20] sm:$0x1]  ;;  %v8551_v6 = vld [vmem:[#allocation11 + $0xd8] sm:$0xff]   ;;  %v8552_v11 = vld [vmem:[#allocation11 + $0xe0] sm:$0xff]  }
  0xe5   : > { %7842 = vmatpush3.bf16.msra.mxu0 %v8550_v62  ;;  %v949_v10 = vld [vmem:[#allocation2 + $0x14] sm:$0x1]  ;;  %v902_v13 = vld [vmem:[#allocation2 + $0x30] sm:$0x1]  ;;  %v899_v15 = vld [vmem:[#allocation2 + $0x24] sm:$0x1]  ;;  %p8941_p8 = pneg %p8940_p1 }
  0xe6   : > { %7614 = vmatpush3.bf16.msra.mxu1 %v9441_v7  ;;  %7843 = vmatprep.subr.bf16.mxu0 %v8551_v6  ;;  %v903_v14 = vsel %vm9520_vm3, 0, %v902_v13  ;;  %v900_v16 = vsel %vm9520_vm3, 0, %v899_v15  ;;  %v8554_v21 = vld [vmem:[#allocation11 + $0xf0] sm:$0xff]   ;;  %v905_v23 = vld [vmem:[#allocation2 + $0x3c] sm:$0x1]  ;;  %v8555_v26 = vld [vmem:[#allocation11 + $0xf8] sm:$0xff]  }
  0xe7   : > { %7615 = vmatprep.subr.bf16.mxu1 %v9445_v8  ;;  %904 = vst [vmem:[#allocation2 + $0x30] sm:$0x1] %v903_v14  ;;  %901 = vst [vmem:[#allocation2 + $0x24] sm:$0x1] %v900_v16  ;;  %v961_v28 = vld [vmem:[#allocation2 + $0x44] sm:$0x1] }
  0xe8   : > { %v962_v29 = vsel %vm9530_vm5, 0, %v961_v28  ;;  %v911_v32 = vld [vmem:[#allocation2 + $0x54] sm:$0x1]  ;;  %v970_v34 = vld [vmem:[#allocation2 + $0x68] sm:$0x1]  ;;  %v9568_v41 = vld [vmem:[#allocation11 + $0x100] sm:$0xff]  }
  0xe9   : > { %7844 = vmatpush3.bf16.msra.mxu0 %v8551_v6  ;;  %963 = vst [vmem:[#allocation2 + $0x44] sm:$0x1] %v962_v29  ;;  %v912_v33 = vsel %vm9520_vm3, 0, %v911_v32  ;;  %v971_v35 = vsel %vm9530_vm5, 0, %v970_v34  ;;  %v967_v39 = vld [vmem:[#allocation2 + $0x5c] sm:$0x1]  ;;  %vm9617_vm8 = vmand %vm1028_vm6, %vm944_vm4 }
  0xea   : > { %7616 = vmatpush3.bf16.msra.mxu1 %v9445_v8  ;;  %7845 = vmatprep.subr.bf16.mxu0 %v8552_v11  ;;  %913 = vst [vmem:[#allocation2 + $0x54] sm:$0x1] %v912_v33  ;;  %972 = vst [vmem:[#allocation2 + $0x68] sm:$0x1] %v971_v35  ;;  %v968_v40 = vsel %vm9530_vm5, 0, %v967_v39  ;;  %v8574_v14 = vld [vmem:[#allocation11 + $0x40] sm:$0xff]  }
  0xeb   : > { %7617 = vmatprep.subr.bf16.mxu1 %v9448_v9  ;;  %969 = vst [vmem:[#allocation2 + $0x5c] sm:$0x1] %v968_v40  ;;  %v917_v44 = vld [vmem:[#allocation2 + $0x6c] sm:$0x1]  ;;  %v976_v46 = vld [vmem:[#allocation2 + $0x80] sm:$0x1]  ;;  %vm9624_vm9 = vmor %vm888_vm2, %vm1006_vm7 }
  0xec   : > { %v918_v45 = vsel %vm9520_vm3, 0, %v917_v44  ;;  %v977_v47 = vsel %vm9530_vm5, 0, %v976_v46  ;;  %v926_v50 = vld [vmem:[#allocation2 + $0x90] sm:$0x1]  ;;  %v923_v52 = vld [vmem:[#allocation2 + $0x84] sm:$0x1]  ;;  %vm9791_vm12 = vmor %vm1664_vm10, %vm1665_vm11 }
  0xed   : > { %7846 = vmatpush3.bf16.msra.mxu0 %v8552_v11  ;;  %919 = vst [vmem:[#allocation2 + $0x6c] sm:$0x1] %v918_v45  ;;  %978 = vst [vmem:[#allocation2 + $0x80] sm:$0x1] %v977_v47  ;;  %v927_v51 = vsel %vm9520_vm3, 0, %v926_v50  ;;  %v924_v53 = vsel %vm9520_vm3, 0, %v923_v52 }
  0xee   : > { %7618 = vmatpush3.bf16.msra.mxu1 %v9448_v9  ;;  %928 = vst [vmem:[#allocation2 + $0x90] sm:$0x1] %v927_v51  ;;  %925 = vst [vmem:[#allocation2 + $0x84] sm:$0x1] %v924_v53  ;;  %v979_v56 = vld [vmem:[#allocation2 + $0x8c] sm:$0x1] }
  0xef   : > { %7619 = vmatprep.subr.bf16.mxu1 %v9451_v12  ;;  %v980_v57 = vsel %vm9530_vm5, 0, %v979_v56  ;;  %v929_v60 = vld [vmem:[#allocation2 + $0x9c] sm:$0x1]  ;;  %v988_v62 = vld [vmem:[#allocation2 + $0xb0] sm:$0x1]  ;;  %vm10012_vm15 = vmor %vm2694_vm13, %vm2695_vm14 }
  0xf0   : > { %981 = vst [vmem:[#allocation2 + $0x8c] sm:$0x1] %v980_v57  ;;  %v935_v6 = vld [vmem:[#allocation2 + $0xb4] sm:$0x1]  ;;  %v991_v11 = vld [vmem:[#allocation2 + $0xbc] sm:$0x1] }
  0xf1   : > { %v992_v13 = vsel %vm9530_vm5, 0, %v991_v11  ;;  %v890_v15 = vld [vmem:[#allocation2] sm:$0x1] }
  0xf2   : > { %7620 = vmatpush3.bf16.msra.mxu1 %v9451_v12  ;;  %993 = vst [vmem:[#allocation2 + $0xbc] sm:$0x1] %v992_v13  ;;  %v891_v16 = vsel %vm9520_vm3, 0, %v890_v15 }
  0xf3   : > { %7653 = vmatprep.subr.bf16.mxu1 %v9044_v19  ;;  %892 = vst [vmem:[#allocation2] sm:$0x1] %v891_v16 }
  0xf5   : > { %7622 = vmatmul.mubr.bf16.vlgmr.msra.gmra.mrb[0].mxu1 %v557_v17  ;;  %v958_v17 = vld [vmem:[#allocation2 + $0x38] sm:$0x1] }
  0xf6   : > { %7625 = vmatprep.mubr.bf16.mxu1 %v558_v18  ;;  %7654 = vmatpush3.bf16.msra.mxu1 %v9424_v0  ;;  %v8553_v18 = vld [vmem:[#allocation11 + $0xe8] sm:$0xff]  }
  0xf7   : > { %7655 = vmatprep.subr.bf16.mxu1 %v9044_v19  ;;  %7847 = vmatprep.subr.bf16.mxu0 %v8553_v18 }
  0xf8   : > { %7848 = vmatpush3.bf16.msra.mxu0 %v8553_v18  ;;  %v946_v18 = vld [vmem:[#allocation2 + $0x8] sm:$0x1] }
  0xf9   : > { %7849 = vmatprep.subr.bf16.mxu0 %v8554_v21 }
  0xfa   : > { %7656 = vmatpush3.bf16.msra.mxu1 %v9426_v1 }
  0xfb   : > { %7657 = vmatprep.subr.bf16.mxu1 %v9044_v19 }
  0xfc   : > { %7850 = vmatpush3.bf16.msra.mxu0 %v8554_v21  ;;  %v8584_v21 = vld [vmem:[#allocation11 + $0x60] sm:$0xff]  }
  0xfd   : > { %7626 = vmatmul.mubr.bf16.gmra.mrb[4].mxu1 %v559_v24  ;;  %v906_v24 = vsel %vm9520_vm3, 0, %v905_v23  ;;  %7851 = vmatprep.subr.bf16.mxu0 %v8555_v26  ;;  %v8588_v23 = vld [vmem:[#allocation11 + $0x78] sm:$0xff]  }
  0xfe   : > { %7629 = vmatprep.mubr.bf16.mxu1 %v560_v25  ;;  %7658 = vmatpush3.bf16.msra.mxu1 %v9431_v2  ;;  %v964_v25 = vld [vmem:[#allocation2 + $0x50] sm:$0x1]  ;;  %907 = vst [vmem:[#allocation2 + $0x3c] sm:$0x1] %v906_v24  ;;  %v9610_v24 = vld [vmem:[%s11250_s4] ss:$0 sm:$0xff] }
  0xff   : > { %7659 = vmatprep.subr.bf16.mxu1 %v9044_v19  ;;  %v965_v27 = vsel %vm9530_vm5, 0, %v964_v25 }
 0x100   : > { %966 = vst [vmem:[#allocation2 + $0x50] sm:$0x1] %v965_v27  ;;  %7852 = vmatpush3.bf16.msra.mxu0 %v8555_v26 }
 0x101   : > { %7885 = vmatprep.subr.bf16.mxu0 %v9568_v41 }
 0x102   : > { %7660 = vmatpush3.bf16.msra.mxu1 %v9435_v3 }
 0x103   : > { %7661 = vmatprep.subr.bf16.mxu1 %v9044_v19 }
 0x105   : > { %7630 = vmatmul.mubr.bf16.gmra.mrb[8].mxu1 %v561_v30  ;;  %v914_v30 = vld [vmem:[#allocation2 + $0x60] sm:$0x1] }
 0x106   : > { %7633 = vmatprep.mubr.bf16.mxu1 %v562_v31  ;;  %7662 = vmatpush3.bf16.msra.mxu1 %v9441_v7  ;;  %v915_v31 = vsel %vm9520_vm3, 0, %v914_v30 }
 0x107   : > { %7663 = vmatprep.subr.bf16.mxu1 %v9044_v19  ;;  %916 = vst [vmem:[#allocation2 + $0x60] sm:$0x1] %v915_v31 }
 0x10a   : > { %7664 = vmatpush3.bf16.msra.mxu1 %v9445_v8 }
 0x10b   : > { %7665 = vmatprep.subr.bf16.mxu1 %v9044_v19 }
 0x10d   : > { %7634 = vmatmul.mubr.bf16.gmra.mrb[12].mxu1 %v563_v36  ;;  %v840_v36 = vld [vmem:[%s9414_s30] sm:$0xff] }
 0x10e   : > { %7637 = vmatprep.mubr.bf16.mxu1 %v564_v37  ;;  %7666 = vmatpush3.bf16.msra.mxu1 %v9448_v9  ;;  %v841_v37 = vld [vmem:[%s9414_s30 + $0x8] sm:$0xff] }
 0x10f   : > { %7667 = vmatprep.subr.bf16.mxu1 %v9044_v19  ;;  %v842_v38 = vpack.c.bf16 %v841_v37, %v840_v36 }
 0x112   : > { %7668 = vmatpush3.bf16.msra.mxu1 %v9451_v12 }
 0x113   : > { %7673 = vmatprep.subr.bf16.mxu1 %v9044_v19 }
 0x115   : > { %7638 = vmatmul.mubr.bf16.gmra.mrb[16].mxu1 %v565_v42  ;;  %v920_v42 = vld [vmem:[#allocation2 + $0x78] sm:$0x1] }
 0x116   : > { %7641 = vmatprep.mubr.bf16.mxu1 %v566_v43  ;;  %v921_v43 = vsel %vm9520_vm3, 0, %v920_v42 }
 0x117   : > { %922 = vst [vmem:[#allocation2 + $0x78] sm:$0x1] %v921_v43 }
 0x11d   : > { %7642 = vmatmul.mubr.bf16.gmra.mrb[20].mxu1 %v567_v48  ;;  %v973_v48 = vld [vmem:[#allocation2 + $0x74] sm:$0x1] }
 0x11e   : > { %7645 = vmatprep.mubr.bf16.mxu1 %v568_v49  ;;  %v974_v49 = vsel %vm9530_vm5, 0, %v973_v48 }
 0x11f   : > { %975 = vst [vmem:[#allocation2 + $0x74] sm:$0x1] %v974_v49 }
 0x125   : > { %7646 = vmatmul.mubr.bf16.gmra.mrb[24].mxu1 %v569_v54  ;;  %v982_v54 = vld [vmem:[#allocation2 + $0x98] sm:$0x1] }
 0x126   : > { %7649 = vmatprep.mubr.bf16.mxu1 %v570_v55  ;;  %v983_v55 = vsel %vm9530_vm5, 0, %v982_v54 }
 0x127   : > { %984 = vst [vmem:[#allocation2 + $0x98] sm:$0x1] %v983_v55 }
 0x12d   : > { %7650 = vmatmul.mubr.bf16.gmra.mrb[28].mxu1 %v571_v58  ;;  %v932_v58 = vld [vmem:[#allocation2 + $0xa8] sm:$0x1] }
 0x12e   : > { %7669 = vmatprep.mubr.msk.bf16.mxu1 %vm9045_vm0, %v9044_v19  ;;  %v933_v59 = vsel %vm9520_vm3, 0, %v932_v58 }
 0x12f   : > { %934 = vst [vmem:[#allocation2 + $0xa8] sm:$0x1] %v933_v59 }
 0x135   : > { %7670 = vmatmul.mubr.bf16.vlgmr.msra.gmra.mrb[32].mxu1 %v795_v61  ;;  %v930_v61 = vsel %vm9520_vm3, 0, %v929_v60 }
 0x136   : > { %7674 = vmatpush3.bf16.msra.mxu1 %v9424_v0  ;;  %7689 = vmatprep.mubr.msk.bf16.mxu1 %vm9045_vm0, %v9044_v19  ;;  %v896_v0 = vld [vmem:[#allocation2 + $0x18] sm:$0x1]  ;;  %931 = vst [vmem:[#allocation2 + $0x9c] sm:$0x1] %v930_v61 }
 0x137   : > { %7675 = vmatprep.subr.bf16.mxu1 %v9044_v19 }
 0x13a   : > { %7676 = vmatpush3.bf16.msra.mxu1 %v9426_v1  ;;  %v897_v1 = vsel %vm9520_vm3, 0, %v896_v0  ;;  %v989_v0 = vsel %vm9530_vm5, 0, %v988_v62 }
 0x13b   : > { %7677 = vmatprep.subr.bf16.mxu1 %v9044_v19  ;;  %898 = vst [vmem:[#allocation2 + $0x18] sm:$0x1] %v897_v1  ;;  %990 = vst [vmem:[#allocation2 + $0xb0] sm:$0x1] %v989_v0  ;;  %v985_v1 = vld [vmem:[#allocation2 + $0xa4] sm:$0x1] }
 0x13e   : > { %7678 = vmatpush3.bf16.msra.mxu1 %v9431_v2  ;;  %v893_v2 = vld [vmem:[#allocation2 + $0xc] sm:$0x1] }
 0x13f   : > { %7679 = vmatprep.subr.bf16.mxu1 %v9044_v19 }
 0x142   : > { %7680 = vmatpush3.bf16.msra.mxu1 %v9435_v3  ;;  %v894_v3 = vsel %vm9520_vm3, 0, %v893_v2  ;;  %v986_v2 = vsel %vm9530_vm5, 0, %v985_v1  ;;  %v1461_v42 = vld [vmem:[#allocation2 + $0x18] sm:$0xf] }
 0x143   : > { %7681 = vmatprep.subr.bf16.mxu1 %v9044_v19  ;;  %895 = vst [vmem:[#allocation2 + $0xc] sm:$0x1] %v894_v3  ;;  %987 = vst [vmem:[#allocation2 + $0xa4] sm:$0x1] %v986_v2  ;;  %v938_v3 = vld [vmem:[#allocation2 + $0xc0] sm:$0x1] }
 0x146   : > { %7682 = vmatpush3.bf16.msra.mxu1 %v9441_v7  ;;  %v953_v7 = vsel %vm9530_vm5, 0, %v952_v5  ;;  %v939_v5 = vsel %vm9520_vm3, 0, %v938_v3 }
 0x147   : > { %7683 = vmatprep.subr.bf16.mxu1 %v9044_v19  ;;  %954 = vst [vmem:[#allocation2 + $0x20] sm:$0x1] %v953_v7  ;;  %940 = vst [vmem:[#allocation2 + $0xc0] sm:$0x1] %v939_v5  ;;  %v936_v7 = vsel %vm9520_vm3, 0, %v935_v6 }
 0x148   : > { %937 = vst [vmem:[#allocation2 + $0xb4] sm:$0x1] %v936_v7 }
 0x14a   : > { %7684 = vmatpush3.bf16.msra.mxu1 %v9445_v8  ;;  %v950_v8 = vsel %vm9530_vm5, 0, %v949_v10  ;;  %v994_v10 = vld [vmem:[#allocation2 + $0xc8] sm:$0x1]  ;;  %v1454_v53 = vld [vmem:[#allocation2 + $0xc] sm:$0xf] }
 0x14b   : > { %7685 = vmatprep.subr.bf16.mxu1 %v9044_v19  ;;  %951 = vst [vmem:[#allocation2 + $0x14] sm:$0x1] %v950_v8  ;;  %v995_v8 = vsel %vm9530_vm5, 0, %v994_v10 }
 0x14c   : > { %996 = vst [vmem:[#allocation2 + $0xc8] sm:$0x1] %v995_v8 }
 0x14e   : > { %7686 = vmatpush3.bf16.msra.mxu1 %v9448_v9  ;;  %v959_v9 = vsel %vm9530_vm5, 0, %v958_v17  ;;  %v8575_v17 = vld [vmem:[#allocation11 + $0x48] sm:$0xff]  }
 0x14f   : > { %7687 = vmatprep.subr.bf16.mxu1 %v9044_v19  ;;  %v955_v19 = vld [vmem:[#allocation2 + $0x2c] sm:$0x1]  ;;  %960 = vst [vmem:[#allocation2 + $0x38] sm:$0x1] %v959_v9  ;;  %v947_v9 = vsel %vm9530_vm5, 0, %v946_v18 }
 0x150   : > { %v956_v20 = vsel %vm9530_vm5, 0, %v955_v19  ;;  %948 = vst [vmem:[#allocation2 + $0x8] sm:$0x1] %v947_v9  ;;  %v8579_v19 = vld [vmem:[#allocation11 + $0x50] sm:$0xff]   ;;  %v1465_v60 = vld [vmem:[#allocation2 + $0x20] sm:$0x1] }
 0x151   : > { %957 = vst [vmem:[#allocation2 + $0x2c] sm:$0x1] %v956_v20  ;;  %v8580_v20 = vld [vmem:[#allocation11 + $0x58] sm:$0xff]  }
 0x152   : > { %7688 = vmatpush3.bf16.msra.mxu1 %v9451_v12  ;;  %v908_v12 = vld [vmem:[#allocation2 + $0x48] sm:$0x1]  ;;  %v1458_v5 = vld [vmem:[#allocation2 + $0x14] sm:$0x1] }
 0x153   : > { %v909_v22 = vsel %vm9520_vm3, 0, %v908_v12  ;;  %7693 = vmatprep.subr.bf16.mxu1 %v8574_v14  ;;  %v8585_v12 = vld [vmem:[#allocation11 + $0x68] sm:$0xff]  }
 0x154   : > { %910 = vst [vmem:[#allocation2 + $0x48] sm:$0x1] %v909_v22  ;;  %v8587_v22 = vld [vmem:[#allocation11 + $0x70] sm:$0xff]  }
 0x155   : > { %7690 = vmatmul.mubr.bf16.vlgmr.msra.gmra.mrb[36].mxu1 %v842_v38 }
 0x156   : > { %7694 = vmatpush3.bf16.msra.mxu1 %v8574_v14 }
 0x157   : > { %7695 = vmatprep.subr.bf16.mxu1 %v8575_v17 }
 0x15a   : > { %7696 = vmatpush3.bf16.msra.mxu1 %v8575_v17 }
 0x15b   : > { %7697 = vmatprep.subr.bf16.mxu1 %v8579_v19 }
 0x15e   : > { %7698 = vmatpush3.bf16.msra.mxu1 %v8579_v19 }
 0x15f   : > { %7699 = vmatprep.subr.bf16.mxu1 %v8580_v20 }
 0x162   : > { %7700 = vmatpush3.bf16.msra.mxu1 %v8580_v20 }
 0x163   : > { %7701 = vmatprep.subr.bf16.mxu1 %v8584_v21 }
 0x166   : > { %7702 = vmatpush3.bf16.msra.mxu1 %v8584_v21 }
 0x167   : > { %7703 = vmatprep.subr.bf16.mxu1 %v8585_v12 }
 0x16a   : > { %7704 = vmatpush3.bf16.msra.mxu1 %v8585_v12 }
 0x16b   : > { %7705 = vmatprep.subr.bf16.mxu1 %v8587_v22 }
 0x16e   : > { %7706 = vmatpush3.bf16.msra.mxu1 %v8587_v22  ;;  %v1475_v22 = vld [vmem:[#allocation2 + $0x30] sm:$0xf] }
 0x16f   : > { %7707 = vmatprep.subr.bf16.mxu1 %v8588_v23 }
 0x172   : > { %7708 = vmatpush3.bf16.msra.mxu1 %v8588_v23 }
 0x1c8   : > { %v7623_v25 = vpop.f32.mrb[0].mxu1 }
 0x1c9   : > { %v669_v26 = vadd.f32 %v7623_v25, %v9610_v24  ;;  %v660_v27 = vpop.f32.mrb[1].mxu1 }
 0x1ca   : > { %v661_v28 = vadd.f32 %v9610_v24, %v660_v27  ;;  %v7624_v29 = vpop.f32.mrb[2].mxu1 }
 0x1cb   : > { %v7289_v30 = vpack.c.bf16 %v669_v26, %v669_v26  ;;  %v672_v31 = vadd.f32 %v7624_v29, %v9610_v24  ;;  %v663_v32 = vpop.f32.mrb[3].mxu1  ;;  %v1468_v29 = vld [vmem:[#allocation2 + $0x24] sm:$0xf] }
 0x1cc   : > { %v7287_v33 = vpack.c.bf16 %v661_v28, %v661_v28  ;;  %v664_v34 = vadd.f32 %v9610_v24, %v663_v32 }
 0x1cd   : > { %v1151_v35 = vshrl.u32 %v7289_v30, 16  ;;  %v7290_v36 = vpack.c.bf16 %v672_v31, %v672_v31  ;;  %v1154_v40 = vshll.u32 %v7289_v30, 16 }
 0x1ce   : > { %v1134_v37 = vshrl.u32 %v7287_v33, 16  ;;  %v7288_v38 = vpack.c.bf16 %v664_v34, %v664_v34  ;;  %v1137_v43 = vshll.u32 %v7287_v33, 16 }
 0x1cf   : > { %v1153_v39 = vrot.slane %v1151_v35, 7  ;;  %v1159_v44 = vshrl.u32 %v7290_v36, 16  ;;  %v1162_v47 = vshll.u32 %v7290_v36, 16 }
 0x1d0   : > { %v1136_v46 = vrot.slane %v1134_v37, 7  ;;  %v1142_v48 = vshrl.u32 %v7288_v38, 16  ;;  %v1145_v49 = vshll.u32 %v7288_v38, 16  ;;  %v7627_v50 = vpop.f32.mrb[4].mxu1 }
 0x1d1   : > { %v1156_v51 = vor.u32 %v1154_v40, %v1153_v39  ;;  %v1157_v52 = vrot.slane %v1153_v39, 4  ;;  %v1161_v54 = vrot.slane %v1159_v44, 7  ;;  %v685_v55 = vadd.f32 %v7627_v50, %v9610_v24  ;;  %v676_v56 = vpop.f32.mrb[5].mxu1 }
 0x1d2   : > { %v1139_v57 = vor.u32 %v1137_v43, %v1136_v46  ;;  %v1140_v58 = vrot.slane %v1136_v46, 4  ;;  %v1144_v61 = vrot.slane %v1142_v48, 7  ;;  %v677_v62 = vadd.f32 %v9610_v24, %v676_v56  ;;  %v7628_v0 = vpop.f32.mrb[6].mxu1  ;;  %v1479_v46 = vld [vmem:[#allocation2 + $0x38] sm:$0x1] }
 0x1d3   : > { %v1462_v1 = vsel %vm9617_vm8, %v1156_v51, %v1461_v42  ;;  %v1164_v2 = vor.u32 %v1162_v47, %v1161_v54  ;;  %v1166_v3 = vrot.slane %v1161_v54, 4  ;;  %v7293_v6 = vpack.c.bf16 %v685_v55, %v685_v55  ;;  %v679_v7 = vpop.f32.mrb[7].mxu1 }
 0x1d4   : > { %1463 = vst [vmem:[#allocation2 + $0x18] sm:$0xf] %v1462_v1  ;;  %v1455_v10 = vsel %vm9617_vm8, %v1139_v57, %v1454_v53  ;;  %v1147_v8 = vor.u32 %v1145_v49, %v1144_v61  ;;  %v1149_v11 = vrot.slane %v1144_v61, 4  ;;  %v7291_v13 = vpack.c.bf16 %v677_v62, %v677_v62 }
 0x1d5   : > { %1456 = vst [vmem:[#allocation2 + $0xc] sm:$0xf] %v1455_v10  ;;  %v1165_v14 = vsel %vm9624_vm9, %v1157_v52, %v1164_v2  ;;  %v1466_v15 = vsel %vm9520_vm3, %v1166_v3, %v1465_v60  ;;  %v1185_v16 = vshrl.u32 %v7293_v6, 16  ;;  %v1188_v20 = vshll.u32 %v7293_v6, 16  ;;  %v1472_v52 = vld [vmem:[#allocation2 + $0x2c] sm:$0x1] }
 0x1d6   : > { %1464 = vst [vmem:[#allocation2 + $0x1c] sm:$0xf] %v1165_v14  ;;  %1467 = vst [vmem:[#allocation2 + $0x20] sm:$0x1] %v1466_v15  ;;  %v1148_v17 = vsel %vm9624_vm9, %v1140_v58, %v1147_v8  ;;  %v1459_v18 = vsel %vm9520_vm3, %v1149_v11, %v1458_v5  ;;  %v1168_v9 = vshrl.u32 %v7291_v13, 16  ;;  %v688_v21 = vadd.f32 %v7628_v0, %v9610_v24  ;;  %v8560_v8 = vld [vmem:[#allocation11 + $0x108] sm:$0xff]  }
 0x1d7   : > { %1457 = vst [vmem:[#allocation2 + $0x10] sm:$0xf] %v1148_v17  ;;  %1460 = vst [vmem:[#allocation2 + $0x14] sm:$0x1] %v1459_v18  ;;  %v1187_v19 = vrot.slane %v1185_v16, 7  ;;  %v680_v12 = vadd.f32 %v9610_v24, %v679_v7  ;;  %v1171_v25 = vshll.u32 %v7291_v13, 16 }
 0x1d8   : > { %v1170_v23 = vrot.slane %v1168_v9, 7  ;;  %v7631_v26 = vpop.f32.mrb[8].mxu1  ;;  %v7294_v30 = vpack.c.bf16 %v688_v21, %v688_v21  ;;  %v1489_v16 = vld [vmem:[#allocation2 + $0x48] sm:$0xf]  ;;  %v1482_v17 = vld [vmem:[#allocation2 + $0x3c] sm:$0xf] }
 0x1d9   : > { %v1190_v27 = vor.u32 %v1188_v20, %v1187_v19  ;;  %v1191_v28 = vrot.slane %v1187_v19, 4  ;;  %v7292_v31 = vpack.c.bf16 %v680_v12, %v680_v12  ;;  %v692_v32 = vpop.f32.mrb[9].mxu1  ;;  %v701_v35 = vadd.f32 %v7631_v26, %v9610_v24 }
 0x1da   : > { %v1173_v33 = vor.u32 %v1171_v25, %v1170_v23  ;;  %v1174_v34 = vrot.slane %v1170_v23, 4  ;;  %v693_v36 = vadd.f32 %v9610_v24, %v692_v32  ;;  %v7632_v37 = vpop.f32.mrb[10].mxu1  ;;  %v1193_v39 = vshrl.u32 %v7294_v30, 16 }
 0x1db   : > { %v1476_v38 = vsel %vm9617_vm8, %v1190_v27, %v1475_v22  ;;  %v1196_v40 = vshll.u32 %v7294_v30, 16  ;;  %v1176_v42 = vshrl.u32 %v7292_v31, 16  ;;  %v695_v43 = vpop.f32.mrb[11].mxu1  ;;  %v1179_v47 = vshll.u32 %v7292_v31, 16 }
 0x1dc   : > { %1477 = vst [vmem:[#allocation2 + $0x30] sm:$0xf] %v1476_v38  ;;  %v1469_v44 = vsel %vm9617_vm8, %v1173_v33, %v1468_v29  ;;  %v7297_v48 = vpack.c.bf16 %v701_v35, %v701_v35  ;;  %v7295_v49 = vpack.c.bf16 %v693_v36, %v693_v36  ;;  %v1195_v50 = vrot.slane %v1193_v39, 7  ;;  %v9667_v22 = vld [vmem:[#allocation2 + $0xc] sm:$0xf] }
 0x1dd   : > { %1470 = vst [vmem:[#allocation2 + $0x24] sm:$0xf] %v1469_v44  ;;  %v1178_v51 = vrot.slane %v1176_v42, 7  ;;  %v704_v53 = vadd.f32 %v7632_v37, %v9610_v24  ;;  %v696_v54 = vadd.f32 %v9610_v24, %v695_v43  ;;  %v8558_v10 = vld [vmem:[#allocation2 + $0x18] sm:$0xff]   ;;  %v8563_v33 = vld [vmem:[#allocation11 + $0x110] sm:$0xff]   ;;  %v3566_v42 = vshrl.u32 %v9667_v22, 16 }
 0x1de   : > { %v1219_v55 = vshrl.u32 %v7297_v48, 16  ;;  %v1222_v56 = vshll.u32 %v7297_v48, 16  ;;  %v1202_v57 = vshrl.u32 %v7295_v49, 16  ;;  %v1205_v58 = vshll.u32 %v7295_v49, 16  ;;  %v8556_v1 = vld [vmem:[#allocation2 + $0xc] sm:$0xff]  }
 0x1df   : > { %v1198_v60 = vor.u32 %v1196_v40, %v1195_v50  ;;  %v1200_v61 = vrot.slane %v1195_v50, 4  ;;  %v1181_v62 = vor.u32 %v1179_v47, %v1178_v51  ;;  %v1183_v0 = vrot.slane %v1178_v51, 4  ;;  %7853 = vmatprep.mubr.bf16.mxu0 %v8556_v1  ;;  %v1493_v37 = vld [vmem:[#allocation2 + $0x50] sm:$0x1]  ;;  %v1486_v38 = vld [vmem:[#allocation2 + $0x44] sm:$0x1] }
 0x1e0   : > { %v9651_v2 = vrot.slane %v1219_v55, 7  ;;  %v9653_v3 = vrot.slane %v1202_v57, 7  ;;  %v7298_v5 = vpack.c.bf16 %v704_v53, %v704_v53  ;;  %v7296_v6 = vpack.c.bf16 %v696_v54, %v696_v54  ;;  %v7635_v7 = vpop.f32.mrb[12].mxu1  ;;  %7854 = vmatmul.mubr.bf16.vlgmr.msra.gmra.mrb[0].mxu0 %v8558_v10  ;;  %v8566_v54 = vld [vmem:[#allocation11 + $0x118] sm:$0xff]   ;;  %v2647_v59 = vld [vmem:[#allocation2 + $0xc] sm:$0xe] }
 0x1e1   : > { %v1199_v11 = vsel %vm9624_vm9, %v1191_v28, %v1198_v60  ;;  %v1480_v13 = vsel %vm9520_vm3, %v1200_v61, %v1479_v46  ;;  %v1182_v14 = vsel %vm9624_vm9, %v1174_v34, %v1181_v62  ;;  %v1473_v15 = vsel %vm9520_vm3, %v1183_v0, %v1472_v52  ;;  %v708_v18 = vpop.f32.mrb[13].mxu1  ;;  %7886 = vmatpush3.bf16.msra.mxu0 %v9568_v41  ;;  %v1503_v0 = vld [vmem:[#allocation2 + $0x60] sm:$0xf] }
 0x1e2   : > { %1478 = vst [vmem:[#allocation2 + $0x34] sm:$0xf] %v1199_v11  ;;  %1481 = vst [vmem:[#allocation2 + $0x38] sm:$0x1] %v1480_v13  ;;  %v1224_v9 = vor.u32 %v1222_v56, %v9651_v2  ;;  %v1225_v19 = vrot.slane %v9651_v2, 4  ;;  %v1207_v20 = vor.u32 %v1205_v58, %v9653_v3  ;;  %v1208_v21 = vrot.slane %v9653_v3, 4  ;;  %7887 = vmatprep.subr.bf16.mxu0 %v8560_v8 }
 0x1e3   : > { %1471 = vst [vmem:[#allocation2 + $0x28] sm:$0xf] %v1182_v14  ;;  %1474 = vst [vmem:[#allocation2 + $0x2c] sm:$0x1] %v1473_v15  ;;  %v7636_v12 = vpop.f32.mrb[14].mxu1  ;;  %v1227_v23 = vshrl.u32 %v7298_v5, 16  ;;  %v717_v31 = vadd.f32 %v7635_v7, %v9610_v24  ;;  %v709_v32 = vadd.f32 %v9610_v24, %v708_v18 }
 0x1e4   : > { %v1230_v25 = vshll.u32 %v7298_v5, 16  ;;  %v1210_v26 = vshrl.u32 %v7296_v6, 16  ;;  %v1213_v27 = vshll.u32 %v7296_v6, 16  ;;  %v711_v28 = vpop.f32.mrb[15].mxu1  ;;  %v1490_v29 = vsel %vm9617_vm8, %v1224_v9, %v1489_v16  ;;  %v1496_v7 = vld [vmem:[#allocation2 + $0x54] sm:$0xf] }
 0x1e5   : > { %v1483_v30 = vsel %vm9617_vm8, %v1207_v20, %v1482_v17  ;;  %1491 = vst [vmem:[#allocation2 + $0x48] sm:$0xf] %v1490_v29  ;;  %v1229_v34 = vrot.slane %v1227_v23, 7  ;;  %v720_v36 = vadd.f32 %v7636_v12, %v9610_v24  ;;  %v712_v41 = vadd.f32 %v9610_v24, %v711_v28  ;;  %7888 = vmatpush3.bf16.msra.mxu0 %v8560_v8  ;;  %v9691_v14 = vld [vmem:[#allocation11 + $0x120] sm:$0xff]   ;;  %v1507_v29 = vld [vmem:[#allocation2 + $0x68] sm:$0x1] }
 0x1e6   : > { %1484 = vst [vmem:[#allocation2 + $0x3c] sm:$0xf] %v1483_v30  ;;  %v1212_v35 = vrot.slane %v1210_v26, 7  ;;  %v7301_v39 = vpack.c.bf16 %v717_v31, %v717_v31  ;;  %v7299_v40 = vpack.c.bf16 %v709_v32, %v709_v32  ;;  %v3569_v43 = vshll.u32 %v9667_v22, 16  ;;  %7889 = vmatprep.subr.bf16.mxu0 %v8563_v33  ;;  %v1500_v31 = vld [vmem:[#allocation2 + $0x5c] sm:$0x1] }
 0x1e7   : > { %v1232_v44 = vor.u32 %v1230_v25, %v1229_v34  ;;  %v1234_v46 = vrot.slane %v1229_v34, 4  ;;  %v7302_v2 = vpack.c.bf16 %v720_v36, %v720_v36  ;;  %v7300_v3 = vpack.c.bf16 %v712_v41, %v712_v41 }
 0x1e8   : > { %v1215_v47 = vor.u32 %v1213_v27, %v1212_v35  ;;  %v1217_v48 = vrot.slane %v1212_v35, 4  ;;  %v1253_v49 = vshrl.u32 %v7301_v39, 16  ;;  %v1256_v50 = vshll.u32 %v7301_v39, 16  ;;  %v7639_v53 = vpop.f32.mrb[16].mxu1 }
 0x1e9   : > { %v1236_v51 = vshrl.u32 %v7299_v40, 16  ;;  %v1239_v52 = vshll.u32 %v7299_v40, 16  ;;  %v1233_v55 = vsel %vm9624_vm9, %v1225_v19, %v1232_v44  ;;  %v1494_v56 = vsel %vm9520_vm3, %v1234_v46, %v1493_v37  ;;  %v724_v60 = vpop.f32.mrb[17].mxu1  ;;  %v8561_v6 = vld [vmem:[#allocation2 + $0x30] sm:$0xff]   ;;  %7890 = vmatpush3.bf16.msra.mxu0 %v8563_v33  ;;  %v1517_v46 = vld [vmem:[#allocation2 + $0x78] sm:$0xf] }
 0x1ea   : > { %v1216_v57 = vsel %vm9624_vm9, %v1208_v21, %v1215_v47  ;;  %v1487_v58 = vsel %vm9520_vm3, %v1217_v48, %v1486_v38  ;;  %v8559_v61 = vld [vmem:[#allocation2 + $0x24] sm:$0xff]   ;;  %1492 = vst [vmem:[#allocation2 + $0x4c] sm:$0xf] %v1233_v55  ;;  %1495 = vst [vmem:[#allocation2 + $0x50] sm:$0x1] %v1494_v56  ;;  %v1255_v62 = vrot.slane %v1253_v49, 7  ;;  %v733_v10 = vadd.f32 %v7639_v53, %v9610_v24 }
 0x1eb   : > { %1485 = vst [vmem:[#allocation2 + $0x40] sm:$0xf] %v1216_v57  ;;  %1488 = vst [vmem:[#allocation2 + $0x44] sm:$0x1] %v1487_v58  ;;  %v1238_v1 = vrot.slane %v1236_v51, 7  ;;  %v7640_v5 = vpop.f32.mrb[18].mxu1  ;;  %v725_v8 = vadd.f32 %v9610_v24, %v724_v60  ;;  %7857 = vmatprep.mubr.bf16.mxu0 %v8559_v61  ;;  %7891 = vmatprep.subr.bf16.mxu0 %v8566_v54 }
 0x1ec   : > { %v736_v11 = vadd.f32 %v7640_v5, %v9610_v24  ;;  %v727_v13 = vpop.f32.mrb[19].mxu1  ;;  %v9693_v15 = vrot.slane %v3566_v42, 4  ;;  %v1258_v16 = vor.u32 %v1256_v50, %v1255_v62  ;;  %v1259_v17 = vrot.slane %v1255_v62, 4  ;;  %7858 = vmatmul.mubr.bf16.gmra.mrb[4].mxu0 %v8561_v6  ;;  %v8572_v38 = vld [vmem:[#allocation11 + $0x128] sm:$0xff]   ;;  %v1510_v60 = vld [vmem:[#allocation2 + $0x6c] sm:$0xf] }
 0x1ed   : > { %v1241_v18 = vor.u32 %v1239_v52, %v1238_v1  ;;  %v1242_v9 = vrot.slane %v1238_v1, 4  ;;  %v1261_v19 = vshrl.u32 %v7302_v2, 16  ;;  %v1264_v20 = vshll.u32 %v7302_v2, 16  ;;  %7892 = vmatpush3.bf16.msra.mxu0 %v8566_v54  ;;  %v1521_v5 = vld [vmem:[#allocation2 + $0x80] sm:$0x1] }
 0x1ee   : > { %v1244_v21 = vshrl.u32 %v7300_v3, 16  ;;  %v1247_v12 = vshll.u32 %v7300_v3, 16  ;;  %v1504_v23 = vsel %vm9617_vm8, %v1258_v16, %v1503_v0  ;;  %v7305_v26 = vpack.c.bf16 %v733_v10, %v733_v10  ;;  %7893 = vmatprep.subr.bf16.mxu0 %v9691_v14 }
 0x1ef   : > { %v1497_v25 = vsel %vm9617_vm8, %v1241_v18, %v1496_v7  ;;  %v7303_v27 = vpack.c.bf16 %v725_v8, %v725_v8  ;;  %1505 = vst [vmem:[#allocation2 + $0x60] sm:$0xf] %v1504_v23  ;;  %v1263_v28 = vrot.slane %v1261_v19, 7  ;;  %v7306_v32 = vpack.c.bf16 %v736_v11, %v736_v11 }
 0x1f0   : > { %1498 = vst [vmem:[#allocation2 + $0x54] sm:$0xf] %v1497_v25  ;;  %v1246_v30 = vrot.slane %v1244_v21, 7  ;;  %v728_v33 = vadd.f32 %v9610_v24, %v727_v13  ;;  %v1287_v34 = vshrl.u32 %v7305_v26, 16  ;;  %v1290_v35 = vshll.u32 %v7305_v26, 16  ;;  %v7643_v37 = vpop.f32.mrb[20].mxu1 }
 0x1f1   : > { %v1270_v36 = vshrl.u32 %v7303_v27, 16  ;;  %v1273_v41 = vshll.u32 %v7303_v27, 16  ;;  %v1266_v39 = vor.u32 %v1264_v20, %v1263_v28  ;;  %v1268_v40 = vrot.slane %v1263_v28, 4  ;;  %v740_v47 = vpop.f32.mrb[21].mxu1  ;;  %v8564_v54 = vld [vmem:[#allocation2 + $0x48] sm:$0xff]   ;;  %7894 = vmatpush3.bf16.msra.mxu0 %v9691_v14 }
 0x1f2   : > { %v1249_v42 = vor.u32 %v1247_v12, %v1246_v30  ;;  %v1251_v44 = vrot.slane %v1246_v30, 4  ;;  %v8562_v48 = vld [vmem:[#allocation2 + $0x3c] sm:$0xff]   ;;  %v1289_v49 = vrot.slane %v1287_v34, 7  ;;  %v1295_v51 = vshrl.u32 %v7306_v32, 16  ;;  %v7644_v53 = vpop.f32.mrb[22].mxu1  ;;  %7895 = vmatprep.subr.bf16.mxu0 %v8572_v38 }
 0x1f3   : > { %v9701_v50 = vrot.slane %v1270_v36, 7  ;;  %v1298_v52 = vshll.u32 %v7306_v32, 16  ;;  %v1267_v55 = vsel %vm9624_vm9, %v1259_v17, %v1266_v39  ;;  %v1508_v56 = vsel %vm9520_vm3, %v1268_v40, %v1507_v29  ;;  %7861 = vmatprep.mubr.bf16.mxu0 %v8562_v48  ;;  %v743_v61 = vpop.f32.mrb[23].mxu1  ;;  %v8577_v17 = vld [vmem:[#allocation11 + $0x130] sm:$0xff]   ;;  %v1514_v29 = vld [vmem:[#allocation2 + $0x74] sm:$0x1] }
 0x1f4   : > { %v1250_v57 = vsel %vm9624_vm9, %v1242_v9, %v1249_v42  ;;  %v1501_v58 = vsel %vm9520_vm3, %v1251_v44, %v1500_v31  ;;  %1506 = vst [vmem:[#allocation2 + $0x64] sm:$0xf] %v1267_v55  ;;  %1509 = vst [vmem:[#allocation2 + $0x68] sm:$0x1] %v1508_v56  ;;  %v1292_v62 = vor.u32 %v1290_v35, %v1289_v49  ;;  %v1293_v0 = vrot.slane %v1289_v49, 4 }
 0x1f5   : > { %1499 = vst [vmem:[#allocation2 + $0x58] sm:$0xf] %v1250_v57  ;;  %1502 = vst [vmem:[#allocation2 + $0x5c] sm:$0x1] %v1501_v58  ;;  %v1275_v1 = vor.u32 %v1273_v41, %v9701_v50  ;;  %v1276_v2 = vrot.slane %v9701_v50, 4  ;;  %7862 = vmatmul.mubr.bf16.gmra.mrb[8].mxu0 %v8564_v54  ;;  %v1297_v3 = vrot.slane %v1295_v51, 7  ;;  %v7304_v6 = vpack.c.bf16 %v728_v33, %v728_v33 }
 0x1f6   : > { %v749_v7 = vadd.f32 %v7643_v37, %v9610_v24  ;;  %v741_v10 = vadd.f32 %v9610_v24, %v740_v47  ;;  %v1518_v8 = vsel %vm9617_vm8, %v1292_v62, %v1517_v46  ;;  %v752_v13 = vadd.f32 %v7644_v53, %v9610_v24  ;;  %7896 = vmatpush3.bf16.msra.mxu0 %v8572_v38  ;;  %v8582_v41 = vld [vmem:[#allocation11 + $0x138] sm:$0xff]   ;;  %v1524_v42 = vld [vmem:[#allocation2 + $0x84] sm:$0xf]  ;;  %v1535_v54 = vld [vmem:[#allocation2 + $0x98] sm:$0x1] }
 0x1f7   : > { %v1511_v11 = vsel %vm9617_vm8, %v1275_v1, %v1510_v60  ;;  %v744_v16 = vadd.f32 %v9610_v24, %v743_v61  ;;  %1519 = vst [vmem:[#allocation2 + $0x78] sm:$0xf] %v1518_v8  ;;  %v1300_v18 = vor.u32 %v1298_v52, %v1297_v3  ;;  %v1302_v9 = vrot.slane %v1297_v3, 4  ;;  %7897 = vmatprep.subr.bf16.mxu0 %v8577_v17  ;;  %v1531_v40 = vld [vmem:[#allocation2 + $0x90] sm:$0xf]  ;;  %v9735_v58 = vld [vmem:[#allocation11 + $0x140] sm:$0xff]  }
 0x1f8   : > { %1512 = vst [vmem:[#allocation2 + $0x6c] sm:$0xf] %v1511_v11  ;;  %v1278_v19 = vshrl.u32 %v7304_v6, 16  ;;  %v1281_v20 = vshll.u32 %v7304_v6, 16  ;;  %v7309_v21 = vpack.c.bf16 %v749_v7, %v749_v7  ;;  %v7307_v14 = vpack.c.bf16 %v741_v10, %v741_v10  ;;  %v7647_v25 = vpop.f32.mrb[24].mxu1  ;;  %v9737_v6 = vld [vmem:[#allocation11] sm:$0xff]  }
 0x1f9   : > { %v7310_v12 = vpack.c.bf16 %v752_v13, %v752_v13  ;;  %v9722_v23 = vpack.c.bf16 %v744_v16, %v744_v16  ;;  %v1301_v26 = vsel %vm9624_vm9, %v1293_v0, %v1300_v18  ;;  %v1522_v27 = vsel %vm9520_vm3, %v1302_v9, %v1521_v5  ;;  %v756_v31 = vpop.f32.mrb[25].mxu1  ;;  %v1528_v8 = vld [vmem:[#allocation2 + $0x8c] sm:$0x1]  ;;  %7741 = vmatprep.subr.bf16.mxu1 %v9737_v6 }
 0x1fa   : > { %v1280_v28 = vrot.slane %v1278_v19, 7  ;;  %v765_v30 = vadd.f32 %v7647_v25, %v9610_v24  ;;  %1520 = vst [vmem:[#allocation2 + $0x7c] sm:$0xf] %v1301_v26  ;;  %1523 = vst [vmem:[#allocation2 + $0x80] sm:$0x1] %v1522_v27  ;;  %v1321_v32 = vshrl.u32 %v7309_v21, 16  ;;  %7898 = vmatpush3.bf16.msra.mxu0 %v8577_v17  ;;  %v757_v13 = vadd.f32 %v9610_v24, %v756_v31 }
 0x1fb   : > { %v1324_v33 = vshll.u32 %v7309_v21, 16  ;;  %v1304_v34 = vshrl.u32 %v7307_v14, 16  ;;  %v1307_v35 = vshll.u32 %v7307_v14, 16  ;;  %v7648_v36 = vpop.f32.mrb[26].mxu1  ;;  %v1329_v44 = vshrl.u32 %v7310_v12, 16  ;;  %v8567_v56 = vld [vmem:[#allocation2 + $0x60] sm:$0xff]   ;;  %7899 = vmatprep.subr.bf16.mxu0 %v8582_v41 }
 0x1fc   : > { %v1283_v37 = vor.u32 %v1281_v20, %v1280_v28  ;;  %v1285_v39 = vrot.slane %v1280_v28, 4  ;;  %v1332_v46 = vshll.u32 %v7310_v12, 16  ;;  %v8565_v47 = vld [vmem:[#allocation2 + $0x54] sm:$0xff]   ;;  %v1323_v48 = vrot.slane %v1321_v32, 7  ;;  %v759_v57 = vpop.f32.mrb[27].mxu1 }
 0x1fd   : > { %v1306_v49 = vrot.slane %v1304_v34, 7  ;;  %v1312_v38 = vshrl.u32 %v9722_v23, 16  ;;  %v1315_v50 = vshll.u32 %v9722_v23, 16  ;;  %v1331_v53 = vrot.slane %v1329_v44, 7  ;;  %7865 = vmatprep.mubr.bf16.mxu0 %v8565_v47  ;;  %v1545_v28 = vld [vmem:[#allocation2 + $0xa8] sm:$0xf] }
 0x1fe   : > { %v1284_v51 = vsel %vm9624_vm9, %v1276_v2, %v1283_v37  ;;  %v1515_v52 = vsel %vm9520_vm3, %v1285_v39, %v1514_v29  ;;  %v7313_v55 = vpack.c.bf16 %v765_v30, %v765_v30  ;;  %v1326_v60 = vor.u32 %v1324_v33, %v1323_v48  ;;  %7866 = vmatmul.mubr.bf16.gmra.mrb[12].mxu0 %v8567_v56  ;;  %v1542_v56 = vld [vmem:[#allocation2 + $0xa4] sm:$0x1] }
 0x1ff   : > { %1513 = vst [vmem:[#allocation2 + $0x70] sm:$0xf] %v1284_v51  ;;  %1516 = vst [vmem:[#allocation2 + $0x74] sm:$0x1] %v1515_v52  ;;  %v1327_v61 = vrot.slane %v1323_v48, 4  ;;  %v1309_v62 = vor.u32 %v1307_v35, %v1306_v49  ;;  %v1310_v0 = vrot.slane %v1306_v49, 4  ;;  %v1334_v1 = vor.u32 %v1332_v46, %v1331_v53  ;;  %7900 = vmatpush3.bf16.msra.mxu0 %v8582_v41 }
 0x200   : > { %v1336_v2 = vrot.slane %v1331_v53, 4  ;;  %v1314_v3 = vrot.slane %v1312_v38, 7  ;;  %v1355_v5 = vshrl.u32 %v7313_v55, 16  ;;  %v1532_v7 = vsel %vm9617_vm8, %v1326_v60, %v1531_v40  ;;  %v7651_v16 = vpop.f32.mrb[28].mxu1  ;;  %7933 = vmatprep.subr.bf16.mxu0 %v9735_v58  ;;  %v1538_v49 = vld [vmem:[#allocation2 + $0x9c] sm:$0xf] }
 0x201   : > { %v1525_v10 = vsel %vm9617_vm8, %v1309_v62, %v1524_v42  ;;  %v1358_v11 = vshll.u32 %v7313_v55, 16  ;;  %1533 = vst [vmem:[#allocation2 + $0x90] sm:$0xf] %v1532_v7  ;;  %v1335_v17 = vsel %vm9624_vm9, %v1327_v61, %v1334_v1  ;;  %v772_v20 = vpop.f32.mrb[29].mxu1  ;;  %v7311_v14 = vpack.c.bf16 %v757_v13, %v757_v13  ;;  %v8570_v47 = vld [vmem:[#allocation2 + $0x78] sm:$0xff]  }
 0x202   : > { %1526 = vst [vmem:[#allocation2 + $0x84] sm:$0xf] %v1525_v10  ;;  %v1536_v18 = vsel %vm9520_vm3, %v1336_v2, %v1535_v54  ;;  %v1317_v9 = vor.u32 %v1315_v50, %v1314_v3  ;;  %v1319_v19 = vrot.slane %v1314_v3, 4  ;;  %1534 = vst [vmem:[#allocation2 + $0x94] sm:$0xf] %v1335_v17  ;;  %v9749_v21 = vrot.slane %v1355_v5, 7 }
 0x203   : > { %1537 = vst [vmem:[#allocation2 + $0x98] sm:$0x1] %v1536_v18  ;;  %v768_v12 = vadd.f32 %v7648_v36, %v9610_v24  ;;  %v760_v23 = vadd.f32 %v9610_v24, %v759_v57  ;;  %v7652_v25 = vpop.f32.mrb[30].mxu1  ;;  %v781_v29 = vadd.f32 %v7651_v16, %v9610_v24  ;;  %v773_v30 = vadd.f32 %v9610_v24, %v772_v20  ;;  %v1549_v55 = vld [vmem:[#allocation2 + $0xb0] sm:$0x1] }
 0x204   : > { %v1318_v26 = vsel %vm9624_vm9, %v1310_v0, %v1317_v9  ;;  %v1529_v27 = vsel %vm9520_vm3, %v1319_v19, %v1528_v8  ;;  %v775_v31 = vpop.f32.mrb[31].mxu1  ;;  %v1360_v32 = vor.u32 %v1358_v11, %v9749_v21  ;;  %v1361_v33 = vrot.slane %v9749_v21, 4  ;;  %v1559_v1 = vld [vmem:[#allocation2 + $0xc0] sm:$0xf] }
 0x205   : > { %1527 = vst [vmem:[#allocation2 + $0x88] sm:$0xf] %v1318_v26  ;;  %1530 = vst [vmem:[#allocation2 + $0x8c] sm:$0x1] %v1529_v27  ;;  %v1338_v34 = vshrl.u32 %v7311_v14, 16  ;;  %v1341_v35 = vshll.u32 %v7311_v14, 16  ;;  %v7314_v36 = vpack.c.bf16 %v768_v12, %v768_v12  ;;  %v7312_v41 = vpack.c.bf16 %v760_v23, %v760_v23 }
 0x206   : > { %v7317_v37 = vpack.c.bf16 %v781_v29, %v781_v29  ;;  %v7315_v39 = vpack.c.bf16 %v773_v30, %v773_v30  ;;  %v8568_v40 = vld [vmem:[#allocation2 + $0x6c] sm:$0xff]   ;;  %v1546_v42 = vsel %vm9617_vm8, %v1360_v32, %v1545_v28  ;;  %v784_v46 = vadd.f32 %v7652_v25, %v9610_v24  ;;  %v1552_v29 = vld [vmem:[#allocation2 + $0xb4] sm:$0xf] }
 0x207   : > { %v1340_v44 = vrot.slane %v1338_v34, 7  ;;  %v776_v48 = vadd.f32 %v9610_v24, %v775_v31  ;;  %1547 = vst [vmem:[#allocation2 + $0xa8] sm:$0xf] %v1546_v42  ;;  %v1363_v38 = vshrl.u32 %v7314_v36, 16  ;;  %v1366_v50 = vshll.u32 %v7314_v36, 16  ;;  %7869 = vmatprep.mubr.bf16.mxu0 %v8568_v40 }
 0x208   : > { %v1346_v51 = vshrl.u32 %v7312_v41, 16  ;;  %v1349_v52 = vshll.u32 %v7312_v41, 16  ;;  %v1389_v57 = vshrl.u32 %v7317_v37, 16  ;;  %v1392_v60 = vshll.u32 %v7317_v37, 16  ;;  %7870 = vmatmul.mubr.bf16.gmra.mrb[16].mxu0 %v8570_v47  ;;  %v830_v61 = vpop.f32.mrb[32].mxu1 }
 0x209   : > { %v1343_v53 = vor.u32 %v1341_v35, %v1340_v44  ;;  %v1344_v54 = vrot.slane %v1340_v44, 4  ;;  %v1365_v62 = vrot.slane %v1363_v38, 7  ;;  %v1372_v2 = vshrl.u32 %v7315_v39, 16  ;;  %v7671_v5 = vpop.f32.mrb[33].mxu1  ;;  %v3518_v30 = vld [vmem:[#allocation2 + $0x10] sm:$0xf] }
 0x20a   : > { %v1348_v0 = vrot.slane %v1346_v51, 7  ;;  %v1375_v3 = vshll.u32 %v7315_v39, 16  ;;  %v1391_v10 = vrot.slane %v1389_v57, 7  ;;  %v7318_v8 = vpack.c.bf16 %v784_v46, %v784_v46  ;;  %v833_v13 = vpop.f32.mrb[34].mxu1  ;;  %v8573_v35 = vld [vmem:[#allocation2 + $0x90] sm:$0xff]  }
 0x20b   : > { %v1539_v7 = vsel %vm9617_vm8, %v1343_v53, %v1538_v49  ;;  %v7316_v11 = vpack.c.bf16 %v776_v48, %v776_v48  ;;  %v1368_v16 = vor.u32 %v1366_v50, %v1365_v62  ;;  %v1370_v17 = vrot.slane %v1365_v62, 4  ;;  %v7672_v20 = vpop.f32.mrb[35].mxu1  ;;  %v1563_v41 = vld [vmem:[#allocation2 + $0xc8] sm:$0x1] }
 0x20c   : > { %1540 = vst [vmem:[#allocation2 + $0x9c] sm:$0xf] %v1539_v7  ;;  %v1351_v18 = vor.u32 %v1349_v52, %v1348_v0  ;;  %v1353_v9 = vrot.slane %v1348_v0, 4  ;;  %v8571_v19 = vld [vmem:[#allocation2 + $0x84] sm:$0xff]   ;;  %v1394_v21 = vor.u32 %v1392_v60, %v1391_v10  ;;  %v1395_v14 = vrot.slane %v1391_v10, 4 }
 0x20d   : > { %v1374_v12 = vrot.slane %v1372_v2, 7  ;;  %v1397_v23 = vshrl.u32 %v7318_v8, 16  ;;  %v1369_v25 = vsel %vm9624_vm9, %v1361_v33, %v1368_v16  ;;  %v1550_v26 = vsel %vm9520_vm3, %v1370_v17, %v1549_v55  ;;  %7873 = vmatprep.mubr.bf16.mxu0 %v8571_v19  ;;  %v1556_v52 = vld [vmem:[#allocation2 + $0xbc] sm:$0x1]  ;;  %v3519_v60 = vld [vmem:[#allocation2 + $0x14] sm:$0x1] }
 0x20e   : > { %v1352_v27 = vsel %vm9624_vm9, %v1344_v54, %v1351_v18  ;;  %v1543_v28 = vsel %vm9520_vm3, %v1353_v9, %v1542_v56  ;;  %1548 = vst [vmem:[#allocation2 + $0xac] sm:$0xf] %v1369_v25  ;;  %1551 = vst [vmem:[#allocation2 + $0xb0] sm:$0x1] %v1550_v26  ;;  %v1560_v31 = vsel %vm9617_vm8, %v1394_v21, %v1559_v1  ;;  %v1400_v36 = vshll.u32 %v7318_v8, 16 }
 0x20f   : > { %1541 = vst [vmem:[#allocation2 + $0xa0] sm:$0xf] %v1352_v27  ;;  %1544 = vst [vmem:[#allocation2 + $0xa4] sm:$0x1] %v1543_v28  ;;  %v1377_v32 = vor.u32 %v1375_v3, %v1374_v12  ;;  %v1378_v33 = vrot.slane %v1374_v12, 4  ;;  %v1399_v34 = vrot.slane %v1397_v23, 7  ;;  %v831_v40 = vadd.f32 %v9610_v24, %v830_v61 }
 0x210   : > { %1561 = vst [vmem:[#allocation2 + $0xc0] sm:$0xf] %v1560_v31  ;;  %v1380_v37 = vshrl.u32 %v7316_v11, 16  ;;  %v1383_v39 = vshll.u32 %v7316_v11, 16  ;;  %v834_v46 = vadd.f32 %v9610_v24, %v833_v13  ;;  %7874 = vmatmul.mubr.bf16.gmra.mrb[20].mxu0 %v8573_v35  ;;  %v3571_v47 = vrot.slane %v3569_v43, 5 }
 0x211   : > { %v1553_v42 = vsel %vm9617_vm8, %v1377_v32, %v1552_v29  ;;  %v1404_v44 = vrot.slane %v1399_v34, 4  ;;  %v1402_v48 = vor.u32 %v1400_v36, %v1399_v34  ;;  %v838_v38 = vmul.f32 0.0, %v831_v40  ;;  %v3520_v61 = vld [vmem:[#allocation2 + $0x18] sm:$0xf]  ;;  %v3521_v2 = vld [vmem:[#allocation2 + $0x1c] sm:$0xf] }
 0x212   : > { %1554 = vst [vmem:[#allocation2 + $0xb4] sm:$0xf] %v1553_v42  ;;  %v1382_v49 = vrot.slane %v1380_v37, 7  ;;  %v3575_v50 = vshll.u32 %v3518_v30, 16  ;;  %v839_v53 = vmul.f32 0.0, %v834_v46  ;;  %v3572_v54 = vor.u32 %v3571_v47, %v9693_v15 }
 0x213   : > { %v1564_v51 = vsel %vm9520_vm3, %v1404_v44, %v1563_v41  ;;  %v3579_v55 = vshrl.u32 %v3518_v30, 16  ;;  %v1403_v24 = vsel %vm9624_vm9, %v1395_v14, %v1402_v48  ;;  %v7285_v43 = vpack.c.bf16 %v838_v38, %v838_v38  ;;  %v1030_v13 = vld [vmem:[#allocation2] sm:$0xf]  ;;  %v1034_v20 = vld [vmem:[#allocation2 + $0x8] sm:$0x1] }
 0x214   : > { %1565 = vst [vmem:[#allocation2 + $0xc8] sm:$0x1] %v1564_v51  ;;  %v1385_v56 = vor.u32 %v1383_v39, %v1382_v49  ;;  %v1387_v22 = vrot.slane %v1382_v49, 4  ;;  %v11342_v57 = vmov 0  ;;  %1562 = vst [vmem:[#allocation2 + $0xc4] sm:$0xf] %v1403_v24  ;;  %v7286_v62 = vpack.c.bf16 %v839_v53, %v839_v53 }
 0x215   : > { %v11343_v57 = vsel %vm9791_vm12, 4294967295, %v11342_v57  ;;  %v3573_v0 = vrot.slane %v3572_v54, 4  ;;  %v3577_v15 = vrot.slane %v3575_v50, 5  ;;  %v3581_v1 = vrot.slane %v3579_v55, 4  ;;  %v8578_v11 = vld [vmem:[#allocation2 + $0xa8] sm:$0xff]  }
 0x216   : > { %11344 = vst [vmem:[#allocation29_spill] sm:$0xff] %v11343_v57  ;;  %v1386_v3 = vsel %vm9624_vm9, %v1378_v33, %v1385_v56  ;;  %v1557_v5 = vsel %vm9520_vm3, %v1387_v22, %v1556_v52  ;;  %v1009_v7 = vshrl.u32 %v7285_v43, 16  ;;  %v1012_v10 = vshll.u32 %v7285_v43, 16  ;;  %v8576_v8 = vld [vmem:[#allocation2 + $0x9c] sm:$0xff]   ;;  %v3523_v33 = vld [vmem:[#allocation2 + $0x24] sm:$0xf] }
 0x217   : > { %1555 = vst [vmem:[#allocation2 + $0xb8] sm:$0xf] %v1386_v3  ;;  %1558 = vst [vmem:[#allocation2 + $0xbc] sm:$0x1] %v1557_v5  ;;  %v1017_v16 = vshrl.u32 %v7286_v62, 16  ;;  %v1020_v17 = vshll.u32 %v7286_v62, 16  ;;  %v3578_v18 = vsel %vm9791_vm12, %v3573_v0, %v3577_v15  ;;  %v3582_v9 = vor.u32 %v3581_v1, %v3577_v15  ;;  %7877 = vmatprep.mubr.bf16.mxu0 %v8576_v8 }
 0x218   : > { %v1011_v19 = vrot.slane %v1009_v7, 7  ;;  %v3585_v21 = vshll.u32 %v3519_v60, 16  ;;  %v3522_v14 = vld [vmem:[#allocation2 + $0x20] sm:$0x1]  ;;  %v3590_v12 = vshrl.u32 %v3520_v61, 16  ;;  %v3593_v23 = vshll.u32 %v3520_v61, 16  ;;  %7878 = vmatmul.mubr.bf16.gmra.mrb[24].mxu0 %v8578_v11 }
 0x219   : > { %v1019_v25 = vrot.slane %v1017_v16, 7  ;;  %v3583_v26 = vrot.slane %v3582_v9, 4  ;;  %v3599_v27 = vshll.u32 %v3521_v2, 16  ;;  %v3603_v28 = vshrl.u32 %v3521_v2, 16  ;;  %v3524_v37 = vld [vmem:[#allocation2 + $0x28] sm:$0xf] }
 0x21a   : > { %v1014_v29 = vor.u32 %v1012_v10, %v1011_v19  ;;  %v1015_v30 = vrot.slane %v1011_v19, 4  ;;  %v3587_v31 = vrot.slane %v3585_v21, 5  ;;  %v3592_v32 = vrot.slane %v3590_v12, 4  ;;  %v3525_v46 = vld [vmem:[#allocation2 + $0x2c] sm:$0x1]  ;;  %v8628_v57 = vld [vmem:[#allocation11 + $0x1b8] sm:$0xff]  }
 0x21b   : > { %v1022_v34 = vor.u32 %v1020_v17, %v1019_v25  ;;  %v1024_v35 = vrot.slane %v1019_v25, 4  ;;  %v3595_v36 = vrot.slane %v3593_v23, 5  ;;  %v3601_v41 = vrot.slane %v3599_v27, 5  ;;  %v3526_v50 = vld [vmem:[#allocation2 + $0x30] sm:$0xf]  ;;  %v8583_v56 = vld [vmem:[#allocation2 + $0xc0] sm:$0xff]  }
 0x21c   : > { %v1031_v39 = vsel %vm9617_vm8, %v1014_v29, %v1030_v13  ;;  %v3588_v40 = vsel %vm9791_vm12, %v3583_v26, %v3587_v31  ;;  %v3605_v42 = vrot.slane %v3603_v28, 4  ;;  %v3609_v44 = vshll.u32 %v3522_v14, 16  ;;  %v3527_v24 = vld [vmem:[#allocation2 + $0x34] sm:$0xf]  ;;  %v3528_v1 = vld [vmem:[#allocation2 + $0x38] sm:$0x1] }
 0x21d   : > { %1032 = vst [vmem:[#allocation2] sm:$0xf] %v1031_v39  ;;  %v1023_v47 = vsel %vm9624_vm9, %v1015_v30, %v1022_v34  ;;  %v1035_v48 = vsel %vm9520_vm3, %v1024_v35, %v1034_v20  ;;  %v7115_v49 = vcombine.low %v3578_v18, %v3588_v40  ;;  %v3596_v38 = vor.u32 %v3595_v36, %v3592_v32  ;;  %v3529_v8 = vld [vmem:[#allocation2 + $0x3c] sm:$0xf] }
 0x21e   : > { %1033 = vst [vmem:[#allocation2 + $0x4] sm:$0xf] %v1023_v47  ;;  %1036 = vst [vmem:[#allocation2 + $0x8] sm:$0x1] %v1035_v48  ;;  %v8581_v51 = vld [vmem:[#allocation2 + $0xb4] sm:$0xff]   ;;  %v3606_v52 = vor.u32 %v3605_v42, %v3601_v41  ;;  %v3611_v53 = vrot.slane %v3609_v44, 5 }
 0x21f   : > { %v3614_v54 = vshrl.u32 %v3523_v33, 16  ;;  %v3617_v55 = vshll.u32 %v3523_v33, 16  ;;  %v3597_v22 = vrot.slane %v3596_v38, 4  ;;  %v3623_v43 = vshll.u32 %v3524_v37, 16  ;;  %7881 = vmatprep.mubr.bf16.mxu0 %v8581_v51  ;;  %v3530_v48 = vld [vmem:[#allocation2 + $0x40] sm:$0xf] }
 0x220   : > { %v3627_v60 = vshrl.u32 %v3524_v37, 16  ;;  %v3633_v61 = vshll.u32 %v3525_v46, 16  ;;  %v3607_v62 = vrot.slane %v3606_v52, 4  ;;  %v3638_v2 = vshrl.u32 %v3526_v50, 16  ;;  %7882 = vmatmul.mubr.bf16.gmra.mrb[28].mxu0 %v8583_v56  ;;  %v1602_v56 = vld [vmem:[#allocation2 + $0xc] sm:$0xf] }
 0x221   : > { %v3616_v0 = vrot.slane %v3614_v54, 4  ;;  %v3619_v15 = vrot.slane %v3617_v55, 5  ;;  %v3602_v3 = vsel %vm9791_vm12, %v3597_v22, %v3601_v41  ;;  %v3625_v5 = vrot.slane %v3623_v43, 5  ;;  %7901 = vmatprep.mubr.bf16.mxu0 %v7115_v49  ;;  %v8589_v41 = vld [vmem:[#allocation11 + $0x148] sm:$0xff]  }
 0x222   : > { %v3629_v7 = vrot.slane %v3627_v60, 4  ;;  %v3635_v10 = vrot.slane %v3633_v61, 5  ;;  %v3612_v11 = vsel %vm9791_vm12, %v3607_v62, %v3611_v53  ;;  %v3640_v16 = vrot.slane %v3638_v2, 4  ;;  %v3531_v55 = vld [vmem:[#allocation2 + $0x44] sm:$0x1]  ;;  %v8590_v62 = vld [vmem:[#allocation11 + $0x150] sm:$0xff]  }
 0x223   : > { %v3620_v13 = vor.u32 %v3619_v15, %v3616_v0  ;;  %v3641_v17 = vshll.u32 %v3526_v50, 16  ;;  %v7116_v18 = vcombine.low %v3602_v3, %v3612_v11  ;;  %v3647_v19 = vshll.u32 %v3527_v24, 16  ;;  %v1603_v2 = vld [vmem:[#allocation2 + $0x10] sm:$0xf] }
 0x224   : > { %v3630_v9 = vor.u32 %v3629_v7, %v3625_v5  ;;  %v3651_v20 = vshrl.u32 %v3527_v24, 16  ;;  %v3657_v12 = vshll.u32 %v3528_v1, 16  ;;  %v1600_v23 = vld [vmem:[#allocation2] sm:$0xf]  ;;  %v3662_v25 = vshrl.u32 %v3529_v8, 16 }
 0x225   : > { %v3621_v21 = vrot.slane %v3620_v13, 4  ;;  %v3643_v14 = vrot.slane %v3641_v17, 5  ;;  %v3649_v27 = vrot.slane %v3647_v19, 5  ;;  %v1601_v29 = vld [vmem:[#allocation2 + $0x4] sm:$0xf]  ;;  %v1668_v30 = vshrl.u32 %v1600_v23, 16 }
 0x226   : > { %v3631_v26 = vrot.slane %v3630_v9, 4  ;;  %v3653_v28 = vrot.slane %v3651_v20, 4  ;;  %v3659_v33 = vrot.slane %v3657_v12, 5  ;;  %v1648_v34 = vld [vmem:[#allocation2 + $0x8] sm:$0x1]  ;;  %v1671_v35 = vshll.u32 %v1600_v23, 16 }
 0x227   : > { %v3626_v31 = vsel %vm9791_vm12, %v3621_v21, %v3625_v5  ;;  %v3644_v32 = vor.u32 %v3643_v14, %v3640_v16  ;;  %v1670_v39 = vrot.slane %v1668_v30, 4  ;;  %v1677_v40 = vshll.u32 %v1601_v29, 16  ;;  %v1649_v16 = vld [vmem:[#allocation2 + $0x14] sm:$0x1] }
 0x228   : > { %v3636_v36 = vsel %vm9791_vm12, %v3631_v26, %v3635_v10  ;;  %v3654_v37 = vor.u32 %v3653_v28, %v3649_v27  ;;  %v1673_v46 = vrot.slane %v1671_v35, 5  ;;  %v1681_v47 = vshrl.u32 %v1601_v29, 16  ;;  %7902 = vmatmul.mubr.bf16.vlgmr.msra.gmra.mrb[0].mxu0 %v7116_v18  ;;  %v8591_v21 = vld [vmem:[#allocation11 + $0x158] sm:$0xff]   ;;  %v1604_v26 = vld [vmem:[#allocation2 + $0x18] sm:$0xf] }
 0x229   : > { %v7117_v42 = vcombine.low %v3626_v31, %v3636_v36  ;;  %v3645_v44 = vrot.slane %v3644_v32, 4  ;;  %v1679_v38 = vrot.slane %v1677_v40, 5  ;;  %v1687_v50 = vshll.u32 %v1648_v34, 16  ;;  %7934 = vmatpush3.bf16.msra.mxu0 %v9735_v58  ;;  %v1605_v31 = vld [vmem:[#allocation2 + $0x1c] sm:$0xf] }
 0x22a   : > { %v3655_v49 = vrot.slane %v3654_v37, 4  ;;  %v3664_v51 = vrot.slane %v3662_v25, 4  ;;  %v1674_v53 = vor.u32 %v1673_v46, %v1670_v39  ;;  %v1683_v54 = vrot.slane %v1681_v47, 4  ;;  %7935 = vmatprep.subr.bf16.mxu0 %v8589_v41  ;;  %v1650_v35 = vld [vmem:[#allocation2 + $0x20] sm:$0x1] }
 0x22b   : > { %7905 = vmatprep.mubr.bf16.mxu0 %v7117_v42  ;;  %v3650_v52 = vsel %vm9791_vm12, %v3645_v44, %v3649_v27  ;;  %v3665_v24 = vshll.u32 %v3529_v8, 16  ;;  %v1689_v43 = vrot.slane %v1687_v50, 5  ;;  %v3671_v60 = vshll.u32 %v3530_v48, 16  ;;  %v3532_v40 = vld [vmem:[#allocation2 + $0x48] sm:$0xf]  ;;  %v8592_v42 = vld [vmem:[#allocation11 + $0x160] sm:$0xff]  }
 0x22c   : > { %v3660_v22 = vsel %vm9791_vm12, %v3655_v49, %v3659_v33  ;;  %v3675_v61 = vshrl.u32 %v3530_v48, 16  ;;  %v1675_v15 = vrot.slane %v1674_v53, 4  ;;  %v1684_v58 = vor.u32 %v1683_v54, %v1679_v38 }
 0x22d   : > { %v7118_v0 = vcombine.low %v3650_v52, %v3660_v22  ;;  %v3667_v1 = vrot.slane %v3665_v24, 5  ;;  %v3673_v3 = vrot.slane %v3671_v60, 5  ;;  %v3681_v7 = vshll.u32 %v3531_v55, 16  ;;  %7936 = vmatpush3.bf16.msra.mxu0 %v8589_v41  ;;  %v3533_v52 = vld [vmem:[#allocation2 + $0x4c] sm:$0xf] }
 0x22e   : > { %v3677_v5 = vrot.slane %v3675_v61, 4  ;;  %v1692_v10 = vshrl.u32 %v1602_v56, 16  ;;  %v1680_v8 = vsel %vm9791_vm12, %v1675_v15, %v1679_v38  ;;  %v1685_v11 = vrot.slane %v1684_v58, 4  ;;  %7937 = vmatprep.subr.bf16.mxu0 %v8590_v62  ;;  %v3534_v24 = vld [vmem:[#allocation2 + $0x50] sm:$0x1] }
 0x22f   : > { %v3668_v13 = vor.u32 %v3667_v1, %v3664_v51  ;;  %v1695_v17 = vshll.u32 %v1602_v56, 16  ;;  %v3683_v9 = vrot.slane %v3681_v7, 5  ;;  %v1701_v20 = vshll.u32 %v1603_v2, 16 }
 0x230   : > { %v3678_v18 = vor.u32 %v3677_v5, %v3673_v3  ;;  %v1694_v19 = vrot.slane %v1692_v10, 4  ;;  %v1690_v14 = vsel %vm9791_vm12, %v1685_v11, %v1689_v43  ;;  %v1705_v25 = vshrl.u32 %v1603_v2, 16  ;;  %7906 = vmatmul.mubr.bf16.gmra.mrb[4].mxu0 %v7118_v0  ;;  %v8593_v0 = vld [vmem:[#allocation11 + $0x168] sm:$0xff]  }
 0x231   : > { %v3669_v12 = vrot.slane %v3668_v13, 4  ;;  %v1697_v23 = vrot.slane %v1695_v17, 5  ;;  %v7003_v27 = vcombine.low %v1680_v8, %v1690_v14  ;;  %v1703_v29 = vrot.slane %v1701_v20, 5  ;;  %7938 = vmatpush3.bf16.msra.mxu0 %v8590_v62  ;;  %v3535_v62 = vld [vmem:[#allocation2 + $0x54] sm:$0xf]  ;;  %v8595_v11 = vld [vmem:[#allocation11 + $0x8] sm:$0xff]  }
 0x232   : > { %v3679_v28 = vrot.slane %v3678_v18, 4  ;;  %v1711_v30 = vshll.u32 %v1649_v16, 16  ;;  %v1707_v34 = vrot.slane %v1705_v25, 4  ;;  %v1716_v37 = vshrl.u32 %v1604_v26, 16  ;;  %7939 = vmatprep.subr.bf16.mxu0 %v8591_v21  ;;  %v3536_v8 = vld [vmem:[#allocation2 + $0x58] sm:$0xf] }
 0x233   : > { %v3674_v32 = vsel %vm9791_vm12, %v3669_v12, %v3673_v3  ;;  %v1698_v33 = vor.u32 %v1697_v23, %v1694_v19  ;;  %7709 = vmatprep.mubr.bf16.mxu1 %v7003_v27  ;;  %v1719_v39 = vshll.u32 %v1604_v26, 16  ;;  %v1725_v48 = vshll.u32 %v1605_v31, 16  ;;  %v3537_v18 = vld [vmem:[#allocation2 + $0x5c] sm:$0x1]  ;;  %v1606_v19 = vld [vmem:[#allocation2 + $0x24] sm:$0xf] }
 0x234   : > { %v3684_v36 = vsel %vm9791_vm12, %v3679_v28, %v3683_v9  ;;  %v1713_v41 = vrot.slane %v1711_v30, 5  ;;  %v1708_v47 = vor.u32 %v1707_v34, %v1703_v29  ;;  %v1718_v49 = vrot.slane %v1716_v37, 4  ;;  %v1607_v23 = vld [vmem:[#allocation2 + $0x28] sm:$0xf]  ;;  %v1651_v34 = vld [vmem:[#allocation2 + $0x2c] sm:$0x1] }
 0x235   : > { %v7119_v44 = vcombine.low %v3674_v32, %v3684_v36  ;;  %v1699_v46 = vrot.slane %v1698_v33, 4  ;;  %v1721_v38 = vrot.slane %v1719_v39, 5  ;;  %v1729_v50 = vshrl.u32 %v1605_v31, 16  ;;  %7940 = vmatpush3.bf16.msra.mxu0 %v8591_v21  ;;  %v8596_v25 = vld [vmem:[#allocation11 + $0x170] sm:$0xff]  }
 0x236   : > { %v1735_v51 = vshll.u32 %v1650_v35, 16  ;;  %v1709_v54 = vrot.slane %v1708_v47, 4  ;;  %v1727_v55 = vrot.slane %v1725_v48, 5  ;;  %v3686_v56 = vshrl.u32 %v3532_v40, 16  ;;  %7941 = vmatprep.subr.bf16.mxu0 %v8592_v42  ;;  %v8597_v35 = vld [vmem:[#allocation11 + $0x10] sm:$0xff]  }
 0x237   : > { %7909 = vmatprep.mubr.bf16.mxu0 %v7119_v44  ;;  %v1704_v53 = vsel %vm9791_vm12, %v1699_v46, %v1703_v29  ;;  %v1722_v22 = vor.u32 %v1721_v38, %v1718_v49  ;;  %v1731_v43 = vrot.slane %v1729_v50, 4  ;;  %v3689_v61 = vshll.u32 %v3532_v40, 16  ;;  %v1608_v40 = vld [vmem:[#allocation2 + $0x30] sm:$0xf]  ;;  %v1609_v48 = vld [vmem:[#allocation2 + $0x34] sm:$0xf] }
 0x238   : > { %v1737_v60 = vrot.slane %v1735_v51, 5  ;;  %v1714_v15 = vsel %vm9791_vm12, %v1709_v54, %v1713_v41  ;;  %v3688_v58 = vrot.slane %v3686_v56, 4  ;;  %v3695_v1 = vshll.u32 %v3533_v52, 16 }
 0x239   : > { %v3699_v2 = vshrl.u32 %v3533_v52, 16  ;;  %v7004_v3 = vcombine.low %v1704_v53, %v1714_v15  ;;  %v1723_v5 = vrot.slane %v1722_v22, 4  ;;  %v1732_v7 = vor.u32 %v1731_v43, %v1727_v55  ;;  %7942 = vmatpush3.bf16.msra.mxu0 %v8592_v42  ;;  %v8599_v42 = vld [vmem:[#allocation11 + $0x178] sm:$0xff]  }
 0x23a   : > { %v3691_v10 = vrot.slane %v3689_v61, 5  ;;  %v3697_v13 = vrot.slane %v3695_v1, 5  ;;  %v3705_v17 = vshll.u32 %v3534_v24, 16  ;;  %v3710_v9 = vshrl.u32 %v3535_v62, 16  ;;  %7943 = vmatprep.subr.bf16.mxu0 %v8593_v0  ;;  %v8598_v52 = vld [vmem:[#allocation11 + $0x18] sm:$0xff]  }
 0x23b   : > { %v3701_v16 = vrot.slane %v3699_v2, 4  ;;  %7710 = vmatmul.mubr.bf16.vlgmr.msra.gmra.mrb[40].mxu1 %v7004_v3  ;;  %v1728_v20 = vsel %vm9791_vm12, %v1723_v5, %v1727_v55  ;;  %v1733_v21 = vrot.slane %v1732_v7, 4  ;;  %v3713_v12 = vshll.u32 %v3535_v62, 16  ;;  %v1652_v61 = vld [vmem:[#allocation2 + $0x38] sm:$0x1] }
 0x23c   : > { %v3692_v14 = vor.u32 %v3691_v10, %v3688_v58  ;;  %v3707_v27 = vrot.slane %v3705_v17, 5  ;;  %v3712_v28 = vrot.slane %v3710_v9, 4  ;;  %v3719_v29 = vshll.u32 %v3536_v8, 16  ;;  %7742 = vmatpush3.bf16.msra.mxu1 %v9737_v6  ;;  %v3538_v1 = vld [vmem:[#allocation2 + $0x60] sm:$0xf]  ;;  %v8602_v2 = vld [vmem:[#allocation11 + $0x180] sm:$0xff]  }
 0x23d   : > { %v3702_v26 = vor.u32 %v3701_v16, %v3697_v13  ;;  %v1738_v30 = vsel %vm9791_vm12, %v1733_v21, %v1737_v60  ;;  %v3715_v32 = vrot.slane %v3713_v12, 5  ;;  %v3723_v33 = vshrl.u32 %v3536_v8, 16  ;;  %7743 = vmatprep.subr.bf16.mxu1 %v8595_v11  ;;  %7944 = vmatpush3.bf16.msra.mxu0 %v8593_v0  ;;  %v3539_v17 = vld [vmem:[#allocation2 + $0x64] sm:$0xf] }
 0x23e   : > { %v3693_v31 = vrot.slane %v3692_v14, 4  ;;  %v7005_v36 = vcombine.low %v1728_v20, %v1738_v30  ;;  %v3721_v37 = vrot.slane %v3719_v29, 5  ;;  %v3729_v39 = vshll.u32 %v3537_v18, 16  ;;  %7945 = vmatprep.subr.bf16.mxu0 %v8596_v25  ;;  %v8600_v18 = vld [vmem:[#allocation11 + $0x20] sm:$0xff]   ;;  %v3540_v14 = vld [vmem:[#allocation2 + $0x68] sm:$0x1] }
 0x23f   : > { %v3703_v41 = vrot.slane %v3702_v26, 4  ;;  %v3716_v6 = vor.u32 %v3715_v32, %v3712_v28  ;;  %v3725_v46 = vrot.slane %v3723_v33, 4  ;;  %v1740_v47 = vshrl.u32 %v1606_v19, 16  ;;  %v3542_v32 = vld [vmem:[#allocation2 + $0x70] sm:$0xf] }
 0x240   : > { %v3698_v44 = vsel %vm9791_vm12, %v3693_v31, %v3697_v13  ;;  %7713 = vmatprep.mubr.bf16.mxu1 %v7005_v36  ;;  %v3731_v38 = vrot.slane %v3729_v39, 5  ;;  %v1743_v50 = vshll.u32 %v1606_v19, 16  ;;  %v1749_v51 = vshll.u32 %v1607_v23, 16  ;;  %7744 = vmatpush3.bf16.msra.mxu1 %v8595_v11 }
 0x241   : > { %v3708_v49 = vsel %vm9791_vm12, %v3703_v41, %v3707_v27  ;;  %v3717_v54 = vrot.slane %v3716_v6, 4  ;;  %v3726_v55 = vor.u32 %v3725_v46, %v3721_v37  ;;  %v1742_v24 = vrot.slane %v1740_v47, 4  ;;  %7745 = vmatprep.subr.bf16.mxu1 %v8597_v35  ;;  %7946 = vmatpush3.bf16.msra.mxu0 %v8596_v25  ;;  %v3541_v27 = vld [vmem:[#allocation2 + $0x6c] sm:$0xf]  ;;  %v8601_v41 = vld [vmem:[#allocation11 + $0x28] sm:$0xff]  }
 0x242   : > { %v7120_v53 = vcombine.low %v3698_v44, %v3708_v49  ;;  %v1745_v56 = vrot.slane %v1743_v50, 5  ;;  %v1751_v22 = vrot.slane %v1749_v51, 5  ;;  %v1753_v43 = vshrl.u32 %v1607_v23, 16  ;;  %7947 = vmatprep.subr.bf16.mxu0 %v8599_v42 }
 0x243   : > { %v1759_v60 = vshll.u32 %v1651_v34, 16  ;;  %v3722_v62 = vsel %vm9791_vm12, %v3717_v54, %v3721_v37  ;;  %v3727_v0 = vrot.slane %v3726_v55, 4  ;;  %v1764_v15 = vshrl.u32 %v1608_v40, 16 }
 0x244   : > { %7910 = vmatmul.mubr.bf16.gmra.mrb[8].mxu0 %v7120_v53  ;;  %v1767_v58 = vshll.u32 %v1608_v40, 16  ;;  %v1746_v3 = vor.u32 %v1745_v56, %v1742_v24  ;;  %v1755_v5 = vrot.slane %v1753_v43, 4  ;;  %v1773_v10 = vshll.u32 %v1609_v48, 16  ;;  %7746 = vmatpush3.bf16.msra.mxu1 %v8597_v35  ;;  %v1610_v24 = vld [vmem:[#allocation2 + $0x3c] sm:$0xf]  ;;  %v8603_v56 = vld [vmem:[#allocation11 + $0x30] sm:$0xff]  }
 0x245   : > { %v1761_v7 = vrot.slane %v1759_v60, 5  ;;  %v3732_v8 = vsel %vm9791_vm12, %v3727_v0, %v3731_v38  ;;  %v1766_v11 = vrot.slane %v1764_v15, 4  ;;  %v1777_v16 = vshrl.u32 %v1609_v48, 16  ;;  %7747 = vmatprep.subr.bf16.mxu1 %v8598_v52  ;;  %7948 = vmatpush3.bf16.msra.mxu0 %v8599_v42  ;;  %v3543_v38 = vld [vmem:[#allocation2 + $0x74] sm:$0x1] }
 0x246   : > { %v1769_v13 = vrot.slane %v1767_v58, 5  ;;  %v7121_v9 = vcombine.low %v3722_v62, %v3732_v8  ;;  %v1747_v19 = vrot.slane %v1746_v3, 4  ;;  %v1756_v20 = vor.u32 %v1755_v5, %v1751_v22  ;;  %7981 = vmatprep.subr.bf16.mxu0 %v8602_v2  ;;  %v1611_v62 = vld [vmem:[#allocation2 + $0x40] sm:$0xf]  ;;  %v1653_v2 = vld [vmem:[#allocation2 + $0x44] sm:$0x1] }
 0x247   : > { %v1775_v21 = vrot.slane %v1773_v10, 5  ;;  %v1779_v23 = vrot.slane %v1777_v16, 4  ;;  %v1783_v25 = vshll.u32 %v1652_v61, 16  ;;  %v3734_v26 = vshrl.u32 %v3538_v1, 16  ;;  %v1612_v3 = vld [vmem:[#allocation2 + $0x48] sm:$0xf] }
 0x248   : > { %v1770_v12 = vor.u32 %v1769_v13, %v1766_v11  ;;  %7913 = vmatprep.mubr.bf16.mxu0 %v7121_v9  ;;  %v1752_v28 = vsel %vm9791_vm12, %v1747_v19, %v1751_v22  ;;  %v1757_v29 = vrot.slane %v1756_v20, 4  ;;  %v3737_v30 = vshll.u32 %v3538_v1, 16  ;;  %7748 = vmatpush3.bf16.msra.mxu1 %v8598_v52  ;;  %v8604_v11 = vld [vmem:[#allocation11 + $0x38] sm:$0xff]  }
 0x249   : > { %v3743_v31 = vshll.u32 %v3539_v17, 16  ;;  %v1780_v34 = vor.u32 %v1779_v23, %v1775_v21  ;;  %v1785_v35 = vrot.slane %v1783_v25, 5  ;;  %v3736_v36 = vrot.slane %v3734_v26, 4  ;;  %7749 = vmatprep.subr.bf16.mxu1 %v8600_v18 }
 0x24a   : > { %v1771_v33 = vrot.slane %v1770_v12, 4  ;;  %v1762_v37 = vsel %vm9791_vm12, %v1757_v29, %v1761_v7  ;;  %v3739_v39 = vrot.slane %v3737_v30, 5  ;;  %v3747_v42 = vshrl.u32 %v3539_v17, 16 }
 0x24b   : > { %v3745_v40 = vrot.slane %v3743_v31, 5  ;;  %v7006_v44 = vcombine.low %v1752_v28, %v1762_v37  ;;  %v1781_v46 = vrot.slane %v1780_v34, 4  ;;  %v3753_v47 = vshll.u32 %v3540_v14, 16  ;;  %v1613_v14 = vld [vmem:[#allocation2 + $0x4c] sm:$0xf] }
 0x24c   : > { %v1776_v6 = vsel %vm9791_vm12, %v1771_v33, %v1775_v21  ;;  %v3740_v48 = vor.u32 %v3739_v39, %v3736_v36  ;;  %v3749_v49 = vrot.slane %v3747_v42, 4  ;;  %v3758_v50 = vshrl.u32 %v3541_v27, 16  ;;  %7750 = vmatpush3.bf16.msra.mxu1 %v8600_v18 }
 0x24d   : > { %v3761_v51 = vshll.u32 %v3541_v27, 16  ;;  %7714 = vmatmul.mubr.bf16.gmra.mrb[44].mxu1 %v7006_v44  ;;  %v1786_v52 = vsel %vm9791_vm12, %v1781_v46, %v1785_v35  ;;  %v3755_v53 = vrot.slane %v3753_v47, 5  ;;  %v3767_v54 = vshll.u32 %v3542_v32, 16  ;;  %7751 = vmatprep.subr.bf16.mxu1 %v8601_v41  ;;  %v1654_v27 = vld [vmem:[#allocation2 + $0x50] sm:$0x1] }
 0x24e   : > { %v3771_v55 = vshrl.u32 %v3542_v32, 16  ;;  %v7007_v22 = vcombine.low %v1776_v6, %v1786_v52  ;;  %v3741_v43 = vrot.slane %v3740_v48, 4  ;;  %v3750_v60 = vor.u32 %v3749_v49, %v3745_v40  ;;  %v3544_v32 = vld [vmem:[#allocation2 + $0x78] sm:$0xf]  ;;  %v9865_v44 = vld [vmem:[#allocation2 + $0x7c] sm:$0xf] }
 0x24f   : > { %v3760_v61 = vrot.slane %v3758_v50, 4  ;;  %v3763_v0 = vrot.slane %v3761_v51, 5  ;;  %v3769_v15 = vrot.slane %v3767_v54, 5  ;;  %v3777_v1 = vshll.u32 %v3543_v38, 16  ;;  %v9867_v49 = vld [vmem:[#allocation2 + $0x80] sm:$0x1] }
 0x250   : > { %v3773_v58 = vrot.slane %v3771_v55, 4  ;;  %7717 = vmatprep.mubr.bf16.mxu1 %v7007_v22  ;;  %v3746_v5 = vsel %vm9791_vm12, %v3741_v43, %v3745_v40  ;;  %v3751_v7 = vrot.slane %v3750_v60, 4  ;;  %v1788_v10 = vshrl.u32 %v1610_v24, 16  ;;  %7752 = vmatpush3.bf16.msra.mxu1 %v8601_v41  ;;  %v9863_v41 = vld [vmem:[#allocation11 + $0x80] sm:$0xff]   ;;  %v3547_v38 = vld [vmem:[#allocation2 + $0x84] sm:$0xf] }
 0x251   : > { %v1791_v8 = vshll.u32 %v1610_v24, 16  ;;  %v3764_v13 = vor.u32 %v3763_v0, %v3760_v61  ;;  %v3779_v17 = vrot.slane %v3777_v1, 5  ;;  %v1797_v18 = vshll.u32 %v1611_v62, 16  ;;  %7753 = vmatprep.subr.bf16.mxu1 %v8603_v56  ;;  %v9876_v1 = vld [vmem:[#allocation2 + $0x88] sm:$0xf] }
 0x252   : > { %v3774_v16 = vor.u32 %v3773_v58, %v3769_v15  ;;  %v3756_v9 = vsel %vm9791_vm12, %v3751_v7, %v3755_v53  ;;  %v1790_v19 = vrot.slane %v1788_v10, 4  ;;  %v1801_v21 = vshrl.u32 %v1611_v62, 16 }
 0x253   : > { %v1793_v20 = vrot.slane %v1791_v8, 5  ;;  %v7122_v12 = vcombine.low %v3746_v5, %v3756_v9  ;;  %v3765_v23 = vrot.slane %v3764_v13, 4  ;;  %v1799_v26 = vrot.slane %v1797_v18, 5 }
 0x254   : > { %v3775_v25 = vrot.slane %v3774_v16, 4  ;;  %v1803_v29 = vrot.slane %v1801_v21, 4  ;;  %v1807_v30 = vshll.u32 %v1653_v2, 16  ;;  %v1812_v31 = vshrl.u32 %v1612_v3, 16  ;;  %7754 = vmatpush3.bf16.msra.mxu1 %v8603_v56  ;;  %v9878_v2 = vld [vmem:[#allocation2 + $0x8c] sm:$0x1] }
 0x255   : > { %v1794_v28 = vor.u32 %v1793_v20, %v1790_v19  ;;  %7914 = vmatmul.mubr.bf16.gmra.mrb[12].mxu0 %v7122_v12  ;;  %v3770_v33 = vsel %vm9791_vm12, %v3765_v23, %v3769_v15  ;;  %v1815_v35 = vshll.u32 %v1612_v3, 16  ;;  %v1821_v36 = vshll.u32 %v1613_v14, 16  ;;  %7755 = vmatprep.subr.bf16.mxu1 %v8604_v11  ;;  %v1615_v21 = vld [vmem:[#allocation2 + $0x58] sm:$0xf] }
 0x256   : > { %v3780_v34 = vsel %vm9791_vm12, %v3775_v25, %v3779_v17  ;;  %v1804_v40 = vor.u32 %v1803_v29, %v1799_v26  ;;  %v1809_v42 = vrot.slane %v1807_v30, 5  ;;  %v1814_v6 = vrot.slane %v1812_v31, 4  ;;  %v1614_v17 = vld [vmem:[#allocation2 + $0x54] sm:$0xf] }
 0x257   : > { %v7123_v37 = vcombine.low %v3770_v33, %v3780_v34  ;;  %v1795_v39 = vrot.slane %v1794_v28, 4  ;;  %v1817_v46 = vrot.slane %v1815_v35, 5  ;;  %v1823_v47 = vrot.slane %v1821_v36, 5  ;;  %v1655_v33 = vld [vmem:[#allocation2 + $0x5c] sm:$0x1] }
 0x258   : > { %v1825_v48 = vshrl.u32 %v1613_v14, 16  ;;  %v1805_v51 = vrot.slane %v1804_v40, 4  ;;  %v1831_v52 = vshll.u32 %v1654_v27, 16  ;;  %v3782_v53 = vshrl.u32 %v3544_v32, 16  ;;  %7756 = vmatpush3.bf16.msra.mxu1 %v8604_v11  ;;  %v1616_v35 = vld [vmem:[#allocation2 + $0x60] sm:$0xf] }
 0x259   : > { %7917 = vmatprep.mubr.bf16.mxu0 %v7123_v37  ;;  %v1800_v50 = vsel %vm9791_vm12, %v1795_v39, %v1799_v26  ;;  %v1818_v54 = vor.u32 %v1817_v46, %v1814_v6  ;;  %v3785_v24 = vshll.u32 %v3544_v32, 16  ;;  %v3791_v56 = vshll.u32 %v9865_v44, 16  ;;  %7789 = vmatprep.subr.bf16.mxu1 %v9863_v41 }
 0x25a   : > { %v1827_v55 = vrot.slane %v1825_v48, 4  ;;  %v1810_v22 = vsel %vm9791_vm12, %v1805_v51, %v1809_v42  ;;  %v1833_v43 = vrot.slane %v1831_v52, 5  ;;  %v3784_v60 = vrot.slane %v3782_v53, 4  ;;  %v1617_v42 = vld [vmem:[#allocation2 + $0x64] sm:$0xf] }
 0x25b   : > { %v3795_v61 = vshrl.u32 %v9865_v44, 16  ;;  %v7008_v62 = vcombine.low %v1800_v50, %v1810_v22  ;;  %v1819_v0 = vrot.slane %v1818_v54, 4  ;;  %v3787_v58 = vrot.slane %v3785_v24, 5  ;;  %v1656_v53 = vld [vmem:[#allocation2 + $0x68] sm:$0x1] }
 0x25c   : > { %v1828_v15 = vor.u32 %v1827_v55, %v1823_v47  ;;  %v3793_v3 = vrot.slane %v3791_v56, 5  ;;  %v3801_v7 = vshll.u32 %v9867_v49, 16  ;;  %v3806_v10 = vshrl.u32 %v3547_v38, 16 }
 0x25d   : > { %v3797_v5 = vrot.slane %v3795_v61, 4  ;;  %7718 = vmatmul.mubr.bf16.gmra.mrb[48].mxu1 %v7008_v62  ;;  %v1824_v8 = vsel %vm9791_vm12, %v1819_v0, %v1823_v47  ;;  %v3788_v13 = vor.u32 %v3787_v58, %v3784_v60  ;;  %v3809_v16 = vshll.u32 %v3547_v38, 16  ;;  %v3550_v62 = vld [vmem:[#allocation2 + $0x90] sm:$0xf] }
 0x25e   : > { %v1829_v11 = vrot.slane %v1828_v15, 4  ;;  %v3803_v9 = vrot.slane %v3801_v7, 5  ;;  %v3808_v19 = vrot.slane %v3806_v10, 4  ;;  %v3815_v20 = vshll.u32 %v9876_v1, 16 }
 0x25f   : > { %v3798_v18 = vor.u32 %v3797_v5, %v3793_v3  ;;  %v3789_v12 = vrot.slane %v3788_v13, 4  ;;  %v3811_v23 = vrot.slane %v3809_v16, 5  ;;  %v3819_v25 = vshrl.u32 %v9876_v1, 16  ;;  %v9896_v5 = vld [vmem:[#allocation2 + $0x94] sm:$0xf] }
 0x260   : > { %v1834_v14 = vsel %vm9791_vm12, %v1829_v11, %v1833_v43  ;;  %v3817_v28 = vrot.slane %v3815_v20, 5  ;;  %v3825_v29 = vshll.u32 %v9878_v2, 16  ;;  %v1836_v34 = vshrl.u32 %v1614_v17, 16  ;;  %v9900_v20 = vld [vmem:[#allocation2 + $0x98] sm:$0x1] }
 0x261   : > { %v7009_v26 = vcombine.low %v1824_v8, %v1834_v14  ;;  %v3799_v27 = vrot.slane %v3798_v18, 4  ;;  %v3794_v30 = vsel %vm9791_vm12, %v3789_v12, %v3793_v3  ;;  %v3812_v31 = vor.u32 %v3811_v23, %v3808_v19 }
 0x262   : > { %v3821_v32 = vrot.slane %v3819_v25, 4  ;;  %v3827_v37 = vrot.slane %v3825_v29, 5  ;;  %v1839_v39 = vshll.u32 %v1614_v17, 16  ;;  %v1845_v40 = vshll.u32 %v1615_v21, 16 }
 0x263   : > { %7721 = vmatprep.mubr.bf16.mxu1 %v7009_v26  ;;  %v3804_v36 = vsel %vm9791_vm12, %v3799_v27, %v3803_v9  ;;  %v3813_v46 = vrot.slane %v3812_v31, 4  ;;  %v1838_v48 = vrot.slane %v1836_v34, 4  ;;  %v1849_v51 = vshrl.u32 %v1615_v21, 16  ;;  %v3553_v27 = vld [vmem:[#allocation2 + $0x9c] sm:$0xf] }
 0x264   : > { %v7124_v6 = vcombine.low %v3794_v30, %v3804_v36  ;;  %v3822_v47 = vor.u32 %v3821_v32, %v3817_v28  ;;  %v1841_v38 = vrot.slane %v1839_v39, 5  ;;  %v1847_v50 = vrot.slane %v1845_v40, 5  ;;  %v9906_v32 = vld [vmem:[#allocation2 + $0xa0] sm:$0xf]  ;;  %v9911_v40 = vld [vmem:[#allocation2 + $0xa4] sm:$0x1] }
 0x265   : > { %v1855_v52 = vshll.u32 %v1655_v33, 16  ;;  %v3818_v54 = vsel %vm9791_vm12, %v3813_v46, %v3817_v28  ;;  %v1860_v24 = vshrl.u32 %v1616_v35, 16  ;;  %v1863_v56 = vshll.u32 %v1616_v35, 16 }
 0x266   : > { %7918 = vmatmul.mubr.bf16.gmra.mrb[16].mxu0 %v7124_v6  ;;  %v3823_v55 = vrot.slane %v3822_v47, 4  ;;  %v1842_v22 = vor.u32 %v1841_v38, %v1838_v48  ;;  %v1851_v43 = vrot.slane %v1849_v51, 4  ;;  %v1869_v61 = vshll.u32 %v1617_v42, 16 }
 0x267   : > { %v1857_v60 = vrot.slane %v1855_v52, 5  ;;  %v1862_v15 = vrot.slane %v1860_v24, 4  ;;  %v1865_v58 = vrot.slane %v1863_v56, 5  ;;  %v1873_v3 = vshrl.u32 %v1617_v42, 16 }
 0x268   : > { %v3828_v0 = vsel %vm9791_vm12, %v3823_v55, %v3827_v37  ;;  %v1843_v10 = vrot.slane %v1842_v22, 4  ;;  %v1852_v8 = vor.u32 %v1851_v43, %v1847_v50  ;;  %v1871_v11 = vrot.slane %v1869_v61, 5  ;;  %v9919_v55 = vld [vmem:[#allocation2 + $0x70] sm:$0xf] }
 0x269   : > { %v7125_v7 = vcombine.low %v3818_v54, %v3828_v0  ;;  %v1866_v13 = vor.u32 %v1865_v58, %v1862_v15  ;;  %v1875_v16 = vrot.slane %v1873_v3, 4  ;;  %v1879_v17 = vshll.u32 %v1656_v53, 16 }
 0x26a   : > { %v3830_v18 = vshrl.u32 %v3550_v62, 16  ;;  %v1848_v9 = vsel %vm9791_vm12, %v1843_v10, %v1847_v50  ;;  %v1853_v19 = vrot.slane %v1852_v8, 4  ;;  %v3833_v21 = vshll.u32 %v3550_v62, 16  ;;  %v9917_v50 = vld [vmem:[#allocation2 + $0x6c] sm:$0xf] }
 0x26b   : > { %7921 = vmatprep.mubr.bf16.mxu0 %v7125_v7  ;;  %v3839_v14 = vshll.u32 %v9896_v5, 16  ;;  %v1867_v12 = vrot.slane %v1866_v13, 4  ;;  %v1876_v23 = vor.u32 %v1875_v16, %v1871_v11  ;;  %v1881_v25 = vrot.slane %v1879_v17, 5  ;;  %v1657_v7 = vld [vmem:[#allocation2 + $0x74] sm:$0x1] }
 0x26c   : > { %v3832_v26 = vrot.slane %v3830_v18, 4  ;;  %v1858_v28 = vsel %vm9791_vm12, %v1853_v19, %v1857_v60  ;;  %v3835_v29 = vrot.slane %v3833_v21, 5  ;;  %v3843_v31 = vshrl.u32 %v9896_v5, 16  ;;  %v9927_v8 = vld [vmem:[#allocation2 + $0x78] sm:$0xf] }
 0x26d   : > { %v3841_v30 = vrot.slane %v3839_v14, 5  ;;  %v7010_v33 = vcombine.low %v1848_v9, %v1858_v28  ;;  %v1872_v34 = vsel %vm9791_vm12, %v1867_v12, %v1871_v11  ;;  %v1877_v35 = vrot.slane %v1876_v23, 4  ;;  %v9932_v18 = vld [vmem:[#allocation2 + $0x7c] sm:$0xf] }
 0x26e   : > { %v3849_v36 = vshll.u32 %v9900_v20, 16  ;;  %v3836_v37 = vor.u32 %v3835_v29, %v3832_v26  ;;  %v3845_v39 = vrot.slane %v3843_v31, 4  ;;  %v3854_v42 = vshrl.u32 %v3553_v27, 16  ;;  %v1658_v29 = vld [vmem:[#allocation2 + $0x80] sm:$0x1] }
 0x26f   : > { %v3857_v6 = vshll.u32 %v3553_v27, 16  ;;  %7722 = vmatmul.mubr.bf16.gmra.mrb[52].mxu1 %v7010_v33  ;;  %v1882_v46 = vsel %vm9791_vm12, %v1877_v35, %v1881_v25  ;;  %v3863_v48 = vshll.u32 %v9906_v32, 16  ;;  %v3867_v38 = vshrl.u32 %v9906_v32, 16  ;;  %v3556_v33 = vld [vmem:[#allocation2 + $0xa8] sm:$0xf] }
 0x270   : > { %v3851_v47 = vrot.slane %v3849_v36, 5  ;;  %v7011_v51 = vcombine.low %v1872_v34, %v1882_v46  ;;  %v3837_v52 = vrot.slane %v3836_v37, 4  ;;  %v3846_v53 = vor.u32 %v3845_v39, %v3841_v30  ;;  %v9941_v39 = vld [vmem:[#allocation2 + $0xac] sm:$0xf] }
 0x271   : > { %v3856_v54 = vrot.slane %v3854_v42, 4  ;;  %v3859_v24 = vrot.slane %v3857_v6, 5  ;;  %v3865_v56 = vrot.slane %v3863_v48, 5  ;;  %v3869_v22 = vrot.slane %v3867_v38, 4 }
 0x272   : > { %v3873_v43 = vshll.u32 %v9911_v40, 16  ;;  %7725 = vmatprep.mubr.bf16.mxu1 %v7011_v51  ;;  %v3842_v60 = vsel %vm9791_vm12, %v3837_v52, %v3841_v30  ;;  %v3847_v61 = vrot.slane %v3846_v53, 4  ;;  %v1884_v62 = vshrl.u32 %v9917_v50, 16  ;;  %v9946_v52 = vld [vmem:[#allocation2 + $0xb0] sm:$0x1] }
 0x273   : > { %v1887_v0 = vshll.u32 %v9917_v50, 16  ;;  %v3860_v15 = vor.u32 %v3859_v24, %v3856_v54  ;;  %v3870_v58 = vor.u32 %v3869_v22, %v3865_v56  ;;  %v1893_v10 = vshll.u32 %v9919_v55, 16 }
 0x274   : > { %v3875_v3 = vrot.slane %v3873_v43, 5  ;;  %v3852_v11 = vsel %vm9791_vm12, %v3847_v61, %v3851_v47  ;;  %v1886_v13 = vrot.slane %v1884_v62, 4  ;;  %v1897_v17 = vshrl.u32 %v9919_v55, 16  ;;  %v3559_v43 = vld [vmem:[#allocation2 + $0xb4] sm:$0xf] }
 0x275   : > { %v1889_v16 = vrot.slane %v1887_v0, 5  ;;  %v7126_v9 = vcombine.low %v3842_v60, %v3852_v11  ;;  %v3861_v19 = vrot.slane %v3860_v15, 4  ;;  %v3871_v21 = vrot.slane %v3870_v58, 4 }
 0x276   : > { %v1895_v14 = vrot.slane %v1893_v10, 5  ;;  %v1899_v23 = vrot.slane %v1897_v17, 4  ;;  %v1903_v25 = vshll.u32 %v1657_v7, 16  ;;  %v1908_v26 = vshrl.u32 %v9927_v8, 16  ;;  %v9952_v10 = vld [vmem:[#allocation2 + $0xb8] sm:$0xf] }
 0x277   : > { %v1890_v12 = vor.u32 %v1889_v16, %v1886_v13  ;;  %7922 = vmatmul.mubr.bf16.gmra.mrb[20].mxu0 %v7126_v9  ;;  %v3866_v27 = vsel %vm9791_vm12, %v3861_v19, %v3865_v56  ;;  %v3876_v28 = vsel %vm9791_vm12, %v3871_v21, %v3875_v3  ;;  %v1911_v30 = vshll.u32 %v9927_v8, 16  ;;  %v9955_v9 = vpop.f32.mrb[36].mxu1 }
 0x278   : > { %v1917_v31 = vshll.u32 %v9932_v18, 16  ;;  %v7127_v34 = vcombine.low %v3866_v27, %v3876_v28  ;;  %v1900_v36 = vor.u32 %v1899_v23, %v1895_v14  ;;  %v1905_v37 = vrot.slane %v1903_v25, 5  ;;  %v7691_v25 = vpop.f32.mrb[37].mxu1 }
 0x279   : > { %v1891_v35 = vrot.slane %v1890_v12, 4  ;;  %v1910_v42 = vrot.slane %v1908_v26, 4  ;;  %v1913_v6 = vrot.slane %v1911_v30, 5  ;;  %v1921_v47 = vshrl.u32 %v9932_v18, 16  ;;  %v9959_v12 = vld [vmem:[#allocation2 + $0xbc] sm:$0x1] }
 0x27a   : > { %v1919_v46 = vrot.slane %v1917_v31, 5  ;;  %7925 = vmatprep.mubr.bf16.mxu0 %v7127_v34  ;;  %v1901_v38 = vrot.slane %v1900_v36, 4  ;;  %v1927_v51 = vshll.u32 %v1658_v29, 16  ;;  %v3878_v53 = vshrl.u32 %v3556_v33, 16  ;;  %v9962_v30 = vld [vmem:[#allocation2 + $0x84] sm:$0xf] }
 0x27b   : > { %v1896_v48 = vsel %vm9791_vm12, %v1891_v35, %v1895_v14  ;;  %v1914_v54 = vor.u32 %v1913_v6, %v1910_v42  ;;  %v1923_v24 = vrot.slane %v1921_v47, 4  ;;  %v3881_v56 = vshll.u32 %v3556_v33, 16  ;;  %v9964_v31 = vpop.f32.mrb[38].mxu1 }
 0x27c   : > { %v3887_v22 = vshll.u32 %v9941_v39, 16  ;;  %v1906_v60 = vsel %vm9791_vm12, %v1901_v38, %v1905_v37  ;;  %v1929_v61 = vrot.slane %v1927_v51, 5  ;;  %v3880_v62 = vrot.slane %v3878_v53, 4  ;;  %v9969_v37 = vld [vmem:[#allocation2 + $0x88] sm:$0xf]  ;;  %v7692_v42 = vpop.f32.mrb[39].mxu1 }
 0x27d   : > { %v3891_v0 = vshrl.u32 %v9941_v39, 16  ;;  %v7012_v15 = vcombine.low %v1896_v48, %v1906_v60  ;;  %v1915_v58 = vrot.slane %v1914_v54, 4  ;;  %v1924_v3 = vor.u32 %v1923_v24, %v1919_v46  ;;  %v1659_v54 = vld [vmem:[#allocation2 + $0x8c] sm:$0x1]  ;;  %v9994_v42 = vld [vmem:[#allocation2 + $0xc4] sm:$0xf] }
 0x27e   : > { %v3883_v7 = vrot.slane %v3881_v56, 5  ;;  %v3889_v11 = vrot.slane %v3887_v22, 5  ;;  %v3897_v16 = vshll.u32 %v9946_v52, 16  ;;  %v3902_v17 = vshrl.u32 %v3559_v43, 16 }
 0x27f   : > { %v3893_v13 = vrot.slane %v3891_v0, 4  ;;  %7726 = vmatmul.mubr.bf16.gmra.mrb[56].mxu1 %v7012_v15  ;;  %v1920_v19 = vsel %vm9791_vm12, %v1915_v58, %v1919_v46  ;;  %v1925_v21 = vrot.slane %v1924_v3, 4  ;;  %v3905_v23 = vshll.u32 %v3559_v43, 16  ;;  %v9981_v3 = vld [vmem:[#allocation2 + $0x94] sm:$0xf] }
 0x280   : > { %v3884_v14 = vor.u32 %v3883_v7, %v3880_v62  ;;  %v3899_v27 = vrot.slane %v3897_v16, 5  ;;  %v3904_v28 = vrot.slane %v3902_v17, 4  ;;  %v3911_v29 = vshll.u32 %v9952_v10, 16 }
 0x281   : > { %v3894_v26 = vor.u32 %v3893_v13, %v3889_v11  ;;  %v1930_v33 = vsel %vm9791_vm12, %v1925_v21, %v1929_v61  ;;  %v3907_v35 = vrot.slane %v3905_v23, 5  ;;  %v3915_v36 = vshrl.u32 %v9952_v10, 16  ;;  %v9979_v61 = vld [vmem:[#allocation2 + $0x90] sm:$0xf]  ;;  %v9986_v21 = vld [vmem:[#allocation2 + $0x98] sm:$0x1] }
 0x282   : > { %v3885_v34 = vrot.slane %v3884_v14, 4  ;;  %v7013_v6 = vcombine.low %v1920_v19, %v1930_v33  ;;  %v3913_v47 = vrot.slane %v3911_v29, 5  ;;  %v3921_v48 = vshll.u32 %v9959_v12, 16  ;;  %11345 = vst [vmem:[#allocation30_spill] sm:$0xff] %v9986_v21  ;;  %v3562_v29 = vld [vmem:[#allocation2 + $0xc0] sm:$0xf] }
 0x283   : > { %v3895_v46 = vrot.slane %v3894_v26, 4  ;;  %v3908_v51 = vor.u32 %v3907_v35, %v3904_v28  ;;  %v3917_v53 = vrot.slane %v3915_v36, 4  ;;  %v1932_v24 = vshrl.u32 %v9962_v30, 16 }
 0x284   : > { %v3890_v38 = vsel %vm9791_vm12, %v3885_v34, %v3889_v11  ;;  %7729 = vmatprep.mubr.bf16.mxu1 %v7013_v6  ;;  %v3923_v22 = vrot.slane %v3921_v48, 5  ;;  %v1935_v43 = vshll.u32 %v9962_v30, 16  ;;  %v1941_v60 = vshll.u32 %v9969_v37, 16 }
 0x285   : > { %v3900_v56 = vsel %vm9791_vm12, %v3895_v46, %v3899_v27  ;;  %v3909_v0 = vrot.slane %v3908_v51, 4  ;;  %v3918_v15 = vor.u32 %v3917_v53, %v3913_v47  ;;  %v1934_v58 = vrot.slane %v1932_v24, 4 }
 0x286   : > { %v7128_v62 = vcombine.low %v3890_v38, %v3900_v56  ;;  %v1937_v7 = vrot.slane %v1935_v43, 5  ;;  %v1943_v11 = vrot.slane %v1941_v60, 5  ;;  %v1945_v13 = vshrl.u32 %v9969_v37, 16 }
 0x287   : > { %v1951_v16 = vshll.u32 %v1659_v54, 16  ;;  %v3914_v17 = vsel %vm9791_vm12, %v3909_v0, %v3913_v47  ;;  %v3919_v19 = vrot.slane %v3918_v15, 4  ;;  %v1956_v14 = vshrl.u32 %v9979_v61, 16 }
 0x288   : > { %7926 = vmatmul.mubr.bf16.gmra.mrb[24].mxu0 %v7128_v62  ;;  %v1959_v23 = vshll.u32 %v9979_v61, 16  ;;  %v1938_v25 = vor.u32 %v1937_v7, %v1934_v58  ;;  %v1947_v26 = vrot.slane %v1945_v13, 4  ;;  %v1965_v28 = vshll.u32 %v9981_v3, 16 }
 0x289   : > { %v1953_v27 = vrot.slane %v1951_v16, 5  ;;  %v3924_v33 = vsel %vm9791_vm12, %v3919_v19, %v3923_v22  ;;  %v1958_v34 = vrot.slane %v1956_v14, 4  ;;  %v1969_v36 = vshrl.u32 %v9981_v3, 16  ;;  %v9999_v22 = vld [vmem:[#allocation2 + $0xc8] sm:$0x1] }
 0x28a   : > { %v1961_v35 = vrot.slane %v1959_v23, 5  ;;  %v7129_v6 = vcombine.low %v3914_v17, %v3924_v33  ;;  %v1939_v46 = vrot.slane %v1938_v25, 4  ;;  %v1948_v47 = vor.u32 %v1947_v26, %v1943_v11  ;;  %v4271_v19 = vld [vmem:[#allocation2 + $0xc] sm:$0xe] }
 0x28b   : > { %v1967_v48 = vrot.slane %v1965_v28, 5  ;;  %v1971_v51 = vrot.slane %v1969_v36, 4  ;;  %v1975_v53 = vshll.u32 %v9986_v21, 16  ;;  %v3926_v54 = vshrl.u32 %v3562_v29, 16  ;;  %v8676_v36 = vld [vmem:[#allocation2 + $0x10] sm:$0xf] }
 0x28c   : > { %v1962_v38 = vor.u32 %v1961_v35, %v1958_v34  ;;  %7929 = vmatprep.mubr.bf16.mxu0 %v7129_v6  ;;  %v1944_v24 = vsel %vm9791_vm12, %v1939_v46, %v1943_v11  ;;  %v1949_v56 = vrot.slane %v1948_v47, 4  ;;  %v3929_v43 = vshll.u32 %v3562_v29, 16  ;;  %v10008_v29 = vld [vmem:[#allocation2 + $0x9c] sm:$0xf]  ;;  %v10016_v46 = vld [vmem:[#allocation2 + $0xa0] sm:$0xf] }
 0x28d   : > { %v3935_v60 = vshll.u32 %v9994_v42, 16  ;;  %v1972_v0 = vor.u32 %v1971_v51, %v1967_v48  ;;  %v1977_v15 = vrot.slane %v1975_v53, 5  ;;  %v3928_v58 = vrot.slane %v3926_v54, 4  ;;  %v8677_v51 = vld [vmem:[#allocation2 + $0x14] sm:$0x1] }
 0x28e   : > { %v1963_v62 = vrot.slane %v1962_v38, 4  ;;  %v1954_v7 = vsel %vm9791_vm12, %v1949_v56, %v1953_v27  ;;  %v3931_v13 = vrot.slane %v3929_v43, 5  ;;  %v3939_v17 = vshrl.u32 %v9994_v42, 16  ;;  %v10018_v54 = vld [vmem:[#allocation2 + $0xa4] sm:$0x1] }
 0x28f   : > { %v3937_v16 = vrot.slane %v3935_v60, 5  ;;  %v7014_v14 = vcombine.low %v1944_v24, %v1954_v7  ;;  %v1973_v23 = vrot.slane %v1972_v0, 4  ;;  %v3945_v25 = vshll.u32 %v9999_v22, 16  ;;  %11348 = vst [vmem:[#allocation31_spill] sm:$0xff] %v10018_v54  ;;  %v10028_v7 = vld [vmem:[#allocation2 + $0xa8] sm:$0xf] }
 0x290   : > { %v1968_v11 = vsel %vm9791_vm12, %v1963_v62, %v1967_v48  ;;  %v3932_v26 = vor.u32 %v3931_v13, %v3928_v58  ;;  %v3941_v28 = vrot.slane %v3939_v17, 4  ;;  %v7139_v35 = vrot.slane %v4271_v19, 9 }
 0x291   : > { %7730 = vmatmul.mubr.bf16.gmra.mrb[60].mxu1 %v7014_v14  ;;  %v1978_v27 = vsel %vm9791_vm12, %v1973_v23, %v1977_v15  ;;  %v3947_v33 = vrot.slane %v3945_v25, 5  ;;  %v4337_v6 = vrot.slane %v8676_v36, 5  ;;  %v4340_v53 = vrot.slane %v8677_v51, 5 }
 0x292   : > { %v7015_v47 = vcombine.low %v1968_v11, %v1978_v27  ;;  %v3933_v48 = vrot.slane %v3932_v26, 4  ;;  %v3942_v38 = vor.u32 %v3941_v28, %v3937_v16  ;;  %v1980_v43 = vshrl.u32 %v10008_v29, 16  ;;  %v10033_v11 = vld [vmem:[#allocation2 + $0xac] sm:$0xf]  ;;  %v10037_v28 = vld [vmem:[#allocation2 + $0xb0] sm:$0x1] }
 0x293   : > { %v4338_v24 = vsel %vm10012_vm15, %v7139_v35, %v4337_v6  ;;  %v4339_v56 = vrot.slane %v4337_v6, 4  ;;  %v1983_v60 = vshll.u32 %v10008_v29, 16  ;;  %v1989_v15 = vshll.u32 %v10016_v46, 16  ;;  %11349 = vst [vmem:[#allocation32_spill] sm:$0xff] %v10037_v28  ;;  %v4272_v27 = vld [vmem:[#allocation2 + $0x18] sm:$0xe] }
 0x294   : > { %7733 = vmatprep.mubr.bf16.mxu1 %v7015_v47  ;;  %v3938_v62 = vsel %vm9791_vm12, %v3933_v48, %v3937_v16  ;;  %v3943_v0 = vrot.slane %v3942_v38, 4  ;;  %v1993_v58 = vshrl.u32 %v10016_v46, 16  ;;  %v1982_v17 = vrot.slane %v1980_v43, 4 }
 0x295   : > { %v4341_v13 = vsel %vm10012_vm15, %v4339_v56, %v4340_v53  ;;  %v1985_v19 = vrot.slane %v1983_v60, 5  ;;  %v1999_v14 = vshll.u32 %v10018_v54, 16  ;;  %v1991_v25 = vrot.slane %v1989_v15, 5  ;;  %v4273_v60 = vld [vmem:[#allocation2 + $0x24] sm:$0xe] }
 0x296   : > { %v3948_v23 = vsel %vm9791_vm12, %v3943_v0, %v3947_v33  ;;  %v7155_v16 = vcombine.low %v4338_v24, %v4341_v13  ;;  %v1995_v26 = vrot.slane %v1993_v58, 4  ;;  %v2004_v47 = vshrl.u32 %v10028_v7, 16 }
 0x297   : > { %v7130_v35 = vcombine.low %v3938_v62, %v3948_v23  ;;  %v1986_v36 = vor.u32 %v1985_v19, %v1982_v17  ;;  %v2001_v6 = vrot.slane %v1999_v14, 5  ;;  %v2007_v38 = vshll.u32 %v10028_v7, 16  ;;  %v8678_v19 = vld [vmem:[#allocation2 + $0x1c] sm:$0xf]  ;;  %v8679_v23 = vld [vmem:[#allocation2 + $0x20] sm:$0x1] }
 0x298   : > { %v1996_v48 = vor.u32 %v1995_v26, %v1991_v25  ;;  %v2013_v51 = vshll.u32 %v10033_v11, 16  ;;  %v2017_v53 = vshrl.u32 %v10033_v11, 16  ;;  %v2006_v24 = vrot.slane %v2004_v47, 4 }
 0x299   : > { %7930 = vmatmul.mubr.bf16.gmra.mrb[28].mxu0 %v7130_v35  ;;  %v1987_v33 = vrot.slane %v1986_v36, 4  ;;  %v2023_v56 = vshll.u32 %v10037_v28, 16  ;;  %v7140_v43 = vrot.slane %v4272_v27, 9  ;;  %v2009_v0 = vrot.slane %v2007_v38, 5  ;;  %v10046_v35 = vld [vmem:[#allocation2 + $0xb4] sm:$0xf] }
 0x29a   : > { %7949 = vmatprep.mubr.bf16.mxu0 %v7155_v16  ;;  %v1997_v62 = vrot.slane %v1996_v48, 4  ;;  %v2015_v15 = vrot.slane %v2013_v51, 5  ;;  %v2019_v58 = vrot.slane %v2017_v53, 4  ;;  %v4344_v14 = vrot.slane %v8678_v19, 5  ;;  %v8680_v53 = vld [vmem:[#allocation2 + $0x28] sm:$0xf] }
 0x29b   : > { %v1992_v13 = vsel %vm9791_vm12, %v1987_v33, %v1991_v25  ;;  %v2025_v17 = vrot.slane %v2023_v56, 5  ;;  %v4347_v26 = vrot.slane %v8679_v23, 5  ;;  %v2010_v27 = vor.u32 %v2009_v0, %v2006_v24  ;;  %v8681_v19 = vld [vmem:[#allocation2 + $0x2c] sm:$0x1]  ;;  %v10052_v23 = vld [vmem:[#allocation2 + $0xb8] sm:$0xf] }
 0x29c   : > { %v2002_v36 = vsel %vm9791_vm12, %v1997_v62, %v2001_v6  ;;  %v2020_v47 = vor.u32 %v2019_v58, %v2015_v15  ;;  %v7141_v16 = vrot.slane %v4273_v60, 9  ;;  %v4345_v38 = vsel %vm10012_vm15, %v7140_v43, %v4344_v14 }
 0x29d   : > { %v7016_v48 = vcombine.low %v1992_v13, %v2002_v36  ;;  %v4346_v51 = vrot.slane %v4344_v14, 4  ;;  %v4351_v25 = vrot.slane %v8680_v53, 5  ;;  %v2011_v33 = vrot.slane %v2010_v27, 4  ;;  %v8605_v14 = vld [vmem:[#allocation11 + $0x188] sm:$0xff]   ;;  %v8682_v53 = vld [vmem:[#allocation11 + $0x180] sm:$0xff]  }
 0x29e   : > { %v2021_v56 = vrot.slane %v2020_v47, 4  ;;  %v4354_v28 = vrot.slane %v8681_v19, 5  ;;  %v2028_v54 = vshrl.u32 %v10046_v35, 16  ;;  %v2031_v43 = vshll.u32 %v10046_v35, 16  ;;  %v8609_v19 = vld [vmem:[#allocation11 + $0x190] sm:$0xff]  }
 0x29f   : > { %7734 = vmatmul.mubr.bf16.gmra.mrb[64].mxu1 %v7016_v48  ;;  %v4348_v6 = vsel %vm10012_vm15, %v4346_v51, %v4347_v26  ;;  %v4352_v24 = vsel %vm10012_vm15, %v7141_v16, %v4351_v25  ;;  %v4353_v60 = vrot.slane %v4351_v25, 4  ;;  %v2016_v62 = vsel %vm9791_vm12, %v2011_v33, %v2015_v15  ;;  %v10066_v26 = vld [vmem:[#allocation2 + $0xbc] sm:$0x1]  ;;  %v4274_v15 = vld [vmem:[#allocation2 + $0x30] sm:$0xe] }
 0x2a0   : > { %v2026_v0 = vsel %vm9791_vm12, %v2021_v56, %v2025_v17  ;;  %v7156_v58 = vcombine.low %v4345_v38, %v4348_v6  ;;  %v2030_v13 = vrot.slane %v2028_v54, 4  ;;  %11350 = vst [vmem:[#allocation33_spill] sm:$0xff] %v10066_v26  ;;  %v2033_v47 = vrot.slane %v2031_v43, 5  ;;  %v8683_v38 = vld [vmem:[#allocation2 + $0x34] sm:$0xf] }
 0x2a1   : > { %v7017_v36 = vcombine.low %v2016_v62, %v2026_v0  ;;  %v4355_v27 = vsel %vm10012_vm15, %v4353_v60, %v4354_v28  ;;  %v2037_v16 = vshll.u32 %v10052_v23, 16  ;;  %v2041_v51 = vshrl.u32 %v10052_v23, 16  ;;  %v4275_v33 = vld [vmem:[#allocation2 + $0x3c] sm:$0xe]  ;;  %v8685_v62 = vld [vmem:[#allocation2 + $0x40] sm:$0xf] }
 0x2a2   : > { %7950 = vmatmul.mubr.bf16.vlgmr.msra.gmra.mrb[0].mxu0 %v7156_v58  ;;  %v7157_v48 = vcombine.low %v4352_v24, %v4355_v27  ;;  %v2034_v17 = vor.u32 %v2033_v47, %v2030_v13  ;;  %v4358_v25 = vrot.slane %v8683_v38, 5  ;;  %v2047_v56 = vshll.u32 %v10066_v26, 16  ;;  %v8684_v24 = vld [vmem:[#allocation2 + $0x38] sm:$0x1] }
 0x2a3   : > { %7737 = vmatprep.mubr.bf16.mxu1 %v7017_v36  ;;  %7982 = vmatpush3.bf16.msra.mxu0 %v8682_v53  ;;  %v2039_v54 = vrot.slane %v2037_v16, 5  ;;  %v2043_v28 = vrot.slane %v2041_v51, 4  ;;  %v7142_v6 = vrot.slane %v4274_v15, 9  ;;  %v4361_v43 = vrot.slane %v8684_v24, 5  ;;  %v8687_v24 = vld [vmem:[#allocation2 + $0x4c] sm:$0xf] }
 0x2a4   : > { %7953 = vmatprep.mubr.bf16.mxu0 %v7157_v48  ;;  %7983 = vmatprep.subr.bf16.mxu0 %v8605_v14  ;;  %v4360_v60 = vrot.slane %v4358_v25, 4  ;;  %v4365_v0 = vrot.slane %v8685_v62, 5  ;;  %v2035_v58 = vrot.slane %v2034_v17, 4  ;;  %v7143_v27 = vrot.slane %v4275_v33, 9  ;;  %v8686_v48 = vld [vmem:[#allocation2 + $0x44] sm:$0x1] }
 0x2a5   : > { %v2044_v36 = vor.u32 %v2043_v28, %v2039_v54  ;;  %v4359_v13 = vsel %vm10012_vm15, %v7142_v6, %v4358_v25  ;;  %v4368_v51 = vrot.slane %v8686_v48, 5  ;;  %v2049_v15 = vrot.slane %v2047_v56, 5  ;;  %v8612_v62 = vld [vmem:[#allocation11 + $0x198] sm:$0xff]   ;;  %v8688_v17 = vld [vmem:[#allocation2] sm:$0xf] }
 0x2a6   : > { %v4362_v47 = vsel %vm10012_vm15, %v4360_v60, %v4361_v43  ;;  %v4367_v16 = vrot.slane %v4365_v0, 4  ;;  %v4372_v26 = vrot.slane %v8687_v24, 5  ;;  %v10075_v28 = vld [vmem:[#allocation2 + $0x4] sm:$0xf]  ;;  %v4366_v25 = vsel %vm10012_vm15, %v7143_v27, %v4365_v0  ;;  %v8690_v6 = vld [vmem:[#allocation2 + $0x58] sm:$0xf] }
 0x2a7   : > { %7984 = vmatpush3.bf16.msra.mxu0 %v8605_v14  ;;  %v2045_v53 = vrot.slane %v2044_v36, 4  ;;  %v7158_v38 = vcombine.low %v4359_v13, %v4362_v47  ;;  %v7027_v33 = vcombine.low %v8688_v17, %v10075_v28  ;;  %v4379_v60 = vrot.slane %v8690_v6, 5  ;;  %v4276_v13 = vld [vmem:[#allocation2 + $0x48] sm:$0xe]  ;;  %v8691_v24 = vld [vmem:[#allocation2 + $0x50] sm:$0x1] }
 0x2a8   : > { %7985 = vmatprep.subr.bf16.mxu0 %v8609_v19  ;;  %v4369_v14 = vsel %vm10012_vm15, %v4367_v16, %v4368_v51  ;;  %v2040_v56 = vsel %vm9791_vm12, %v2035_v58, %v2039_v54  ;;  %v4374_v47 = vrot.slane %v4372_v26, 4  ;;  %v4375_v17 = vrot.slane %v8691_v24, 5  ;;  %v4277_v0 = vld [vmem:[#allocation2 + $0x54] sm:$0xe]  ;;  %v8692_v16 = vld [vmem:[#allocation2 + $0x5c] sm:$0x1] }
 0x2a9   : > { %v2050_v43 = vsel %vm9791_vm12, %v2045_v53, %v2049_v15  ;;  %v7159_v36 = vcombine.low %v4366_v25, %v4369_v14  ;;  %v4381_v27 = vrot.slane %v4379_v60, 4  ;;  %v4382_v51 = vrot.slane %v8692_v16, 5  ;;  %v8615_v6 = vld [vmem:[#allocation11 + $0x1a0] sm:$0xff]   ;;  %v8693_v53 = vld [vmem:[#allocation2 + $0x64] sm:$0xf] }
 0x2aa   : > { %7954 = vmatmul.mubr.bf16.gmra.mrb[4].mxu0 %v7158_v38  ;;  %v7018_v48 = vcombine.low %v2040_v56, %v2050_v43  ;;  %v7144_v54 = vrot.slane %v4276_v13, 9  ;;  %v4376_v58 = vsel %vm10012_vm15, %v4374_v47, %v4375_v17  ;;  %v4386_v15 = vrot.slane %v8693_v53, 5  ;;  %v8618_v13 = vld [vmem:[#allocation11 + $0x1a8] sm:$0xff]   ;;  %v8695_v17 = vld [vmem:[#allocation2 + $0xc] sm:$0xf] }
 0x2ab   : > { %7986 = vmatpush3.bf16.msra.mxu0 %v8609_v19  ;;  %7957 = vmatprep.mubr.bf16.mxu0 %v7159_v36  ;;  %v7145_v38 = vrot.slane %v4277_v0, 9  ;;  %v4383_v25 = vsel %vm10012_vm15, %v4381_v27, %v4382_v51  ;;  %v8694_v19 = vld [vmem:[#allocation2 + $0x70] sm:$0xf]  ;;  %v8697_v16 = vld [vmem:[#allocation2 + $0x68] sm:$0x1]  ;;  %v8622_v51 = vld [vmem:[#allocation11 + $0x88] sm:$0xff]   ;;  %v7038_v63 = vcombine.low %v9962_v30, %v9969_v37  ;;  %v7041_v30 = vcombine.low %v10028_v7, %v10033_v11 }
 0x2ac   : > { %7987 = vmatprep.subr.bf16.mxu0 %v8612_v62  ;;  %7738 = vmatmul.mubr.bf16.gmra.mrb[68].mxu1 %v7018_v48  ;;  %v4393_v14 = vrot.slane %v8694_v19, 5  ;;  %v4373_v56 = vsel %vm10012_vm15, %v7144_v54, %v4372_v26  ;;  %v4388_v48 = vrot.slane %v4386_v15, 4  ;;  %v10094_v0 = vld [vmem:[#allocation2 + $0x10] sm:$0xf]  ;;  %v4389_v26 = vrot.slane %v8697_v16, 5  ;;  %v8623_v19 = vld [vmem:[#allocation11 + $0x1b0] sm:$0xff]  }
 0x2ad   : > { %7757 = vmatprep.mubr.bf16.mxu1 %v7027_v33  ;;  %v7160_v43 = vcombine.low %v4373_v56, %v4376_v58  ;;  %v4380_v36 = vsel %vm10012_vm15, %v7145_v38, %v4379_v60  ;;  %v4278_v33 = vld [vmem:[#allocation2 + $0x60] sm:$0xe]  ;;  %v7028_v27 = vcombine.low %v8695_v17, %v10094_v0  ;;  %v8698_v54 = vld [vmem:[#allocation2 + $0x18] sm:$0xf]  ;;  %v10097_v60 = vld [vmem:[#allocation2 + $0x1c] sm:$0xf] }
 0x2ae   : > { %v7161_v47 = vcombine.low %v4380_v36, %v4383_v25  ;;  %v4395_v24 = vrot.slane %v4393_v14, 4  ;;  %v7029_v58 = vcombine.low %v8698_v54, %v10097_v60  ;;  %v8700_v53 = vld [vmem:[#allocation2 + $0x74] sm:$0x1]  ;;  %v11289_v25 = vrot.slane %v9865_v44, 5  ;;  %v8701_v16 = vld [vmem:[#allocation2 + $0x24] sm:$0xf] }
 0x2af   : > { %7988 = vmatpush3.bf16.msra.mxu0 %v8612_v62  ;;  %v4279_v62 = vld [vmem:[#allocation2 + $0x6c] sm:$0xe]  ;;  %v4396_v38 = vrot.slane %v8700_v53, 5  ;;  %v7146_v56 = vrot.slane %v4278_v33, 9  ;;  %v10107_v54 = vld [vmem:[#allocation2 + $0x28] sm:$0xf] }
 0x2b0   : > { %7989 = vmatprep.subr.bf16.mxu0 %v8615_v6  ;;  %v7147_v36 = vrot.slane %v4279_v62, 9  ;;  %v7030_v53 = vcombine.low %v8701_v16, %v10107_v54  ;;  %v10110_v33 = vld [vmem:[#allocation2 + $0x34] sm:$0xf]  ;;  %v8625_v17 = vld [vmem:[#allocation11 + $0x90] sm:$0xff]   ;;  %v2720_v45 = vrot.slane %v10107_v54, 5 }
 0x2b1   : > { %v4285_v16 = vld [vmem:[#allocation2 + $0xb4] sm:$0xe] }
 0x2b2   : > { %7958 = vmatmul.mubr.bf16.gmra.mrb[8].mxu0 %v7160_v43  ;;  %v4390_v43 = vsel %vm10012_vm15, %v4388_v48, %v4389_v26  ;;  %v4387_v26 = vsel %vm10012_vm15, %v7146_v56, %v4386_v15  ;;  %v4403_v15 = vrot.slane %v9867_v49, 5  ;;  %v4281_v56 = vld [vmem:[#allocation2 + $0x84] sm:$0xe]  ;;  %v4438_v49 = vrot.slane %v9959_v12, 5 }
 0x2b3   : > { %7961 = vmatprep.mubr.bf16.mxu0 %v7161_v47  ;;  %7990 = vmatpush3.bf16.msra.mxu0 %v8615_v6  ;;  %v4397_v6 = vsel %vm10012_vm15, %v4395_v24, %v4396_v38  ;;  %v4280_v47 = vld [vmem:[#allocation2 + $0x78] sm:$0xe]  ;;  %v4284_v24 = vld [vmem:[#allocation2 + $0xa8] sm:$0xe]  ;;  %v7162_v62 = vcombine.low %v4387_v26, %v4390_v43  ;;  %v4428_v38 = vrot.slane %v9941_v39, 5  ;;  %v11351_v43 = vrot.slane %v9876_v1, 5 }
 0x2b4   : > { %7991 = vmatprep.subr.bf16.mxu0 %v8618_v13  ;;  %7758 = vmatmul.mubr.bf16.vlgmr.msra.gmra.mrb[40].mxu1 %v7028_v27  ;;  %v8703_v27 = vld [vmem:[#allocation2 + $0x30] sm:$0xf]  ;;  %v7148_v21 = vrot.slane %v4280_v47, 9  ;;  %v4410_v39 = vrot.slane %v9878_v2, 5  ;;  %v4286_v2 = vld [vmem:[#allocation2 + $0xc0] sm:$0xe] }
 0x2b5   : > { %7761 = vmatprep.mubr.bf16.mxu1 %v7029_v58  ;;  %7790 = vmatpush3.bf16.msra.mxu1 %v9863_v41  ;;  %v7031_v48 = vcombine.low %v8703_v27, %v10110_v33  ;;  %v4394_v41 = vsel %vm10012_vm15, %v7147_v36, %v4393_v14  ;;  %v4402_v58 = vrot.slane %v11289_v25, 4  ;;  %v4409_v14 = vrot.slane %v11351_v43, 4 }
 0x2b6   : > { %7791 = vmatprep.subr.bf16.mxu1 %v8622_v51  ;;  %v7163_v27 = vcombine.low %v4394_v41, %v4397_v6  ;;  %v7152_v36 = vrot.slane %v4284_v24, 9  ;;  %v4430_v26 = vrot.slane %v4428_v38, 4  ;;  %v4431_v25 = vrot.slane %v9946_v52, 5  ;;  %v8627_v41 = vld [vmem:[#allocation11 + $0x98] sm:$0xff]  }
 0x2b7   : > { %7992 = vmatpush3.bf16.msra.mxu0 %v8618_v13  ;;  %v4435_v13 = vrot.slane %v9952_v10, 5  ;;  %v7153_v6 = vrot.slane %v4285_v16, 9  ;;  %v4404_v10 = vsel %vm10012_vm15, %v4402_v58, %v4403_v15  ;;  %v7149_v58 = vrot.slane %v4281_v56, 9 }
 0x2b8   : > { %7993 = vmatprep.subr.bf16.mxu0 %v8623_v19  ;;  %v10136_v52 = vsel %vm10012_vm15, %v4430_v26, %v4431_v25  ;;  %v4442_v25 = vrot.slane %v9994_v42, 5  ;;  %v4445_v42 = vrot.slane %v9999_v22, 5  ;;  %v8705_v26 = vld [vmem:[#allocation2 + $0x3c] sm:$0xf] }
 0x2b9   : > { %7792 = vmatpush3.bf16.msra.mxu1 %v8622_v51  ;;  %v4437_v47 = vrot.slane %v4435_v13, 4  ;;  %v10132_v51 = vsel %vm10012_vm15, %v7152_v36, %v4428_v38  ;;  %v4411_v38 = vsel %vm10012_vm15, %v4409_v14, %v4410_v39  ;;  %v11353_v14 = vrot.slane %v9876_v1, 5  ;;  %v10176_v39 = vld [vmem:[#allocation2 + $0x40] sm:$0xf] }
 0x2ba   : > { %7962 = vmatmul.mubr.bf16.gmra.mrb[12].mxu0 %v7162_v62  ;;  %v4414_v62 = vrot.slane %v9896_v5, 5  ;;  %7793 = vmatprep.subr.bf16.mxu1 %v8625_v17  ;;  %v7168_v12 = vcombine.low %v10132_v51, %v10136_v52  ;;  %v10144_v5 = vsel %vm10012_vm15, %v7153_v6, %v4435_v13  ;;  %v7154_v13 = vrot.slane %v4286_v2, 9  ;;  %v8707_v2 = vld [vmem:[#allocation2 + $0x48] sm:$0xf] }
 0x2bb   : > { %7965 = vmatprep.mubr.bf16.mxu0 %v7163_v27  ;;  %7994 = vmatpush3.bf16.msra.mxu0 %v8623_v19  ;;  %v10138_v19 = vld [vmem:[#allocation11 + $0x1c0] sm:$0xff]   ;;  %v10148_v24 = vsel %vm10012_vm15, %v4437_v47, %v4438_v49  ;;  %v11352_v27 = vrot.slane %v9865_v44, 5  ;;  %v4444_v43 = vrot.slane %v4442_v25, 4  ;;  %v7032_v6 = vcombine.low %v8705_v26, %v10176_v39 }
 0x2bc   : > { %7995 = vmatprep.subr.bf16.mxu0 %v8628_v57  ;;  %7762 = vmatmul.mubr.bf16.gmra.mrb[44].mxu1 %v7030_v53  ;;  %v4421_v53 = vrot.slane %v9906_v32, 5  ;;  %v7169_v16 = vcombine.low %v10144_v5, %v10148_v24  ;;  %v4408_v32 = vsel %vm10012_vm15, %v7149_v58, %v11353_v14  ;;  %v4416_v44 = vrot.slane %v4414_v62, 4  ;;  %v4283_v49 = vld [vmem:[#allocation2 + $0x9c] sm:$0xe] }
 0x2bd   : > { %7765 = vmatprep.mubr.bf16.mxu1 %v7031_v48  ;;  %7794 = vmatpush3.bf16.msra.mxu1 %v8625_v17  ;;  %v4401_v15 = vsel %vm10012_vm15, %v7148_v21, %v11352_v27  ;;  %v8631_v48 = vld [vmem:[#allocation11 + $0xa0] sm:$0xff]   ;;  %v7165_v17 = vcombine.low %v4408_v32, %v4411_v38  ;;  %v10168_v21 = vsel %vm10012_vm15, %v7154_v13, %v4442_v25  ;;  %v4417_v47 = vrot.slane %v9900_v20, 5  ;;  %v10180_v25 = vld [vmem:[#allocation2 + $0x4c] sm:$0xf]  ;;  %v997_v13 = vld [vmem:[#allocation2 + $0xd4] sm:$0x1] }
 0x2be   : > { %7795 = vmatprep.subr.bf16.mxu1 %v8627_v41  ;;  %v7164_v56 = vcombine.low %v4401_v15, %v4404_v10  ;;  %v10172_v36 = vsel %vm10012_vm15, %v4444_v43, %v4445_v42  ;;  %v4423_v22 = vrot.slane %v4421_v53, 4  ;;  %v8633_v10 = vld [vmem:[#allocation11 + $0xa8] sm:$0xff]   ;;  %v7033_v58 = vcombine.low %v8707_v2, %v10180_v25  ;;  %v941_v38 = vld [vmem:[#allocation2 + $0xcc] sm:$0x1] }
 0x2bf   : > { %7996 = vmatpush3.bf16.msra.mxu0 %v8628_v57  ;;  %v4282_v57 = vld [vmem:[#allocation2 + $0x90] sm:$0xe]  ;;  %v7170_v1 = vcombine.low %v10168_v21, %v10172_v36  ;;  %v4418_v15 = vsel %vm10012_vm15, %v4416_v44, %v4417_v47  ;;  %v7151_v43 = vrot.slane %v4283_v49, 9  ;;  %v942_v32 = vsel %vm9520_vm3, 0, %v941_v38  ;;  %v8712_v2 = vld [vmem:[#allocation2 + $0x60] sm:$0xf] }
 0x2c0   : > { %8029 = vmatprep.subr.bf16.mxu0 %v10138_v19  ;;  %v7150_v27 = vrot.slane %v4282_v57, 9  ;;  %943 = vst [vmem:[#allocation2 + $0xcc] sm:$0x1] %v942_v32  ;;  %v2713_v5 = vrot.slane %v10097_v60, 5  ;;  %v2727_v24 = vrot.slane %v10110_v33, 5  ;;  %v7052_v33 = vrot.slane %v2647_v59, 9 }
 0x2c1   : > { %7796 = vmatpush3.bf16.msra.mxu1 %v8627_v41  ;;  %v4424_v41 = vrot.slane %v9911_v40, 5  ;;  %v8709_v40 = vld [vmem:[%s11250_s4] ss:$0 sm:$0xff]  ;;  %v4422_v44 = vsel %vm10012_vm15, %v7151_v43, %v4421_v53  ;;  %v8639_v53 = vld [vmem:[#allocation11 + $0xb8] sm:$0xff]  }
 0x2c2   : > { %7966 = vmatmul.mubr.bf16.gmra.mrb[16].mxu0 %v7164_v56  ;;  %7797 = vmatprep.subr.bf16.mxu1 %v8631_v48  ;;  %v4415_v42 = vsel %vm10012_vm15, %v7150_v27, %v4414_v62  ;;  %v8638_v56 = vld [vmem:[#allocation11 + $0xb0] sm:$0xff]   ;;  %v878_v14 = vadd.f32 %v8709_v40, %v9955_v9  ;;  %v998_v62 = vsel %vm9530_vm5, 0, %v997_v13  ;;  %v8710_v9 = vld [vmem:[#allocation2 + $0x54] sm:$0xf] }
 0x2c3   : > { %7969 = vmatprep.mubr.bf16.mxu0 %v7165_v17  ;;  %v4425_v20 = vsel %vm10012_vm15, %v4423_v22, %v4424_v41  ;;  %v7166_v17 = vcombine.low %v4415_v42, %v4418_v15  ;;  %999 = vst [vmem:[#allocation2 + $0xd4] sm:$0x1] %v998_v62  ;;  %v8636_v59 = vld [vmem:[#allocation2 + $0x30] sm:$0xff]  }
 0x2c4   : > { %7766 = vmatmul.mubr.bf16.gmra.mrb[48].mxu1 %v7032_v6  ;;  %v7167_v57 = vcombine.low %v4422_v44, %v4425_v20  ;;  %v885_v22 = vmul.f32 0.0, %v878_v14  ;;  %v10201_v6 = vld [vmem:[#allocation2 + $0x58] sm:$0xf]  ;;  %v7037_v44 = vcombine.low %v9927_v8, %v9932_v18  ;;  %v8714_v8 = vld [vmem:[#allocation2 + $0x14] sm:$0x1] }
 0x2c5   : > { %7769 = vmatprep.mubr.bf16.mxu1 %v7033_v58  ;;  %7798 = vmatpush3.bf16.msra.mxu1 %v8631_v48  ;;  %v881_v48 = vadd.f32 %v8709_v40, %v9964_v31  ;;  %v7034_v47 = vcombine.low %v8710_v9, %v10201_v6  ;;  %v10204_v31 = vld [vmem:[#allocation2 + $0x64] sm:$0xf]  ;;  %v2709_v18 = vrot.slane %v8714_v8, 5 }
 0x2c6   : > { %7799 = vmatprep.subr.bf16.mxu1 %v8633_v10  ;;  %v7319_v49 = vpack.c.bf16 %v885_v22, %v885_v22  ;;  %v7035_v4 = vcombine.low %v8712_v2, %v10204_v31  ;;  %v2649_v9 = vld [vmem:[#allocation2 + $0x24] sm:$0xe]  ;;  %v8716_v2 = vld [vmem:[#allocation2 + $0x20] sm:$0x1] }
 0x2c7   : > { %v886_v26 = vmul.f32 0.0, %v881_v48  ;;  %v1593_v13 = vld [vmem:[#allocation2 + $0xcc] sm:$0xf]  ;;  %v8629_v48 = vld [vmem:[#allocation2 + $0x18] sm:$0xff]  }
 0x2c8   : > { %v1573_v41 = vshrl.u32 %v7319_v49, 16  ;;  %v1576_v38 = vshll.u32 %v7319_v49, 16 }
 0x2c9   : > { %7800 = vmatpush3.bf16.msra.mxu1 %v8633_v10  ;;  %v7320_v58 = vpack.c.bf16 %v886_v26, %v886_v26  ;;  %v2715_v26 = vrot.slane %v2713_v5, 4 }
 0x2ca   : > { %7970 = vmatmul.mubr.bf16.gmra.mrb[20].mxu0 %v7166_v17  ;;  %7801 = vmatprep.subr.bf16.mxu1 %v8638_v56  ;;  %v1575_v15 = vrot.slane %v1573_v41, 7  ;;  %v1597_v40 = vld [vmem:[#allocation2 + $0xd4] sm:$0x1]  ;;  %v7036_v17 = vcombine.low %v9917_v50, %v9919_v55  ;;  %v2699_v50 = vrot.slane %v10075_v28, 5  ;;  %v2706_v55 = vrot.slane %v10094_v0, 5 }
 0x2cb   : > { %7973 = vmatprep.mubr.bf16.mxu0 %v7167_v57  ;;  %v1581_v10 = vshrl.u32 %v7320_v58, 16  ;;  %v1584_v27 = vshll.u32 %v7320_v58, 16  ;;  %v7039_v28 = vcombine.low %v9979_v61, %v9981_v3  ;;  %v7040_v0 = vcombine.low %v10008_v29, %v10016_v46  ;;  %v8715_v57 = vld [vmem:[#allocation2 + $0x8] sm:$0x1] }
 0x2cc   : > { %7770 = vmatmul.mubr.bf16.gmra.mrb[52].mxu1 %v7034_v47  ;;  %v1578_v20 = vor.u32 %v1576_v38, %v1575_v15  ;;  %v1579_v42 = vrot.slane %v1575_v15, 4  ;;  %v2701_v62 = vrot.slane %v2699_v50, 4  ;;  %v2702_v54 = vrot.slane %v8715_v57, 5 }
 0x2cd   : > { %7773 = vmatprep.mubr.bf16.mxu1 %v7035_v4  ;;  %7802 = vmatpush3.bf16.msra.mxu1 %v8638_v56  ;;  %v1583_v43 = vrot.slane %v1581_v10, 7  ;;  %v2708_v22 = vrot.slane %v2706_v55, 4  ;;  %v7042_v61 = vcombine.low %v10046_v35, %v10052_v23  ;;  %v2722_v47 = vrot.slane %v2720_v45, 4 }
 0x2ce   : > { %7803 = vmatprep.subr.bf16.mxu1 %v8639_v53  ;;  %v1594_v56 = vsel %vm9617_vm8, %v1578_v20, %v1593_v13  ;;  %v2716_v4 = vrot.slane %v8716_v2, 5  ;;  %v2729_v58 = vrot.slane %v2727_v24, 4  ;;  %v2734_v41 = vrot.slane %v10176_v39, 5  ;;  %v8718_v13 = vld [vmem:[#allocation2 + $0x38] sm:$0x1]  ;;  %v8643_v2 = vld [vmem:[#allocation11 + $0x1d0] sm:$0xff]  }
 0x2cf   : > { %v1586_v14 = vor.u32 %v1584_v27, %v1583_v43  ;;  %v1588_v32 = vrot.slane %v1583_v43, 4  ;;  %1595 = vst [vmem:[#allocation2 + $0xcc] sm:$0xf] %v1594_v56  ;;  %v10248_v36 = vsel %vm10012_vm15, %v7052_v33, %v2706_v55  ;;  %v2741_v10 = vrot.slane %v10180_v25, 5  ;;  %v8640_v55 = vld [vmem:[#allocation11 + $0x1c8] sm:$0xff]  }
 0x2d0   : > { %v10253_v27 = vsel %vm10012_vm15, %v2701_v62, %v2702_v54  ;;  %v10257_v39 = vsel %vm10012_vm15, %v2708_v22, %v2709_v18  ;;  %v10261_v15 = vsel %vm10012_vm15, %v2715_v26, %v2716_v4  ;;  %v2730_v43 = vrot.slane %v8718_v13, 5  ;;  %v8720_v22 = vld [vmem:[#allocation2 + $0x50] sm:$0x1]  ;;  %v8723_v13 = vld [vmem:[#allocation2 + $0x68] sm:$0x1] }
 0x2d1   : > { %7804 = vmatpush3.bf16.msra.mxu1 %v8639_v53  ;;  %v1587_v51 = vsel %vm9624_vm9, %v1579_v42, %v1586_v14  ;;  %v1598_v52 = vsel %vm9520_vm3, %v1588_v32, %v1597_v40  ;;  %v2650_v53 = vld [vmem:[#allocation2 + $0x30] sm:$0xe]  ;;  %v7054_v42 = vrot.slane %v2649_v9, 9  ;;  %v2651_v32 = vld [vmem:[#allocation2 + $0x3c] sm:$0xe]  ;;  %v2736_v56 = vrot.slane %v2734_v41, 4 }
 0x2d2   : > { %7974 = vmatmul.mubr.bf16.gmra.mrb[24].mxu0 %v7168_v12  ;;  %v2646_v12 = vld [vmem:[#allocation2] sm:$0xe]  ;;  %1596 = vst [vmem:[#allocation2 + $0xd0] sm:$0xf] %v1587_v51  ;;  %1599 = vst [vmem:[#allocation2 + $0xd4] sm:$0x1] %v1598_v52 }
 0x2d3   : > { %7977 = vmatprep.mubr.bf16.mxu0 %v7169_v16  ;;  %v7051_v60 = vrot.slane %v2646_v12, 9  ;;  %v2648_v16 = vld [vmem:[#allocation2 + $0x18] sm:$0xe]  ;;  %v7055_v14 = vrot.slane %v2650_v53, 9  ;;  %v2748_v51 = vrot.slane %v10201_v6, 5  ;;  %v2755_v52 = vrot.slane %v10204_v31, 5 }
 0x2d4   : > { %7774 = vmatmul.mubr.bf16.gmra.mrb[56].mxu1 %v7036_v17  ;;  %v7053_v49 = vrot.slane %v2648_v16, 9  ;;  %v10273_v17 = vsel %vm10012_vm15, %v2729_v58, %v2730_v43  ;;  %v8635_v12 = vld [vmem:[#allocation2 + $0x24] sm:$0xff]   ;;  %v2743_v18 = vrot.slane %v2741_v10, 4  ;;  %v10287_v6 = vsel %vm10012_vm15, %v7054_v42, %v2720_v45  ;;  %v5157_v45 = vld [vmem:[#allocation2 + $0x1c] sm:$0xf] }
 0x2d5   : > { %7777 = vmatprep.mubr.bf16.mxu1 %v7037_v44  ;;  %v10244_v21 = vsel %vm10012_vm15, %v7051_v60, %v2699_v50  ;;  %v2652_v44 = vld [vmem:[#allocation2 + $0x48] sm:$0xe]  ;;  %v8719_v60 = vld [vmem:[#allocation2 + $0x44] sm:$0x1]  ;;  %v2744_v26 = vrot.slane %v8720_v22, 5  ;;  %v2750_v33 = vrot.slane %v2748_v51, 4 }
 0x2d6   : > { %v10265_v20 = vsel %vm10012_vm15, %v7053_v49, %v2713_v5  ;;  %v7067_v50 = vcombine.low %v10244_v21, %v10253_v27  ;;  %v7068_v5 = vcombine.low %v10248_v36, %v10257_v39  ;;  %v2737_v16 = vrot.slane %v8719_v60, 5  ;;  %v2654_v9 = vld [vmem:[#allocation2 + $0x60] sm:$0xe]  ;;  %v10304_v53 = vld [vmem:[#allocation2 + $0x70] sm:$0xf]  ;;  %v8642_v22 = vld [vmem:[#allocation2 + $0x48] sm:$0xff]  }
 0x2d7   : > { %v7069_v8 = vcombine.low %v10265_v20, %v10261_v15  ;;  %v7057_v54 = vrot.slane %v2652_v44, 9  ;;  %v2762_v49 = vrot.slane %v10304_v53, 5  ;;  %v2758_v43 = vrot.slane %v8723_v13, 5  ;;  %v8724_v42 = vld [vmem:[#allocation2 + $0x7c] sm:$0xf]  ;;  %v8646_v60 = vld [vmem:[#allocation11 + $0x1d8] sm:$0xff]  }
 0x2d8   : > { %v5218_v44 = vshrl.u32 %v5157_v45, 16  ;;  %v5158_v31 = vld [vmem:[#allocation2 + $0x20] sm:$0x1]  ;;  %v10470_v13 = vld [vmem:[#allocation11 + $0x200] sm:$0xff]  }
 0x2d9   : > { %v10327_v29 = vsel %vm10012_vm15, %v7057_v54, %v2741_v10  ;;  %v2764_v10 = vrot.slane %v2762_v49, 4  ;;  %v5224_v53 = vshll.u32 %v5158_v31, 16 }
 0x2da   : > { %7978 = vmatmul.mubr.bf16.gmra.mrb[28].mxu0 %v7170_v1  ;;  %v8717_v1 = vld [vmem:[#allocation2 + $0x2c] sm:$0x1] }
 0x2db   : > { %7997 = vmatprep.mubr.bf16.mxu0 %v8629_v48  ;;  %v2723_v38 = vrot.slane %v8717_v1, 5  ;;  %v2653_v48 = vld [vmem:[#allocation2 + $0x54] sm:$0xe]  ;;  %v8722_v1 = vld [vmem:[#allocation2 + $0x5c] sm:$0x1] }
 0x2dc   : > { %7778 = vmatmul.mubr.bf16.gmra.mrb[60].mxu1 %v7038_v63  ;;  %v10291_v63 = vsel %vm10012_vm15, %v7055_v14, %v2727_v24  ;;  %v10300_v24 = vsel %vm10012_vm15, %v2736_v56, %v2737_v16  ;;  %v7058_v58 = vrot.slane %v2653_v48, 9  ;;  %v2769_v14 = vrot.slane %v8724_v42, 5  ;;  %v8726_v42 = vld [vmem:[#allocation2 + $0x80] sm:$0x1] }
 0x2dd   : > { %7781 = vmatprep.mubr.bf16.mxu1 %v7039_v28  ;;  %v10269_v40 = vsel %vm10012_vm15, %v2722_v47, %v2723_v38  ;;  %v7056_v28 = vrot.slane %v2651_v32, 9  ;;  %v7071_v57 = vcombine.low %v10291_v63, %v10273_v17  ;;  %v2757_v47 = vrot.slane %v2755_v52, 4  ;;  %v5156_v32 = vld [vmem:[#allocation2 + $0x18] sm:$0xf]  ;;  %v10495_v17 = vld [vmem:[#allocation2 + $0x44] sm:$0x1] }
 0x2de   : > { %v7070_v62 = vcombine.low %v10287_v6, %v10269_v40  ;;  %v2751_v38 = vrot.slane %v8722_v1, 5  ;;  %v5214_v56 = vshll.u32 %v5157_v45, 16  ;;  %v2783_v16 = vrot.slane %v9981_v3, 5  ;;  %v8655_v3 = vld [vmem:[#allocation11 + $0x1f0] sm:$0xff]   ;;  %11361 = vst [vmem:[#allocation29_spill] sm:$0xff] %v10495_v17 }
 0x2df   : > { %v10309_v4 = vsel %vm10012_vm15, %v7056_v28, %v2734_v41  ;;  %v10341_v25 = vsel %vm10012_vm15, %v2757_v47, %v2758_v43  ;;  %v8641_v28 = vld [vmem:[#allocation2 + $0x3c] sm:$0xff]   ;;  %v5205_v48 = vshrl.u32 %v5156_v32, 16  ;;  %v5208_v54 = vshll.u32 %v5156_v32, 16  ;;  %v8650_v6 = vld [vmem:[#allocation2 + $0x84] sm:$0xff]  }
 0x2e0   : > { %v5220_v47 = vrot.slane %v5218_v44, 4  ;;  %v2772_v32 = vrot.slane %v8726_v42, 5  ;;  %v2658_v44 = vld [vmem:[#allocation2 + $0x90] sm:$0xe] }
 0x2e2   : > { %7998 = vmatmul.mubr.bf16.vlgmr.msra.gmra.mrb[0].mxu0 %v8635_v12  ;;  %v7059_v12 = vrot.slane %v2654_v9, 9  ;;  %v10347_v9 = vrot.slane %v5214_v56, 5 }
 0x2e3   : > { %8030 = vmatpush3.bf16.msra.mxu0 %v10138_v19  ;;  %8001 = vmatprep.mubr.bf16.mxu0 %v8636_v59  ;;  %v10313_v19 = vsel %vm10012_vm15, %v2743_v18, %v2744_v26  ;;  %v2655_v18 = vld [vmem:[#allocation2 + $0x6c] sm:$0xe]  ;;  %v2656_v59 = vld [vmem:[#allocation2 + $0x78] sm:$0xe]  ;;  %v8725_v26 = vld [vmem:[#allocation2 + $0x74] sm:$0x1] }
 0x2e4   : > { %8031 = vmatprep.subr.bf16.mxu0 %v8640_v55  ;;  %7782 = vmatmul.mubr.bf16.gmra.mrb[64].mxu1 %v7040_v0  ;;  %v10331_v0 = vsel %vm10012_vm15, %v7058_v58, %v2748_v51  ;;  %v2657_v51 = vld [vmem:[#allocation2 + $0x84] sm:$0xe]  ;;  %v2765_v45 = vrot.slane %v8725_v26, 5  ;;  %v7060_v1 = vrot.slane %v2655_v18, 9  ;;  %v5207_v18 = vrot.slane %v5205_v48, 4 }
 0x2e5   : > { %7785 = vmatprep.mubr.bf16.mxu1 %v7041_v30  ;;  %v10337_v30 = vsel %vm10012_vm15, %v2750_v33, %v2751_v38  ;;  %v2771_v33 = vrot.slane %v2769_v14, 4  ;;  %v7061_v38 = vrot.slane %v2656_v59, 9  ;;  %v7062_v56 = vrot.slane %v2657_v51, 9  ;;  %v8727_v48 = vld [vmem:[#allocation2 + $0x8c] sm:$0x1]  ;;  %v11354_v26 = vld [vmem:[#allocation30_spill] sm:$0xff] }
 0x2e6   : > { %v10361_v43 = vsel %vm10012_vm15, %v2764_v10, %v2765_v45  ;;  %v5221_v59 = vor.u32 %v5220_v47, %v10347_v9  ;;  %v2790_v51 = vrot.slane %v10016_v46, 5  ;;  %v10382_v35 = vsel %vm10012_vm15, %v7060_v1, %v2762_v49  ;;  %v5159_v45 = vld [vmem:[#allocation2 + $0x24] sm:$0xf]  ;;  %v5160_v49 = vld [vmem:[#allocation2 + $0x28] sm:$0xf] }
 0x2e7   : > { %8032 = vmatpush3.bf16.msra.mxu0 %v8640_v55  ;;  %v2776_v55 = vrot.slane %v9969_v37, 5  ;;  %v10355_v37 = vsel %vm10012_vm15, %v7059_v12, %v2755_v52  ;;  %v2785_v12 = vrot.slane %v2783_v16, 4  ;;  %v10370_v10 = vsel %vm10012_vm15, %v2771_v33, %v2772_v32  ;;  %v8644_v33 = vld [vmem:[#allocation2 + $0x54] sm:$0xff]   ;;  %v2659_v32 = vld [vmem:[#allocation2 + $0x9c] sm:$0xe] }
 0x2e8   : > { %8033 = vmatprep.subr.bf16.mxu0 %v8643_v2  ;;  %v2786_v46 = vrot.slane %v11354_v26, 5  ;;  %v5222_v42 = vrot.slane %v5221_v59, 4  ;;  %v5229_v31 = vshrl.u32 %v5159_v45, 16  ;;  %v5242_v26 = vshrl.u32 %v5160_v49, 16  ;;  %v5171_v58 = vld [vmem:[#allocation2 + $0x54] sm:$0xf] }
 0x2e9   : > { %v2778_v52 = vrot.slane %v2776_v55, 4  ;;  %v10393_v27 = vsel %vm10012_vm15, %v7062_v56, %v2776_v55  ;;  %v2660_v55 = vld [vmem:[#allocation2 + $0xa8] sm:$0xe]  ;;  %v2792_v56 = vrot.slane %v2790_v51, 4  ;;  %v5328_v7 = vshll.u32 %v5171_v58, 16 }
 0x2ea   : > { %8002 = vmatmul.mubr.bf16.gmra.mrb[4].mxu0 %v8641_v28  ;;  %v8649_v28 = vld [vmem:[#allocation11 + $0x1e0] sm:$0xff]   ;;  %v7065_v21 = vrot.slane %v2660_v55, 9 }
 0x2eb   : > { %8005 = vmatprep.mubr.bf16.mxu0 %v8642_v22  ;;  %8034 = vmatpush3.bf16.msra.mxu0 %v8643_v2  ;;  %v5210_v2 = vrot.slane %v5208_v54, 5  ;;  %v2797_v22 = vrot.slane %v10033_v11, 5  ;;  %v2779_v54 = vrot.slane %v8727_v48, 5  ;;  %v8645_v11 = vld [vmem:[#allocation2 + $0x60] sm:$0xff]  }
 0x2ec   : > { %8035 = vmatprep.subr.bf16.mxu0 %v8646_v60  ;;  %7786 = vmatmul.mubr.bf16.gmra.mrb[68].mxu1 %v7042_v61  ;;  %v10386_v61 = vsel %vm10012_vm15, %v7061_v38, %v2769_v14  ;;  %v8652_v14 = vld [vmem:[#allocation11 + $0x1e8] sm:$0xff]  }
 0x2ed   : > { %7805 = vmatprep.mubr.bf16.mxu1 %v7067_v50  ;;  %v7063_v50 = vrot.slane %v2658_v44, 9  ;;  %v10399_v1 = vsel %vm10012_vm15, %v2778_v52, %v2779_v54  ;;  %v5211_v38 = vor.u32 %v5210_v2, %v5207_v18  ;;  %v2799_v44 = vrot.slane %v2797_v22, 4  ;;  %v11355_v2 = vld [vmem:[#allocation31_spill] sm:$0xff] }
 0x2ee   : > { %v5232_v52 = vshll.u32 %v5159_v45, 16  ;;  %v5238_v54 = vshll.u32 %v5160_v49, 16  ;;  %v5226_v18 = vrot.slane %v5224_v53, 5  ;;  %v2793_v59 = vrot.slane %v11355_v2, 5  ;;  %v5162_v49 = vld [vmem:[#allocation2 + $0x30] sm:$0xf] }
 0x2ef   : > { %8036 = vmatpush3.bf16.msra.mxu0 %v8646_v60  ;;  %v10403_v60 = vsel %vm10012_vm15, %v2785_v12, %v2786_v46  ;;  %v10409_v48 = vsel %vm10012_vm15, %v7063_v50, %v2783_v16  ;;  %v11356_v46 = vld [vmem:[#allocation32_spill] sm:$0xff]  ;;  %v5212_v50 = vrot.slane %v5211_v38, 4  ;;  %v7064_v45 = vrot.slane %v2659_v32, 9 }
 0x2f0   : > { %8037 = vmatprep.subr.bf16.mxu0 %v8649_v28  ;;  %v2800_v47 = vrot.slane %v11356_v46, 5  ;;  %v10424_v53 = vsel %vm10012_vm15, %v2792_v56, %v2793_v59  ;;  %v5231_v46 = vrot.slane %v5229_v31, 4  ;;  %v10430_v38 = vld [vmem:[#allocation2 + $0x34] sm:$0xf]  ;;  %v5234_v36 = vrot.slane %v5232_v52, 5 }
 0x2f1   : > { %11358 = vst [vmem:[#allocation30_spill] sm:$0xff] %v10430_v38  ;;  %v10435_v39 = vrot.slane %v5238_v54, 5  ;;  %v10441_v32 = vsel %vm10012_vm15, %v7064_v45, %v2790_v51  ;;  %v10447_v56 = vld [vmem:[#allocation2 + $0x38] sm:$0x1]  ;;  %v5253_v15 = vshrl.u32 %v5162_v49, 16  ;;  %v5256_v20 = vshll.u32 %v5162_v49, 16 }
 0x2f2   : > { %8006 = vmatmul.mubr.bf16.gmra.mrb[8].mxu0 %v8644_v33  ;;  %v5161_v33 = vld [vmem:[#allocation2 + $0x2c] sm:$0x1]  ;;  %v10428_v2 = vsel %vm10012_vm15, %v2799_v44, %v2800_v47  ;;  %v10445_v47 = vsel %vm10012_vm15, %v7065_v21, %v2797_v22  ;;  %11359 = vst [vmem:[#allocation31_spill] sm:$0xff] %v10447_v56  ;;  %v8658_v44 = vld [vmem:[#allocation11 + $0x1f8] sm:$0xff]   ;;  %v5217_v31 = vsel %vm9791_vm12, %v5212_v50, %v10347_v9  ;;  %v5262_v51 = vshll.u32 %v10430_v38, 16  ;;  %v8648_v21 = vld [vmem:[#allocation2 + $0x78] sm:$0xff]  }
 0x2f3   : > { %8009 = vmatprep.mubr.bf16.mxu0 %v8645_v11  ;;  %8038 = vmatpush3.bf16.msra.mxu0 %v8649_v28  ;;  %v5227_v11 = vsel %vm9791_vm12, %v5222_v42, %v5226_v18  ;;  %v5248_v55 = vshll.u32 %v5161_v33, 16  ;;  %v10437_v42 = vld [vmem:[#allocation2 + $0x40] sm:$0xf]  ;;  %v5266_v52 = vshrl.u32 %v10430_v38, 16  ;;  %v5165_v22 = vld [vmem:[#allocation2 + $0x3c] sm:$0xf]  ;;  %v5235_v9 = vor.u32 %v5234_v36, %v5231_v46 }
 0x2f4   : > { %8039 = vmatprep.subr.bf16.mxu0 %v8652_v14  ;;  %7806 = vmatmul.mubr.bf16.vlgmr.msra.gmra.mrb[40].mxu1 %v7068_v5  ;;  %v5244_v5 = vrot.slane %v5242_v26, 4  ;;  %v10456_v54 = vcombine.low %v5217_v31, %v5227_v11  ;;  %v5286_v18 = vshll.u32 %v10437_v42, 16  ;;  %v5290_v59 = vshrl.u32 %v10437_v42, 16  ;;  %v10462_v33 = vld [vmem:[#allocation2 + $0x4c] sm:$0xf] }
 0x2f5   : > { %7809 = vmatprep.mubr.bf16.mxu1 %v7069_v8  ;;  %v8647_v8 = vld [vmem:[#allocation2 + $0x6c] sm:$0xff]   ;;  %v10465_v45 = vrot.slane %v5248_v55, 5  ;;  %v5272_v49 = vshll.u32 %v10447_v56, 16  ;;  %v5255_v11 = vrot.slane %v5253_v15, 4  ;;  %v5258_v31 = vrot.slane %v5256_v20, 5 }
 0x2f6   : > { %v5245_v50 = vor.u32 %v5244_v5, %v10435_v39  ;;  %v10468_v26 = vld [vmem:[#allocation2 + $0xb4] sm:$0xe]  ;;  %v5277_v16 = vshrl.u32 %v5165_v22, 16  ;;  %v5280_v12 = vshll.u32 %v5165_v22, 16  ;;  %v5268_v46 = vrot.slane %v5266_v52, 4 }
 0x2f7   : > { %8040 = vmatpush3.bf16.msra.mxu0 %v8652_v14  ;;  %v5168_v14 = vld [vmem:[#allocation2 + $0x48] sm:$0xf]  ;;  %v5310_v36 = vshll.u32 %v10462_v33, 16  ;;  %v5314_v5 = vshrl.u32 %v10462_v33, 16  ;;  %v5292_v55 = vrot.slane %v5290_v59, 4  ;;  %v7066_v40 = vrot.slane %v10468_v26, 9 }
 0x2f8   : > { %8041 = vmatprep.subr.bf16.mxu0 %v8655_v3  ;;  %v5301_v15 = vshrl.u32 %v5168_v14, 16  ;;  %v5304_v20 = vshll.u32 %v5168_v14, 16  ;;  %v10481_v22 = vld [vmem:[#allocation2 + $0x58] sm:$0xf]  ;;  %v10488_v52 = vrot.slane %v5245_v50, 4  ;;  %v5279_v14 = vrot.slane %v5277_v16, 4 }
 0x2f9   : > { %11360 = vst [vmem:[#allocation32_spill] sm:$0xff] %v10481_v22  ;;  %v5282_v59 = vrot.slane %v5280_v12, 5  ;;  %v10497_v63 = vrot.slane %v5310_v36, 5  ;;  %v5338_v50 = vshrl.u32 %v10481_v22, 16  ;;  %v8651_v26 = vld [vmem:[#allocation2 + $0x90] sm:$0xff]  }
 0x2fa   : > { %8010 = vmatmul.mubr.bf16.gmra.mrb[12].mxu0 %v8647_v8  ;;  %v10472_v8 = vrot.slane %v5262_v51, 5  ;;  %v10486_v51 = vrot.slane %v5235_v9, 4  ;;  %v5334_v9 = vshll.u32 %v10481_v22, 16  ;;  %v5306_v16 = vrot.slane %v5304_v20, 5  ;;  %v10508_v36 = vld [vmem:[#allocation2 + $0x50] sm:$0x1] }
 0x2fb   : > { %8013 = vmatprep.mubr.bf16.mxu0 %v8648_v21  ;;  %8042 = vmatpush3.bf16.msra.mxu0 %v8655_v3  ;;  %v10479_v3 = vrot.slane %v5286_v18, 5  ;;  %v10490_v21 = vrot.slane %v5272_v49, 5  ;;  %v2804_v18 = vrot.slane %v10052_v23, 5  ;;  %v5303_v23 = vrot.slane %v5301_v15, 4  ;;  %v5174_v56 = vld [vmem:[#allocation2 + $0x60] sm:$0xf] }
 0x2fc   : > { %8043 = vmatprep.subr.bf16.mxu0 %v8658_v44  ;;  %7810 = vmatmul.mubr.bf16.gmra.mrb[44].mxu1 %v7070_v62  ;;  %v5259_v62 = vor.u32 %v5258_v31, %v5255_v11  ;;  %v5241_v12 = vsel %vm9791_vm12, %v10486_v51, %v10435_v39  ;;  %v11362_v11 = vld [vmem:[#allocation33_spill] sm:$0xff]  ;;  %v5283_v15 = vor.u32 %v5282_v59, %v5279_v14  ;;  %v5296_v20 = vshll.u32 %v10495_v17, 16  ;;  %v8731_v28 = vld [vmem:[#allocation2 + $0x2c] sm:$0x1] }
 0x2fd   : > { %7813 = vmatprep.mubr.bf16.mxu1 %v7071_v57  ;;  %v5316_v57 = vrot.slane %v5314_v5, 4  ;;  %v5293_v49 = vor.u32 %v5292_v55, %v10479_v3  ;;  %v2807_v31 = vrot.slane %v11362_v11, 5  ;;  %v5325_v5 = vshrl.u32 %v5171_v58, 16  ;;  %v10529_v17 = vld [vmem:[#allocation2 + $0x5c] sm:$0x1] }
 0x2fe   : > { %v2806_v55 = vrot.slane %v2804_v18, 4  ;;  %v5260_v41 = vrot.slane %v5259_v62, 4  ;;  %v10518_v51 = vrot.slane %v5334_v9, 5  ;;  %v5340_v11 = vrot.slane %v5338_v50, 4 }
 0x2ff   : > { %8044 = vmatpush3.bf16.msra.mxu0 %v8658_v44  ;;  %v5269_v44 = vor.u32 %v5268_v46, %v10472_v8  ;;  %v5251_v46 = vsel %vm9791_vm12, %v10488_v52, %v10465_v45  ;;  %v5317_v39 = vor.u32 %v5316_v57, %v10497_v63  ;;  %v11363_v58 = vcombine.low %v10309_v4, %v10300_v24 }
 0x300   : > { %8077 = vmatprep.subr.bf16.mxu0 %v10470_v13  ;;  %v5294_v38 = vrot.slane %v5293_v49, 4  ;;  %v5307_v45 = vor.u32 %v5306_v16, %v5303_v23  ;;  %v5320_v52 = vshll.u32 %v10508_v36, 16  ;;  %v11364_v14 = vcombine.low %v10327_v29, %v10313_v19  ;;  %v8654_v23 = vld [vmem:[#allocation2 + $0xa8] sm:$0xff]  }
 0x301   : > { %v5327_v62 = vrot.slane %v5325_v5, 4  ;;  %v5330_v59 = vrot.slane %v5328_v7, 5  ;;  %v5284_v50 = vrot.slane %v5283_v15, 4  ;;  %v5298_v22 = vrot.slane %v5296_v20, 5  ;;  %v5177_v20 = vld [vmem:[#allocation2 + $0x6c] sm:$0xf] }
 0x302   : > { %8014 = vmatmul.mubr.bf16.gmra.mrb[16].mxu0 %v8650_v6  ;;  %v10515_v6 = vld [vmem:[#allocation2 + $0x64] sm:$0xf]  ;;  %v5349_v24 = vshrl.u32 %v5174_v56, 16  ;;  %v5352_v4 = vshll.u32 %v5174_v56, 16  ;;  %v10533_v49 = vsel %vm10012_vm15, %v7066_v40, %v2804_v18  ;;  %v10537_v19 = vsel %vm10012_vm15, %v2806_v55, %v2807_v31 }
 0x303   : > { %8017 = vmatprep.mubr.bf16.mxu0 %v8651_v26  ;;  %v5270_v26 = vrot.slane %v5269_v44, 4  ;;  %v5358_v57 = vshll.u32 %v10515_v6, 16  ;;  %v5362_v9 = vshrl.u32 %v10515_v6, 16  ;;  %v8653_v44 = vld [vmem:[#allocation2 + $0x9c] sm:$0xff]   ;;  %v5318_v29 = vrot.slane %v5317_v39, 4 }
 0x304   : > { %7814 = vmatmul.mubr.bf16.gmra.mrb[48].mxu1 %v11363_v58  ;;  %v5341_v7 = vor.u32 %v5340_v11, %v10518_v51  ;;  %v5299_v56 = vsel %vm9791_vm12, %v5294_v38, %v5298_v22  ;;  %v5308_v5 = vrot.slane %v5307_v45, 4  ;;  %v5322_v15 = vrot.slane %v5320_v52, 5  ;;  %v10554_v38 = vld [vmem:[#allocation2 + $0x68] sm:$0x1]  ;;  %v10558_v45 = vld [vmem:[#allocation2 + $0x70] sm:$0xf] }
 0x305   : > { %7817 = vmatprep.mubr.bf16.mxu1 %v11364_v14  ;;  %v5275_v16 = vsel %vm9791_vm12, %v5270_v26, %v10490_v21  ;;  %v5331_v40 = vor.u32 %v5330_v59, %v5327_v62  ;;  %v5344_v18 = vshll.u32 %v10529_v17, 16  ;;  %v10546_v31 = vrot.slane %v5358_v57, 5 }
 0x306   : > { %v5364_v55 = vrot.slane %v5362_v9, 4  ;;  %v5265_v39 = vsel %vm9791_vm12, %v5260_v41, %v10472_v8  ;;  %v5289_v21 = vsel %vm9791_vm12, %v5284_v50, %v10479_v3  ;;  %v5351_v22 = vrot.slane %v5349_v24, 4 }
 0x307   : > { %v5354_v11 = vrot.slane %v5352_v4, 5  ;;  %v5323_v58 = vsel %vm9791_vm12, %v5318_v29, %v5322_v15  ;;  %v5342_v26 = vrot.slane %v5341_v7, 4  ;;  %v5373_v52 = vshrl.u32 %v5177_v20, 16  ;;  %v8657_v7 = vld [vmem:[#allocation2 + $0xc0] sm:$0xff]  }
 0x308   : > { %v5376_v14 = vshll.u32 %v5177_v20, 16  ;;  %v11365_v62 = vcombine.low %v10331_v0, %v10337_v30  ;;  %v10563_v41 = vcombine.low %v5241_v12, %v5251_v46  ;;  %v10565_v8 = vcombine.low %v5265_v39, %v5275_v16  ;;  %v5180_v12 = vld [vmem:[#allocation2 + $0x78] sm:$0xf]  ;;  %v10578_v46 = vld [vmem:[#allocation2 + $0x7c] sm:$0xf] }
 0x309   : > { %v10569_v59 = vcombine.low %v5289_v21, %v5299_v56  ;;  %v11366_v57 = vcombine.low %v10355_v37, %v10341_v25  ;;  %v5313_v9 = vsel %vm9791_vm12, %v5308_v5, %v10497_v63  ;;  %v5332_v50 = vrot.slane %v5331_v40, 4  ;;  %v10584_v25 = vld [vmem:[#allocation2 + $0x88] sm:$0xf]  ;;  %v8656_v37 = vld [vmem:[#allocation2 + $0xb4] sm:$0xff]  }
 0x30a   : > { %8018 = vmatmul.mubr.bf16.gmra.mrb[20].mxu0 %v8653_v44  ;;  %v5346_v0 = vrot.slane %v5344_v18, 5  ;;  %v5365_v30 = vor.u32 %v5364_v55, %v10546_v31  ;;  %v10580_v24 = vcombine.low %v5313_v9, %v5323_v58  ;;  %v5355_v4 = vor.u32 %v5354_v11, %v5351_v22  ;;  %v5183_v18 = vld [vmem:[#allocation2 + $0x84] sm:$0xf]  ;;  %v10594_v21 = vld [vmem:[#allocation2 + $0x74] sm:$0x1] }
 0x30b   : > { %8021 = vmatprep.mubr.bf16.mxu0 %v8654_v23  ;;  %v5368_v44 = vshll.u32 %v10554_v38, 16  ;;  %v5382_v29 = vshll.u32 %v10558_v45, 16  ;;  %v5375_v23 = vrot.slane %v5373_v52, 4  ;;  %v5378_v16 = vrot.slane %v5376_v14, 5 }
 0x30c   : > { %7818 = vmatmul.mubr.bf16.gmra.mrb[52].mxu1 %v11365_v62  ;;  %v5347_v63 = vsel %vm9791_vm12, %v5342_v26, %v5346_v0  ;;  %v5386_v56 = vshrl.u32 %v10558_v45, 16  ;;  %v5397_v5 = vshrl.u32 %v5180_v12, 16  ;;  %v5400_v15 = vshll.u32 %v5180_v12, 16  ;;  %v5186_v62 = vld [vmem:[#allocation2 + $0x90] sm:$0xf] }
 0x30d   : > { %7821 = vmatprep.mubr.bf16.mxu1 %v11366_v57  ;;  %v5406_v20 = vshll.u32 %v10578_v46, 16  ;;  %v5410_v40 = vshrl.u32 %v10578_v46, 16  ;;  %v5337_v55 = vsel %vm9791_vm12, %v5332_v50, %v10518_v51  ;;  %v5366_v39 = vrot.slane %v5365_v30, 4  ;;  %v10602_v51 = vld [vmem:[#allocation2 + $0x94] sm:$0xf] }
 0x30e   : > { %v5430_v22 = vshll.u32 %v10584_v25, 16  ;;  %v5434_v11 = vshrl.u32 %v10584_v25, 16  ;;  %v10598_v58 = vcombine.low %v5337_v55, %v5347_v63  ;;  %v5356_v26 = vrot.slane %v5355_v4, 4 }
 0x30f   : > { %v5370_v52 = vrot.slane %v5368_v44, 5  ;;  %v10600_v14 = vrot.slane %v5382_v29, 5  ;;  %v5379_v57 = vor.u32 %v5378_v16, %v5375_v23  ;;  %v5388_v9 = vrot.slane %v5386_v56, 4  ;;  %v10615_v23 = vld [vmem:[#allocation2 + $0x80] sm:$0x1] }
 0x310   : > { %v5421_v0 = vshrl.u32 %v5183_v18, 16  ;;  %v5424_v12 = vshll.u32 %v5183_v18, 16  ;;  %v11367_v50 = vcombine.low %v10382_v35, %v10361_v43  ;;  %v5399_v30 = vrot.slane %v5397_v5, 4  ;;  %v10619_v35 = vld [vmem:[#allocation2 + $0x8c] sm:$0x1] }
 0x311   : > { %v5412_v63 = vrot.slane %v5410_v40, 4  ;;  %v11368_v4 = vcombine.low %v10386_v61, %v10370_v10  ;;  %v5371_v44 = vsel %vm9791_vm12, %v5366_v39, %v5370_v52  ;;  %v5392_v29 = vshll.u32 %v10594_v21, 16  ;;  %v8659_v10 = vld [vmem:[#allocation2 + $0xcc] sm:$0xff]  }
 0x312   : > { %8022 = vmatmul.mubr.bf16.gmra.mrb[24].mxu0 %v8656_v37  ;;  %v5402_v37 = vrot.slane %v5400_v15, 5  ;;  %v10617_v16 = vrot.slane %v5430_v22, 5  ;;  %v5436_v43 = vrot.slane %v5434_v11, 4  ;;  %v5445_v56 = vshrl.u32 %v5186_v62, 16 }
 0x313   : > { %8025 = vmatprep.mubr.bf16.mxu0 %v8657_v7  ;;  %v10607_v7 = vrot.slane %v5406_v20, 5  ;;  %v5448_v5 = vshll.u32 %v5186_v62, 16  ;;  %v5454_v15 = vshll.u32 %v10602_v51, 16  ;;  %v5458_v20 = vshrl.u32 %v10602_v51, 16  ;;  %v10631_v62 = vld [vmem:[#allocation2 + $0xa0] sm:$0xf] }
 0x314   : > { %7822 = vmatmul.mubr.bf16.gmra.mrb[56].mxu1 %v11367_v50  ;;  %v5361_v61 = vsel %vm9791_vm12, %v5356_v26, %v10546_v31  ;;  %v10626_v40 = vrot.slane %v5379_v57, 4  ;;  %v5423_v18 = vrot.slane %v5421_v0, 4  ;;  %v5426_v55 = vrot.slane %v5424_v12, 5  ;;  %11369 = vst [vmem:[#allocation33_spill] sm:$0xff] %v10631_v62  ;;  %v5189_v57 = vld [vmem:[#allocation2 + $0x9c] sm:$0xf] }
 0x315   : > { %7825 = vmatprep.mubr.bf16.mxu1 %v11368_v4  ;;  %v5389_v39 = vor.u32 %v5388_v9, %v10600_v14  ;;  %v5403_v22 = vor.u32 %v5402_v37, %v5399_v30  ;;  %v5413_v11 = vor.u32 %v5412_v63, %v10607_v7  ;;  %v5416_v52 = vshll.u32 %v10615_v23, 16  ;;  %v10642_v37 = vld [vmem:[#allocation2 + $0xac] sm:$0xf] }
 0x316   : > { %v10633_v50 = vcombine.low %v5361_v61, %v5371_v44  ;;  %v10635_v4 = vrot.slane %v5392_v29, 5  ;;  %v5437_v31 = vor.u32 %v5436_v43, %v10617_v16  ;;  %v5440_v26 = vshll.u32 %v10619_v35, 16 }
 0x317   : > { %v5447_v9 = vrot.slane %v5445_v56, 4  ;;  %v5450_v0 = vrot.slane %v5448_v5, 5  ;;  %v10640_v12 = vrot.slane %v5454_v15, 5  ;;  %v5460_v30 = vrot.slane %v5458_v20, 4 }
 0x318   : > { %v5385_v63 = vsel %vm9791_vm12, %v10626_v40, %v10600_v14  ;;  %v5427_v44 = vor.u32 %v5426_v55, %v5423_v18  ;;  %v5478_v29 = vshll.u32 %v10631_v62, 16  ;;  %v5482_v43 = vshrl.u32 %v10631_v62, 16  ;;  %v5192_v18 = vld [vmem:[#allocation2 + $0xa8] sm:$0xf] }
 0x319   : > { %v5390_v56 = vrot.slane %v5389_v39, 4  ;;  %v5404_v5 = vrot.slane %v5403_v22, 4  ;;  %v5414_v15 = vrot.slane %v5413_v11, 4  ;;  %v5418_v20 = vrot.slane %v5416_v52, 5  ;;  %v10661_v39 = vld [vmem:[#allocation2 + $0xa4] sm:$0x1] }
 0x31a   : > { %8026 = vmatmul.mubr.bf16.gmra.mrb[28].mxu0 %v8659_v10  ;;  %v10653_v10 = vld [vmem:[#allocation2 + $0x98] sm:$0x1]  ;;  %v11371_v61 = vcombine.low %v10409_v48, %v10403_v60  ;;  %v5438_v14 = vrot.slane %v5437_v31, 4  ;;  %v5469_v40 = vshrl.u32 %v5189_v57, 16  ;;  %v5502_v55 = vshll.u32 %v10642_v37, 16  ;;  %v8661_v11 = vld [vmem:[#allocation11 + $0x208] sm:$0xff]  }
 0x31b   : > { %8045 = vmatprep.mubr.bf16.mxu0 %v10456_v54  ;;  %v11370_v54 = vcombine.low %v10393_v27, %v10399_v1  ;;  %v5506_v3 = vshrl.u32 %v10642_v37, 16  ;;  %v5442_v62 = vrot.slane %v5440_v26, 5  ;;  %v5451_v27 = vor.u32 %v5450_v0, %v5447_v9 }
 0x31c   : > { %v5461_v1 = vor.u32 %v5460_v30, %v10640_v12  ;;  %v5472_v22 = vshll.u32 %v5189_v57, 16  ;;  %v5428_v52 = vrot.slane %v5427_v44, 4  ;;  %v10664_v60 = vrot.slane %v5478_v29, 5 }
 0x31d   : > { %7826 = vmatmul.mubr.bf16.gmra.mrb[60].mxu1 %v11370_v54  ;;  %v5464_v54 = vshll.u32 %v10653_v10, 16  ;;  %v5484_v48 = vrot.slane %v5482_v43, 4  ;;  %v5395_v31 = vsel %vm9791_vm12, %v5390_v56, %v10635_v4  ;;  %v5419_v26 = vsel %vm9791_vm12, %v5414_v15, %v5418_v20  ;;  %v10678_v43 = vld [vmem:[#allocation2 + $0xb8] sm:$0xf] }
 0x31e   : > { %7829 = vmatprep.mubr.bf16.mxu1 %v11371_v61  ;;  %v5493_v9 = vshrl.u32 %v5192_v18, 16  ;;  %v5496_v0 = vshll.u32 %v5192_v18, 16  ;;  %v5443_v57 = vsel %vm9791_vm12, %v5438_v14, %v5442_v62  ;;  %v10674_v30 = vrot.slane %v5469_v40, 4  ;;  %v8662_v62 = vld [vmem:[#allocation11 + $0x210] sm:$0xff]   ;;  %v10698_v61 = vld [vmem:[#allocation2 + $0xb0] sm:$0x1] }
 0x31f   : > { %v10676_v44 = vrot.slane %v5502_v55, 5  ;;  %v5508_v29 = vrot.slane %v5506_v3, 4  ;;  %v10682_v4 = vrot.slane %v5451_v27, 4  ;;  %v10684_v56 = vrot.slane %v5461_v1, 4  ;;  %v10707_v55 = vld [vmem:[#allocation2 + $0xb4] sm:$0xf] }
 0x320   : > { %v10686_v15 = vrot.slane %v5472_v22, 5  ;;  %v5409_v3 = vsel %vm9791_vm12, %v5404_v5, %v10607_v7  ;;  %v10695_v20 = vrot.slane %v5464_v54, 5  ;;  %v11372_v14 = vcombine.low %v10441_v32, %v10424_v53  ;;  %v10721_v22 = vld [vmem:[#allocation2 + $0xc0] sm:$0xf] }
 0x321   : > { %v10703_v40 = vrot.slane %v5493_v9, 4  ;;  %v10705_v18 = vrot.slane %v5496_v0, 5  ;;  %v5526_v7 = vshll.u32 %v10678_v43, 16  ;;  %v11373_v5 = vcombine.low %v10445_v47, %v10428_v2  ;;  %v5915_v9 = vld [vmem:[#allocation2 + $0x54] sm:$0xe] }
 0x322   : > { %8046 = vmatmul.mubr.bf16.vlgmr.msra.gmra.mrb[0].mxu0 %v10563_v41  ;;  %v5488_v41 = vshll.u32 %v10661_v39, 16  ;;  %v10714_v27 = vcombine.low %v5385_v63, %v5395_v31  ;;  %v10716_v1 = vcombine.low %v5409_v3, %v5419_v26  ;;  %v5509_v32 = vor.u32 %v5508_v29, %v10676_v44  ;;  %v5914_v31 = vld [vmem:[#allocation2 + $0x48] sm:$0xe]  ;;  %v8663_v26 = vld [vmem:[#allocation11 + $0x218] sm:$0xff]  }
 0x323   : > { %8078 = vmatpush3.bf16.msra.mxu0 %v10470_v13  ;;  %8049 = vmatprep.mubr.bf16.mxu0 %v10565_v8  ;;  %v5433_v13 = vsel %vm9791_vm12, %v5428_v52, %v10617_v16  ;;  %v5485_v8 = vor.u32 %v5484_v48, %v10664_v60  ;;  %v5530_v16 = vshrl.u32 %v10678_v43, 16  ;;  %v10723_v52 = vld [vmem:[#allocation2 + $0xc4] sm:$0xf]  ;;  %v5913_v48 = vld [vmem:[#allocation2 + $0x3c] sm:$0xe]  ;;  %v10744_v3 = vrot.slane %v5526_v7, 5 }
 0x324   : > { %8079 = vmatprep.subr.bf16.mxu0 %v8661_v11  ;;  %v10718_v53 = vcombine.low %v5433_v13, %v5443_v57  ;;  %v10735_v63 = vrot.slane %v5488_v41, 5  ;;  %v5997_v41 = vrot.slane %v10437_v42, 5  ;;  %v6004_v0 = vrot.slane %v10462_v33, 5  ;;  %v8664_v42 = vld [vmem:[#allocation11 + $0x220] sm:$0xff]  }
 0x325   : > { %7830 = vmatmul.mubr.bf16.gmra.mrb[64].mxu1 %v11372_v14  ;;  %v10746_v13 = vrot.slane %v5530_v16, 4  ;;  %v10750_v14 = vrot.slane %v5509_v32, 4  ;;  %v11374_v16 = vld [vmem:[#allocation29_spill] sm:$0xff]  ;;  %v7231_v47 = vrot.slane %v5914_v31, 9  ;;  %v6007_v33 = vrot.slane %v10508_v36, 5 }
 0x326   : > { %7833 = vmatprep.mubr.bf16.mxu1 %v11373_v5  ;;  %v7230_v5 = vrot.slane %v5913_v48, 9  ;;  %v5999_v57 = vrot.slane %v5997_v41, 4  ;;  %v6000_v29 = vrot.slane %v11374_v16, 5  ;;  %v6006_v48 = vrot.slane %v6004_v0, 4 }
 0x327   : > { %8080 = vmatpush3.bf16.msra.mxu0 %v8661_v11  ;;  %v10737_v11 = vrot.slane %v5485_v8, 4  ;;  %v5916_v8 = vld [vmem:[#allocation2 + $0x60] sm:$0xe]  ;;  %v10772_v31 = vsel %vm10012_vm15, %v7231_v47, %v6004_v0  ;;  %v7232_v16 = vrot.slane %v5915_v9, 9  ;;  %v5919_v47 = vld [vmem:[#allocation2 + $0x84] sm:$0xe] }
 0x328   : > { %8081 = vmatprep.subr.bf16.mxu0 %v8662_v62  ;;  %v10760_v32 = vsel %vm10012_vm15, %v7230_v5, %v5997_v41  ;;  %v5917_v5 = vld [vmem:[#allocation2 + $0x6c] sm:$0xe]  ;;  %v10779_v7 = vsel %vm10012_vm15, %v6006_v48, %v6007_v33  ;;  %v7233_v9 = vrot.slane %v5916_v8, 9  ;;  %v6032_v8 = vrot.slane %v10578_v46, 5 }
 0x329   : > { %v7234_v33 = vrot.slane %v5917_v5, 9 }
 0x32a   : > { %8050 = vmatmul.mubr.bf16.gmra.mrb[4].mxu0 %v10569_v59  ;;  %v11376_v59 = vld [vmem:[#allocation32_spill] sm:$0xff] }
 0x32b   : > { %8053 = vmatprep.mubr.bf16.mxu0 %v10580_v24  ;;  %8082 = vmatpush3.bf16.msra.mxu0 %v8662_v62  ;;  %v11375_v24 = vcombine.low %v10533_v49, %v10537_v19  ;;  %v10768_v62 = vsel %vm10012_vm15, %v5999_v57, %v6000_v29  ;;  %v6011_v41 = vrot.slane %v11376_v59, 5  ;;  %v6014_v49 = vrot.slane %v10529_v17, 5  ;;  %v5918_v29 = vld [vmem:[#allocation2 + $0x78] sm:$0xe]  ;;  %v8665_v59 = vld [vmem:[#allocation11 + $0x228] sm:$0xff]  }
 0x32c   : > { %8083 = vmatprep.subr.bf16.mxu0 %v8663_v26  ;;  %v6018_v19 = vrot.slane %v10515_v6, 5  ;;  %v6021_v57 = vrot.slane %v10554_v38, 5  ;;  %v6025_v17 = vrot.slane %v10558_v45, 5  ;;  %v6028_v38 = vrot.slane %v10594_v21, 5 }
 0x32d   : > { %7834 = vmatmul.mubr.bf16.gmra.mrb[68].mxu1 %v11375_v24  ;;  %v6013_v0 = vrot.slane %v6011_v41, 4  ;;  %v10788_v24 = vsel %vm10012_vm15, %v7232_v16, %v6011_v41  ;;  %v7235_v5 = vrot.slane %v5918_v29, 9  ;;  %v5921_v29 = vld [vmem:[#allocation2 + $0x9c] sm:$0xe] }
 0x32e   : > { %v6020_v48 = vrot.slane %v6018_v19, 4  ;;  %v6027_v41 = vrot.slane %v6025_v17, 4  ;;  %v10813_v46 = vsel %vm10012_vm15, %v7234_v33, %v6025_v17  ;;  %v6042_v33 = vrot.slane %v10619_v35, 5  ;;  %v8667_v35 = vld [vmem:[#allocation11 + $0x238] sm:$0xff]  }
 0x32f   : > { %8084 = vmatpush3.bf16.msra.mxu0 %v8663_v26  ;;  %v10793_v6 = vsel %vm10012_vm15, %v6013_v0, %v6014_v49  ;;  %v10797_v26 = vsel %vm10012_vm15, %v7233_v9, %v6018_v19  ;;  %v6035_v49 = vrot.slane %v10615_v23, 5  ;;  %v5920_v19 = vld [vmem:[#allocation2 + $0x90] sm:$0xe]  ;;  %v8666_v0 = vld [vmem:[#allocation11 + $0x230] sm:$0xff]   ;;  %v6046_v17 = vrot.slane %v10602_v51, 5 }
 0x330   : > { %8085 = vmatprep.subr.bf16.mxu0 %v8664_v42  ;;  %v10806_v45 = vsel %vm10012_vm15, %v6020_v48, %v6021_v57  ;;  %v10818_v9 = vsel %vm10012_vm15, %v6027_v41, %v6028_v38  ;;  %v6039_v57 = vrot.slane %v10584_v25, 5  ;;  %v7237_v41 = vrot.slane %v5920_v19, 9  ;;  %v5922_v25 = vld [vmem:[#allocation2 + $0xa8] sm:$0xe]  ;;  %v5924_v38 = vld [vmem:[#allocation2 + $0xc0] sm:$0xe] }
 0x331   : > { %v6048_v48 = vrot.slane %v6046_v17, 4  ;;  %v11394_v34 = vcombine.low %v10813_v46, %v10818_v9  ;;  %v8671_v46 = vld [vmem:[#allocation12 + $0x18] sm:$0xff]   ;;  %v8672_v9 = vld [vmem:[#allocation12 + $0x20] sm:$0xff]  }
 0x332   : > { %8054 = vmatmul.mubr.bf16.gmra.mrb[8].mxu0 %v10598_v58  ;;  %v6034_v58 = vrot.slane %v6032_v8, 4  ;;  %v10847_v19 = vsel %vm10012_vm15, %v7237_v41, %v6046_v17  ;;  %v6063_v41 = vrot.slane %v10698_v61, 5 }
 0x333   : > { %8057 = vmatprep.mubr.bf16.mxu0 %v10633_v50  ;;  %8086 = vmatpush3.bf16.msra.mxu0 %v8664_v42  ;;  %v10822_v50 = vsel %vm10012_vm15, %v7235_v5, %v6032_v8  ;;  %v7236_v42 = vrot.slane %v5919_v47, 9  ;;  %v6041_v8 = vrot.slane %v6039_v57, 4  ;;  %v6049_v47 = vrot.slane %v10653_v10, 5 }
 0x334   : > { %8087 = vmatprep.subr.bf16.mxu0 %v8665_v59  ;;  %v10829_v23 = vsel %vm10012_vm15, %v6034_v58, %v6035_v49  ;;  %v7238_v58 = vrot.slane %v5921_v29, 9  ;;  %v11377_v49 = vld [vmem:[#allocation33_spill] sm:$0xff]  ;;  %v6056_v10 = vrot.slane %v10661_v39, 5  ;;  %v5925_v29 = vld [vmem:[#allocation2 + $0xcc] sm:$0xe] }
 0x335   : > { %v10838_v5 = vsel %vm10012_vm15, %v7236_v42, %v6039_v57  ;;  %v6053_v21 = vrot.slane %v11377_v49, 5  ;;  %v10843_v51 = vsel %vm10012_vm15, %v6041_v8, %v6042_v33  ;;  %v5923_v42 = vld [vmem:[#allocation2 + $0xb4] sm:$0xe]  ;;  %v10851_v57 = vld [vmem:[#allocation2 + $0xbc] sm:$0x1]  ;;  %v10857_v49 = vsel %vm10012_vm15, %v6048_v48, %v6049_v47 }
 0x336   : > { %v7239_v8 = vrot.slane %v5922_v25, 9  ;;  %v10868_v48 = vld [vmem:[#allocation2 + $0xc8] sm:$0x1]  ;;  %v10870_v47 = vld [vmem:[#allocation2 + $0xd4] sm:$0x1]  ;;  %v7240_v25 = vrot.slane %v5923_v42, 9 }
 0x337   : > { %8088 = vmatpush3.bf16.msra.mxu0 %v8665_v59  ;;  %v6060_v59 = vrot.slane %v10642_v37, 5  ;;  %v6055_v33 = vrot.slane %v6053_v21, 4  ;;  %v10864_v37 = vsel %vm10012_vm15, %v7238_v58, %v6053_v21  ;;  %v6067_v58 = vrot.slane %v10678_v43, 5 }
 0x338   : > { %8089 = vmatprep.subr.bf16.mxu0 %v8666_v0  ;;  %v6070_v17 = vrot.slane %v10851_v57, 5  ;;  %v7241_v42 = vrot.slane %v5924_v38, 9  ;;  %v7242_v16 = vrot.slane %v5925_v29, 9  ;;  %v6077_v36 = vrot.slane %v10868_v48, 5 }
 0x339   : > { %v6062_v39 = vrot.slane %v6060_v59, 4  ;;  %v10878_v21 = vsel %vm10012_vm15, %v7239_v8, %v6060_v59  ;;  %v6069_v8 = vrot.slane %v6067_v58, 4 }
 0x33a   : > { %8058 = vmatmul.mubr.bf16.gmra.mrb[12].mxu0 %v10714_v27  ;;  %v10874_v27 = vsel %vm10012_vm15, %v6055_v33, %v6056_v10  ;;  %v6074_v10 = vrot.slane %v10723_v52, 5  ;;  %v5202_v33 = vld [vmem:[#allocation2 + $0xd0] sm:$0xf] }
 0x33b   : > { %8061 = vmatprep.mubr.bf16.mxu0 %v10716_v1  ;;  %8090 = vmatpush3.bf16.msra.mxu0 %v8666_v0  ;;  %v10885_v0 = vsel %vm10012_vm15, %v6062_v39, %v6063_v41  ;;  %v6081_v54 = vrot.slane %v5202_v33, 5  ;;  %v6084_v1 = vrot.slane %v10870_v47, 5  ;;  %v5544_v39 = vshll.u32 %v10721_v22, 16 }
 0x33c   : > { %8091 = vmatprep.subr.bf16.mxu0 %v8667_v35  ;;  %v6076_v43 = vrot.slane %v6074_v10, 4  ;;  %v10896_v41 = vsel %vm10012_vm15, %v7240_v25, %v6067_v58  ;;  %v10900_v2 = vsel %vm10012_vm15, %v6069_v8, %v6070_v17  ;;  %v10904_v38 = vsel %vm10012_vm15, %v7241_v42, %v6074_v10 }
 0x33d   : > { %v7256_v29 = vcombine.low %v10896_v41, %v10900_v2  ;;  %v6083_v25 = vrot.slane %v6081_v54, 4  ;;  %v11378_v17 = vsel %vm9791_vm12, %v10684_v56, %v10695_v20  ;;  %v11379_v58 = vsel %vm9791_vm12, %v10682_v4, %v10640_v12 }
 0x33e   : > { %v10910_v59 = vsel %vm10012_vm15, %v6076_v43, %v6077_v36  ;;  %v7213_v10 = vcombine.low %v11379_v58, %v11378_v17  ;;  %v11380_v36 = vor.u32 %v10686_v15, %v10674_v30  ;;  %v11381_v42 = vshll.u32 %v10698_v61, 16  ;;  %v5201_v15 = vld [vmem:[#allocation2 + $0xcc] sm:$0xf] }
 0x33f   : > { %8092 = vmatpush3.bf16.msra.mxu0 %v8667_v35  ;;  %v10914_v35 = vsel %vm10012_vm15, %v7242_v16, %v6081_v54  ;;  %v5491_v56 = vsel %vm9791_vm12, %v10737_v11, %v10735_v63  ;;  %v11382_v12 = vshll.u32 %v10723_v52, 16  ;;  %v11383_v20 = vshrl.u32 %v10723_v52, 16 }
 0x340   : > { %v5476_v8 = vrot.slane %v11380_v36, 4  ;;  %v5514_v16 = vrot.slane %v11381_v42, 5  ;;  %v10944_v61 = vsel %vm10012_vm15, %v6083_v25, %v6084_v1  ;;  %v11385_v17 = vshrl.u32 %v10707_v55, 16 }
 0x341   : > { %v5552_v4 = vrot.slane %v11382_v12, 5  ;;  %v5556_v30 = vrot.slane %v11383_v20, 4  ;;  %v11386_v63 = vshll.u32 %v10707_v55, 16  ;;  %v5533_v1 = vor.u32 %v10746_v13, %v10744_v3 }
 0x342   : > { %8062 = vmatmul.mubr.bf16.gmra.mrb[16].mxu0 %v10718_v53  ;;  %v11384_v53 = vor.u32 %v10705_v18, %v10703_v40  ;;  %v5519_v58 = vrot.slane %v11385_v17, 4  ;;  %v5515_v36 = vsel %vm9791_vm12, %v10750_v14, %v5514_v16  ;;  %v11387_v25 = vshrl.u32 %v10721_v22, 16 }
 0x343   : > { %8065 = vmatprep.mubr.bf16.mxu0 %v7213_v10  ;;  %v5522_v11 = vrot.slane %v11386_v63, 5  ;;  %v5546_v18 = vrot.slane %v5544_v39, 5  ;;  %v5565_v10 = vshrl.u32 %v5201_v15, 16  ;;  %v5568_v42 = vshll.u32 %v5201_v15, 16 }
 0x344   : > { %v5500_v43 = vrot.slane %v11384_v53, 4  ;;  %v5543_v40 = vrot.slane %v11387_v25, 4  ;;  %v5574_v12 = vshll.u32 %v5202_v33, 16  ;;  %v5578_v20 = vshrl.u32 %v5202_v33, 16 }
 0x345   : > { %v5481_v55 = vsel %vm9791_vm12, %v5476_v8, %v10664_v60  ;;  %v5557_v53 = vor.u32 %v5556_v30, %v5552_v4  ;;  %v5523_v16 = vor.u32 %v5522_v11, %v5519_v58  ;;  %v5536_v13 = vshll.u32 %v10851_v57, 16  ;;  %v8728_v11 = vld [vmem:[#allocation2 + $0x1c] sm:$0xf] }
 0x346   : > { %v7214_v17 = vcombine.low %v5481_v55, %v5491_v56  ;;  %v5505_v14 = vsel %vm9791_vm12, %v5500_v43, %v10676_v44  ;;  %v5534_v63 = vrot.slane %v5533_v1, 4  ;;  %v5547_v39 = vor.u32 %v5546_v18, %v5543_v40 }
 0x347   : > { %v7215_v22 = vcombine.low %v5505_v14, %v5515_v36  ;;  %v5560_v15 = vshll.u32 %v10868_v48, 16  ;;  %v5567_v25 = vrot.slane %v5565_v10, 4  ;;  %v5570_v33 = vrot.slane %v5568_v42, 5 }
 0x348   : > { %v5576_v52 = vrot.slane %v5574_v12, 5  ;;  %v5580_v54 = vrot.slane %v5578_v20, 4  ;;  %v5558_v60 = vrot.slane %v5557_v53, 4  ;;  %v5524_v8 = vrot.slane %v5523_v16, 4  ;;  %v8729_v53 = vld [vmem:[#allocation2 + $0x20] sm:$0x1] }
 0x349   : > { %v5538_v56 = vrot.slane %v5536_v13, 5  ;;  %v5548_v30 = vrot.slane %v5547_v39, 4  ;;  %v5562_v55 = vrot.slane %v5560_v15, 5  ;;  %v5571_v57 = vor.u32 %v5570_v33, %v5567_v25  ;;  %v8730_v16 = vld [vmem:[#allocation2 + $0x28] sm:$0xf] }
 0x34a   : > { %8066 = vmatmul.mubr.bf16.gmra.mrb[20].mxu0 %v7214_v17  ;;  %v5581_v43 = vor.u32 %v5580_v54, %v5576_v52  ;;  %v5584_v58 = vshll.u32 %v10870_v47, 16  ;;  %v5976_v36 = vrot.slane %v8728_v11, 5  ;;  %v5529_v1 = vsel %vm9791_vm12, %v5524_v8, %v10744_v3  ;;  %v5910_v47 = vld [vmem:[#allocation2 + $0x18] sm:$0xe]  ;;  %v5911_v8 = vld [vmem:[#allocation2 + $0x24] sm:$0xe] }
 0x34b   : > { %8069 = vmatprep.mubr.bf16.mxu0 %v7215_v22  ;;  %v5539_v44 = vsel %vm9791_vm12, %v5534_v63, %v5538_v56  ;;  %v5563_v48 = vsel %vm9791_vm12, %v5558_v60, %v5562_v55  ;;  %v5553_v18 = vsel %vm9791_vm12, %v5548_v30, %v5552_v4  ;;  %v5572_v42 = vrot.slane %v5571_v57, 4  ;;  %v11388_v63 = vld [vmem:[#allocation30_spill] sm:$0xff]  ;;  %v5912_v30 = vld [vmem:[#allocation2 + $0x30] sm:$0xe]  ;;  %v11389_v55 = vld [vmem:[#allocation31_spill] sm:$0xff] }
 0x34c   : > { %v7216_v40 = vcombine.low %v5529_v1, %v5539_v44  ;;  %v7217_v10 = vcombine.low %v5553_v18, %v5563_v48  ;;  %v5582_v12 = vrot.slane %v5581_v43, 4  ;;  %v5586_v20 = vrot.slane %v5584_v58, 5 }
 0x34d   : > { %v5978_v54 = vrot.slane %v5976_v36, 4  ;;  %v5979_v17 = vrot.slane %v8729_v53, 5  ;;  %v5577_v14 = vsel %vm9791_vm12, %v5572_v42, %v5576_v52  ;;  %v5983_v13 = vrot.slane %v8730_v16, 5 }
 0x34e   : > { %v5587_v3 = vsel %vm9791_vm12, %v5582_v12, %v5586_v20  ;;  %v7227_v22 = vrot.slane %v5910_v47, 9  ;;  %v5990_v39 = vrot.slane %v11388_v63, 5  ;;  %v5986_v56 = vrot.slane %v8731_v28, 5 }
 0x34f   : > { %v5980_v4 = vsel %vm10012_vm15, %v5978_v54, %v5979_v17  ;;  %v7218_v15 = vcombine.low %v5577_v14, %v5587_v3  ;;  %v5985_v60 = vrot.slane %v5983_v13, 4  ;;  %v5993_v44 = vrot.slane %v11389_v55, 5 }
 0x350   : > { %v5977_v25 = vsel %vm10012_vm15, %v7227_v22, %v5976_v36  ;;  %v5992_v52 = vrot.slane %v5990_v39, 4  ;;  %v7228_v57 = vrot.slane %v5911_v8, 9  ;;  %v7229_v58 = vrot.slane %v5912_v30, 9 }
 0x351   : > { %v7243_v33 = vcombine.low %v5977_v25, %v5980_v4  ;;  %v5987_v43 = vsel %vm10012_vm15, %v5985_v60, %v5986_v56  ;;  %v11390_v18 = vcombine.low %v10760_v32, %v10768_v62  ;;  %v11392_v42 = vcombine.low %v10788_v24, %v10793_v6  ;;  %v8669_v24 = vld [vmem:[#allocation12 + $0x8] sm:$0xff]   ;;  %v8670_v6 = vld [vmem:[#allocation12 + $0x10] sm:$0xff]  }
 0x352   : > { %8070 = vmatmul.mubr.bf16.gmra.mrb[24].mxu0 %v7216_v40  ;;  %v5994_v48 = vsel %vm10012_vm15, %v5992_v52, %v5993_v44  ;;  %v5984_v11 = vsel %vm10012_vm15, %v7228_v57, %v5983_v13  ;;  %v5991_v1 = vsel %vm10012_vm15, %v7229_v58, %v5990_v39  ;;  %v11393_v12 = vcombine.low %v10797_v26, %v10806_v45 }
 0x353   : > { %8073 = vmatprep.mubr.bf16.mxu0 %v7217_v10  ;;  %v7244_v36 = vcombine.low %v5984_v11, %v5987_v43  ;;  %v7245_v40 = vcombine.low %v5991_v1, %v5994_v48  ;;  %v11391_v10 = vcombine.low %v10772_v31, %v10779_v7  ;;  %v11395_v32 = vcombine.low %v10822_v50, %v10829_v23  ;;  %v8668_v31 = vld [vmem:[#allocation12] sm:$0xff]   ;;  %v8673_v23 = vld [vmem:[#allocation12 + $0x28] sm:$0xff]  }
 0x354   : > { %v11396_v7 = vcombine.low %v10838_v5, %v10843_v51  ;;  %v11397_v62 = vcombine.low %v10847_v19, %v10857_v49  ;;  %8125 = vmatprep.subr.bf16.mxu1 %v8668_v31  ;;  %v11398_v26 = vcombine.low %v10864_v37, %v10874_v27  ;;  %v11399_v45 = vcombine.low %v10878_v21, %v10885_v0  ;;  %v8674_v5 = vld [vmem:[#allocation12 + $0x30] sm:$0xff]   ;;  %v8675_v19 = vld [vmem:[#allocation12 + $0x38] sm:$0xff]  }
 0x355   : > { %8126 = vmatpush3.bf16.msra.mxu1 %v8668_v31  ;;  %v11400_v50 = vcombine.low %v10904_v38, %v10910_v59  ;;  %v11401_v51 = vcombine.low %v10914_v35, %v10944_v61 }
 0x356   : > { %8127 = vmatprep.subr.bf16.mxu1 %v8669_v24 }
 0x359   : > { %8128 = vmatpush3.bf16.msra.mxu1 %v8669_v24 }
 0x35a   : > { %8074 = vmatmul.mubr.bf16.gmra.mrb[28].mxu0 %v7218_v15  ;;  %8129 = vmatprep.subr.bf16.mxu1 %v8670_v6 }
 0x35b   : > { %8093 = vmatprep.mubr.bf16.mxu0 %v7243_v33 }
 0x35d   : > { %8130 = vmatpush3.bf16.msra.mxu1 %v8670_v6 }
 0x35e   : > { %8131 = vmatprep.subr.bf16.mxu1 %v8671_v46 }
 0x361   : > { %8132 = vmatpush3.bf16.msra.mxu1 %v8671_v46 }
 0x362   : > { %8094 = vmatmul.mubr.bf16.vlgmr.msra.gmra.mrb[0].mxu0 %v7244_v36  ;;  %8133 = vmatprep.subr.bf16.mxu1 %v8672_v9 }
 0x363   : > { %8097 = vmatprep.mubr.bf16.mxu0 %v7245_v40 }
 0x365   : > { %8134 = vmatpush3.bf16.msra.mxu1 %v8672_v9 }
 0x366   : > { %8135 = vmatprep.subr.bf16.mxu1 %v8673_v23 }
 0x369   : > { %8136 = vmatpush3.bf16.msra.mxu1 %v8673_v23 }
 0x36a   : > { %8098 = vmatmul.mubr.bf16.gmra.mrb[4].mxu0 %v11390_v18  ;;  %8137 = vmatprep.subr.bf16.mxu1 %v8674_v5 }
 0x36b   : > { %8101 = vmatprep.mubr.bf16.mxu0 %v11391_v10 }
 0x36d   : > { %8138 = vmatpush3.bf16.msra.mxu1 %v8674_v5 }
 0x36e   : > { %8139 = vmatprep.subr.bf16.mxu1 %v8675_v19 }
 0x371   : > { %8140 = vmatpush3.bf16.msra.mxu1 %v8675_v19 }
 0x372   : > { %8102 = vmatmul.mubr.bf16.gmra.mrb[8].mxu0 %v11392_v42 }
 0x373   : > { %8105 = vmatprep.mubr.bf16.mxu0 %v11393_v12 }
 0x37a   : > { %8106 = vmatmul.mubr.bf16.gmra.mrb[12].mxu0 %v11394_v34 }
 0x37b   : > { %8109 = vmatprep.mubr.bf16.mxu0 %v11395_v32 }
 0x382   : > { %8110 = vmatmul.mubr.bf16.gmra.mrb[16].mxu0 %v11396_v7 }
 0x383   : > { %8113 = vmatprep.mubr.bf16.mxu0 %v11397_v62 }
 0x38a   : > { %8114 = vmatmul.mubr.bf16.gmra.mrb[20].mxu0 %v11398_v26 }
 0x38b   : > { %8117 = vmatprep.mubr.bf16.mxu0 %v11399_v45 }
 0x392   : > { %8118 = vmatmul.mubr.bf16.gmra.mrb[24].mxu0 %v7256_v29 }
 0x393   : > { %8121 = vmatprep.mubr.bf16.mxu0 %v11400_v50 }
 0x39a   : > { %8122 = vmatmul.mubr.bf16.gmra.mrb[28].mxu0 %v11401_v51 }
 0x3c7   : > { %v7807_v2 = vpop.f32.mrb[40].mxu1 }
 0x3c8   : > { %v2972_v49 = vpop.f32.mrb[41].mxu1 }
 0x3c9   : > { %v7808_v37 = vpop.f32.mrb[42].mxu1 }
 0x3ca   : > { %v2975_v27 = vpop.f32.mrb[43].mxu1 }
 0x3cf   : > { %v7811_v21 = vpop.f32.mrb[44].mxu1 }
 0x3d0   : > { %v2988_v0 = vpop.f32.mrb[45].mxu1 }
 0x3d1   : > { %v7812_v59 = vpop.f32.mrb[46].mxu1 }
 0x3d2   : > { %v2991_v41 = vpop.f32.mrb[47].mxu1 }
 0x3d7   : > { %v7815_v38 = vpop.f32.mrb[48].mxu1 }
 0x3d8   : > { %v3004_v29 = vpop.f32.mrb[49].mxu1 }
 0x3d9   : > { %v7816_v20 = vpop.f32.mrb[50].mxu1 }
 0x3da   : > { %v3007_v54 = vpop.f32.mrb[51].mxu1 }
 0x3df   : > { %v7819_v35 = vpop.f32.mrb[52].mxu1 }
 0x3e0   : > { %v3020_v61 = vpop.f32.mrb[53].mxu1 }
 0x3e1   : > { %v7820_v47 = vpop.f32.mrb[54].mxu1 }
 0x3e2   : > { %v3023_v53 = vpop.f32.mrb[55].mxu1 }
 0x3e7   : > { %v11037_v17 = vpop.f32.mrb[56].mxu1 }
 0x3e8   : > { %v11039_v14 = vpop.f32.mrb[57].mxu1 }
 0x3e9   : > { %v11041_v3 = vpop.f32.mrb[58].mxu1 }
 0x3ea   : > { %v11043_v16 = vpop.f32.mrb[59].mxu1 }
 0x3f0   : > { %v11045_v13 = vpop.f32.mrb[60].mxu1 }
 0x3f1   : > { %v11047_v22 = vpop.f32.mrb[61].mxu1 }
 0x3f2   : > { %v11049_v4 = vpop.f32.mrb[62].mxu1 }
 0x3f3   : > { %v11051_v63 = vpop.f32.mrb[63].mxu1 }
 0x3f8   : > { %v11053_v39 = vpop.f32.mrb[64].mxu1 }
 0x3f9   : > { %v11055_v15 = vpop.f32.mrb[65].mxu1 }
 0x3fa   : > { %v11057_v25 = vpop.f32.mrb[66].mxu1 }
 0x3fb   : > { %v11059_v33 = vpop.f32.mrb[67].mxu1 }
 0x400   : > { %v11061_v60 = vpop.f32.mrb[68].mxu1 }
 0x401   : > { %v11063_v8 = vpop.f32.mrb[69].mxu1 }
 0x402   : > { %v11065_v52 = vpop.f32.mrb[70].mxu1 }
 0x403   : > { %v11067_v28 = vpop.f32.mrb[71].mxu1 }
 0x435   : > { %v8095_v56 = vpop.f32.mrb[0].mxu0 }
 0x436   : > { %v8173_v30 = vadd.f32 %v8095_v56, %v7807_v2  ;;  %v6249_v55 = vpop.f32.mrb[1].mxu0 }
 0x437   : > { %v8174_v44 = vadd.f32 %v6249_v55, %v2972_v49  ;;  %v8096_v57 = vpop.f32.mrb[2].mxu0 }
 0x438   : > { %v8175_v43 = vadd.f32 %v8096_v57, %v7808_v37  ;;  %v6252_v58 = vpop.f32.mrb[3].mxu0 }
 0x439   : > { %v8176_v48 = vadd.f32 %v6252_v58, %v2975_v27 }
 0x43a   : > { %v6409_v11 = vpack.c.bf16 %v8175_v43, %v8173_v30 }
 0x43b   : > { %v6408_v36 = vpack.c.bf16 %v8176_v48, %v8174_v44 }
 0x43d   : > { %v8099_v1 = vpop.f32.mrb[4].mxu0  ;;  %8141 = vmatprep.mubr.bf16.mxu1 %v6408_v36 }
 0x43e   : > { %v8177_v40 = vadd.f32 %v8099_v1, %v7811_v21  ;;  %v6265_v18 = vpop.f32.mrb[5].mxu0  ;;  %8142 = vmatmul.mubr.bf16.vlgmr.msra.gmra.mrb[72].mxu1 %v6409_v11 }
 0x43f   : > { %v8178_v10 = vadd.f32 %v6265_v18, %v2988_v0  ;;  %v8100_v42 = vpop.f32.mrb[6].mxu0 }
 0x440   : > { %v8179_v12 = vadd.f32 %v8100_v42, %v7812_v59  ;;  %v6268_v34 = vpop.f32.mrb[7].mxu0 }
 0x441   : > { %v8180_v32 = vadd.f32 %v6268_v34, %v2991_v41 }
 0x442   : > { %v6411_v7 = vpack.c.bf16 %v8179_v12, %v8177_v40 }
 0x443   : > { %v6410_v62 = vpack.c.bf16 %v8180_v32, %v8178_v10 }
 0x445   : > { %v8103_v31 = vpop.f32.mrb[8].mxu0  ;;  %8145 = vmatprep.mubr.bf16.mxu1 %v6410_v62 }
 0x446   : > { %v8181_v24 = vadd.f32 %v8103_v31, %v7815_v38  ;;  %v6281_v6 = vpop.f32.mrb[9].mxu0  ;;  %8146 = vmatmul.mubr.bf16.gmra.mrb[76].mxu1 %v6411_v7 }
 0x447   : > { %v8182_v26 = vadd.f32 %v6281_v6, %v3004_v29  ;;  %v8104_v45 = vpop.f32.mrb[10].mxu0 }
 0x448   : > { %v8183_v46 = vadd.f32 %v8104_v45, %v7816_v20  ;;  %v6284_v9 = vpop.f32.mrb[11].mxu0 }
 0x449   : > { %v8184_v50 = vadd.f32 %v6284_v9, %v3007_v54  ;;  %v8733_v9 = vld [vmem:[%s9400_s8] sm:$0xff] }
 0x44a   : > { %v6413_v23 = vpack.c.bf16 %v8183_v46, %v8181_v24 }
 0x44b   : > { %v6412_v5 = vpack.c.bf16 %v8184_v50, %v8182_v26 }
 0x44d   : > { %v8107_v51 = vpop.f32.mrb[12].mxu0  ;;  %8149 = vmatprep.mubr.bf16.mxu1 %v6412_v5 }
 0x44e   : > { %v8185_v19 = vadd.f32 %v8107_v51, %v7819_v35  ;;  %v6297_v2 = vpop.f32.mrb[13].mxu0  ;;  %8150 = vmatmul.mubr.bf16.gmra.mrb[80].mxu1 %v6413_v23  ;;  %v8734_v51 = vld [vmem:[%s9400_s8 + $0x18] sm:$0xff] }
 0x44f   : > { %v8186_v49 = vadd.f32 %v6297_v2, %v3020_v61  ;;  %v8108_v37 = vpop.f32.mrb[14].mxu0 }
 0x450   : > { %v8187_v27 = vadd.f32 %v8108_v37, %v7820_v47  ;;  %v6300_v21 = vpop.f32.mrb[15].mxu0 }
 0x451   : > { %v8188_v0 = vadd.f32 %v6300_v21, %v3023_v53 }
 0x452   : > { %v6415_v59 = vpack.c.bf16 %v8187_v27, %v8185_v19 }
 0x453   : > { %v6414_v41 = vpack.c.bf16 %v8188_v0, %v8186_v49  ;;  %v8735_v49 = vld [vmem:[%s9400_s8 + $0x8] sm:$0xff] }
 0x455   : > { %v8111_v38 = vpop.f32.mrb[16].mxu0  ;;  %8153 = vmatprep.mubr.bf16.mxu1 %v6414_v41 }
 0x456   : > { %v8189_v29 = vadd.f32 %v8111_v38, %v11037_v17  ;;  %v6313_v20 = vpop.f32.mrb[17].mxu0  ;;  %8154 = vmatmul.mubr.bf16.gmra.mrb[84].mxu1 %v6415_v59 }
 0x457   : > { %v8190_v54 = vadd.f32 %v6313_v20, %v11039_v14  ;;  %v8112_v56 = vpop.f32.mrb[18].mxu0  ;;  %v8736_v20 = vld [vmem:[%s9400_s8 + $0x30] sm:$0xff] }
 0x458   : > { %v8191_v35 = vadd.f32 %v8112_v56, %v11041_v3  ;;  %v6316_v30 = vpop.f32.mrb[19].mxu0 }
 0x459   : > { %v8192_v61 = vadd.f32 %v6316_v30, %v11043_v16  ;;  %v8737_v30 = vld [vmem:[%s9400_s8 + $0x20] sm:$0xff] }
 0x45a   : > { %v6417_v55 = vpack.c.bf16 %v8191_v35, %v8189_v29 }
 0x45b   : > { %v6416_v47 = vpack.c.bf16 %v8192_v61, %v8190_v54 }
 0x45d   : > { %v8115_v44 = vpop.f32.mrb[20].mxu0  ;;  %8157 = vmatprep.mubr.bf16.mxu1 %v6416_v47 }
 0x45e   : > { %v8193_v53 = vadd.f32 %v8115_v44, %v11045_v13  ;;  %v6329_v57 = vpop.f32.mrb[21].mxu0  ;;  %8158 = vmatmul.mubr.bf16.gmra.mrb[88].mxu1 %v6417_v55  ;;  %v8738_v44 = vld [vmem:[%s9400_s8 + $0x38] sm:$0xff] }
 0x45f   : > { %v8194_v17 = vadd.f32 %v6329_v57, %v11047_v22  ;;  %v8116_v43 = vpop.f32.mrb[22].mxu0 }
 0x460   : > { %v8195_v58 = vadd.f32 %v8116_v43, %v11049_v4  ;;  %v6332_v14 = vpop.f32.mrb[23].mxu0 }
 0x461   : > { %v8196_v48 = vadd.f32 %v6332_v14, %v11051_v63 }
 0x462   : > { %v6419_v3 = vpack.c.bf16 %v8195_v58, %v8193_v53 }
 0x463   : > { %v6418_v11 = vpack.c.bf16 %v8196_v48, %v8194_v17  ;;  %v8739_v17 = vld [vmem:[%s9400_s8 + $0x28] sm:$0xff] }
 0x465   : > { %v8119_v36 = vpop.f32.mrb[24].mxu0  ;;  %8161 = vmatprep.mubr.bf16.mxu1 %v6418_v11 }
 0x466   : > { %v8197_v16 = vadd.f32 %v8119_v36, %v11053_v39  ;;  %v6345_v1 = vpop.f32.mrb[25].mxu0  ;;  %8162 = vmatmul.mubr.bf16.gmra.mrb[92].mxu1 %v6419_v3 }
 0x467   : > { %v8198_v13 = vadd.f32 %v6345_v1, %v11055_v15  ;;  %v8120_v40 = vpop.f32.mrb[26].mxu0  ;;  %v8740_v1 = vld [vmem:[%s9400_s8 + $0x50] sm:$0xff] }
 0x468   : > { %v8199_v18 = vadd.f32 %v8120_v40, %v11057_v25  ;;  %v6348_v22 = vpop.f32.mrb[27].mxu0 }
 0x469   : > { %v8200_v10 = vadd.f32 %v6348_v22, %v11059_v33  ;;  %v8741_v22 = vld [vmem:[%s9400_s8 + $0x40] sm:$0xff] }
 0x46a   : > { %v6421_v4 = vpack.c.bf16 %v8199_v18, %v8197_v16 }
 0x46b   : > { %v6420_v42 = vpack.c.bf16 %v8200_v10, %v8198_v13 }
 0x46d   : > { %v8123_v12 = vpop.f32.mrb[28].mxu0  ;;  %8165 = vmatprep.mubr.bf16.mxu1 %v6420_v42 }
 0x46e   : > { %v8201_v63 = vadd.f32 %v8123_v12, %v11061_v60  ;;  %v6361_v34 = vpop.f32.mrb[29].mxu0  ;;  %8166 = vmatmul.mubr.bf16.gmra.mrb[96].mxu1 %v6421_v4  ;;  %v11088_v60 = vld [vmem:[%s11402_s18] ss:$0 sm:$0xff]  ;;  %v8742_v12 = vld [vmem:[%s9400_s8 + $0x58] sm:$0xff] }
 0x46f   : > { %v8202_v39 = vadd.f32 %v6361_v34, %v11063_v8  ;;  %v8124_v32 = vpop.f32.mrb[30].mxu0 }
 0x470   : > { %v8203_v15 = vadd.f32 %v8124_v32, %v11065_v52  ;;  %v6364_v7 = vpop.f32.mrb[31].mxu0 }
 0x471   : > { %v8204_v25 = vadd.f32 %v6364_v7, %v11067_v28  ;;  %v8732_v28 = vld [vmem:[%s9400_s8 + $0x10] sm:$0xff] }
 0x472   : > { %v6423_v62 = vpack.c.bf16 %v8203_v15, %v8201_v63 }
 0x473   : > { %v6422_v33 = vpack.c.bf16 %v8204_v25, %v8202_v39  ;;  %v8743_v39 = vld [vmem:[%s9400_s8 + $0x48] sm:$0xff] }
 0x475   : > { %8169 = vmatprep.mubr.bf16.mxu1 %v6422_v33 }
 0x476   : > { %8170 = vmatmul.mubr.bf16.gmra.mrb[100].mxu1 %v6423_v62 }
 0x511   : > { %v8143_v31 = vpop.f32.mrb[72].mxu1 }
 0x512   : > { %v6538_v8 = vadd.f32 %v8143_v31, %v11088_v60  ;;  %v6529_v24 = vpop.f32.mrb[73].mxu1 }
 0x513   : > { %v6530_v52 = vadd.f32 %v11088_v60, %v6529_v24  ;;  %v8144_v6 = vpop.f32.mrb[74].mxu1  ;;  %v8744_v24 = vld [vmem:[%s9400_s8 + $0x70] sm:$0xff] }
 0x514   : > { %v6658_v26 = vadd.f32 %v8732_v28, %v6538_v8  ;;  %v6541_v45 = vadd.f32 %v8144_v6, %v11088_v60  ;;  %v6532_v46 = vpop.f32.mrb[75].mxu1 }
 0x515   : > { %v6656_v50 = vadd.f32 %v8733_v9, %v6530_v52  ;;  %v6533_v23 = vadd.f32 %v11088_v60, %v6532_v46 }
 0x516   : > { %v6690_v5 = vmax.f32 %v6658_v26, 0.0  ;;  %v6659_v19 = vadd.f32 %v8734_v51, %v6541_v45  ;;  %v8745_v26 = vld [vmem:[%s9400_s8 + $0x60] sm:$0xff]  ;;  %v8747_v51 = vld [vmem:[%s9400_s8 + $0x68] sm:$0xff] }
 0x517   : > { %v6688_v2 = vmax.f32 %v6656_v50, 0.0  ;;  %v6657_v37 = vadd.f32 %v8735_v49, %v6533_v23  ;;  %v8746_v50 = vld [vmem:[%s9400_s8 + $0x78] sm:$0xff] }
 0x518   : > { %6722 = vst [vmem:[%s11100_s1 + $0x10] sm:$0xff] %v6690_v5  ;;  %v6691_v27 = vmax.f32 %v6659_v19, 0.0 }
 0x519   : > { %6720 = vst [vmem:[%s11100_s1] sm:$0xff] %v6688_v2  ;;  %v6689_v21 = vmax.f32 %v6657_v37, 0.0  ;;  %v8147_v0 = vpop.f32.mrb[76].mxu1 }
 0x51a   : > { %6723 = vst [vmem:[%s11100_s1 + $0x18] sm:$0xff] %v6691_v27  ;;  %v6554_v59 = vadd.f32 %v8147_v0, %v11088_v60  ;;  %v6545_v41 = vpop.f32.mrb[77].mxu1 }
 0x51b   : > { %6721 = vst [vmem:[%s11100_s1 + $0x8] sm:$0xff] %v6689_v21  ;;  %v6546_v38 = vadd.f32 %v11088_v60, %v6545_v41  ;;  %v8148_v29 = vpop.f32.mrb[78].mxu1  ;;  %v8748_v41 = vld [vmem:[%s9400_s8 + $0x90] sm:$0xff] }
 0x51c   : > { %v6662_v54 = vadd.f32 %v8736_v20, %v6554_v59  ;;  %v6557_v56 = vadd.f32 %v8148_v29, %v11088_v60  ;;  %v6548_v35 = vpop.f32.mrb[79].mxu1 }
 0x51d   : > { %v6660_v61 = vadd.f32 %v8737_v30, %v6546_v38  ;;  %v6549_v55 = vadd.f32 %v11088_v60, %v6548_v35 }
 0x51e   : > { %v6694_v47 = vmax.f32 %v6662_v54, 0.0  ;;  %v6663_v53 = vadd.f32 %v8738_v44, %v6557_v56  ;;  %v8749_v54 = vld [vmem:[%s9400_s8 + $0x80] sm:$0xff]  ;;  %v8751_v44 = vld [vmem:[%s9400_s8 + $0x88] sm:$0xff] }
 0x51f   : > { %v6692_v57 = vmax.f32 %v6660_v61, 0.0  ;;  %v6661_v43 = vadd.f32 %v8739_v17, %v6549_v55  ;;  %v8750_v61 = vld [vmem:[%s9400_s8 + $0x98] sm:$0xff] }
 0x520   : > { %6726 = vst [vmem:[%s11100_s1 + $0x30] sm:$0xff] %v6694_v47  ;;  %v6695_v58 = vmax.f32 %v6663_v53, 0.0 }
 0x521   : > { %6724 = vst [vmem:[%s11100_s1 + $0x20] sm:$0xff] %v6692_v57  ;;  %v6693_v14 = vmax.f32 %v6661_v43, 0.0  ;;  %v8151_v48 = vpop.f32.mrb[80].mxu1 }
 0x522   : > { %6727 = vst [vmem:[%s11100_s1 + $0x38] sm:$0xff] %v6695_v58  ;;  %v6570_v3 = vadd.f32 %v8151_v48, %v11088_v60  ;;  %v6561_v11 = vpop.f32.mrb[81].mxu1 }
 0x523   : > { %6725 = vst [vmem:[%s11100_s1 + $0x28] sm:$0xff] %v6693_v14  ;;  %v6562_v36 = vadd.f32 %v11088_v60, %v6561_v11  ;;  %v8152_v16 = vpop.f32.mrb[82].mxu1  ;;  %v8752_v11 = vld [vmem:[%s9400_s8 + $0xb0] sm:$0xff] }
 0x524   : > { %v6666_v13 = vadd.f32 %v8740_v1, %v6570_v3  ;;  %v6573_v40 = vadd.f32 %v8152_v16, %v11088_v60  ;;  %v6564_v18 = vpop.f32.mrb[83].mxu1 }
 0x525   : > { %v6664_v10 = vadd.f32 %v8741_v22, %v6562_v36  ;;  %v6565_v4 = vadd.f32 %v11088_v60, %v6564_v18 }
 0x526   : > { %v6698_v42 = vmax.f32 %v6666_v13, 0.0  ;;  %v6667_v63 = vadd.f32 %v8742_v12, %v6573_v40  ;;  %v8753_v13 = vld [vmem:[%s9400_s8 + $0xa0] sm:$0xff]  ;;  %v8755_v12 = vld [vmem:[%s9400_s8 + $0xa8] sm:$0xff] }
 0x527   : > { %v6696_v34 = vmax.f32 %v6664_v10, 0.0  ;;  %v6665_v32 = vadd.f32 %v8743_v39, %v6565_v4  ;;  %v8754_v10 = vld [vmem:[%s9400_s8 + $0xb8] sm:$0xff] }
 0x528   : > { %6730 = vst [vmem:[%s11100_s1 + $0x50] sm:$0xff] %v6698_v42  ;;  %v6699_v15 = vmax.f32 %v6667_v63, 0.0 }
 0x529   : > { %6728 = vst [vmem:[%s11100_s1 + $0x40] sm:$0xff] %v6696_v34  ;;  %v6697_v7 = vmax.f32 %v6665_v32, 0.0  ;;  %v8155_v25 = vpop.f32.mrb[84].mxu1 }
 0x52a   : > { %6731 = vst [vmem:[%s11100_s1 + $0x58] sm:$0xff] %v6699_v15  ;;  %v6586_v62 = vadd.f32 %v8155_v25, %v11088_v60  ;;  %v6577_v33 = vpop.f32.mrb[85].mxu1 }
 0x52b   : > { %6729 = vst [vmem:[%s11100_s1 + $0x48] sm:$0xff] %v6697_v7  ;;  %v6578_v31 = vadd.f32 %v11088_v60, %v6577_v33  ;;  %v8156_v8 = vpop.f32.mrb[86].mxu1  ;;  %v8756_v33 = vld [vmem:[%s9400_s8 + $0xd0] sm:$0xff] }
 0x52c   : > { %v6670_v52 = vadd.f32 %v8744_v24, %v6586_v62  ;;  %v6589_v6 = vadd.f32 %v8156_v8, %v11088_v60  ;;  %v6580_v28 = vpop.f32.mrb[87].mxu1 }
 0x52d   : > { %v6668_v45 = vadd.f32 %v8745_v26, %v6578_v31  ;;  %v6581_v46 = vadd.f32 %v11088_v60, %v6580_v28 }
 0x52e   : > { %v6702_v9 = vmax.f32 %v6670_v52, 0.0  ;;  %v6671_v23 = vadd.f32 %v8746_v50, %v6589_v6  ;;  %v8757_v52 = vld [vmem:[%s9400_s8 + $0xc0] sm:$0xff]  ;;  %v8759_v50 = vld [vmem:[%s9400_s8 + $0xc8] sm:$0xff] }
 0x52f   : > { %v6700_v5 = vmax.f32 %v6668_v45, 0.0  ;;  %v6669_v19 = vadd.f32 %v8747_v51, %v6581_v46  ;;  %v8758_v45 = vld [vmem:[%s9400_s8 + $0xd8] sm:$0xff] }
 0x530   : > { %6734 = vst [vmem:[%s11100_s1 + $0x70] sm:$0xff] %v6702_v9  ;;  %v6703_v2 = vmax.f32 %v6671_v23, 0.0 }
 0x531   : > { %6732 = vst [vmem:[%s11100_s1 + $0x60] sm:$0xff] %v6700_v5  ;;  %v6701_v49 = vmax.f32 %v6669_v19, 0.0  ;;  %v8159_v37 = vpop.f32.mrb[88].mxu1 }
 0x532   : > { %6735 = vst [vmem:[%s11100_s1 + $0x78] sm:$0xff] %v6703_v2  ;;  %v6602_v27 = vadd.f32 %v8159_v37, %v11088_v60  ;;  %v6593_v21 = vpop.f32.mrb[89].mxu1 }
 0x533   : > { %6733 = vst [vmem:[%s11100_s1 + $0x68] sm:$0xff] %v6701_v49  ;;  %v6594_v0 = vadd.f32 %v11088_v60, %v6593_v21  ;;  %v8160_v59 = vpop.f32.mrb[90].mxu1  ;;  %v8760_v21 = vld [vmem:[%s9400_s8 + $0xf0] sm:$0xff] }
 0x534   : > { %v6674_v38 = vadd.f32 %v8748_v41, %v6602_v27  ;;  %v6605_v29 = vadd.f32 %v8160_v59, %v11088_v60  ;;  %v6596_v20 = vpop.f32.mrb[91].mxu1 }
 0x535   : > { %v6672_v56 = vadd.f32 %v8749_v54, %v6594_v0  ;;  %v6597_v35 = vadd.f32 %v11088_v60, %v6596_v20 }
 0x536   : > { %v6706_v30 = vmax.f32 %v6674_v38, 0.0  ;;  %v6675_v55 = vadd.f32 %v8750_v61, %v6605_v29  ;;  %v8761_v38 = vld [vmem:[%s9400_s8 + $0xe0] sm:$0xff]  ;;  %v8763_v61 = vld [vmem:[%s9400_s8 + $0xe8] sm:$0xff] }
 0x537   : > { %v6704_v47 = vmax.f32 %v6672_v56, 0.0  ;;  %v6673_v53 = vadd.f32 %v8751_v44, %v6597_v35  ;;  %v8762_v56 = vld [vmem:[%s9400_s8 + $0xf8] sm:$0xff]  ;;  %s9046_s8 = smov [#allocation14]  }
 0x538   : > { %6738 = vst [vmem:[%s11100_s1 + $0x90] sm:$0xff] %v6706_v30  ;;  %v6707_v57 = vmax.f32 %v6675_v55, 0.0  ;;  %s8942_s9 = sshll.u32 %s9046_s8, 4  ;;  %s8943_s9 = int_to_ptr.vmem [resolvable:$false] %s8942_s9 }
 0x539   : > { %6736 = vst [vmem:[%s11100_s1 + $0x80] sm:$0xff] %v6704_v47  ;;  %v6705_v17 = vmax.f32 %v6673_v53, 0.0  ;;  %v8163_v43 = vpop.f32.mrb[92].mxu1  ;;  %s8944_s17 = scalar_lea.vmem %s8943_s9, 8192  ;;  %p8945_p13 = scmp.lt.s32.totalorder %s11194_s23, %s8943_s9 }
 0x53a   : > { %6739 = vst [vmem:[%s11100_s1 + $0x98] sm:$0xff] %v6707_v57  ;;  %v6618_v58 = vadd.f32 %v8163_v43, %v11088_v60  ;;  %v6609_v14 = vpop.f32.mrb[93].mxu1  ;;  %p8946_p5 = scmp.lt.s32.totalorder %s8944_s17, %s8938_s15 }
 0x53b   : > { %6737 = vst [vmem:[%s11100_s1 + $0x88] sm:$0xff] %v6705_v17  ;;  %v6610_v48 = vadd.f32 %v11088_v60, %v6609_v14  ;;  %v8164_v3 = vpop.f32.mrb[94].mxu1 }
 0x53c   : > { %v6678_v36 = vadd.f32 %v8752_v11, %v6618_v58  ;;  %v6621_v16 = vadd.f32 %v8164_v3, %v11088_v60  ;;  %v6612_v1 = vpop.f32.mrb[95].mxu1  ;;  %p8947_p3 = por %p8946_p5, %p8945_p13 }
 0x53d   : > { %v6676_v40 = vadd.f32 %v8753_v13, %v6610_v48  ;;  %v6613_v18 = vadd.f32 %v11088_v60, %v6612_v1 }
 0x53e   : > { %v6710_v22 = vmax.f32 %v6678_v36, 0.0  ;;  %v6679_v4 = vadd.f32 %v8754_v10, %v6621_v16  ;;  %p8948_p6 = pnand %p8947_p3, %p8941_p8 }
 0x53f   : > { %v6708_v42 = vmax.f32 %v6676_v40, 0.0  ;;  %v6677_v63 = vadd.f32 %v8755_v12, %v6613_v18 }
 0x540   : > { %6742 = vst [vmem:[%s11100_s1 + $0xb0] sm:$0xff] %v6710_v22  ;;  %v6711_v34 = vmax.f32 %v6679_v4, 0.0 }
 0x541   : > { %6740 = vst [vmem:[%s11100_s1 + $0xa0] sm:$0xff] %v6708_v42  ;;  %v6709_v39 = vmax.f32 %v6677_v63, 0.0  ;;  %v8167_v32 = vpop.f32.mrb[96].mxu1 }
 0x542   : > { %6743 = vst [vmem:[%s11100_s1 + $0xb8] sm:$0xff] %v6711_v34  ;;  %v6634_v15 = vadd.f32 %v8167_v32, %v11088_v60  ;;  %v6625_v7 = vpop.f32.mrb[97].mxu1 }
 0x543   : > { %6741 = vst [vmem:[%s11100_s1 + $0xa8] sm:$0xff] %v6709_v39  ;;  %v6626_v25 = vadd.f32 %v11088_v60, %v6625_v7  ;;  %v8168_v62 = vpop.f32.mrb[98].mxu1 }
 0x544   : > { %v6682_v31 = vadd.f32 %v8756_v33, %v6634_v15  ;;  %v6637_v8 = vadd.f32 %v8168_v62, %v11088_v60  ;;  %v6628_v24 = vpop.f32.mrb[99].mxu1 }
 0x545   : > { %v6680_v6 = vadd.f32 %v8757_v52, %v6626_v25  ;;  %v6629_v28 = vadd.f32 %v11088_v60, %v6628_v24 }
 0x546   : > { %v6714_v26 = vmax.f32 %v6682_v31, 0.0  ;;  %v6683_v46 = vadd.f32 %v8758_v45, %v6637_v8 }
 0x547   : > { %v6712_v9 = vmax.f32 %v6680_v6, 0.0  ;;  %v6681_v23 = vadd.f32 %v8759_v50, %v6629_v28 }
 0x548   : > { %6746 = vst [vmem:[%s11100_s1 + $0xd0] sm:$0xff] %v6714_v26  ;;  %v6715_v5 = vmax.f32 %v6683_v46, 0.0 }
 0x549   : > { %6744 = vst [vmem:[%s11100_s1 + $0xc0] sm:$0xff] %v6712_v9  ;;  %v6713_v51 = vmax.f32 %v6681_v23, 0.0  ;;  %v8171_v19 = vpop.f32.mrb[100].mxu1 }
 0x54a   : > { %6747 = vst [vmem:[%s11100_s1 + $0xd8] sm:$0xff] %v6715_v5  ;;  %v6650_v2 = vadd.f32 %v8171_v19, %v11088_v60  ;;  %v6641_v49 = vpop.f32.mrb[101].mxu1 }
 0x54b   : > { %6745 = vst [vmem:[%s11100_s1 + $0xc8] sm:$0xff] %v6713_v51  ;;  %v6642_v37 = vadd.f32 %v11088_v60, %v6641_v49  ;;  %v8172_v27 = vpop.f32.mrb[102].mxu1 }
 0x54c   : > { %v6686_v0 = vadd.f32 %v8760_v21, %v6650_v2  ;;  %v6653_v59 = vadd.f32 %v8172_v27, %v11088_v60  ;;  %v6644_v41 = vpop.f32.mrb[103].mxu1 }
 0x54d   : > { %v6684_v29 = vadd.f32 %v8761_v38, %v6642_v37  ;;  %v6645_v20 = vadd.f32 %v11088_v60, %v6644_v41 }
 0x54e   : > { %v6718_v54 = vmax.f32 %v6686_v0, 0.0  ;;  %v6687_v35 = vadd.f32 %v8762_v56, %v6653_v59 }
 0x54f   : > { %v6716_v30 = vmax.f32 %v6684_v29, 0.0  ;;  %v6685_v55 = vadd.f32 %v8763_v61, %v6645_v20 }
 0x550   : > { %6750 = vst [vmem:[%s11100_s1 + $0xf0] sm:$0xff] %v6718_v54  ;;  %v6719_v47 = vmax.f32 %v6687_v35, 0.0 }
 0x551   : > { %6748 = vst [vmem:[%s11100_s1 + $0xe0] sm:$0xff] %v6716_v30  ;;  %v6717_v60 = vmax.f32 %v6685_v55, 0.0 }
 0x552   : > { %6751 = vst [vmem:[%s11100_s1 + $0xf8] sm:$0xff] %v6719_v47 }
 0x553   : > { %6749 = vst [vmem:[%s11100_s1 + $0xe8] sm:$0xff] %v6717_v60 }
 0x554   : > { %8951 = shalt.err (!%p8948_p6)
}
 0x555   : > { %s8952_s22 = scalar_lea.hbm %s11192_s13, 4096  ;;  %s8956_s11 = scalar_lea.hbm %s11405_s3, 8192 }
 0x556   : > { %p8953_p7 = scmp.ne.s32.totalorder %s11192_s13, %s8952_s22  ;;  %p8957_p4 = scmp.lt.u32.totalorder %s11192_s13, %s11405_s3 }
 0x557   : > { %p8958_p12 = scmp.lt.u32.totalorder %s8956_s11, %s8952_s22  ;;  %p8960_p11 = scmp.lt.u32.totalorder %s8952_s22, %s11192_s13 }
 0x558   : > { %p8954_p9 = pnand %p8953_p7, %p11406_p10 }
 0x559   : > { %p8959_p2 = por %p8958_p12, %p8957_p4 }
 0x55a   : > { %p8955_p0 = pneg %p8954_p9 }
 0x55b   : > { %p8961_p1 = por %p8960_p11, %p8959_p2 }
 0x55d   : > { %p8962_p8 = pnand %p8961_p1, %p8955_p0 }
 0x55f   : > { %8965 = shalt.err (!%p8962_p8)
}
 0x560   : > { %s9047_s20 = smov 128   ;;  %s9048_s29 = smov 8  }
 0x561   : > { %8447 = dma.vmem_to_hbm [thread:$0]  (%p11406_p10), %s11194_s23, 4096, %s11192_s13, %s6753_s16, %s9047_s20, %s9047_s20, %s9048_s29  }
 0x562 PF: > { %s11407_s21 = sld [smem:[#allocation20_spill]]  ;;  %s11408_s18 = sld [smem:[#allocation26_spill]] }
 0x563   : > { %s11409_s1 = sld [smem:[#allocation24_spill]] }
 0x568   : > { %s6784_s7 = sand.u32 1, %s11407_s21   ;;  %p11410_p13 = scmp.ne.s32.totalorder %s11408_s18, 0 }
 0x569   : > { %p11411_p5 = scmp.ge.s32.totalorder %s11409_s1, 2  ;;  %s6785_s10 = scalar_lea.sflag [#allocation5], %s6784_s7 }
 0x56b   : > { %p8470_p3 = pnand %p11411_p5, %p11410_p13 }
 0x56d   : > { %9007 = dma.done.wait (!%p8470_p3), %s6785_s10, 4096  }
 0x56e   : > { %9009 = vsyncadd (!%p8470_p3), %s6785_s10, 4294963200  ;;  %s29_s10 = sadd.s32 1, %s11409_s1   ;;  %s11412_s12 = sld [smem:[#allocation21_spill]] }
 0x56f   : > { %p26_p6 = scmp.ge.s32.totalorder %s29_s10, 4   ;;  %s11413_s29 = sld [smem:[#allocation28_spill]] }
 0x570   : > { %s11414_s30 = sld [smem:[#allocation23_spill]]  ;;  %s11415_s9 = sld [smem:[#allocation27_spill]] }
 0x571   : > { %s11416_s27 = smov %s9016_s28  ;;  %28 = sbr.rel (!%p26_p6) target bundleno = 15 (0xf), region = 144 }
 0x574   : > { %s11417_s28 = smov %s11412_s12 }
 0x578   :  { %6790 = vsyncpa [#allocation4], 1 }
 0x579   :  { %6792 = vsyncpa [#allocation4 + $0x1], 1 }
 0x57a   :  { %6793 = vsyncpa [#allocation7], 1 }
 0x57b   :  { %6795 = vsyncpa [#allocation7 + $0x1], 1 }
 0x57c   :  { %6796 = vsyncpa [#allocation10], 1 }
 0x57d   :  { %6797 = vsyncpa [#allocation13], 1 }
 0x57e   :  { %6798 = vsyncpa [#allocation5], 1 }
 0x57f   :  { %6800 = vsyncpa [#allocation5 + $0x1], 1 }

// kernel: tpu_custom_call.1
= control target key start
LH: loop header
LB: loop body
LE: loop exit
PB: predicated region body
PF: predicated region fallthrough
CT: control target
= control target key end

     0   :  { %s11246_s0 = inlined_call_operand.hbm [shape: f32[2,16,16,128], index: 0, kind: input, shape index: {}]   ;;  %s11247_s1 = inlined_call_operand.hbm [shape: f32[2,16,16,128], index: 1, kind: input, shape index: {}]   ;;  %s11248_s2 = inlined_call_operand.hbm [shape: f32[2,16,16,128], index: 2, kind: input, shape index: {}]   ;;  %s11249_s3 = inlined_call_operand.hbm [shape: bf16[128,128], index: 3, kind: input, shape index: {}]   ;;  %s11250_s4 = inlined_call_operand.vmem [shape: f32[1,128], index: 4, kind: input, shape index: {}]   ;;  %s11251_s5 = inlined_call_operand.hbm [shape: bf16[9,128,128], index: 5, kind: input, shape index: {}]   ;;  %s11252_s6 = inlined_call_operand.hbm [shape: bf16[128,128], index: 6, kind: input, shape index: {}]   ;;  %s11253_s7 = inlined_call_operand.vmem [shape: f32[1,128], index: 7, kind: input, shape index: {}]   ;;  %s11254_s8 = inlined_call_operand.hbm [shape: f32[2,16,16,128], index: 8, kind: output, shape index: {}]  }
   0x1   :  { %11295 = sst [smem:[#allocation34_spill]] %s11247_s1 }
   0x2   :  { %11296 = sst [smem:[#allocation35_spill]] %s11249_s3 }
   0x3   :  { %11297 = sst [smem:[#allocation36_spill]] %s11253_s7 }
   0x4   :  { %11298 = sst [smem:[#allocation37_spill]] %s11254_s8 }
   0x5   :  { %13 = vsyncpa [#allocation4], 0 }
   0x6   :  { %15 = vsyncpa [#allocation4 + $0x1], 0 }
   0x7   :  { %16 = vsyncpa [#allocation7], 0 }
   0x8   :  { %18 = vsyncpa [#allocation7 + $0x1], 0 }
   0x9   :  { %19 = vsyncpa [#allocation10], 0 }
   0xa   :  { %20 = vsyncpa [#allocation13], 0 }
   0xb   :  { %21 = vsyncpa [#allocation5], 0 }
   0xc   :  { %23 = vsyncpa [#allocation5 + $0x1], 0  ;;  %s9094_s27 = smov 0   ;;  %s9096_s28 = smov 0  }
   0xd   :  { %s9098_s29 = smov 0   ;;  %s9100_s30 = smov 0  }
   0xe   :  { %s9102_s9 = smov 0   ;;  %s9104_s10 = smov 0  }
   0xf LB: > { %11299 = sst [smem:[#allocation20_spill]] %s9012_s27  ;;  %s9125_s11 = sadd.s32 4294967295, %s9032_s10   ;;  %s9032_s10 = sphi %s9104_s10, %s29_s10   ;;  %s9028_s9 = sphi %s9102_s9, %s11415_s9   ;;  %s9024_s30 = sphi %s9100_s30, %s11414_s30   ;;  %s9020_s29 = sphi %s9098_s29, %s11413_s29   ;;  %s9016_s28 = sphi %s9096_s28, %s11417_s28   ;;  %s9012_s27 = sphi %s9094_s27, %s11416_s27  }
  0x10   : > { %11300 = sst [smem:[#allocation21_spill]] %s9020_s29  ;;  %s6935_s12 = sadd.s32 4294967294, %s9032_s10  }
  0x11   : > { %11301 = sst [smem:[#allocation22_spill]] %s9024_s30  ;;  %p57_p0 = scmp.ne.s32.totalorder %s9020_s29, %s9016_s28 }
  0x12   : > { %11302 = sst [smem:[#allocation23_spill]] %s9028_s9  ;;  %p58_p1 = scmp.eq.s32.totalorder %s9032_s10, 0 }
  0x13   : > { %11303 = sst [smem:[#allocation24_spill]] %s9032_s10  ;;  %p63_p2 = scmp.ne.s32.totalorder %s9016_s28, %s9012_s27 }
  0x14   : > { %p11257_p3 = scmp.eq.s32.totalorder %s9125_s11, 0  ;;  %p9134_p4 = por %p58_p1, %p57_p0 }
  0x15   : > { %p266_p5 = scmp.eq.s32.totalorder %s9125_s11, 1  ;;  %p272_p7 = scmp.eq.s32.totalorder %s6935_s12, 1 }
  0x16   : > { %p9141_p6 = por %p11257_p3, %p63_p2  ;;  %p6936_p9 = scmp.ge.s32.totalorder %s9032_s10, 1 }
  0x17   : > { %p9145_p8 = por %p266_p5, %p57_p0  ;;  %p9150_p10 = por %p272_p7, %p63_p2 }
  0x18   : > { %s11305_s14 = scalar_select %p9141_p6, 1, 0 }
  0x19   : > { %s11306_s15 = scalar_select %p9145_p8, 1, 0 }
  0x1a   : > { %s11308_s16 = scalar_select %p9150_p10, 1, 0 }
  0x1b   : > { %11307 = sst [smem:[#allocation25_spill]] %s11306_s15  ;;  %p279_p11 = scmp.lt.s32.totalorder %s9032_s10, 3 }
  0x1c   : > { %11309 = sst [smem:[#allocation26_spill]] %s11308_s16  ;;  %s9034_s18 = smov [#allocation9]  }
  0x1d   : > { %p9155_p12 = pnand %p6936_p9, %p279_p11  ;;  %s291_s19 = sshll.u32 %s9034_s18, 4  ;;  %s9159_s19 = int_to_ptr.vmem [resolvable:$true] %s291_s19 }
  0x1e   : > { %s41_s21 = sadd.s32 1, %s9028_s9  ;;  %s11313_s3 = sld [smem:[#allocation35_spill]] }
  0x1f   : > { %s11310_s17 = scalar_select %p9155_p12, 1, 0 }
  0x20   : > { %p8449_p13 = pneg %p9155_p12  ;;  %p9172_p2 = scmp.ge.s32.totalorder %s41_s21, 2 }
  0x22   : > { %p9166_p1 = pnand %p8449_p13, %p11257_p3 }
  0x24   : > { %s11311_s20 = scalar_select %p9166_p1, 1, 0 }
  0x25   : > { %s8764_s26 = scalar_lea.hbm %s11313_s3, 1024  ;;  %p9184_p7 = pneg %p9166_p1 }
  0x26   : > { %p8765_p5 = scmp.ne.s32.totalorder %s11313_s3, %s8764_s26  ;;  %p8771_p13 = scmp.lt.u32.totalorder %s8764_s26, %s11313_s3 }
  0x27   : > { %s11314_s16 = scalar_select %p9184_p7, 1, 0 }
  0x28   : > { %p8767_p9 = pnand %p9184_p7, %p8765_p5 }
  0x2a   : > { %p8768_p11 = pneg %p8767_p9 }
  0x2c   : > { %p8773_p0 = pnand %p8771_p13, %p8768_p11 }
  0x2e   : > { %8776 = shalt.err (!%p8773_p0)
}
  0x2f   : > { %s8777_s24 = scalar_lea.vmem %s9159_s19, 1024  ;;  %p8785_p6 = scmp.lt.s32.totalorder %s9159_s19, %s9159_s19 }
  0x30   : > { %p8778_p3 = scmp.ne.s32.totalorder %s9159_s19, %s8777_s24  ;;  %p8786_p12 = scmp.lt.s32.totalorder %s8777_s24, %s8777_s24 }
  0x32   : > { %p8780_p10 = pnand %p8778_p3, %p9184_p7  ;;  %p8787_p5 = por %p8786_p12, %p8785_p6 }
  0x34   : > { %p8781_p8 = pneg %p8780_p10 }
  0x36   : > { %p8788_p9 = pnand %p8787_p5, %p8781_p8 }
  0x38   : > { %8791 = shalt.err (!%p8788_p9)
}
  0x39   : > { %s11262_s25 = smov 64   ;;  %s11264_s27 = smov 4  }
  0x3a   : > { %8452 = dma.hbm_to_vmem [thread:$0]  (!%p9166_p1), %s11313_s3, 1024, %s9159_s19, [#allocation10], %s11262_s25, %s11262_s25, %s11264_s27  }
  0x3b   : > { %s11419_s21 = smov (%p9172_p2, %s41_s21), 0  ;;  %p8476_p3 = scmp.lt.s32.totalorder %s9032_s10, 2 }
  0x3c   : > { %11315 = sst [smem:[#allocation27_spill]] %s11419_s21  ;;  %s9214_s12 = sand.u32 1, %s9020_s29  }
  0x3d   : > { %s45_s18 = ssub.s32 %s9028_s9, %s11419_s21  ;;  %s9219_s24 = sshll.u32 %s9028_s9, 12 }
  0x3e   : > { %p48_p6 = scmp.eq.s32.totalorder %s45_s18, 0  ;;  %p9223_p8 = pnand %p8476_p3, %p9134_p4 }
  0x3f   : > { %s11317_s22 = sadd.s32 1, %s9020_s29  ;;  %s361_s23 = sand.u32 1, %s9032_s10  }
  0x40   : > { %s11316_s8 = scalar_select %p9223_p8, 1, 0 }
  0x41   : > { %s9230_s19 = scalar_select %p48_p6, %s9020_s29, %s11317_s22  }
  0x42   : > { %s6944_s26 = sshll.u32 %s9214_s12, 4  ;;  %s11319_s1 = sld [smem:[#allocation34_spill]] }
  0x43   : > { %11318 = sst [smem:[#allocation28_spill]] %s9230_s19  ;;  %s365_s13 = scalar_lea.vmem [#allocation6], %s6944_s26 }
  0x44   : > { %s378_s18 = sshll.u32 %s365_s13, 4  ;;  %s9242_s21 = scalar_lea.vmem [#allocation8], %s6944_s26  ;;  %s9240_s18 = int_to_ptr.vmem [resolvable:$true] %s378_s18 }
  0x45   : > { %s405_s22 = sshll.u32 %s9242_s21, 4  ;;  %s9245_s9 = scalar_lea.sflag [#allocation7], %s361_s23  ;;  %s9280_s22 = int_to_ptr.vmem [resolvable:$true] %s405_s22 }
  0x46   : > { %p9251_p10 = pneg %p9223_p8 }
  0x48   : > { %s9238_s3 = scalar_lea.hbm %s11319_s1, %s9219_s24  ;;  %s8797_s26 = scalar_lea.hbm %s11319_s1, 8192 }
  0x49   : > { %s8792_s19 = scalar_lea.hbm %s9238_s3, 256  ;;  %p8798_p2 = scmp.lt.u32.totalorder %s9238_s3, %s11319_s1 }
  0x4a   : > { %p8793_p4 = scmp.ne.s32.totalorder %s9238_s3, %s8792_s19  ;;  %p8799_p11 = scmp.lt.u32.totalorder %s8797_s26, %s8792_s19 }
  0x4b   : > { %s11320_s25 = scalar_select %p9251_p10, 1, 0 }
  0x4c   : > { %p8795_p12 = pnand %p9251_p10, %p8793_p4  ;;  %p8800_p13 = por %p8799_p11, %p8798_p2 }
  0x4d   : > { %p8801_p5 = scmp.lt.u32.totalorder %s8792_s19, %s9238_s3 }
  0x4e   : > { %p8796_p0 = pneg %p8795_p12 }
  0x4f   : > { %p8802_p9 = por %p8801_p5, %p8800_p13 }
  0x51   : > { %p8803_p3 = pnand %p8802_p9, %p8796_p0 }
  0x53   : > { %8806 = shalt.err (!%p8803_p3)
}
  0x54   : > { %s8807_s23 = scalar_lea.vmem %s9240_s18, 256  ;;  %s9037_s27 = smov [#allocation6]  }
  0x55   : > { %p8808_p6 = scmp.ne.s32.totalorder %s9240_s18, %s8807_s23  ;;  %s8812_s13 = sshll.u32 %s9037_s27, 4  ;;  %s8813_s13 = int_to_ptr.vmem [resolvable:$false] %s8812_s13 }
  0x56   : > { %s8814_s29 = scalar_lea.vmem %s8813_s13, 512  ;;  %p8815_p1 = scmp.lt.s32.totalorder %s9240_s18, %s8813_s13 }
  0x57   : > { %p8810_p4 = pnand %p8808_p6, %p9251_p10  ;;  %p8816_p7 = scmp.lt.s32.totalorder %s8814_s29, %s8807_s23 }
  0x59   : > { %p8811_p12 = pneg %p8810_p4  ;;  %p8817_p2 = por %p8816_p7, %p8815_p1 }
  0x5b   : > { %p8818_p11 = pnand %p8817_p2, %p8811_p12 }
  0x5d   : > { %8821 = shalt.err (!%p8818_p11)
}
  0x5e   : > { %s11279_s10 = smov 128   ;;  %s9039_s19 = smov 8  }
  0x5f   : > { %8465 = dma.hbm_to_vmem [thread:$0]  (!%p9223_p8), %s9238_s3, 256, %s9240_s18, %s9245_s9, %s11279_s10, %s11279_s10, %s9039_s19  }
  0x60   : > { %s9040_s26 = smov [#allocation11]   ;;  %s9041_s27 = smov [#allocation12]  }
  0x61   : > { %s307_s23 = sshll.u32 %s9040_s26, 4  ;;  %s320_s13 = sshll.u32 %s9041_s27, 4  ;;  %s308_s23 = int_to_ptr.vmem [resolvable:$true] %s307_s23  ;;  %s321_s13 = int_to_ptr.vmem [resolvable:$true] %s320_s13 }
  0x62   : > { %s8822_s15 = scalar_lea.hbm %s11251_s5, 9216  ;;  %p11321_p7 = scmp.ne.s32.totalorder %s11314_s16, 0 }
  0x63   : > { %p8823_p1 = scmp.ne.s32.totalorder %s11251_s5, %s8822_s15  ;;  %p8829_p5 = scmp.lt.u32.totalorder %s8822_s15, %s11251_s5 }
  0x65   : > { %p8825_p0 = pnand %p8823_p1, %p11321_p7 }
  0x67   : > { %p8826_p13 = pneg %p8825_p0 }
  0x69   : > { %p8831_p9 = pnand %p8829_p5, %p8826_p13 }
  0x6b   : > { %8834 = shalt.err (!%p8831_p9)
}
  0x6c   : > { %s8835_s18 = scalar_lea.vmem %s308_s23, 9216  ;;  %p8843_p12 = scmp.lt.s32.totalorder %s308_s23, %s308_s23 }
  0x6d   : > { %p8836_p3 = scmp.ne.s32.totalorder %s308_s23, %s8835_s18  ;;  %p8844_p2 = scmp.lt.s32.totalorder %s8835_s18, %s8835_s18 }
  0x6f   : > { %p8838_p6 = pnand %p8836_p3, %p11321_p7  ;;  %p8845_p11 = por %p8844_p2, %p8843_p12 }
  0x71   : > { %p8839_p4 = pneg %p8838_p6 }
  0x73   : > { %p8846_p8 = pnand %p8845_p11, %p8839_p4 }
  0x75   : > { %8849 = shalt.err (!%p8846_p8)
}
  0x76   : > { %p11322_p1 = scmp.ne.s32.totalorder %s11311_s20, 0  ;;  %s11323_s1 = smov 4  }
  0x77   : > { %s11324_s7 = smov 64   ;;  %s8850_s29 = scalar_lea.hbm %s11252_s6, 1024 }
  0x78   : > { %8455 = dma.hbm_to_vmem [thread:$0]  (!%p11322_p1), %s11251_s5, 9216, %s308_s23, [#allocation10], %s11324_s7, %s11324_s7, %s11323_s1  }
  0x79   : > { %p8851_p0 = scmp.ne.s32.totalorder %s11252_s6, %s8850_s29  ;;  %p8857_p5 = scmp.lt.u32.totalorder %s8850_s29, %s11252_s6 }
  0x7b   : > { %p8853_p8 = pnand %p8851_p0, %p11321_p7 }
  0x7d   : > { %p8854_p13 = pneg %p8853_p8 }
  0x7f   : > { %p8859_p9 = pnand %p8857_p5, %p8854_p13 }
  0x81   : > { %8862 = shalt.err (!%p8859_p9)
}
  0x82   : > { %s8863_s30 = scalar_lea.vmem %s321_s13, 1024  ;;  %p8871_p12 = scmp.lt.s32.totalorder %s321_s13, %s321_s13 }
  0x83   : > { %p8864_p3 = scmp.ne.s32.totalorder %s321_s13, %s8863_s30  ;;  %p8872_p2 = scmp.lt.s32.totalorder %s8863_s30, %s8863_s30 }
  0x85   : > { %p8866_p6 = pnand %p8864_p3, %p11321_p7  ;;  %p8873_p11 = por %p8872_p2, %p8871_p12 }
  0x87   : > { %p8867_p4 = pneg %p8866_p6 }
  0x89   : > { %p8874_p10 = pnand %p8873_p11, %p8867_p4 }
  0x8b   : > { %8877 = shalt.err (!%p8874_p10)
}
  0x8c   : > { %8458 = dma.hbm_to_vmem [thread:$0]  (!%p11322_p1), %s11252_s6, 1024, %s321_s13, [#allocation13], %s11324_s7, %s11324_s7, %s11323_s1  }
  0x8d   : > { %s6941_s16 = sshll.u32 %s9214_s12, 8  ;;  %s9329_s27 = scalar_lea.hbm %s11246_s0, %s9219_s24 }
  0x8e   : > { %s7284_s20 = sadd.s32 3840, %s9219_s24  ;;  %s341_s29 = scalar_lea.vmem [#allocation3], %s6941_s16 }
  0x8f   : > { %s351_s3 = sshll.u32 %s341_s29, 4  ;;  %s9335_s30 = scalar_lea.hbm %s11248_s2, %s7284_s20  ;;  %s9337_s3 = int_to_ptr.vmem [resolvable:$true] %s351_s3 }
  0x90   : > { %s338_s13 = scalar_lea.sflag [#allocation4], %s9214_s12  ;;  %s8878_s1 = scalar_lea.hbm %s9329_s27, 4096 }
  0x91   : > { %p8879_p10 = scmp.ne.s32.totalorder %s9329_s27, %s8878_s1  ;;  %p11325_p7 = scmp.ne.s32.totalorder %s11320_s25, 0 }
  0x92   : > { %s8883_s23 = scalar_lea.hbm %s11246_s0, 8192  ;;  %p8884_p8 = scmp.lt.u32.totalorder %s9329_s27, %s11246_s0 }
  0x93   : > { %p8881_p1 = pnand %p8879_p10, %p11325_p7  ;;  %p8885_p13 = scmp.lt.u32.totalorder %s8883_s23, %s8878_s1 }
  0x94   : > { %p8887_p9 = scmp.lt.u32.totalorder %s8878_s1, %s9329_s27 }
  0x95   : > { %p8882_p0 = pneg %p8881_p1  ;;  %p8886_p5 = por %p8885_p13, %p8884_p8 }
  0x97   : > { %p8888_p3 = por %p8887_p9, %p8886_p5 }
  0x99   : > { %p8889_p6 = pnand %p8888_p3, %p8882_p0 }
  0x9b   : > { %8892 = shalt.err (!%p8889_p6)
}
  0x9c   : > { %s8893_s15 = scalar_lea.vmem %s9337_s3, 4096  ;;  %s9042_s26 = smov [#allocation3]  }
  0x9d   : > { %p8894_p4 = scmp.ne.s32.totalorder %s9337_s3, %s8893_s15  ;;  %s8898_s20 = sshll.u32 %s9042_s26, 4  ;;  %s8899_s20 = int_to_ptr.vmem [resolvable:$false] %s8898_s20 }
  0x9e   : > { %s8900_s29 = scalar_lea.vmem %s8899_s20, 8192  ;;  %p8901_p11 = scmp.lt.s32.totalorder %s9337_s3, %s8899_s20 }
  0x9f   : > { %p8896_p12 = pnand %p8894_p4, %p11325_p7  ;;  %p8902_p10 = scmp.lt.s32.totalorder %s8900_s29, %s8893_s15 }
  0xa1   : > { %p8897_p2 = pneg %p8896_p12  ;;  %p8903_p1 = por %p8902_p10, %p8901_p11 }
  0xa3   : > { %p8904_p8 = pnand %p8903_p1, %p8897_p2 }
  0xa5   : > { %8907 = shalt.err (!%p8904_p8)
}
  0xa6   : > { %p11326_p0 = scmp.ne.s32.totalorder %s11316_s8, 0  ;;  %s11327_s21 = smov 128  }
  0xa7   : > { %s8908_s18 = scalar_lea.hbm %s9335_s30, 256  ;;  %s8913_s10 = scalar_lea.hbm %s11248_s2, 8192 }
  0xa8   : > { %8462 = dma.hbm_to_vmem [thread:$0]  (!%p11326_p0), %s9329_s27, 4096, %s9337_s3, %s338_s13, %s11327_s21, %s11327_s21, %s9039_s19  }
  0xa9   : > { %p8909_p13 = scmp.ne.s32.totalorder %s9335_s30, %s8908_s18  ;;  %p8914_p3 = scmp.lt.u32.totalorder %s9335_s30, %s11248_s2 }
  0xaa   : > { %p8915_p6 = scmp.lt.u32.totalorder %s8913_s10, %s8908_s18  ;;  %p8917_p12 = scmp.lt.u32.totalorder %s8908_s18, %s9335_s30 }
  0xab   : > { %p8911_p5 = pnand %p8909_p13, %p11325_p7 }
  0xac   : > { %p8916_p4 = por %p8915_p6, %p8914_p3 }
  0xad   : > { %p8912_p9 = pneg %p8911_p5 }
  0xae   : > { %p8918_p2 = por %p8917_p12, %p8916_p4 }
  0xb0   : > { %p8919_p11 = pnand %p8918_p2, %p8912_p9 }
  0xb2   : > { %8922 = shalt.err (!%p8919_p11)
}
  0xb3   : > { %s8923_s12 = scalar_lea.vmem %s9280_s22, 256  ;;  %s9043_s27 = smov [#allocation8]  }
  0xb4   : > { %p8924_p10 = scmp.ne.s32.totalorder %s9280_s22, %s8923_s12  ;;  %s8928_s3 = sshll.u32 %s9043_s27, 4  ;;  %s8929_s3 = int_to_ptr.vmem [resolvable:$false] %s8928_s3 }
  0xb5   : > { %s8930_s13 = scalar_lea.vmem %s8929_s3, 512  ;;  %p8931_p13 = scmp.lt.s32.totalorder %s9280_s22, %s8929_s3 }
  0xb6   : > { %p8926_p1 = pnand %p8924_p10, %p11325_p7  ;;  %p8932_p5 = scmp.lt.s32.totalorder %s8930_s13, %s8923_s12 }
  0xb8   : > { %p8927_p8 = pneg %p8926_p1  ;;  %p8933_p3 = por %p8932_p5, %p8931_p13 }
  0xba   : > { %p8934_p6 = pnand %p8933_p3, %p8927_p8 }
  0xbc   : > { %8937 = shalt.err (!%p8934_p6)
}
  0xbd   : > { %8468 = dma.hbm_to_vmem [thread:$0]  (!%p11326_p0), %s9335_s30, 256, %s9280_s22, %s9245_s9, %s11327_s21, %s11327_s21, %s9039_s19  }
  0xbe   : > { %p11328_p7 = scmp.ne.s32.totalorder %s11310_s17, 0 }
  0xc0   : > { %417 = sbr.rel (%p11328_p7) target bundleno = 1378 (0x562), region = 52 }
  0xc7   : > { %s9394_s25 = sand.u32 1, %s9016_s28   ;;  %p11329_p9 = scmp.ne.s32.totalorder %s11305_s14, 0 }
  0xc8   : > { %s6951_s16 = sshll.u32 %s9394_s25, 8  ;;  %s420_s15 = scalar_lea.sflag [#allocation4], %s9394_s25 }
  0xc9   : > { %s9400_s8 = scalar_lea.vmem [#allocation3], %s6951_s16 }
  0xca   : > { %8991 = dma.done.wait (%p11329_p9), %s420_s15, 4096  }
  0xcb   : > { %8993 = vsyncadd (%p11329_p9), %s420_s15, 4294963200  ;;  %s428_s9 = sand.u32 1, %s9125_s11   ;;  %s6952_s17 = sshll.u32 %s9394_s25, 4 }
  0xcc   : > { %s429_s22 = scalar_lea.sflag [#allocation7], %s428_s9  ;;  %s9408_s19 = scalar_lea.vmem [#allocation6], %s6952_s17 }
  0xcd   : > { %8995 = dma.done.wait (%p11329_p9), %s429_s22, 512  }
  0xce   : > { %8997 = vsyncadd (%p11329_p9), %s429_s22, 4294966784  ;;  %s9414_s30 = scalar_lea.vmem [#allocation8], %s6952_s17  ;;  %p11330_p0 = scmp.eq.s32.totalorder %s9125_s11, 0 }
  0xd0   : > { %8999 = dma.done.wait (%p11330_p0), [#allocation10], 10240   ;;  %p11331_p4 = pmov %p11330_p0 }
  0xd1   : > { %p11332_p12 = pmov %p11330_p0 }
  0xd2   : > { %9001 = vsyncadd (%p11331_p4), [#allocation10], 4294957056 }
  0xd3   : > { %9003 = dma.done.wait (%p11332_p12), [#allocation13], 1024   ;;  %p11333_p2 = pmov %p11330_p0 }
  0xd4   : > { %v9424_v0 = vld [vmem:[#allocation9] sm:$0xff]   ;;  %v9426_v1 = vld [vmem:[#allocation9 + $0x8] sm:$0xff]   ;;  %v9431_v2 = vld [vmem:[#allocation9 + $0x10] sm:$0xff]   ;;  %v9044_v19 = vmov 0.0   ;;  %vm9045_vm0 = vmmov 0   ;;  %vm887_vm1 = vcmask 1040384  }
  0xd5   : > { %9005 = vsyncadd (%p11333_p2), [#allocation13], 4294966272  ;;  %7605 = vmatprep.subr.bf16.mxu1 %v9424_v0  ;;  %v9435_v3 = vld [vmem:[#allocation9 + $0x18] sm:$0xff]   ;;  %v507_v4 = vld [vmem:[%s9400_s8] sm:$0xff]  ;;  %vm888_vm2 = vsmask.f32 256 }
  0xd6   : > { %7606 = vmatpush3.bf16.msra.mxu1 %v9424_v0  ;;  %v508_v5 = vld [vmem:[%s9400_s8 + $0x8] sm:$0xff]  ;;  %v9441_v7 = vld [vmem:[#allocation9 + $0x20] sm:$0xff]   ;;  %v9448_v9 = vld [vmem:[#allocation9 + $0x30] sm:$0xff]   ;;  %vm944_vm4 = vsmask.f32 7938  ;;  %vm1028_vm6 = vcmask 1043456  }
  0xd7   : > { %7607 = vmatprep.subr.bf16.mxu1 %v9426_v1  ;;  %v556_v6 = vpack.c.bf16 %v508_v5, %v507_v4  ;;  %v9445_v8 = vld [vmem:[#allocation9 + $0x28] sm:$0xff]   ;;  %v8548_v10 = vld [vmem:[#allocation11 + $0xc0] sm:$0xff]   ;;  %v9451_v12 = vld [vmem:[#allocation9 + $0x38] sm:$0xff]   ;;  %vm1006_vm7 = vsmask.f32 4368  ;;  %vm2694_vm13 = vcmask 1042432  }
  0xd8   : > { %v8549_v11 = vld [vmem:[#allocation11 + $0xc8] sm:$0xff]   ;;  %7837 = vmatprep.subr.bf16.mxu0 %v8548_v10  ;;  %v509_v13 = vld [vmem:[%s9400_s8 + $0x10] sm:$0xff]  ;;  %v510_v14 = vld [vmem:[%s9400_s8 + $0x18] sm:$0xff]  ;;  %vm1664_vm10 = vsmask.f32 3328  ;;  %vm2695_vm14 = vcmask 1046532  }
  0xd9   : > { %7621 = vmatprep.mubr.bf16.mxu1 %v556_v6  ;;  %7838 = vmatpush3.bf16.msra.mxu0 %v8548_v10  ;;  %v511_v15 = vld [vmem:[%s9400_s8 + $0x20] sm:$0xff]  ;;  %v512_v16 = vld [vmem:[%s9400_s8 + $0x28] sm:$0xff]  ;;  %v557_v17 = vpack.c.bf16 %v510_v14, %v509_v13  ;;  %v513_v20 = vld [vmem:[%s9400_s8 + $0x30] sm:$0xff]  ;;  %vm1665_vm11 = vsmask.f32 7440  ;;  %s11402_s18 = sld [smem:[#allocation36_spill]] }
  0xda   : > { %7608 = vmatpush3.bf16.msra.mxu1 %v9426_v1  ;;  %7839 = vmatprep.subr.bf16.mxu0 %v8549_v11  ;;  %v558_v18 = vpack.c.bf16 %v512_v16, %v511_v15  ;;  %v514_v21 = vld [vmem:[%s9400_s8 + $0x38] sm:$0xff]  ;;  %v515_v22 = vld [vmem:[%s9400_s8 + $0x40] sm:$0xff]  ;;  %v516_v23 = vld [vmem:[%s9400_s8 + $0x48] sm:$0xff]  ;;  %s11100_s1 = scalar_lea.vmem [#allocation14], %s6951_s16  ;;  %s11403_s7 = sld [smem:[#allocation22_spill]] }
  0xdb   : > { %7609 = vmatprep.subr.bf16.mxu1 %v9431_v2  ;;  %v559_v24 = vpack.c.bf16 %v514_v21, %v513_v20  ;;  %v560_v25 = vpack.c.bf16 %v516_v23, %v515_v22  ;;  %v517_v26 = vld [vmem:[%s9400_s8 + $0x50] sm:$0xff]  ;;  %v518_v27 = vld [vmem:[%s9400_s8 + $0x58] sm:$0xff]  ;;  %v519_v28 = vld [vmem:[%s9400_s8 + $0x60] sm:$0xff]  ;;  %s6769_s23 = sshll.u32 %s11100_s1, 4  ;;  %s11404_s24 = sld [smem:[#allocation25_spill]]  ;;  %s11194_s23 = int_to_ptr.vmem [resolvable:$true] %s6769_s23 }
  0xdc   : > { %v520_v29 = vld [vmem:[%s9400_s8 + $0x68] sm:$0xff]  ;;  %v561_v30 = vpack.c.bf16 %v518_v27, %v517_v26  ;;  %v521_v32 = vld [vmem:[%s9400_s8 + $0x70] sm:$0xff]  ;;  %v522_v33 = vld [vmem:[%s9400_s8 + $0x78] sm:$0xff]  ;;  %s11405_s3 = sld [smem:[#allocation37_spill]]  ;;  %s6753_s16 = scalar_lea.sflag [#allocation5], %s9394_s25 }
  0xdd   : > { %7840 = vmatpush3.bf16.msra.mxu0 %v8549_v11  ;;  %v562_v31 = vpack.c.bf16 %v520_v29, %v519_v28  ;;  %v523_v34 = vld [vmem:[%s9400_s8 + $0x80] sm:$0xff]  ;;  %v524_v35 = vld [vmem:[%s9400_s8 + $0x88] sm:$0xff]  ;;  %v563_v36 = vpack.c.bf16 %v522_v33, %v521_v32  ;;  %v525_v38 = vld [vmem:[%s9400_s8 + $0x90] sm:$0xff]  ;;  %s8938_s15 = scalar_lea.vmem %s11194_s23, 4096 }
  0xde   : > { %7610 = vmatpush3.bf16.msra.mxu1 %v9431_v2  ;;  %v564_v37 = vpack.c.bf16 %v524_v35, %v523_v34  ;;  %v526_v39 = vld [vmem:[%s9400_s8 + $0x98] sm:$0xff]  ;;  %v527_v40 = vld [vmem:[%s9400_s8 + $0xa0] sm:$0xff]  ;;  %v528_v41 = vld [vmem:[%s9400_s8 + $0xa8] sm:$0xff]  ;;  %p8939_p11 = scmp.ne.s32.totalorder %s11194_s23, %s8938_s15 }
  0xdf   : > { %7611 = vmatprep.subr.bf16.mxu1 %v9435_v3  ;;  %v565_v42 = vpack.c.bf16 %v526_v39, %v525_v38  ;;  %v566_v43 = vpack.c.bf16 %v528_v41, %v527_v40  ;;  %v529_v44 = vld [vmem:[%s9400_s8 + $0xb0] sm:$0xff]  ;;  %v530_v45 = vld [vmem:[%s9400_s8 + $0xb8] sm:$0xff]  ;;  %v531_v46 = vld [vmem:[%s9400_s8 + $0xc0] sm:$0xff] }
  0xe0   : > { %v532_v47 = vld [vmem:[%s9400_s8 + $0xc8] sm:$0xff]  ;;  %v567_v48 = vpack.c.bf16 %v530_v45, %v529_v44  ;;  %v533_v50 = vld [vmem:[%s9400_s8 + $0xd0] sm:$0xff]  ;;  %v534_v51 = vld [vmem:[%s9400_s8 + $0xd8] sm:$0xff]  ;;  %s7321_s10 = sshll.u32 %s11403_s7, 12 }
  0xe1   : > { %v568_v49 = vpack.c.bf16 %v532_v47, %v531_v46  ;;  %v535_v52 = vld [vmem:[%s9400_s8 + $0xe0] sm:$0xff]  ;;  %v536_v53 = vld [vmem:[%s9400_s8 + $0xe8] sm:$0xff]  ;;  %v569_v54 = vpack.c.bf16 %v534_v51, %v533_v50  ;;  %v537_v56 = vld [vmem:[%s9400_s8 + $0xf0] sm:$0xff]  ;;  %p11406_p10 = scmp.ne.s32.totalorder %s11404_s24, 0 }
  0xe2   : > { %7612 = vmatpush3.bf16.msra.mxu1 %v9435_v3  ;;  %v570_v55 = vpack.c.bf16 %v536_v53, %v535_v52  ;;  %v538_v57 = vld [vmem:[%s9400_s8 + $0xf8] sm:$0xff]  ;;  %v793_v59 = vld [vmem:[%s9408_s19] sm:$0xff]  ;;  %vm9520_vm3 = vmand %vm887_vm1, %vm888_vm2  ;;  %s11192_s13 = scalar_lea.hbm %s11405_s3, %s7321_s10 }
  0xe3   : > { %7613 = vmatprep.subr.bf16.mxu1 %v9441_v7  ;;  %v571_v58 = vpack.c.bf16 %v538_v57, %v537_v56  ;;  %v794_v60 = vld [vmem:[%s9408_s19 + $0x8] sm:$0xff]  ;;  %v8550_v62 = vld [vmem:[#allocation11 + $0xd0] sm:$0xff]   ;;  %vm9530_vm5 = vmand %vm887_vm1, %vm944_vm4  ;;  %p8940_p1 = pnand %p8939_p11, %p11406_p10 }
  0xe4   : > { %v795_v61 = vpack.c.bf16 %v794_v60, %v793_v59  ;;  %7841 = vmatprep.subr.bf16.mxu0 %v8550_v62  ;;  %v952_v5 = vld [vmem:[#allocation2 + $0x20] sm:$0x1]  ;;  %v8551_v6 = vld [vmem:[#allocation11 + $0xd8] sm:$0xff]   ;;  %v8552_v11 = vld [vmem:[#allocation11 + $0xe0] sm:$0xff]  }
  0xe5   : > { %7842 = vmatpush3.bf16.msra.mxu0 %v8550_v62  ;;  %v949_v10 = vld [vmem:[#allocation2 + $0x14] sm:$0x1]  ;;  %v902_v13 = vld [vmem:[#allocation2 + $0x30] sm:$0x1]  ;;  %v899_v15 = vld [vmem:[#allocation2 + $0x24] sm:$0x1]  ;;  %p8941_p8 = pneg %p8940_p1 }
  0xe6   : > { %7614 = vmatpush3.bf16.msra.mxu1 %v9441_v7  ;;  %7843 = vmatprep.subr.bf16.mxu0 %v8551_v6  ;;  %v903_v14 = vsel %vm9520_vm3, 0, %v902_v13  ;;  %v900_v16 = vsel %vm9520_vm3, 0, %v899_v15  ;;  %v8554_v21 = vld [vmem:[#allocation11 + $0xf0] sm:$0xff]   ;;  %v905_v23 = vld [vmem:[#allocation2 + $0x3c] sm:$0x1]  ;;  %v8555_v26 = vld [vmem:[#allocation11 + $0xf8] sm:$0xff]  }
  0xe7   : > { %7615 = vmatprep.subr.bf16.mxu1 %v9445_v8  ;;  %904 = vst [vmem:[#allocation2 + $0x30] sm:$0x1] %v903_v14  ;;  %901 = vst [vmem:[#allocation2 + $0x24] sm:$0x1] %v900_v16  ;;  %v961_v28 = vld [vmem:[#allocation2 + $0x44] sm:$0x1] }
  0xe8   : > { %v962_v29 = vsel %vm9530_vm5, 0, %v961_v28  ;;  %v911_v32 = vld [vmem:[#allocation2 + $0x54] sm:$0x1]  ;;  %v970_v34 = vld [vmem:[#allocation2 + $0x68] sm:$0x1]  ;;  %v9568_v41 = vld [vmem:[#allocation11 + $0x100] sm:$0xff]  }
  0xe9   : > { %7844 = vmatpush3.bf16.msra.mxu0 %v8551_v6  ;;  %963 = vst [vmem:[#allocation2 + $0x44] sm:$0x1] %v962_v29  ;;  %v912_v33 = vsel %vm9520_vm3, 0, %v911_v32  ;;  %v971_v35 = vsel %vm9530_vm5, 0, %v970_v34  ;;  %v967_v39 = vld [vmem:[#allocation2 + $0x5c] sm:$0x1]  ;;  %vm9617_vm8 = vmand %vm1028_vm6, %vm944_vm4 }
  0xea   : > { %7616 = vmatpush3.bf16.msra.mxu1 %v9445_v8  ;;  %7845 = vmatprep.subr.bf16.mxu0 %v8552_v11  ;;  %913 = vst [vmem:[#allocation2 + $0x54] sm:$0x1] %v912_v33  ;;  %972 = vst [vmem:[#allocation2 + $0x68] sm:$0x1] %v971_v35  ;;  %v968_v40 = vsel %vm9530_vm5, 0, %v967_v39  ;;  %v8574_v14 = vld [vmem:[#allocation11 + $0x40] sm:$0xff]  }
  0xeb   : > { %7617 = vmatprep.subr.bf16.mxu1 %v9448_v9  ;;  %969 = vst [vmem:[#allocation2 + $0x5c] sm:$0x1] %v968_v40  ;;  %v917_v44 = vld [vmem:[#allocation2 + $0x6c] sm:$0x1]  ;;  %v976_v46 = vld [vmem:[#allocation2 + $0x80] sm:$0x1]  ;;  %vm9624_vm9 = vmor %vm888_vm2, %vm1006_vm7 }
  0xec   : > { %v918_v45 = vsel %vm9520_vm3, 0, %v917_v44  ;;  %v977_v47 = vsel %vm9530_vm5, 0, %v976_v46  ;;  %v926_v50 = vld [vmem:[#allocation2 + $0x90] sm:$0x1]  ;;  %v923_v52 = vld [vmem:[#allocation2 + $0x84] sm:$0x1]  ;;  %vm9791_vm12 = vmor %vm1664_vm10, %vm1665_vm11 }
  0xed   : > { %7846 = vmatpush3.bf16.msra.mxu0 %v8552_v11  ;;  %919 = vst [vmem:[#allocation2 + $0x6c] sm:$0x1] %v918_v45  ;;  %978 = vst [vmem:[#allocation2 + $0x80] sm:$0x1] %v977_v47  ;;  %v927_v51 = vsel %vm9520_vm3, 0, %v926_v50  ;;  %v924_v53 = vsel %vm9520_vm3, 0, %v923_v52 }
  0xee   : > { %7618 = vmatpush3.bf16.msra.mxu1 %v9448_v9  ;;  %928 = vst [vmem:[#allocation2 + $0x90] sm:$0x1] %v927_v51  ;;  %925 = vst [vmem:[#allocation2 + $0x84] sm:$0x1] %v924_v53  ;;  %v979_v56 = vld [vmem:[#allocation2 + $0x8c] sm:$0x1] }
  0xef   : > { %7619 = vmatprep.subr.bf16.mxu1 %v9451_v12  ;;  %v980_v57 = vsel %vm9530_vm5, 0, %v979_v56  ;;  %v929_v60 = vld [vmem:[#allocation2 + $0x9c] sm:$0x1]  ;;  %v988_v62 = vld [vmem:[#allocation2 + $0xb0] sm:$0x1]  ;;  %vm10012_vm15 = vmor %vm2694_vm13, %vm2695_vm14 }
  0xf0   : > { %981 = vst [vmem:[#allocation2 + $0x8c] sm:$0x1] %v980_v57  ;;  %v935_v6 = vld [vmem:[#allocation2 + $0xb4] sm:$0x1]  ;;  %v991_v11 = vld [vmem:[#allocation2 + $0xbc] sm:$0x1] }
  0xf1   : > { %v992_v13 = vsel %vm9530_vm5, 0, %v991_v11  ;;  %v890_v15 = vld [vmem:[#allocation2] sm:$0x1] }
  0xf2   : > { %7620 = vmatpush3.bf16.msra.mxu1 %v9451_v12  ;;  %993 = vst [vmem:[#allocation2 + $0xbc] sm:$0x1] %v992_v13  ;;  %v891_v16 = vsel %vm9520_vm3, 0, %v890_v15 }
  0xf3   : > { %7653 = vmatprep.subr.bf16.mxu1 %v9044_v19  ;;  %892 = vst [vmem:[#allocation2] sm:$0x1] %v891_v16 }
  0xf5   : > { %7622 = vmatmul.mubr.bf16.vlgmr.msra.gmra.mrb[0].mxu1 %v557_v17  ;;  %v958_v17 = vld [vmem:[#allocation2 + $0x38] sm:$0x1] }
  0xf6   : > { %7625 = vmatprep.mubr.bf16.mxu1 %v558_v18  ;;  %7654 = vmatpush3.bf16.msra.mxu1 %v9424_v0  ;;  %v8553_v18 = vld [vmem:[#allocation11 + $0xe8] sm:$0xff]  }
  0xf7   : > { %7655 = vmatprep.subr.bf16.mxu1 %v9044_v19  ;;  %7847 = vmatprep.subr.bf16.mxu0 %v8553_v18 }
  0xf8   : > { %7848 = vmatpush3.bf16.msra.mxu0 %v8553_v18  ;;  %v946_v18 = vld [vmem:[#allocation2 + $0x8] sm:$0x1] }
  0xf9   : > { %7849 = vmatprep.subr.bf16.mxu0 %v8554_v21 }
  0xfa   : > { %7656 = vmatpush3.bf16.msra.mxu1 %v9426_v1 }
  0xfb   : > { %7657 = vmatprep.subr.bf16.mxu1 %v9044_v19 }
  0xfc   : > { %7850 = vmatpush3.bf16.msra.mxu0 %v8554_v21  ;;  %v8584_v21 = vld [vmem:[#allocation11 + $0x60] sm:$0xff]  }
  0xfd   : > { %7626 = vmatmul.mubr.bf16.gmra.mrb[4].mxu1 %v559_v24  ;;  %v906_v24 = vsel %vm9520_vm3, 0, %v905_v23  ;;  %7851 = vmatprep.subr.bf16.mxu0 %v8555_v26  ;;  %v8588_v23 = vld [vmem:[#allocation11 + $0x78] sm:$0xff]  }
  0xfe   : > { %7629 = vmatprep.mubr.bf16.mxu1 %v560_v25  ;;  %7658 = vmatpush3.bf16.msra.mxu1 %v9431_v2  ;;  %v964_v25 = vld [vmem:[#allocation2 + $0x50] sm:$0x1]  ;;  %907 = vst [vmem:[#allocation2 + $0x3c] sm:$0x1] %v906_v24  ;;  %v9610_v24 = vld [vmem:[%s11250_s4] ss:$0 sm:$0xff] }
  0xff   : > { %7659 = vmatprep.subr.bf16.mxu1 %v9044_v19  ;;  %v965_v27 = vsel %vm9530_vm5, 0, %v964_v25 }
 0x100   : > { %966 = vst [vmem:[#allocation2 + $0x50] sm:$0x1] %v965_v27  ;;  %7852 = vmatpush3.bf16.msra.mxu0 %v8555_v26 }
 0x101   : > { %7885 = vmatprep.subr.bf16.mxu0 %v9568_v41 }
 0x102   : > { %7660 = vmatpush3.bf16.msra.mxu1 %v9435_v3 }
 0x103   : > { %7661 = vmatprep.subr.bf16.mxu1 %v9044_v19 }
 0x105   : > { %7630 = vmatmul.mubr.bf16.gmra.mrb[8].mxu1 %v561_v30  ;;  %v914_v30 = vld [vmem:[#allocation2 + $0x60] sm:$0x1] }
 0x106   : > { %7633 = vmatprep.mubr.bf16.mxu1 %v562_v31  ;;  %7662 = vmatpush3.bf16.msra.mxu1 %v9441_v7  ;;  %v915_v31 = vsel %vm9520_vm3, 0, %v914_v30 }
 0x107   : > { %7663 = vmatprep.subr.bf16.mxu1 %v9044_v19  ;;  %916 = vst [vmem:[#allocation2 + $0x60] sm:$0x1] %v915_v31 }
 0x10a   : > { %7664 = vmatpush3.bf16.msra.mxu1 %v9445_v8 }
 0x10b   : > { %7665 = vmatprep.subr.bf16.mxu1 %v9044_v19 }
 0x10d   : > { %7634 = vmatmul.mubr.bf16.gmra.mrb[12].mxu1 %v563_v36  ;;  %v840_v36 = vld [vmem:[%s9414_s30] sm:$0xff] }
 0x10e   : > { %7637 = vmatprep.mubr.bf16.mxu1 %v564_v37  ;;  %7666 = vmatpush3.bf16.msra.mxu1 %v9448_v9  ;;  %v841_v37 = vld [vmem:[%s9414_s30 + $0x8] sm:$0xff] }
 0x10f   : > { %7667 = vmatprep.subr.bf16.mxu1 %v9044_v19  ;;  %v842_v38 = vpack.c.bf16 %v841_v37, %v840_v36 }
 0x112   : > { %7668 = vmatpush3.bf16.msra.mxu1 %v9451_v12 }
 0x113   : > { %7673 = vmatprep.subr.bf16.mxu1 %v9044_v19 }
 0x115   : > { %7638 = vmatmul.mubr.bf16.gmra.mrb[16].mxu1 %v565_v42  ;;  %v920_v42 = vld [vmem:[#allocation2 + $0x78] sm:$0x1] }
 0x116   : > { %7641 = vmatprep.mubr.bf16.mxu1 %v566_v43  ;;  %v921_v43 = vsel %vm9520_vm3, 0, %v920_v42 }
 0x117   : > { %922 = vst [vmem:[#allocation2 + $0x78] sm:$0x1] %v921_v43 }
 0x11d   : > { %7642 = vmatmul.mubr.bf16.gmra.mrb[20].mxu1 %v567_v48  ;;  %v973_v48 = vld [vmem:[#allocation2 + $0x74] sm:$0x1] }
 0x11e   : > { %7645 = vmatprep.mubr.bf16.mxu1 %v568_v49  ;;  %v974_v49 = vsel %vm9530_vm5, 0, %v973_v48 }
 0x11f   : > { %975 = vst [vmem:[#allocation2 + $0x74] sm:$0x1] %v974_v49 }
 0x125   : > { %7646 = vmatmul.mubr.bf16.gmra.mrb[24].mxu1 %v569_v54  ;;  %v982_v54 = vld [vmem:[#allocation2 + $0x98] sm:$0x1] }
 0x126   : > { %7649 = vmatprep.mubr.bf16.mxu1 %v570_v55  ;;  %v983_v55 = vsel %vm9530_vm5, 0, %v982_v54 }
 0x127   : > { %984 = vst [vmem:[#allocation2 + $0x98] sm:$0x1] %v983_v55 }
 0x12d   : > { %7650 = vmatmul.mubr.bf16.gmra.mrb[28].mxu1 %v571_v58  ;;  %v932_v58 = vld [vmem:[#allocation2 + $0xa8] sm:$0x1] }
 0x12e   : > { %7669 = vmatprep.mubr.msk.bf16.mxu1 %vm9045_vm0, %v9044_v19  ;;  %v933_v59 = vsel %vm9520_vm3, 0, %v932_v58 }
 0x12f   : > { %934 = vst [vmem:[#allocation2 + $0xa8] sm:$0x1] %v933_v59 }
 0x135   : > { %7670 = vmatmul.mubr.bf16.vlgmr.msra.gmra.mrb[32].mxu1 %v795_v61  ;;  %v930_v61 = vsel %vm9520_vm3, 0, %v929_v60 }
 0x136   : > { %7674 = vmatpush3.bf16.msra.mxu1 %v9424_v0  ;;  %7689 = vmatprep.mubr.msk.bf16.mxu1 %vm9045_vm0, %v9044_v19  ;;  %v896_v0 = vld [vmem:[#allocation2 + $0x18] sm:$0x1]  ;;  %931 = vst [vmem:[#allocation2 + $0x9c] sm:$0x1] %v930_v61 }
 0x137   : > { %7675 = vmatprep.subr.bf16.mxu1 %v9044_v19 }
 0x13a   : > { %7676 = vmatpush3.bf16.msra.mxu1 %v9426_v1  ;;  %v897_v1 = vsel %vm9520_vm3, 0, %v896_v0  ;;  %v989_v0 = vsel %vm9530_vm5, 0, %v988_v62 }
 0x13b   : > { %7677 = vmatprep.subr.bf16.mxu1 %v9044_v19  ;;  %898 = vst [vmem:[#allocation2 + $0x18] sm:$0x1] %v897_v1  ;;  %990 = vst [vmem:[#allocation2 + $0xb0] sm:$0x1] %v989_v0  ;;  %v985_v1 = vld [vmem:[#allocation2 + $0xa4] sm:$0x1] }
 0x13e   : > { %7678 = vmatpush3.bf16.msra.mxu1 %v9431_v2  ;;  %v893_v2 = vld [vmem:[#allocation2 + $0xc] sm:$0x1] }
 0x13f   : > { %7679 = vmatprep.subr.bf16.mxu1 %v9044_v19 }
 0x142   : > { %7680 = vmatpush3.bf16.msra.mxu1 %v9435_v3  ;;  %v894_v3 = vsel %vm9520_vm3, 0, %v893_v2  ;;  %v986_v2 = vsel %vm9530_vm5, 0, %v985_v1  ;;  %v1461_v42 = vld [vmem:[#allocation2 + $0x18] sm:$0xf] }
 0x143   : > { %7681 = vmatprep.subr.bf16.mxu1 %v9044_v19  ;;  %895 = vst [vmem:[#allocation2 + $0xc] sm:$0x1] %v894_v3  ;;  %987 = vst [vmem:[#allocation2 + $0xa4] sm:$0x1] %v986_v2  ;;  %v938_v3 = vld [vmem:[#allocation2 + $0xc0] sm:$0x1] }
 0x146   : > { %7682 = vmatpush3.bf16.msra.mxu1 %v9441_v7  ;;  %v953_v7 = vsel %vm9530_vm5, 0, %v952_v5  ;;  %v939_v5 = vsel %vm9520_vm3, 0, %v938_v3 }
 0x147   : > { %7683 = vmatprep.subr.bf16.mxu1 %v9044_v19  ;;  %954 = vst [vmem:[#allocation2 + $0x20] sm:$0x1] %v953_v7  ;;  %940 = vst [vmem:[#allocation2 + $0xc0] sm:$0x1] %v939_v5  ;;  %v936_v7 = vsel %vm9520_vm3, 0, %v935_v6 }
 0x148   : > { %937 = vst [vmem:[#allocation2 + $0xb4] sm:$0x1] %v936_v7 }
 0x14a   : > { %7684 = vmatpush3.bf16.msra.mxu1 %v9445_v8  ;;  %v950_v8 = vsel %vm9530_vm5, 0, %v949_v10  ;;  %v994_v10 = vld [vmem:[#allocation2 + $0xc8] sm:$0x1]  ;;  %v1454_v53 = vld [vmem:[#allocation2 + $0xc] sm:$0xf] }
 0x14b   : > { %7685 = vmatprep.subr.bf16.mxu1 %v9044_v19  ;;  %951 = vst [vmem:[#allocation2 + $0x14] sm:$0x1] %v950_v8  ;;  %v995_v8 = vsel %vm9530_vm5, 0, %v994_v10 }
 0x14c   : > { %996 = vst [vmem:[#allocation2 + $0xc8] sm:$0x1] %v995_v8 }
 0x14e   : > { %7686 = vmatpush3.bf16.msra.mxu1 %v9448_v9  ;;  %v959_v9 = vsel %vm9530_vm5, 0, %v958_v17  ;;  %v8575_v17 = vld [vmem:[#allocation11 + $0x48] sm:$0xff]  }
 0x14f   : > { %7687 = vmatprep.subr.bf16.mxu1 %v9044_v19  ;;  %v955_v19 = vld [vmem:[#allocation2 + $0x2c] sm:$0x1]  ;;  %960 = vst [vmem:[#allocation2 + $0x38] sm:$0x1] %v959_v9  ;;  %v947_v9 = vsel %vm9530_vm5, 0, %v946_v18 }
 0x150   : > { %v956_v20 = vsel %vm9530_vm5, 0, %v955_v19  ;;  %948 = vst [vmem:[#allocation2 + $0x8] sm:$0x1] %v947_v9  ;;  %v8579_v19 = vld [vmem:[#allocation11 + $0x50] sm:$0xff]   ;;  %v1465_v60 = vld [vmem:[#allocation2 + $0x20] sm:$0x1] }
 0x151   : > { %957 = vst [vmem:[#allocation2 + $0x2c] sm:$0x1] %v956_v20  ;;  %v8580_v20 = vld [vmem:[#allocation11 + $0x58] sm:$0xff]  }
 0x152   : > { %7688 = vmatpush3.bf16.msra.mxu1 %v9451_v12  ;;  %v908_v12 = vld [vmem:[#allocation2 + $0x48] sm:$0x1]  ;;  %v1458_v5 = vld [vmem:[#allocation2 + $0x14] sm:$0x1] }
 0x153   : > { %v909_v22 = vsel %vm9520_vm3, 0, %v908_v12  ;;  %7693 = vmatprep.subr.bf16.mxu1 %v8574_v14  ;;  %v8585_v12 = vld [vmem:[#allocation11 + $0x68] sm:$0xff]  }
 0x154   : > { %910 = vst [vmem:[#allocation2 + $0x48] sm:$0x1] %v909_v22  ;;  %v8587_v22 = vld [vmem:[#allocation11 + $0x70] sm:$0xff]  }
 0x155   : > { %7690 = vmatmul.mubr.bf16.vlgmr.msra.gmra.mrb[36].mxu1 %v842_v38 }
 0x156   : > { %7694 = vmatpush3.bf16.msra.mxu1 %v8574_v14 }
 0x157   : > { %7695 = vmatprep.subr.bf16.mxu1 %v8575_v17 }
 0x15a   : > { %7696 = vmatpush3.bf16.msra.mxu1 %v8575_v17 }
 0x15b   : > { %7697 = vmatprep.subr.bf16.mxu1 %v8579_v19 }
 0x15e   : > { %7698 = vmatpush3.bf16.msra.mxu1 %v8579_v19 }
 0x15f   : > { %7699 = vmatprep.subr.bf16.mxu1 %v8580_v20 }
 0x162   : > { %7700 = vmatpush3.bf16.msra.mxu1 %v8580_v20 }
 0x163   : > { %7701 = vmatprep.subr.bf16.mxu1 %v8584_v21 }
 0x166   : > { %7702 = vmatpush3.bf16.msra.mxu1 %v8584_v21 }
 0x167   : > { %7703 = vmatprep.subr.bf16.mxu1 %v8585_v12 }
 0x16a   : > { %7704 = vmatpush3.bf16.msra.mxu1 %v8585_v12 }
 0x16b   : > { %7705 = vmatprep.subr.bf16.mxu1 %v8587_v22 }
 0x16e   : > { %7706 = vmatpush3.bf16.msra.mxu1 %v8587_v22  ;;  %v1475_v22 = vld [vmem:[#allocation2 + $0x30] sm:$0xf] }
 0x16f   : > { %7707 = vmatprep.subr.bf16.mxu1 %v8588_v23 }
 0x172   : > { %7708 = vmatpush3.bf16.msra.mxu1 %v8588_v23 }
 0x1c8   : > { %v7623_v25 = vpop.f32.mrb[0].mxu1 }
 0x1c9   : > { %v669_v26 = vadd.f32 %v7623_v25, %v9610_v24  ;;  %v660_v27 = vpop.f32.mrb[1].mxu1 }
 0x1ca   : > { %v661_v28 = vadd.f32 %v9610_v24, %v660_v27  ;;  %v7624_v29 = vpop.f32.mrb[2].mxu1 }
 0x1cb   : > { %v7289_v30 = vpack.c.bf16 %v669_v26, %v669_v26  ;;  %v672_v31 = vadd.f32 %v7624_v29, %v9610_v24  ;;  %v663_v32 = vpop.f32.mrb[3].mxu1  ;;  %v1468_v29 = vld [vmem:[#allocation2 + $0x24] sm:$0xf] }
 0x1cc   : > { %v7287_v33 = vpack.c.bf16 %v661_v28, %v661_v28  ;;  %v664_v34 = vadd.f32 %v9610_v24, %v663_v32 }
 0x1cd   : > { %v1151_v35 = vshrl.u32 %v7289_v30, 16  ;;  %v7290_v36 = vpack.c.bf16 %v672_v31, %v672_v31  ;;  %v1154_v40 = vshll.u32 %v7289_v30, 16 }
 0x1ce   : > { %v1134_v37 = vshrl.u32 %v7287_v33, 16  ;;  %v7288_v38 = vpack.c.bf16 %v664_v34, %v664_v34  ;;  %v1137_v43 = vshll.u32 %v7287_v33, 16 }
 0x1cf   : > { %v1153_v39 = vrot.slane %v1151_v35, 7  ;;  %v1159_v44 = vshrl.u32 %v7290_v36, 16  ;;  %v1162_v47 = vshll.u32 %v7290_v36, 16 }
 0x1d0   : > { %v1136_v46 = vrot.slane %v1134_v37, 7  ;;  %v1142_v48 = vshrl.u32 %v7288_v38, 16  ;;  %v1145_v49 = vshll.u32 %v7288_v38, 16  ;;  %v7627_v50 = vpop.f32.mrb[4].mxu1 }
 0x1d1   : > { %v1156_v51 = vor.u32 %v1154_v40, %v1153_v39  ;;  %v1157_v52 = vrot.slane %v1153_v39, 4  ;;  %v1161_v54 = vrot.slane %v1159_v44, 7  ;;  %v685_v55 = vadd.f32 %v7627_v50, %v9610_v24  ;;  %v676_v56 = vpop.f32.mrb[5].mxu1 }
 0x1d2   : > { %v1139_v57 = vor.u32 %v1137_v43, %v1136_v46  ;;  %v1140_v58 = vrot.slane %v1136_v46, 4  ;;  %v1144_v61 = vrot.slane %v1142_v48, 7  ;;  %v677_v62 = vadd.f32 %v9610_v24, %v676_v56  ;;  %v7628_v0 = vpop.f32.mrb[6].mxu1  ;;  %v1479_v46 = vld [vmem:[#allocation2 + $0x38] sm:$0x1] }
 0x1d3   : > { %v1462_v1 = vsel %vm9617_vm8, %v1156_v51, %v1461_v42  ;;  %v1164_v2 = vor.u32 %v1162_v47, %v1161_v54  ;;  %v1166_v3 = vrot.slane %v1161_v54, 4  ;;  %v7293_v6 = vpack.c.bf16 %v685_v55, %v685_v55  ;;  %v679_v7 = vpop.f32.mrb[7].mxu1 }
 0x1d4   : > { %1463 = vst [vmem:[#allocation2 + $0x18] sm:$0xf] %v1462_v1  ;;  %v1455_v10 = vsel %vm9617_vm8, %v1139_v57, %v1454_v53  ;;  %v1147_v8 = vor.u32 %v1145_v49, %v1144_v61  ;;  %v1149_v11 = vrot.slane %v1144_v61, 4  ;;  %v7291_v13 = vpack.c.bf16 %v677_v62, %v677_v62 }
 0x1d5   : > { %1456 = vst [vmem:[#allocation2 + $0xc] sm:$0xf] %v1455_v10  ;;  %v1165_v14 = vsel %vm9624_vm9, %v1157_v52, %v1164_v2  ;;  %v1466_v15 = vsel %vm9520_vm3, %v1166_v3, %v1465_v60  ;;  %v1185_v16 = vshrl.u32 %v7293_v6, 16  ;;  %v1188_v20 = vshll.u32 %v7293_v6, 16  ;;  %v1472_v52 = vld [vmem:[#allocation2 + $0x2c] sm:$0x1] }
 0x1d6   : > { %1464 = vst [vmem:[#allocation2 + $0x1c] sm:$0xf] %v1165_v14  ;;  %1467 = vst [vmem:[#allocation2 + $0x20] sm:$0x1] %v1466_v15  ;;  %v1148_v17 = vsel %vm9624_vm9, %v1140_v58, %v1147_v8  ;;  %v1459_v18 = vsel %vm9520_vm3, %v1149_v11, %v1458_v5  ;;  %v1168_v9 = vshrl.u32 %v7291_v13, 16  ;;  %v688_v21 = vadd.f32 %v7628_v0, %v9610_v24  ;;  %v8560_v8 = vld [vmem:[#allocation11 + $0x108] sm:$0xff]  }
 0x1d7   : > { %1457 = vst [vmem:[#allocation2 + $0x10] sm:$0xf] %v1148_v17  ;;  %1460 = vst [vmem:[#allocation2 + $0x14] sm:$0x1] %v1459_v18  ;;  %v1187_v19 = vrot.slane %v1185_v16, 7  ;;  %v680_v12 = vadd.f32 %v9610_v24, %v679_v7  ;;  %v1171_v25 = vshll.u32 %v7291_v13, 16 }
 0x1d8   : > { %v1170_v23 = vrot.slane %v1168_v9, 7  ;;  %v7631_v26 = vpop.f32.mrb[8].mxu1  ;;  %v7294_v30 = vpack.c.bf16 %v688_v21, %v688_v21  ;;  %v1489_v16 = vld [vmem:[#allocation2 + $0x48] sm:$0xf]  ;;  %v1482_v17 = vld [vmem:[#allocation2 + $0x3c] sm:$0xf] }
 0x1d9   : > { %v1190_v27 = vor.u32 %v1188_v20, %v1187_v19  ;;  %v1191_v28 = vrot.slane %v1187_v19, 4  ;;  %v7292_v31 = vpack.c.bf16 %v680_v12, %v680_v12  ;;  %v692_v32 = vpop.f32.mrb[9].mxu1  ;;  %v701_v35 = vadd.f32 %v7631_v26, %v9610_v24 }
 0x1da   : > { %v1173_v33 = vor.u32 %v1171_v25, %v1170_v23  ;;  %v1174_v34 = vrot.slane %v1170_v23, 4  ;;  %v693_v36 = vadd.f32 %v9610_v24, %v692_v32  ;;  %v7632_v37 = vpop.f32.mrb[10].mxu1  ;;  %v1193_v39 = vshrl.u32 %v7294_v30, 16 }
 0x1db   : > { %v1476_v38 = vsel %vm9617_vm8, %v1190_v27, %v1475_v22  ;;  %v1196_v40 = vshll.u32 %v7294_v30, 16  ;;  %v1176_v42 = vshrl.u32 %v7292_v31, 16  ;;  %v695_v43 = vpop.f32.mrb[11].mxu1  ;;  %v1179_v47 = vshll.u32 %v7292_v31, 16 }
 0x1dc   : > { %1477 = vst [vmem:[#allocation2 + $0x30] sm:$0xf] %v1476_v38  ;;  %v1469_v44 = vsel %vm9617_vm8, %v1173_v33, %v1468_v29  ;;  %v7297_v48 = vpack.c.bf16 %v701_v35, %v701_v35  ;;  %v7295_v49 = vpack.c.bf16 %v693_v36, %v693_v36  ;;  %v1195_v50 = vrot.slane %v1193_v39, 7  ;;  %v9667_v22 = vld [vmem:[#allocation2 + $0xc] sm:$0xf] }
 0x1dd   : > { %1470 = vst [vmem:[#allocation2 + $0x24] sm:$0xf] %v1469_v44  ;;  %v1178_v51 = vrot.slane %v1176_v42, 7  ;;  %v704_v53 = vadd.f32 %v7632_v37, %v9610_v24  ;;  %v696_v54 = vadd.f32 %v9610_v24, %v695_v43  ;;  %v8558_v10 = vld [vmem:[#allocation2 + $0x18] sm:$0xff]   ;;  %v8563_v33 = vld [vmem:[#allocation11 + $0x110] sm:$0xff]   ;;  %v3566_v42 = vshrl.u32 %v9667_v22, 16 }
 0x1de   : > { %v1219_v55 = vshrl.u32 %v7297_v48, 16  ;;  %v1222_v56 = vshll.u32 %v7297_v48, 16  ;;  %v1202_v57 = vshrl.u32 %v7295_v49, 16  ;;  %v1205_v58 = vshll.u32 %v7295_v49, 16  ;;  %v8556_v1 = vld [vmem:[#allocation2 + $0xc] sm:$0xff]  }
 0x1df   : > { %v1198_v60 = vor.u32 %v1196_v40, %v1195_v50  ;;  %v1200_v61 = vrot.slane %v1195_v50, 4  ;;  %v1181_v62 = vor.u32 %v1179_v47, %v1178_v51  ;;  %v1183_v0 = vrot.slane %v1178_v51, 4  ;;  %7853 = vmatprep.mubr.bf16.mxu0 %v8556_v1  ;;  %v1493_v37 = vld [vmem:[#allocation2 + $0x50] sm:$0x1]  ;;  %v1486_v38 = vld [vmem:[#allocation2 + $0x44] sm:$0x1] }
 0x1e0   : > { %v9651_v2 = vrot.slane %v1219_v55, 7  ;;  %v9653_v3 = vrot.slane %v1202_v57, 7  ;;  %v7298_v5 = vpack.c.bf16 %v704_v53, %v704_v53  ;;  %v7296_v6 = vpack.c.bf16 %v696_v54, %v696_v54  ;;  %v7635_v7 = vpop.f32.mrb[12].mxu1  ;;  %7854 = vmatmul.mubr.bf16.vlgmr.msra.gmra.mrb[0].mxu0 %v8558_v10  ;;  %v8566_v54 = vld [vmem:[#allocation11 + $0x118] sm:$0xff]   ;;  %v2647_v59 = vld [vmem:[#allocation2 + $0xc] sm:$0xe] }
 0x1e1   : > { %v1199_v11 = vsel %vm9624_vm9, %v1191_v28, %v1198_v60  ;;  %v1480_v13 = vsel %vm9520_vm3, %v1200_v61, %v1479_v46  ;;  %v1182_v14 = vsel %vm9624_vm9, %v1174_v34, %v1181_v62  ;;  %v1473_v15 = vsel %vm9520_vm3, %v1183_v0, %v1472_v52  ;;  %v708_v18 = vpop.f32.mrb[13].mxu1  ;;  %7886 = vmatpush3.bf16.msra.mxu0 %v9568_v41  ;;  %v1503_v0 = vld [vmem:[#allocation2 + $0x60] sm:$0xf] }
 0x1e2   : > { %1478 = vst [vmem:[#allocation2 + $0x34] sm:$0xf] %v1199_v11  ;;  %1481 = vst [vmem:[#allocation2 + $0x38] sm:$0x1] %v1480_v13  ;;  %v1224_v9 = vor.u32 %v1222_v56, %v9651_v2  ;;  %v1225_v19 = vrot.slane %v9651_v2, 4  ;;  %v1207_v20 = vor.u32 %v1205_v58, %v9653_v3  ;;  %v1208_v21 = vrot.slane %v9653_v3, 4  ;;  %7887 = vmatprep.subr.bf16.mxu0 %v8560_v8 }
 0x1e3   : > { %1471 = vst [vmem:[#allocation2 + $0x28] sm:$0xf] %v1182_v14  ;;  %1474 = vst [vmem:[#allocation2 + $0x2c] sm:$0x1] %v1473_v15  ;;  %v7636_v12 = vpop.f32.mrb[14].mxu1  ;;  %v1227_v23 = vshrl.u32 %v7298_v5, 16  ;;  %v717_v31 = vadd.f32 %v7635_v7, %v9610_v24  ;;  %v709_v32 = vadd.f32 %v9610_v24, %v708_v18 }
 0x1e4   : > { %v1230_v25 = vshll.u32 %v7298_v5, 16  ;;  %v1210_v26 = vshrl.u32 %v7296_v6, 16  ;;  %v1213_v27 = vshll.u32 %v7296_v6, 16  ;;  %v711_v28 = vpop.f32.mrb[15].mxu1  ;;  %v1490_v29 = vsel %vm9617_vm8, %v1224_v9, %v1489_v16  ;;  %v1496_v7 = vld [vmem:[#allocation2 + $0x54] sm:$0xf] }
 0x1e5   : > { %v1483_v30 = vsel %vm9617_vm8, %v1207_v20, %v1482_v17  ;;  %1491 = vst [vmem:[#allocation2 + $0x48] sm:$0xf] %v1490_v29  ;;  %v1229_v34 = vrot.slane %v1227_v23, 7  ;;  %v720_v36 = vadd.f32 %v7636_v12, %v9610_v24  ;;  %v712_v41 = vadd.f32 %v9610_v24, %v711_v28  ;;  %7888 = vmatpush3.bf16.msra.mxu0 %v8560_v8  ;;  %v9691_v14 = vld [vmem:[#allocation11 + $0x120] sm:$0xff]   ;;  %v1507_v29 = vld [vmem:[#allocation2 + $0x68] sm:$0x1] }
 0x1e6   : > { %1484 = vst [vmem:[#allocation2 + $0x3c] sm:$0xf] %v1483_v30  ;;  %v1212_v35 = vrot.slane %v1210_v26, 7  ;;  %v7301_v39 = vpack.c.bf16 %v717_v31, %v717_v31  ;;  %v7299_v40 = vpack.c.bf16 %v709_v32, %v709_v32  ;;  %v3569_v43 = vshll.u32 %v9667_v22, 16  ;;  %7889 = vmatprep.subr.bf16.mxu0 %v8563_v33  ;;  %v1500_v31 = vld [vmem:[#allocation2 + $0x5c] sm:$0x1] }
 0x1e7   : > { %v1232_v44 = vor.u32 %v1230_v25, %v1229_v34  ;;  %v1234_v46 = vrot.slane %v1229_v34, 4  ;;  %v7302_v2 = vpack.c.bf16 %v720_v36, %v720_v36  ;;  %v7300_v3 = vpack.c.bf16 %v712_v41, %v712_v41 }
 0x1e8   : > { %v1215_v47 = vor.u32 %v1213_v27, %v1212_v35  ;;  %v1217_v48 = vrot.slane %v1212_v35, 4  ;;  %v1253_v49 = vshrl.u32 %v7301_v39, 16  ;;  %v1256_v50 = vshll.u32 %v7301_v39, 16  ;;  %v7639_v53 = vpop.f32.mrb[16].mxu1 }
 0x1e9   : > { %v1236_v51 = vshrl.u32 %v7299_v40, 16  ;;  %v1239_v52 = vshll.u32 %v7299_v40, 16  ;;  %v1233_v55 = vsel %vm9624_vm9, %v1225_v19, %v1232_v44  ;;  %v1494_v56 = vsel %vm9520_vm3, %v1234_v46, %v1493_v37  ;;  %v724_v60 = vpop.f32.mrb[17].mxu1  ;;  %v8561_v6 = vld [vmem:[#allocation2 + $0x30] sm:$0xff]   ;;  %7890 = vmatpush3.bf16.msra.mxu0 %v8563_v33  ;;  %v1517_v46 = vld [vmem:[#allocation2 + $0x78] sm:$0xf] }
 0x1ea   : > { %v1216_v57 = vsel %vm9624_vm9, %v1208_v21, %v1215_v47  ;;  %v1487_v58 = vsel %vm9520_vm3, %v1217_v48, %v1486_v38  ;;  %v8559_v61 = vld [vmem:[#allocation2 + $0x24] sm:$0xff]   ;;  %1492 = vst [vmem:[#allocation2 + $0x4c] sm:$0xf] %v1233_v55  ;;  %1495 = vst [vmem:[#allocation2 + $0x50] sm:$0x1] %v1494_v56  ;;  %v1255_v62 = vrot.slane %v1253_v49, 7  ;;  %v733_v10 = vadd.f32 %v7639_v53, %v9610_v24 }
 0x1eb   : > { %1485 = vst [vmem:[#allocation2 + $0x40] sm:$0xf] %v1216_v57  ;;  %1488 = vst [vmem:[#allocation2 + $0x44] sm:$0x1] %v1487_v58  ;;  %v1238_v1 = vrot.slane %v1236_v51, 7  ;;  %v7640_v5 = vpop.f32.mrb[18].mxu1  ;;  %v725_v8 = vadd.f32 %v9610_v24, %v724_v60  ;;  %7857 = vmatprep.mubr.bf16.mxu0 %v8559_v61  ;;  %7891 = vmatprep.subr.bf16.mxu0 %v8566_v54 }
 0x1ec   : > { %v736_v11 = vadd.f32 %v7640_v5, %v9610_v24  ;;  %v727_v13 = vpop.f32.mrb[19].mxu1  ;;  %v9693_v15 = vrot.slane %v3566_v42, 4  ;;  %v1258_v16 = vor.u32 %v1256_v50, %v1255_v62  ;;  %v1259_v17 = vrot.slane %v1255_v62, 4  ;;  %7858 = vmatmul.mubr.bf16.gmra.mrb[4].mxu0 %v8561_v6  ;;  %v8572_v38 = vld [vmem:[#allocation11 + $0x128] sm:$0xff]   ;;  %v1510_v60 = vld [vmem:[#allocation2 + $0x6c] sm:$0xf] }
 0x1ed   : > { %v1241_v18 = vor.u32 %v1239_v52, %v1238_v1  ;;  %v1242_v9 = vrot.slane %v1238_v1, 4  ;;  %v1261_v19 = vshrl.u32 %v7302_v2, 16  ;;  %v1264_v20 = vshll.u32 %v7302_v2, 16  ;;  %7892 = vmatpush3.bf16.msra.mxu0 %v8566_v54  ;;  %v1521_v5 = vld [vmem:[#allocation2 + $0x80] sm:$0x1] }
 0x1ee   : > { %v1244_v21 = vshrl.u32 %v7300_v3, 16  ;;  %v1247_v12 = vshll.u32 %v7300_v3, 16  ;;  %v1504_v23 = vsel %vm9617_vm8, %v1258_v16, %v1503_v0  ;;  %v7305_v26 = vpack.c.bf16 %v733_v10, %v733_v10  ;;  %7893 = vmatprep.subr.bf16.mxu0 %v9691_v14 }
 0x1ef   : > { %v1497_v25 = vsel %vm9617_vm8, %v1241_v18, %v1496_v7  ;;  %v7303_v27 = vpack.c.bf16 %v725_v8, %v725_v8  ;;  %1505 = vst [vmem:[#allocation2 + $0x60] sm:$0xf] %v1504_v23  ;;  %v1263_v28 = vrot.slane %v1261_v19, 7  ;;  %v7306_v32 = vpack.c.bf16 %v736_v11, %v736_v11 }
 0x1f0   : > { %1498 = vst [vmem:[#allocation2 + $0x54] sm:$0xf] %v1497_v25  ;;  %v1246_v30 = vrot.slane %v1244_v21, 7  ;;  %v728_v33 = vadd.f32 %v9610_v24, %v727_v13  ;;  %v1287_v34 = vshrl.u32 %v7305_v26, 16  ;;  %v1290_v35 = vshll.u32 %v7305_v26, 16  ;;  %v7643_v37 = vpop.f32.mrb[20].mxu1 }
 0x1f1   : > { %v1270_v36 = vshrl.u32 %v7303_v27, 16  ;;  %v1273_v41 = vshll.u32 %v7303_v27, 16  ;;  %v1266_v39 = vor.u32 %v1264_v20, %v1263_v28  ;;  %v1268_v40 = vrot.slane %v1263_v28, 4  ;;  %v740_v47 = vpop.f32.mrb[21].mxu1  ;;  %v8564_v54 = vld [vmem:[#allocation2 + $0x48] sm:$0xff]   ;;  %7894 = vmatpush3.bf16.msra.mxu0 %v9691_v14 }
 0x1f2   : > { %v1249_v42 = vor.u32 %v1247_v12, %v1246_v30  ;;  %v1251_v44 = vrot.slane %v1246_v30, 4  ;;  %v8562_v48 = vld [vmem:[#allocation2 + $0x3c] sm:$0xff]   ;;  %v1289_v49 = vrot.slane %v1287_v34, 7  ;;  %v1295_v51 = vshrl.u32 %v7306_v32, 16  ;;  %v7644_v53 = vpop.f32.mrb[22].mxu1  ;;  %7895 = vmatprep.subr.bf16.mxu0 %v8572_v38 }
 0x1f3   : > { %v9701_v50 = vrot.slane %v1270_v36, 7  ;;  %v1298_v52 = vshll.u32 %v7306_v32, 16  ;;  %v1267_v55 = vsel %vm9624_vm9, %v1259_v17, %v1266_v39  ;;  %v1508_v56 = vsel %vm9520_vm3, %v1268_v40, %v1507_v29  ;;  %7861 = vmatprep.mubr.bf16.mxu0 %v8562_v48  ;;  %v743_v61 = vpop.f32.mrb[23].mxu1  ;;  %v8577_v17 = vld [vmem:[#allocation11 + $0x130] sm:$0xff]   ;;  %v1514_v29 = vld [vmem:[#allocation2 + $0x74] sm:$0x1] }
 0x1f4   : > { %v1250_v57 = vsel %vm9624_vm9, %v1242_v9, %v1249_v42  ;;  %v1501_v58 = vsel %vm9520_vm3, %v1251_v44, %v1500_v31  ;;  %1506 = vst [vmem:[#allocation2 + $0x64] sm:$0xf] %v1267_v55  ;;  %1509 = vst [vmem:[#allocation2 + $0x68] sm:$0x1] %v1508_v56  ;;  %v1292_v62 = vor.u32 %v1290_v35, %v1289_v49  ;;  %v1293_v0 = vrot.slane %v1289_v49, 4 }
 0x1f5   : > { %1499 = vst [vmem:[#allocation2 + $0x58] sm:$0xf] %v1250_v57  ;;  %1502 = vst [vmem:[#allocation2 + $0x5c] sm:$0x1] %v1501_v58  ;;  %v1275_v1 = vor.u32 %v1273_v41, %v9701_v50  ;;  %v1276_v2 = vrot.slane %v9701_v50, 4  ;;  %7862 = vmatmul.mubr.bf16.gmra.mrb[8].mxu0 %v8564_v54  ;;  %v1297_v3 = vrot.slane %v1295_v51, 7  ;;  %v7304_v6 = vpack.c.bf16 %v728_v33, %v728_v33 }
 0x1f6   : > { %v749_v7 = vadd.f32 %v7643_v37, %v9610_v24  ;;  %v741_v10 = vadd.f32 %v9610_v24, %v740_v47  ;;  %v1518_v8 = vsel %vm9617_vm8, %v1292_v62, %v1517_v46  ;;  %v752_v13 = vadd.f32 %v7644_v53, %v9610_v24  ;;  %7896 = vmatpush3.bf16.msra.mxu0 %v8572_v38  ;;  %v8582_v41 = vld [vmem:[#allocation11 + $0x138] sm:$0xff]   ;;  %v1524_v42 = vld [vmem:[#allocation2 + $0x84] sm:$0xf]  ;;  %v1535_v54 = vld [vmem:[#allocation2 + $0x98] sm:$0x1] }
 0x1f7   : > { %v1511_v11 = vsel %vm9617_vm8, %v1275_v1, %v1510_v60  ;;  %v744_v16 = vadd.f32 %v9610_v24, %v743_v61  ;;  %1519 = vst [vmem:[#allocation2 + $0x78] sm:$0xf] %v1518_v8  ;;  %v1300_v18 = vor.u32 %v1298_v52, %v1297_v3  ;;  %v1302_v9 = vrot.slane %v1297_v3, 4  ;;  %7897 = vmatprep.subr.bf16.mxu0 %v8577_v17  ;;  %v1531_v40 = vld [vmem:[#allocation2 + $0x90] sm:$0xf]  ;;  %v9735_v58 = vld [vmem:[#allocation11 + $0x140] sm:$0xff]  }
 0x1f8   : > { %1512 = vst [vmem:[#allocation2 + $0x6c] sm:$0xf] %v1511_v11  ;;  %v1278_v19 = vshrl.u32 %v7304_v6, 16  ;;  %v1281_v20 = vshll.u32 %v7304_v6, 16  ;;  %v7309_v21 = vpack.c.bf16 %v749_v7, %v749_v7  ;;  %v7307_v14 = vpack.c.bf16 %v741_v10, %v741_v10  ;;  %v7647_v25 = vpop.f32.mrb[24].mxu1  ;;  %v9737_v6 = vld [vmem:[#allocation11] sm:$0xff]  }
 0x1f9   : > { %v7310_v12 = vpack.c.bf16 %v752_v13, %v752_v13  ;;  %v9722_v23 = vpack.c.bf16 %v744_v16, %v744_v16  ;;  %v1301_v26 = vsel %vm9624_vm9, %v1293_v0, %v1300_v18  ;;  %v1522_v27 = vsel %vm9520_vm3, %v1302_v9, %v1521_v5  ;;  %v756_v31 = vpop.f32.mrb[25].mxu1  ;;  %v1528_v8 = vld [vmem:[#allocation2 + $0x8c] sm:$0x1]  ;;  %7741 = vmatprep.subr.bf16.mxu1 %v9737_v6 }
 0x1fa   : > { %v1280_v28 = vrot.slane %v1278_v19, 7  ;;  %v765_v30 = vadd.f32 %v7647_v25, %v9610_v24  ;;  %1520 = vst [vmem:[#allocation2 + $0x7c] sm:$0xf] %v1301_v26  ;;  %1523 = vst [vmem:[#allocation2 + $0x80] sm:$0x1] %v1522_v27  ;;  %v1321_v32 = vshrl.u32 %v7309_v21, 16  ;;  %7898 = vmatpush3.bf16.msra.mxu0 %v8577_v17  ;;  %v757_v13 = vadd.f32 %v9610_v24, %v756_v31 }
 0x1fb   : > { %v1324_v33 = vshll.u32 %v7309_v21, 16  ;;  %v1304_v34 = vshrl.u32 %v7307_v14, 16  ;;  %v1307_v35 = vshll.u32 %v7307_v14, 16  ;;  %v7648_v36 = vpop.f32.mrb[26].mxu1  ;;  %v1329_v44 = vshrl.u32 %v7310_v12, 16  ;;  %v8567_v56 = vld [vmem:[#allocation2 + $0x60] sm:$0xff]   ;;  %7899 = vmatprep.subr.bf16.mxu0 %v8582_v41 }
 0x1fc   : > { %v1283_v37 = vor.u32 %v1281_v20, %v1280_v28  ;;  %v1285_v39 = vrot.slane %v1280_v28, 4  ;;  %v1332_v46 = vshll.u32 %v7310_v12, 16  ;;  %v8565_v47 = vld [vmem:[#allocation2 + $0x54] sm:$0xff]   ;;  %v1323_v48 = vrot.slane %v1321_v32, 7  ;;  %v759_v57 = vpop.f32.mrb[27].mxu1 }
 0x1fd   : > { %v1306_v49 = vrot.slane %v1304_v34, 7  ;;  %v1312_v38 = vshrl.u32 %v9722_v23, 16  ;;  %v1315_v50 = vshll.u32 %v9722_v23, 16  ;;  %v1331_v53 = vrot.slane %v1329_v44, 7  ;;  %7865 = vmatprep.mubr.bf16.mxu0 %v8565_v47  ;;  %v1545_v28 = vld [vmem:[#allocation2 + $0xa8] sm:$0xf] }
 0x1fe   : > { %v1284_v51 = vsel %vm9624_vm9, %v1276_v2, %v1283_v37  ;;  %v1515_v52 = vsel %vm9520_vm3, %v1285_v39, %v1514_v29  ;;  %v7313_v55 = vpack.c.bf16 %v765_v30, %v765_v30  ;;  %v1326_v60 = vor.u32 %v1324_v33, %v1323_v48  ;;  %7866 = vmatmul.mubr.bf16.gmra.mrb[12].mxu0 %v8567_v56  ;;  %v1542_v56 = vld [vmem:[#allocation2 + $0xa4] sm:$0x1] }
 0x1ff   : > { %1513 = vst [vmem:[#allocation2 + $0x70] sm:$0xf] %v1284_v51  ;;  %1516 = vst [vmem:[#allocation2 + $0x74] sm:$0x1] %v1515_v52  ;;  %v1327_v61 = vrot.slane %v1323_v48, 4  ;;  %v1309_v62 = vor.u32 %v1307_v35, %v1306_v49  ;;  %v1310_v0 = vrot.slane %v1306_v49, 4  ;;  %v1334_v1 = vor.u32 %v1332_v46, %v1331_v53  ;;  %7900 = vmatpush3.bf16.msra.mxu0 %v8582_v41 }
 0x200   : > { %v1336_v2 = vrot.slane %v1331_v53, 4  ;;  %v1314_v3 = vrot.slane %v1312_v38, 7  ;;  %v1355_v5 = vshrl.u32 %v7313_v55, 16  ;;  %v1532_v7 = vsel %vm9617_vm8, %v1326_v60, %v1531_v40  ;;  %v7651_v16 = vpop.f32.mrb[28].mxu1  ;;  %7933 = vmatprep.subr.bf16.mxu0 %v9735_v58  ;;  %v1538_v49 = vld [vmem:[#allocation2 + $0x9c] sm:$0xf] }
 0x201   : > { %v1525_v10 = vsel %vm9617_vm8, %v1309_v62, %v1524_v42  ;;  %v1358_v11 = vshll.u32 %v7313_v55, 16  ;;  %1533 = vst [vmem:[#allocation2 + $0x90] sm:$0xf] %v1532_v7  ;;  %v1335_v17 = vsel %vm9624_vm9, %v1327_v61, %v1334_v1  ;;  %v772_v20 = vpop.f32.mrb[29].mxu1  ;;  %v7311_v14 = vpack.c.bf16 %v757_v13, %v757_v13  ;;  %v8570_v47 = vld [vmem:[#allocation2 + $0x78] sm:$0xff]  }
 0x202   : > { %1526 = vst [vmem:[#allocation2 + $0x84] sm:$0xf] %v1525_v10  ;;  %v1536_v18 = vsel %vm9520_vm3, %v1336_v2, %v1535_v54  ;;  %v1317_v9 = vor.u32 %v1315_v50, %v1314_v3  ;;  %v1319_v19 = vrot.slane %v1314_v3, 4  ;;  %1534 = vst [vmem:[#allocation2 + $0x94] sm:$0xf] %v1335_v17  ;;  %v9749_v21 = vrot.slane %v1355_v5, 7 }
 0x203   : > { %1537 = vst [vmem:[#allocation2 + $0x98] sm:$0x1] %v1536_v18  ;;  %v768_v12 = vadd.f32 %v7648_v36, %v9610_v24  ;;  %v760_v23 = vadd.f32 %v9610_v24, %v759_v57  ;;  %v7652_v25 = vpop.f32.mrb[30].mxu1  ;;  %v781_v29 = vadd.f32 %v7651_v16, %v9610_v24  ;;  %v773_v30 = vadd.f32 %v9610_v24, %v772_v20  ;;  %v1549_v55 = vld [vmem:[#allocation2 + $0xb0] sm:$0x1] }
 0x204   : > { %v1318_v26 = vsel %vm9624_vm9, %v1310_v0, %v1317_v9  ;;  %v1529_v27 = vsel %vm9520_vm3, %v1319_v19, %v1528_v8  ;;  %v775_v31 = vpop.f32.mrb[31].mxu1  ;;  %v1360_v32 = vor.u32 %v1358_v11, %v9749_v21  ;;  %v1361_v33 = vrot.slane %v9749_v21, 4  ;;  %v1559_v1 = vld [vmem:[#allocation2 + $0xc0] sm:$0xf] }
 0x205   : > { %1527 = vst [vmem:[#allocation2 + $0x88] sm:$0xf] %v1318_v26  ;;  %1530 = vst [vmem:[#allocation2 + $0x8c] sm:$0x1] %v1529_v27  ;;  %v1338_v34 = vshrl.u32 %v7311_v14, 16  ;;  %v1341_v35 = vshll.u32 %v7311_v14, 16  ;;  %v7314_v36 = vpack.c.bf16 %v768_v12, %v768_v12  ;;  %v7312_v41 = vpack.c.bf16 %v760_v23, %v760_v23 }
 0x206   : > { %v7317_v37 = vpack.c.bf16 %v781_v29, %v781_v29  ;;  %v7315_v39 = vpack.c.bf16 %v773_v30, %v773_v30  ;;  %v8568_v40 = vld [vmem:[#allocation2 + $0x6c] sm:$0xff]   ;;  %v1546_v42 = vsel %vm9617_vm8, %v1360_v32, %v1545_v28  ;;  %v784_v46 = vadd.f32 %v7652_v25, %v9610_v24  ;;  %v1552_v29 = vld [vmem:[#allocation2 + $0xb4] sm:$0xf] }
 0x207   : > { %v1340_v44 = vrot.slane %v1338_v34, 7  ;;  %v776_v48 = vadd.f32 %v9610_v24, %v775_v31  ;;  %1547 = vst [vmem:[#allocation2 + $0xa8] sm:$0xf] %v1546_v42  ;;  %v1363_v38 = vshrl.u32 %v7314_v36, 16  ;;  %v1366_v50 = vshll.u32 %v7314_v36, 16  ;;  %7869 = vmatprep.mubr.bf16.mxu0 %v8568_v40 }
 0x208   : > { %v1346_v51 = vshrl.u32 %v7312_v41, 16  ;;  %v1349_v52 = vshll.u32 %v7312_v41, 16  ;;  %v1389_v57 = vshrl.u32 %v7317_v37, 16  ;;  %v1392_v60 = vshll.u32 %v7317_v37, 16  ;;  %7870 = vmatmul.mubr.bf16.gmra.mrb[16].mxu0 %v8570_v47  ;;  %v830_v61 = vpop.f32.mrb[32].mxu1 }
 0x209   : > { %v1343_v53 = vor.u32 %v1341_v35, %v1340_v44  ;;  %v1344_v54 = vrot.slane %v1340_v44, 4  ;;  %v1365_v62 = vrot.slane %v1363_v38, 7  ;;  %v1372_v2 = vshrl.u32 %v7315_v39, 16  ;;  %v7671_v5 = vpop.f32.mrb[33].mxu1  ;;  %v3518_v30 = vld [vmem:[#allocation2 + $0x10] sm:$0xf] }
 0x20a   : > { %v1348_v0 = vrot.slane %v1346_v51, 7  ;;  %v1375_v3 = vshll.u32 %v7315_v39, 16  ;;  %v1391_v10 = vrot.slane %v1389_v57, 7  ;;  %v7318_v8 = vpack.c.bf16 %v784_v46, %v784_v46  ;;  %v833_v13 = vpop.f32.mrb[34].mxu1  ;;  %v8573_v35 = vld [vmem:[#allocation2 + $0x90] sm:$0xff]  }
 0x20b   : > { %v1539_v7 = vsel %vm9617_vm8, %v1343_v53, %v1538_v49  ;;  %v7316_v11 = vpack.c.bf16 %v776_v48, %v776_v48  ;;  %v1368_v16 = vor.u32 %v1366_v50, %v1365_v62  ;;  %v1370_v17 = vrot.slane %v1365_v62, 4  ;;  %v7672_v20 = vpop.f32.mrb[35].mxu1  ;;  %v1563_v41 = vld [vmem:[#allocation2 + $0xc8] sm:$0x1] }
 0x20c   : > { %1540 = vst [vmem:[#allocation2 + $0x9c] sm:$0xf] %v1539_v7  ;;  %v1351_v18 = vor.u32 %v1349_v52, %v1348_v0  ;;  %v1353_v9 = vrot.slane %v1348_v0, 4  ;;  %v8571_v19 = vld [vmem:[#allocation2 + $0x84] sm:$0xff]   ;;  %v1394_v21 = vor.u32 %v1392_v60, %v1391_v10  ;;  %v1395_v14 = vrot.slane %v1391_v10, 4 }
 0x20d   : > { %v1374_v12 = vrot.slane %v1372_v2, 7  ;;  %v1397_v23 = vshrl.u32 %v7318_v8, 16  ;;  %v1369_v25 = vsel %vm9624_vm9, %v1361_v33, %v1368_v16  ;;  %v1550_v26 = vsel %vm9520_vm3, %v1370_v17, %v1549_v55  ;;  %7873 = vmatprep.mubr.bf16.mxu0 %v8571_v19  ;;  %v1556_v52 = vld [vmem:[#allocation2 + $0xbc] sm:$0x1]  ;;  %v3519_v60 = vld [vmem:[#allocation2 + $0x14] sm:$0x1] }
 0x20e   : > { %v1352_v27 = vsel %vm9624_vm9, %v1344_v54, %v1351_v18  ;;  %v1543_v28 = vsel %vm9520_vm3, %v1353_v9, %v1542_v56  ;;  %1548 = vst [vmem:[#allocation2 + $0xac] sm:$0xf] %v1369_v25  ;;  %1551 = vst [vmem:[#allocation2 + $0xb0] sm:$0x1] %v1550_v26  ;;  %v1560_v31 = vsel %vm9617_vm8, %v1394_v21, %v1559_v1  ;;  %v1400_v36 = vshll.u32 %v7318_v8, 16 }
 0x20f   : > { %1541 = vst [vmem:[#allocation2 + $0xa0] sm:$0xf] %v1352_v27  ;;  %1544 = vst [vmem:[#allocation2 + $0xa4] sm:$0x1] %v1543_v28  ;;  %v1377_v32 = vor.u32 %v1375_v3, %v1374_v12  ;;  %v1378_v33 = vrot.slane %v1374_v12, 4  ;;  %v1399_v34 = vrot.slane %v1397_v23, 7  ;;  %v831_v40 = vadd.f32 %v9610_v24, %v830_v61 }
 0x210   : > { %1561 = vst [vmem:[#allocation2 + $0xc0] sm:$0xf] %v1560_v31  ;;  %v1380_v37 = vshrl.u32 %v7316_v11, 16  ;;  %v1383_v39 = vshll.u32 %v7316_v11, 16  ;;  %v834_v46 = vadd.f32 %v9610_v24, %v833_v13  ;;  %7874 = vmatmul.mubr.bf16.gmra.mrb[20].mxu0 %v8573_v35  ;;  %v3571_v47 = vrot.slane %v3569_v43, 5 }
 0x211   : > { %v1553_v42 = vsel %vm9617_vm8, %v1377_v32, %v1552_v29  ;;  %v1404_v44 = vrot.slane %v1399_v34, 4  ;;  %v1402_v48 = vor.u32 %v1400_v36, %v1399_v34  ;;  %v838_v38 = vmul.f32 0.0, %v831_v40  ;;  %v3520_v61 = vld [vmem:[#allocation2 + $0x18] sm:$0xf]  ;;  %v3521_v2 = vld [vmem:[#allocation2 + $0x1c] sm:$0xf] }
 0x212   : > { %1554 = vst [vmem:[#allocation2 + $0xb4] sm:$0xf] %v1553_v42  ;;  %v1382_v49 = vrot.slane %v1380_v37, 7  ;;  %v3575_v50 = vshll.u32 %v3518_v30, 16  ;;  %v839_v53 = vmul.f32 0.0, %v834_v46  ;;  %v3572_v54 = vor.u32 %v3571_v47, %v9693_v15 }
 0x213   : > { %v1564_v51 = vsel %vm9520_vm3, %v1404_v44, %v1563_v41  ;;  %v3579_v55 = vshrl.u32 %v3518_v30, 16  ;;  %v1403_v24 = vsel %vm9624_vm9, %v1395_v14, %v1402_v48  ;;  %v7285_v43 = vpack.c.bf16 %v838_v38, %v838_v38  ;;  %v1030_v13 = vld [vmem:[#allocation2] sm:$0xf]  ;;  %v1034_v20 = vld [vmem:[#allocation2 + $0x8] sm:$0x1] }
 0x214   : > { %1565 = vst [vmem:[#allocation2 + $0xc8] sm:$0x1] %v1564_v51  ;;  %v1385_v56 = vor.u32 %v1383_v39, %v1382_v49  ;;  %v1387_v22 = vrot.slane %v1382_v49, 4  ;;  %v11342_v57 = vmov 0  ;;  %1562 = vst [vmem:[#allocation2 + $0xc4] sm:$0xf] %v1403_v24  ;;  %v7286_v62 = vpack.c.bf16 %v839_v53, %v839_v53 }
 0x215   : > { %v11343_v57 = vsel %vm9791_vm12, 4294967295, %v11342_v57  ;;  %v3573_v0 = vrot.slane %v3572_v54, 4  ;;  %v3577_v15 = vrot.slane %v3575_v50, 5  ;;  %v3581_v1 = vrot.slane %v3579_v55, 4  ;;  %v8578_v11 = vld [vmem:[#allocation2 + $0xa8] sm:$0xff]  }
 0x216   : > { %11344 = vst [vmem:[#allocation29_spill] sm:$0xff] %v11343_v57  ;;  %v1386_v3 = vsel %vm9624_vm9, %v1378_v33, %v1385_v56  ;;  %v1557_v5 = vsel %vm9520_vm3, %v1387_v22, %v1556_v52  ;;  %v1009_v7 = vshrl.u32 %v7285_v43, 16  ;;  %v1012_v10 = vshll.u32 %v7285_v43, 16  ;;  %v8576_v8 = vld [vmem:[#allocation2 + $0x9c] sm:$0xff]   ;;  %v3523_v33 = vld [vmem:[#allocation2 + $0x24] sm:$0xf] }
 0x217   : > { %1555 = vst [vmem:[#allocation2 + $0xb8] sm:$0xf] %v1386_v3  ;;  %1558 = vst [vmem:[#allocation2 + $0xbc] sm:$0x1] %v1557_v5  ;;  %v1017_v16 = vshrl.u32 %v7286_v62, 16  ;;  %v1020_v17 = vshll.u32 %v7286_v62, 16  ;;  %v3578_v18 = vsel %vm9791_vm12, %v3573_v0, %v3577_v15  ;;  %v3582_v9 = vor.u32 %v3581_v1, %v3577_v15  ;;  %7877 = vmatprep.mubr.bf16.mxu0 %v8576_v8 }
 0x218   : > { %v1011_v19 = vrot.slane %v1009_v7, 7  ;;  %v3585_v21 = vshll.u32 %v3519_v60, 16  ;;  %v3522_v14 = vld [vmem:[#allocation2 + $0x20] sm:$0x1]  ;;  %v3590_v12 = vshrl.u32 %v3520_v61, 16  ;;  %v3593_v23 = vshll.u32 %v3520_v61, 16  ;;  %7878 = vmatmul.mubr.bf16.gmra.mrb[24].mxu0 %v8578_v11 }
 0x219   : > { %v1019_v25 = vrot.slane %v1017_v16, 7  ;;  %v3583_v26 = vrot.slane %v3582_v9, 4  ;;  %v3599_v27 = vshll.u32 %v3521_v2, 16  ;;  %v3603_v28 = vshrl.u32 %v3521_v2, 16  ;;  %v3524_v37 = vld [vmem:[#allocation2 + $0x28] sm:$0xf] }
 0x21a   : > { %v1014_v29 = vor.u32 %v1012_v10, %v1011_v19  ;;  %v1015_v30 = vrot.slane %v1011_v19, 4  ;;  %v3587_v31 = vrot.slane %v3585_v21, 5  ;;  %v3592_v32 = vrot.slane %v3590_v12, 4  ;;  %v3525_v46 = vld [vmem:[#allocation2 + $0x2c] sm:$0x1]  ;;  %v8628_v57 = vld [vmem:[#allocation11 + $0x1b8] sm:$0xff]  }
 0x21b   : > { %v1022_v34 = vor.u32 %v1020_v17, %v1019_v25  ;;  %v1024_v35 = vrot.slane %v1019_v25, 4  ;;  %v3595_v36 = vrot.slane %v3593_v23, 5  ;;  %v3601_v41 = vrot.slane %v3599_v27, 5  ;;  %v3526_v50 = vld [vmem:[#allocation2 + $0x30] sm:$0xf]  ;;  %v8583_v56 = vld [vmem:[#allocation2 + $0xc0] sm:$0xff]  }
 0x21c   : > { %v1031_v39 = vsel %vm9617_vm8, %v1014_v29, %v1030_v13  ;;  %v3588_v40 = vsel %vm9791_vm12, %v3583_v26, %v3587_v31  ;;  %v3605_v42 = vrot.slane %v3603_v28, 4  ;;  %v3609_v44 = vshll.u32 %v3522_v14, 16  ;;  %v3527_v24 = vld [vmem:[#allocation2 + $0x34] sm:$0xf]  ;;  %v3528_v1 = vld [vmem:[#allocation2 + $0x38] sm:$0x1] }
 0x21d   : > { %1032 = vst [vmem:[#allocation2] sm:$0xf] %v1031_v39  ;;  %v1023_v47 = vsel %vm9624_vm9, %v1015_v30, %v1022_v34  ;;  %v1035_v48 = vsel %vm9520_vm3, %v1024_v35, %v1034_v20  ;;  %v7115_v49 = vcombine.low %v3578_v18, %v3588_v40  ;;  %v3596_v38 = vor.u32 %v3595_v36, %v3592_v32  ;;  %v3529_v8 = vld [vmem:[#allocation2 + $0x3c] sm:$0xf] }
 0x21e   : > { %1033 = vst [vmem:[#allocation2 + $0x4] sm:$0xf] %v1023_v47  ;;  %1036 = vst [vmem:[#allocation2 + $0x8] sm:$0x1] %v1035_v48  ;;  %v8581_v51 = vld [vmem:[#allocation2 + $0xb4] sm:$0xff]   ;;  %v3606_v52 = vor.u32 %v3605_v42, %v3601_v41  ;;  %v3611_v53 = vrot.slane %v3609_v44, 5 }
 0x21f   : > { %v3614_v54 = vshrl.u32 %v3523_v33, 16  ;;  %v3617_v55 = vshll.u32 %v3523_v33, 16  ;;  %v3597_v22 = vrot.slane %v3596_v38, 4  ;;  %v3623_v43 = vshll.u32 %v3524_v37, 16  ;;  %7881 = vmatprep.mubr.bf16.mxu0 %v8581_v51  ;;  %v3530_v48 = vld [vmem:[#allocation2 + $0x40] sm:$0xf] }
 0x220   : > { %v3627_v60 = vshrl.u32 %v3524_v37, 16  ;;  %v3633_v61 = vshll.u32 %v3525_v46, 16  ;;  %v3607_v62 = vrot.slane %v3606_v52, 4  ;;  %v3638_v2 = vshrl.u32 %v3526_v50, 16  ;;  %7882 = vmatmul.mubr.bf16.gmra.mrb[28].mxu0 %v8583_v56  ;;  %v1602_v56 = vld [vmem:[#allocation2 + $0xc] sm:$0xf] }
 0x221   : > { %v3616_v0 = vrot.slane %v3614_v54, 4  ;;  %v3619_v15 = vrot.slane %v3617_v55, 5  ;;  %v3602_v3 = vsel %vm9791_vm12, %v3597_v22, %v3601_v41  ;;  %v3625_v5 = vrot.slane %v3623_v43, 5  ;;  %7901 = vmatprep.mubr.bf16.mxu0 %v7115_v49  ;;  %v8589_v41 = vld [vmem:[#allocation11 + $0x148] sm:$0xff]  }
 0x222   : > { %v3629_v7 = vrot.slane %v3627_v60, 4  ;;  %v3635_v10 = vrot.slane %v3633_v61, 5  ;;  %v3612_v11 = vsel %vm9791_vm12, %v3607_v62, %v3611_v53  ;;  %v3640_v16 = vrot.slane %v3638_v2, 4  ;;  %v3531_v55 = vld [vmem:[#allocation2 + $0x44] sm:$0x1]  ;;  %v8590_v62 = vld [vmem:[#allocation11 + $0x150] sm:$0xff]  }
 0x223   : > { %v3620_v13 = vor.u32 %v3619_v15, %v3616_v0  ;;  %v3641_v17 = vshll.u32 %v3526_v50, 16  ;;  %v7116_v18 = vcombine.low %v3602_v3, %v3612_v11  ;;  %v3647_v19 = vshll.u32 %v3527_v24, 16  ;;  %v1603_v2 = vld [vmem:[#allocation2 + $0x10] sm:$0xf] }
 0x224   : > { %v3630_v9 = vor.u32 %v3629_v7, %v3625_v5  ;;  %v3651_v20 = vshrl.u32 %v3527_v24, 16  ;;  %v3657_v12 = vshll.u32 %v3528_v1, 16  ;;  %v1600_v23 = vld [vmem:[#allocation2] sm:$0xf]  ;;  %v3662_v25 = vshrl.u32 %v3529_v8, 16 }
 0x225   : > { %v3621_v21 = vrot.slane %v3620_v13, 4  ;;  %v3643_v14 = vrot.slane %v3641_v17, 5  ;;  %v3649_v27 = vrot.slane %v3647_v19, 5  ;;  %v1601_v29 = vld [vmem:[#allocation2 + $0x4] sm:$0xf]  ;;  %v1668_v30 = vshrl.u32 %v1600_v23, 16 }
 0x226   : > { %v3631_v26 = vrot.slane %v3630_v9, 4  ;;  %v3653_v28 = vrot.slane %v3651_v20, 4  ;;  %v3659_v33 = vrot.slane %v3657_v12, 5  ;;  %v1648_v34 = vld [vmem:[#allocation2 + $0x8] sm:$0x1]  ;;  %v1671_v35 = vshll.u32 %v1600_v23, 16 }
 0x227   : > { %v3626_v31 = vsel %vm9791_vm12, %v3621_v21, %v3625_v5  ;;  %v3644_v32 = vor.u32 %v3643_v14, %v3640_v16  ;;  %v1670_v39 = vrot.slane %v1668_v30, 4  ;;  %v1677_v40 = vshll.u32 %v1601_v29, 16  ;;  %v1649_v16 = vld [vmem:[#allocation2 + $0x14] sm:$0x1] }
 0x228   : > { %v3636_v36 = vsel %vm9791_vm12, %v3631_v26, %v3635_v10  ;;  %v3654_v37 = vor.u32 %v3653_v28, %v3649_v27  ;;  %v1673_v46 = vrot.slane %v1671_v35, 5  ;;  %v1681_v47 = vshrl.u32 %v1601_v29, 16  ;;  %7902 = vmatmul.mubr.bf16.vlgmr.msra.gmra.mrb[0].mxu0 %v7116_v18  ;;  %v8591_v21 = vld [vmem:[#allocation11 + $0x158] sm:$0xff]   ;;  %v1604_v26 = vld [vmem:[#allocation2 + $0x18] sm:$0xf] }
 0x229   : > { %v7117_v42 = vcombine.low %v3626_v31, %v3636_v36  ;;  %v3645_v44 = vrot.slane %v3644_v32, 4  ;;  %v1679_v38 = vrot.slane %v1677_v40, 5  ;;  %v1687_v50 = vshll.u32 %v1648_v34, 16  ;;  %7934 = vmatpush3.bf16.msra.mxu0 %v9735_v58  ;;  %v1605_v31 = vld [vmem:[#allocation2 + $0x1c] sm:$0xf] }
 0x22a   : > { %v3655_v49 = vrot.slane %v3654_v37, 4  ;;  %v3664_v51 = vrot.slane %v3662_v25, 4  ;;  %v1674_v53 = vor.u32 %v1673_v46, %v1670_v39  ;;  %v1683_v54 = vrot.slane %v1681_v47, 4  ;;  %7935 = vmatprep.subr.bf16.mxu0 %v8589_v41  ;;  %v1650_v35 = vld [vmem:[#allocation2 + $0x20] sm:$0x1] }
 0x22b   : > { %7905 = vmatprep.mubr.bf16.mxu0 %v7117_v42  ;;  %v3650_v52 = vsel %vm9791_vm12, %v3645_v44, %v3649_v27  ;;  %v3665_v24 = vshll.u32 %v3529_v8, 16  ;;  %v1689_v43 = vrot.slane %v1687_v50, 5  ;;  %v3671_v60 = vshll.u32 %v3530_v48, 16  ;;  %v3532_v40 = vld [vmem:[#allocation2 + $0x48] sm:$0xf]  ;;  %v8592_v42 = vld [vmem:[#allocation11 + $0x160] sm:$0xff]  }
 0x22c   : > { %v3660_v22 = vsel %vm9791_vm12, %v3655_v49, %v3659_v33  ;;  %v3675_v61 = vshrl.u32 %v3530_v48, 16  ;;  %v1675_v15 = vrot.slane %v1674_v53, 4  ;;  %v1684_v58 = vor.u32 %v1683_v54, %v1679_v38 }
 0x22d   : > { %v7118_v0 = vcombine.low %v3650_v52, %v3660_v22  ;;  %v3667_v1 = vrot.slane %v3665_v24, 5  ;;  %v3673_v3 = vrot.slane %v3671_v60, 5  ;;  %v3681_v7 = vshll.u32 %v3531_v55, 16  ;;  %7936 = vmatpush3.bf16.msra.mxu0 %v8589_v41  ;;  %v3533_v52 = vld [vmem:[#allocation2 + $0x4c] sm:$0xf] }
 0x22e   : > { %v3677_v5 = vrot.slane %v3675_v61, 4  ;;  %v1692_v10 = vshrl.u32 %v1602_v56, 16  ;;  %v1680_v8 = vsel %vm9791_vm12, %v1675_v15, %v1679_v38  ;;  %v1685_v11 = vrot.slane %v1684_v58, 4  ;;  %7937 = vmatprep.subr.bf16.mxu0 %v8590_v62  ;;  %v3534_v24 = vld [vmem:[#allocation2 + $0x50] sm:$0x1] }
 0x22f   : > { %v3668_v13 = vor.u32 %v3667_v1, %v3664_v51  ;;  %v1695_v17 = vshll.u32 %v1602_v56, 16  ;;  %v3683_v9 = vrot.slane %v3681_v7, 5  ;;  %v1701_v20 = vshll.u32 %v1603_v2, 16 }
 0x230   : > { %v3678_v18 = vor.u32 %v3677_v5, %v3673_v3  ;;  %v1694_v19 = vrot.slane %v1692_v10, 4  ;;  %v1690_v14 = vsel %vm9791_vm12, %v1685_v11, %v1689_v43  ;;  %v1705_v25 = vshrl.u32 %v1603_v2, 16  ;;  %7906 = vmatmul.mubr.bf16.gmra.mrb[4].mxu0 %v7118_v0  ;;  %v8593_v0 = vld [vmem:[#allocation11 + $0x168] sm:$0xff]  }
 0x231   : > { %v3669_v12 = vrot.slane %v3668_v13, 4  ;;  %v1697_v23 = vrot.slane %v1695_v17, 5  ;;  %v7003_v27 = vcombine.low %v1680_v8, %v1690_v14  ;;  %v1703_v29 = vrot.slane %v1701_v20, 5  ;;  %7938 = vmatpush3.bf16.msra.mxu0 %v8590_v62  ;;  %v3535_v62 = vld [vmem:[#allocation2 + $0x54] sm:$0xf]  ;;  %v8595_v11 = vld [vmem:[#allocation11 + $0x8] sm:$0xff]  }
 0x232   : > { %v3679_v28 = vrot.slane %v3678_v18, 4  ;;  %v1711_v30 = vshll.u32 %v1649_v16, 16  ;;  %v1707_v34 = vrot.slane %v1705_v25, 4  ;;  %v1716_v37 = vshrl.u32 %v1604_v26, 16  ;;  %7939 = vmatprep.subr.bf16.mxu0 %v8591_v21  ;;  %v3536_v8 = vld [vmem:[#allocation2 + $0x58] sm:$0xf] }
 0x233   : > { %v3674_v32 = vsel %vm9791_vm12, %v3669_v12, %v3673_v3  ;;  %v1698_v33 = vor.u32 %v1697_v23, %v1694_v19  ;;  %7709 = vmatprep.mubr.bf16.mxu1 %v7003_v27  ;;  %v1719_v39 = vshll.u32 %v1604_v26, 16  ;;  %v1725_v48 = vshll.u32 %v1605_v31, 16  ;;  %v3537_v18 = vld [vmem:[#allocation2 + $0x5c] sm:$0x1]  ;;  %v1606_v19 = vld [vmem:[#allocation2 + $0x24] sm:$0xf] }
 0x234   : > { %v3684_v36 = vsel %vm9791_vm12, %v3679_v28, %v3683_v9  ;;  %v1713_v41 = vrot.slane %v1711_v30, 5  ;;  %v1708_v47 = vor.u32 %v1707_v34, %v1703_v29  ;;  %v1718_v49 = vrot.slane %v1716_v37, 4  ;;  %v1607_v23 = vld [vmem:[#allocation2 + $0x28] sm:$0xf]  ;;  %v1651_v34 = vld [vmem:[#allocation2 + $0x2c] sm:$0x1] }
 0x235   : > { %v7119_v44 = vcombine.low %v3674_v32, %v3684_v36  ;;  %v1699_v46 = vrot.slane %v1698_v33, 4  ;;  %v1721_v38 = vrot.slane %v1719_v39, 5  ;;  %v1729_v50 = vshrl.u32 %v1605_v31, 16  ;;  %7940 = vmatpush3.bf16.msra.mxu0 %v8591_v21  ;;  %v8596_v25 = vld [vmem:[#allocation11 + $0x170] sm:$0xff]  }
 0x236   : > { %v1735_v51 = vshll.u32 %v1650_v35, 16  ;;  %v1709_v54 = vrot.slane %v1708_v47, 4  ;;  %v1727_v55 = vrot.slane %v1725_v48, 5  ;;  %v3686_v56 = vshrl.u32 %v3532_v40, 16  ;;  %7941 = vmatprep.subr.bf16.mxu0 %v8592_v42  ;;  %v8597_v35 = vld [vmem:[#allocation11 + $0x10] sm:$0xff]  }
 0x237   : > { %7909 = vmatprep.mubr.bf16.mxu0 %v7119_v44  ;;  %v1704_v53 = vsel %vm9791_vm12, %v1699_v46, %v1703_v29  ;;  %v1722_v22 = vor.u32 %v1721_v38, %v1718_v49  ;;  %v1731_v43 = vrot.slane %v1729_v50, 4  ;;  %v3689_v61 = vshll.u32 %v3532_v40, 16  ;;  %v1608_v40 = vld [vmem:[#allocation2 + $0x30] sm:$0xf]  ;;  %v1609_v48 = vld [vmem:[#allocation2 + $0x34] sm:$0xf] }
 0x238   : > { %v1737_v60 = vrot.slane %v1735_v51, 5  ;;  %v1714_v15 = vsel %vm9791_vm12, %v1709_v54, %v1713_v41  ;;  %v3688_v58 = vrot.slane %v3686_v56, 4  ;;  %v3695_v1 = vshll.u32 %v3533_v52, 16 }
 0x239   : > { %v3699_v2 = vshrl.u32 %v3533_v52, 16  ;;  %v7004_v3 = vcombine.low %v1704_v53, %v1714_v15  ;;  %v1723_v5 = vrot.slane %v1722_v22, 4  ;;  %v1732_v7 = vor.u32 %v1731_v43, %v1727_v55  ;;  %7942 = vmatpush3.bf16.msra.mxu0 %v8592_v42  ;;  %v8599_v42 = vld [vmem:[#allocation11 + $0x178] sm:$0xff]  }
 0x23a   : > { %v3691_v10 = vrot.slane %v3689_v61, 5  ;;  %v3697_v13 = vrot.slane %v3695_v1, 5  ;;  %v3705_v17 = vshll.u32 %v3534_v24, 16  ;;  %v3710_v9 = vshrl.u32 %v3535_v62, 16  ;;  %7943 = vmatprep.subr.bf16.mxu0 %v8593_v0  ;;  %v8598_v52 = vld [vmem:[#allocation11 + $0x18] sm:$0xff]  }
 0x23b   : > { %v3701_v16 = vrot.slane %v3699_v2, 4  ;;  %7710 = vmatmul.mubr.bf16.vlgmr.msra.gmra.mrb[40].mxu1 %v7004_v3  ;;  %v1728_v20 = vsel %vm9791_vm12, %v1723_v5, %v1727_v55  ;;  %v1733_v21 = vrot.slane %v1732_v7, 4  ;;  %v3713_v12 = vshll.u32 %v3535_v62, 16  ;;  %v1652_v61 = vld [vmem:[#allocation2 + $0x38] sm:$0x1] }
 0x23c   : > { %v3692_v14 = vor.u32 %v3691_v10, %v3688_v58  ;;  %v3707_v27 = vrot.slane %v3705_v17, 5  ;;  %v3712_v28 = vrot.slane %v3710_v9, 4  ;;  %v3719_v29 = vshll.u32 %v3536_v8, 16  ;;  %7742 = vmatpush3.bf16.msra.mxu1 %v9737_v6  ;;  %v3538_v1 = vld [vmem:[#allocation2 + $0x60] sm:$0xf]  ;;  %v8602_v2 = vld [vmem:[#allocation11 + $0x180] sm:$0xff]  }
 0x23d   : > { %v3702_v26 = vor.u32 %v3701_v16, %v3697_v13  ;;  %v1738_v30 = vsel %vm9791_vm12, %v1733_v21, %v1737_v60  ;;  %v3715_v32 = vrot.slane %v3713_v12, 5  ;;  %v3723_v33 = vshrl.u32 %v3536_v8, 16  ;;  %7743 = vmatprep.subr.bf16.mxu1 %v8595_v11  ;;  %7944 = vmatpush3.bf16.msra.mxu0 %v8593_v0  ;;  %v3539_v17 = vld [vmem:[#allocation2 + $0x64] sm:$0xf] }
 0x23e   : > { %v3693_v31 = vrot.slane %v3692_v14, 4  ;;  %v7005_v36 = vcombine.low %v1728_v20, %v1738_v30  ;;  %v3721_v37 = vrot.slane %v3719_v29, 5  ;;  %v3729_v39 = vshll.u32 %v3537_v18, 16  ;;  %7945 = vmatprep.subr.bf16.mxu0 %v8596_v25  ;;  %v8600_v18 = vld [vmem:[#allocation11 + $0x20] sm:$0xff]   ;;  %v3540_v14 = vld [vmem:[#allocation2 + $0x68] sm:$0x1] }
 0x23f   : > { %v3703_v41 = vrot.slane %v3702_v26, 4  ;;  %v3716_v6 = vor.u32 %v3715_v32, %v3712_v28  ;;  %v3725_v46 = vrot.slane %v3723_v33, 4  ;;  %v1740_v47 = vshrl.u32 %v1606_v19, 16  ;;  %v3542_v32 = vld [vmem:[#allocation2 + $0x70] sm:$0xf] }
 0x240   : > { %v3698_v44 = vsel %vm9791_vm12, %v3693_v31, %v3697_v13  ;;  %7713 = vmatprep.mubr.bf16.mxu1 %v7005_v36  ;;  %v3731_v38 = vrot.slane %v3729_v39, 5  ;;  %v1743_v50 = vshll.u32 %v1606_v19, 16  ;;  %v1749_v51 = vshll.u32 %v1607_v23, 16  ;;  %7744 = vmatpush3.bf16.msra.mxu1 %v8595_v11 }
 0x241   : > { %v3708_v49 = vsel %vm9791_vm12, %v3703_v41, %v3707_v27  ;;  %v3717_v54 = vrot.slane %v3716_v6, 4  ;;  %v3726_v55 = vor.u32 %v3725_v46, %v3721_v37  ;;  %v1742_v24 = vrot.slane %v1740_v47, 4  ;;  %7745 = vmatprep.subr.bf16.mxu1 %v8597_v35  ;;  %7946 = vmatpush3.bf16.msra.mxu0 %v8596_v25  ;;  %v3541_v27 = vld [vmem:[#allocation2 + $0x6c] sm:$0xf]  ;;  %v8601_v41 = vld [vmem:[#allocation11 + $0x28] sm:$0xff]  }
 0x242   : > { %v7120_v53 = vcombine.low %v3698_v44, %v3708_v49  ;;  %v1745_v56 = vrot.slane %v1743_v50, 5  ;;  %v1751_v22 = vrot.slane %v1749_v51, 5  ;;  %v1753_v43 = vshrl.u32 %v1607_v23, 16  ;;  %7947 = vmatprep.subr.bf16.mxu0 %v8599_v42 }
 0x243   : > { %v1759_v60 = vshll.u32 %v1651_v34, 16  ;;  %v3722_v62 = vsel %vm9791_vm12, %v3717_v54, %v3721_v37  ;;  %v3727_v0 = vrot.slane %v3726_v55, 4  ;;  %v1764_v15 = vshrl.u32 %v1608_v40, 16 }
 0x244   : > { %7910 = vmatmul.mubr.bf16.gmra.mrb[8].mxu0 %v7120_v53  ;;  %v1767_v58 = vshll.u32 %v1608_v40, 16  ;;  %v1746_v3 = vor.u32 %v1745_v56, %v1742_v24  ;;  %v1755_v5 = vrot.slane %v1753_v43, 4  ;;  %v1773_v10 = vshll.u32 %v1609_v48, 16  ;;  %7746 = vmatpush3.bf16.msra.mxu1 %v8597_v35  ;;  %v1610_v24 = vld [vmem:[#allocation2 + $0x3c] sm:$0xf]  ;;  %v8603_v56 = vld [vmem:[#allocation11 + $0x30] sm:$0xff]  }
 0x245   : > { %v1761_v7 = vrot.slane %v1759_v60, 5  ;;  %v3732_v8 = vsel %vm9791_vm12, %v3727_v0, %v3731_v38  ;;  %v1766_v11 = vrot.slane %v1764_v15, 4  ;;  %v1777_v16 = vshrl.u32 %v1609_v48, 16  ;;  %7747 = vmatprep.subr.bf16.mxu1 %v8598_v52  ;;  %7948 = vmatpush3.bf16.msra.mxu0 %v8599_v42  ;;  %v3543_v38 = vld [vmem:[#allocation2 + $0x74] sm:$0x1] }
 0x246   : > { %v1769_v13 = vrot.slane %v1767_v58, 5  ;;  %v7121_v9 = vcombine.low %v3722_v62, %v3732_v8  ;;  %v1747_v19 = vrot.slane %v1746_v3, 4  ;;  %v1756_v20 = vor.u32 %v1755_v5, %v1751_v22  ;;  %7981 = vmatprep.subr.bf16.mxu0 %v8602_v2  ;;  %v1611_v62 = vld [vmem:[#allocation2 + $0x40] sm:$0xf]  ;;  %v1653_v2 = vld [vmem:[#allocation2 + $0x44] sm:$0x1] }
 0x247   : > { %v1775_v21 = vrot.slane %v1773_v10, 5  ;;  %v1779_v23 = vrot.slane %v1777_v16, 4  ;;  %v1783_v25 = vshll.u32 %v1652_v61, 16  ;;  %v3734_v26 = vshrl.u32 %v3538_v1, 16  ;;  %v1612_v3 = vld [vmem:[#allocation2 + $0x48] sm:$0xf] }
 0x248   : > { %v1770_v12 = vor.u32 %v1769_v13, %v1766_v11  ;;  %7913 = vmatprep.mubr.bf16.mxu0 %v7121_v9  ;;  %v1752_v28 = vsel %vm9791_vm12, %v1747_v19, %v1751_v22  ;;  %v1757_v29 = vrot.slane %v1756_v20, 4  ;;  %v3737_v30 = vshll.u32 %v3538_v1, 16  ;;  %7748 = vmatpush3.bf16.msra.mxu1 %v8598_v52  ;;  %v8604_v11 = vld [vmem:[#allocation11 + $0x38] sm:$0xff]  }
 0x249   : > { %v3743_v31 = vshll.u32 %v3539_v17, 16  ;;  %v1780_v34 = vor.u32 %v1779_v23, %v1775_v21  ;;  %v1785_v35 = vrot.slane %v1783_v25, 5  ;;  %v3736_v36 = vrot.slane %v3734_v26, 4  ;;  %7749 = vmatprep.subr.bf16.mxu1 %v8600_v18 }
 0x24a   : > { %v1771_v33 = vrot.slane %v1770_v12, 4  ;;  %v1762_v37 = vsel %vm9791_vm12, %v1757_v29, %v1761_v7  ;;  %v3739_v39 = vrot.slane %v3737_v30, 5  ;;  %v3747_v42 = vshrl.u32 %v3539_v17, 16 }
 0x24b   : > { %v3745_v40 = vrot.slane %v3743_v31, 5  ;;  %v7006_v44 = vcombine.low %v1752_v28, %v1762_v37  ;;  %v1781_v46 = vrot.slane %v1780_v34, 4  ;;  %v3753_v47 = vshll.u32 %v3540_v14, 16  ;;  %v1613_v14 = vld [vmem:[#allocation2 + $0x4c] sm:$0xf] }
 0x24c   : > { %v1776_v6 = vsel %vm9791_vm12, %v1771_v33, %v1775_v21  ;;  %v3740_v48 = vor.u32 %v3739_v39, %v3736_v36  ;;  %v3749_v49 = vrot.slane %v3747_v42, 4  ;;  %v3758_v50 = vshrl.u32 %v3541_v27, 16  ;;  %7750 = vmatpush3.bf16.msra.mxu1 %v8600_v18 }
 0x24d   : > { %v3761_v51 = vshll.u32 %v3541_v27, 16  ;;  %7714 = vmatmul.mubr.bf16.gmra.mrb[44].mxu1 %v7006_v44  ;;  %v1786_v52 = vsel %vm9791_vm12, %v1781_v46, %v1785_v35  ;;  %v3755_v53 = vrot.slane %v3753_v47, 5  ;;  %v3767_v54 = vshll.u32 %v3542_v32, 16  ;;  %7751 = vmatprep.subr.bf16.mxu1 %v8601_v41  ;;  %v1654_v27 = vld [vmem:[#allocation2 + $0x50] sm:$0x1] }
 0x24e   : > { %v3771_v55 = vshrl.u32 %v3542_v32, 16  ;;  %v7007_v22 = vcombine.low %v1776_v6, %v1786_v52  ;;  %v3741_v43 = vrot.slane %v3740_v48, 4  ;;  %v3750_v60 = vor.u32 %v3749_v49, %v3745_v40  ;;  %v3544_v32 = vld [vmem:[#allocation2 + $0x78] sm:$0xf]  ;;  %v9865_v44 = vld [vmem:[#allocation2 + $0x7c] sm:$0xf] }
 0x24f   : > { %v3760_v61 = vrot.slane %v3758_v50, 4  ;;  %v3763_v0 = vrot.slane %v3761_v51, 5  ;;  %v3769_v15 = vrot.slane %v3767_v54, 5  ;;  %v3777_v1 = vshll.u32 %v3543_v38, 16  ;;  %v9867_v49 = vld [vmem:[#allocation2 + $0x80] sm:$0x1] }
 0x250   : > { %v3773_v58 = vrot.slane %v3771_v55, 4  ;;  %7717 = vmatprep.mubr.bf16.mxu1 %v7007_v22  ;;  %v3746_v5 = vsel %vm9791_vm12, %v3741_v43, %v3745_v40  ;;  %v3751_v7 = vrot.slane %v3750_v60, 4  ;;  %v1788_v10 = vshrl.u32 %v1610_v24, 16  ;;  %7752 = vmatpush3.bf16.msra.mxu1 %v8601_v41  ;;  %v9863_v41 = vld [vmem:[#allocation11 + $0x80] sm:$0xff]   ;;  %v3547_v38 = vld [vmem:[#allocation2 + $0x84] sm:$0xf] }
 0x251   : > { %v1791_v8 = vshll.u32 %v1610_v24, 16  ;;  %v3764_v13 = vor.u32 %v3763_v0, %v3760_v61  ;;  %v3779_v17 = vrot.slane %v3777_v1, 5  ;;  %v1797_v18 = vshll.u32 %v1611_v62, 16  ;;  %7753 = vmatprep.subr.bf16.mxu1 %v8603_v56  ;;  %v9876_v1 = vld [vmem:[#allocation2 + $0x88] sm:$0xf] }
 0x252   : > { %v3774_v16 = vor.u32 %v3773_v58, %v3769_v15  ;;  %v3756_v9 = vsel %vm9791_vm12, %v3751_v7, %v3755_v53  ;;  %v1790_v19 = vrot.slane %v1788_v10, 4  ;;  %v1801_v21 = vshrl.u32 %v1611_v62, 16 }
 0x253   : > { %v1793_v20 = vrot.slane %v1791_v8, 5  ;;  %v7122_v12 = vcombine.low %v3746_v5, %v3756_v9  ;;  %v3765_v23 = vrot.slane %v3764_v13, 4  ;;  %v1799_v26 = vrot.slane %v1797_v18, 5 }
 0x254   : > { %v3775_v25 = vrot.slane %v3774_v16, 4  ;;  %v1803_v29 = vrot.slane %v1801_v21, 4  ;;  %v1807_v30 = vshll.u32 %v1653_v2, 16  ;;  %v1812_v31 = vshrl.u32 %v1612_v3, 16  ;;  %7754 = vmatpush3.bf16.msra.mxu1 %v8603_v56  ;;  %v9878_v2 = vld [vmem:[#allocation2 + $0x8c] sm:$0x1] }
 0x255   : > { %v1794_v28 = vor.u32 %v1793_v20, %v1790_v19  ;;  %7914 = vmatmul.mubr.bf16.gmra.mrb[12].mxu0 %v7122_v12  ;;  %v3770_v33 = vsel %vm9791_vm12, %v3765_v23, %v3769_v15  ;;  %v1815_v35 = vshll.u32 %v1612_v3, 16  ;;  %v1821_v36 = vshll.u32 %v1613_v14, 16  ;;  %7755 = vmatprep.subr.bf16.mxu1 %v8604_v11  ;;  %v1615_v21 = vld [vmem:[#allocation2 + $0x58] sm:$0xf] }
 0x256   : > { %v3780_v34 = vsel %vm9791_vm12, %v3775_v25, %v3779_v17  ;;  %v1804_v40 = vor.u32 %v1803_v29, %v1799_v26  ;;  %v1809_v42 = vrot.slane %v1807_v30, 5  ;;  %v1814_v6 = vrot.slane %v1812_v31, 4  ;;  %v1614_v17 = vld [vmem:[#allocation2 + $0x54] sm:$0xf] }
 0x257   : > { %v7123_v37 = vcombine.low %v3770_v33, %v3780_v34  ;;  %v1795_v39 = vrot.slane %v1794_v28, 4  ;;  %v1817_v46 = vrot.slane %v1815_v35, 5  ;;  %v1823_v47 = vrot.slane %v1821_v36, 5  ;;  %v1655_v33 = vld [vmem:[#allocation2 + $0x5c] sm:$0x1] }
 0x258   : > { %v1825_v48 = vshrl.u32 %v1613_v14, 16  ;;  %v1805_v51 = vrot.slane %v1804_v40, 4  ;;  %v1831_v52 = vshll.u32 %v1654_v27, 16  ;;  %v3782_v53 = vshrl.u32 %v3544_v32, 16  ;;  %7756 = vmatpush3.bf16.msra.mxu1 %v8604_v11  ;;  %v1616_v35 = vld [vmem:[#allocation2 + $0x60] sm:$0xf] }
 0x259   : > { %7917 = vmatprep.mubr.bf16.mxu0 %v7123_v37  ;;  %v1800_v50 = vsel %vm9791_vm12, %v1795_v39, %v1799_v26  ;;  %v1818_v54 = vor.u32 %v1817_v46, %v1814_v6  ;;  %v3785_v24 = vshll.u32 %v3544_v32, 16  ;;  %v3791_v56 = vshll.u32 %v9865_v44, 16  ;;  %7789 = vmatprep.subr.bf16.mxu1 %v9863_v41 }
 0x25a   : > { %v1827_v55 = vrot.slane %v1825_v48, 4  ;;  %v1810_v22 = vsel %vm9791_vm12, %v1805_v51, %v1809_v42  ;;  %v1833_v43 = vrot.slane %v1831_v52, 5  ;;  %v3784_v60 = vrot.slane %v3782_v53, 4  ;;  %v1617_v42 = vld [vmem:[#allocation2 + $0x64] sm:$0xf] }
 0x25b   : > { %v3795_v61 = vshrl.u32 %v9865_v44, 16  ;;  %v7008_v62 = vcombine.low %v1800_v50, %v1810_v22  ;;  %v1819_v0 = vrot.slane %v1818_v54, 4  ;;  %v3787_v58 = vrot.slane %v3785_v24, 5  ;;  %v1656_v53 = vld [vmem:[#allocation2 + $0x68] sm:$0x1] }
 0x25c   : > { %v1828_v15 = vor.u32 %v1827_v55, %v1823_v47  ;;  %v3793_v3 = vrot.slane %v3791_v56, 5  ;;  %v3801_v7 = vshll.u32 %v9867_v49, 16  ;;  %v3806_v10 = vshrl.u32 %v3547_v38, 16 }
 0x25d   : > { %v3797_v5 = vrot.slane %v3795_v61, 4  ;;  %7718 = vmatmul.mubr.bf16.gmra.mrb[48].mxu1 %v7008_v62  ;;  %v1824_v8 = vsel %vm9791_vm12, %v1819_v0, %v1823_v47  ;;  %v3788_v13 = vor.u32 %v3787_v58, %v3784_v60  ;;  %v3809_v16 = vshll.u32 %v3547_v38, 16  ;;  %v3550_v62 = vld [vmem:[#allocation2 + $0x90] sm:$0xf] }
 0x25e   : > { %v1829_v11 = vrot.slane %v1828_v15, 4  ;;  %v3803_v9 = vrot.slane %v3801_v7, 5  ;;  %v3808_v19 = vrot.slane %v3806_v10, 4  ;;  %v3815_v20 = vshll.u32 %v9876_v1, 16 }
 0x25f   : > { %v3798_v18 = vor.u32 %v3797_v5, %v3793_v3  ;;  %v3789_v12 = vrot.slane %v3788_v13, 4  ;;  %v3811_v23 = vrot.slane %v3809_v16, 5  ;;  %v3819_v25 = vshrl.u32 %v9876_v1, 16  ;;  %v9896_v5 = vld [vmem:[#allocation2 + $0x94] sm:$0xf] }
 0x260   : > { %v1834_v14 = vsel %vm9791_vm12, %v1829_v11, %v1833_v43  ;;  %v3817_v28 = vrot.slane %v3815_v20, 5  ;;  %v3825_v29 = vshll.u32 %v9878_v2, 16  ;;  %v1836_v34 = vshrl.u32 %v1614_v17, 16  ;;  %v9900_v20 = vld [vmem:[#allocation2 + $0x98] sm:$0x1] }
 0x261   : > { %v7009_v26 = vcombine.low %v1824_v8, %v1834_v14  ;;  %v3799_v27 = vrot.slane %v3798_v18, 4  ;;  %v3794_v30 = vsel %vm9791_vm12, %v3789_v12, %v3793_v3  ;;  %v3812_v31 = vor.u32 %v3811_v23, %v3808_v19 }
 0x262   : > { %v3821_v32 = vrot.slane %v3819_v25, 4  ;;  %v3827_v37 = vrot.slane %v3825_v29, 5  ;;  %v1839_v39 = vshll.u32 %v1614_v17, 16  ;;  %v1845_v40 = vshll.u32 %v1615_v21, 16 }
 0x263   : > { %7721 = vmatprep.mubr.bf16.mxu1 %v7009_v26  ;;  %v3804_v36 = vsel %vm9791_vm12, %v3799_v27, %v3803_v9  ;;  %v3813_v46 = vrot.slane %v3812_v31, 4  ;;  %v1838_v48 = vrot.slane %v1836_v34, 4  ;;  %v1849_v51 = vshrl.u32 %v1615_v21, 16  ;;  %v3553_v27 = vld [vmem:[#allocation2 + $0x9c] sm:$0xf] }
 0x264   : > { %v7124_v6 = vcombine.low %v3794_v30, %v3804_v36  ;;  %v3822_v47 = vor.u32 %v3821_v32, %v3817_v28  ;;  %v1841_v38 = vrot.slane %v1839_v39, 5  ;;  %v1847_v50 = vrot.slane %v1845_v40, 5  ;;  %v9906_v32 = vld [vmem:[#allocation2 + $0xa0] sm:$0xf]  ;;  %v9911_v40 = vld [vmem:[#allocation2 + $0xa4] sm:$0x1] }
 0x265   : > { %v1855_v52 = vshll.u32 %v1655_v33, 16  ;;  %v3818_v54 = vsel %vm9791_vm12, %v3813_v46, %v3817_v28  ;;  %v1860_v24 = vshrl.u32 %v1616_v35, 16  ;;  %v1863_v56 = vshll.u32 %v1616_v35, 16 }
 0x266   : > { %7918 = vmatmul.mubr.bf16.gmra.mrb[16].mxu0 %v7124_v6  ;;  %v3823_v55 = vrot.slane %v3822_v47, 4  ;;  %v1842_v22 = vor.u32 %v1841_v38, %v1838_v48  ;;  %v1851_v43 = vrot.slane %v1849_v51, 4  ;;  %v1869_v61 = vshll.u32 %v1617_v42, 16 }
 0x267   : > { %v1857_v60 = vrot.slane %v1855_v52, 5  ;;  %v1862_v15 = vrot.slane %v1860_v24, 4  ;;  %v1865_v58 = vrot.slane %v1863_v56, 5  ;;  %v1873_v3 = vshrl.u32 %v1617_v42, 16 }
 0x268   : > { %v3828_v0 = vsel %vm9791_vm12, %v3823_v55, %v3827_v37  ;;  %v1843_v10 = vrot.slane %v1842_v22, 4  ;;  %v1852_v8 = vor.u32 %v1851_v43, %v1847_v50  ;;  %v1871_v11 = vrot.slane %v1869_v61, 5  ;;  %v9919_v55 = vld [vmem:[#allocation2 + $0x70] sm:$0xf] }
 0x269   : > { %v7125_v7 = vcombine.low %v3818_v54, %v3828_v0  ;;  %v1866_v13 = vor.u32 %v1865_v58, %v1862_v15  ;;  %v1875_v16 = vrot.slane %v1873_v3, 4  ;;  %v1879_v17 = vshll.u32 %v1656_v53, 16 }
 0x26a   : > { %v3830_v18 = vshrl.u32 %v3550_v62, 16  ;;  %v1848_v9 = vsel %vm9791_vm12, %v1843_v10, %v1847_v50  ;;  %v1853_v19 = vrot.slane %v1852_v8, 4  ;;  %v3833_v21 = vshll.u32 %v3550_v62, 16  ;;  %v9917_v50 = vld [vmem:[#allocation2 + $0x6c] sm:$0xf] }
 0x26b   : > { %7921 = vmatprep.mubr.bf16.mxu0 %v7125_v7  ;;  %v3839_v14 = vshll.u32 %v9896_v5, 16  ;;  %v1867_v12 = vrot.slane %v1866_v13, 4  ;;  %v1876_v23 = vor.u32 %v1875_v16, %v1871_v11  ;;  %v1881_v25 = vrot.slane %v1879_v17, 5  ;;  %v1657_v7 = vld [vmem:[#allocation2 + $0x74] sm:$0x1] }
 0x26c   : > { %v3832_v26 = vrot.slane %v3830_v18, 4  ;;  %v1858_v28 = vsel %vm9791_vm12, %v1853_v19, %v1857_v60  ;;  %v3835_v29 = vrot.slane %v3833_v21, 5  ;;  %v3843_v31 = vshrl.u32 %v9896_v5, 16  ;;  %v9927_v8 = vld [vmem:[#allocation2 + $0x78] sm:$0xf] }
 0x26d   : > { %v3841_v30 = vrot.slane %v3839_v14, 5  ;;  %v7010_v33 = vcombine.low %v1848_v9, %v1858_v28  ;;  %v1872_v34 = vsel %vm9791_vm12, %v1867_v12, %v1871_v11  ;;  %v1877_v35 = vrot.slane %v1876_v23, 4  ;;  %v9932_v18 = vld [vmem:[#allocation2 + $0x7c] sm:$0xf] }
 0x26e   : > { %v3849_v36 = vshll.u32 %v9900_v20, 16  ;;  %v3836_v37 = vor.u32 %v3835_v29, %v3832_v26  ;;  %v3845_v39 = vrot.slane %v3843_v31, 4  ;;  %v3854_v42 = vshrl.u32 %v3553_v27, 16  ;;  %v1658_v29 = vld [vmem:[#allocation2 + $0x80] sm:$0x1] }
 0x26f   : > { %v3857_v6 = vshll.u32 %v3553_v27, 16  ;;  %7722 = vmatmul.mubr.bf16.gmra.mrb[52].mxu1 %v7010_v33  ;;  %v1882_v46 = vsel %vm9791_vm12, %v1877_v35, %v1881_v25  ;;  %v3863_v48 = vshll.u32 %v9906_v32, 16  ;;  %v3867_v38 = vshrl.u32 %v9906_v32, 16  ;;  %v3556_v33 = vld [vmem:[#allocation2 + $0xa8] sm:$0xf] }
 0x270   : > { %v3851_v47 = vrot.slane %v3849_v36, 5  ;;  %v7011_v51 = vcombine.low %v1872_v34, %v1882_v46  ;;  %v3837_v52 = vrot.slane %v3836_v37, 4  ;;  %v3846_v53 = vor.u32 %v3845_v39, %v3841_v30  ;;  %v9941_v39 = vld [vmem:[#allocation2 + $0xac] sm:$0xf] }
 0x271   : > { %v3856_v54 = vrot.slane %v3854_v42, 4  ;;  %v3859_v24 = vrot.slane %v3857_v6, 5  ;;  %v3865_v56 = vrot.slane %v3863_v48, 5  ;;  %v3869_v22 = vrot.slane %v3867_v38, 4 }
 0x272   : > { %v3873_v43 = vshll.u32 %v9911_v40, 16  ;;  %7725 = vmatprep.mubr.bf16.mxu1 %v7011_v51  ;;  %v3842_v60 = vsel %vm9791_vm12, %v3837_v52, %v3841_v30  ;;  %v3847_v61 = vrot.slane %v3846_v53, 4  ;;  %v1884_v62 = vshrl.u32 %v9917_v50, 16  ;;  %v9946_v52 = vld [vmem:[#allocation2 + $0xb0] sm:$0x1] }
 0x273   : > { %v1887_v0 = vshll.u32 %v9917_v50, 16  ;;  %v3860_v15 = vor.u32 %v3859_v24, %v3856_v54  ;;  %v3870_v58 = vor.u32 %v3869_v22, %v3865_v56  ;;  %v1893_v10 = vshll.u32 %v9919_v55, 16 }
 0x274   : > { %v3875_v3 = vrot.slane %v3873_v43, 5  ;;  %v3852_v11 = vsel %vm9791_vm12, %v3847_v61, %v3851_v47  ;;  %v1886_v13 = vrot.slane %v1884_v62, 4  ;;  %v1897_v17 = vshrl.u32 %v9919_v55, 16  ;;  %v3559_v43 = vld [vmem:[#allocation2 + $0xb4] sm:$0xf] }
 0x275   : > { %v1889_v16 = vrot.slane %v1887_v0, 5  ;;  %v7126_v9 = vcombine.low %v3842_v60, %v3852_v11  ;;  %v3861_v19 = vrot.slane %v3860_v15, 4  ;;  %v3871_v21 = vrot.slane %v3870_v58, 4 }
 0x276   : > { %v1895_v14 = vrot.slane %v1893_v10, 5  ;;  %v1899_v23 = vrot.slane %v1897_v17, 4  ;;  %v1903_v25 = vshll.u32 %v1657_v7, 16  ;;  %v1908_v26 = vshrl.u32 %v9927_v8, 16  ;;  %v9952_v10 = vld [vmem:[#allocation2 + $0xb8] sm:$0xf] }
 0x277   : > { %v1890_v12 = vor.u32 %v1889_v16, %v1886_v13  ;;  %7922 = vmatmul.mubr.bf16.gmra.mrb[20].mxu0 %v7126_v9  ;;  %v3866_v27 = vsel %vm9791_vm12, %v3861_v19, %v3865_v56  ;;  %v3876_v28 = vsel %vm9791_vm12, %v3871_v21, %v3875_v3  ;;  %v1911_v30 = vshll.u32 %v9927_v8, 16  ;;  %v9955_v9 = vpop.f32.mrb[36].mxu1 }
 0x278   : > { %v1917_v31 = vshll.u32 %v9932_v18, 16  ;;  %v7127_v34 = vcombine.low %v3866_v27, %v3876_v28  ;;  %v1900_v36 = vor.u32 %v1899_v23, %v1895_v14  ;;  %v1905_v37 = vrot.slane %v1903_v25, 5  ;;  %v7691_v25 = vpop.f32.mrb[37].mxu1 }
 0x279   : > { %v1891_v35 = vrot.slane %v1890_v12, 4  ;;  %v1910_v42 = vrot.slane %v1908_v26, 4  ;;  %v1913_v6 = vrot.slane %v1911_v30, 5  ;;  %v1921_v47 = vshrl.u32 %v9932_v18, 16  ;;  %v9959_v12 = vld [vmem:[#allocation2 + $0xbc] sm:$0x1] }
 0x27a   : > { %v1919_v46 = vrot.slane %v1917_v31, 5  ;;  %7925 = vmatprep.mubr.bf16.mxu0 %v7127_v34  ;;  %v1901_v38 = vrot.slane %v1900_v36, 4  ;;  %v1927_v51 = vshll.u32 %v1658_v29, 16  ;;  %v3878_v53 = vshrl.u32 %v3556_v33, 16  ;;  %v9962_v30 = vld [vmem:[#allocation2 + $0x84] sm:$0xf] }
 0x27b   : > { %v1896_v48 = vsel %vm9791_vm12, %v1891_v35, %v1895_v14  ;;  %v1914_v54 = vor.u32 %v1913_v6, %v1910_v42  ;;  %v1923_v24 = vrot.slane %v1921_v47, 4  ;;  %v3881_v56 = vshll.u32 %v3556_v33, 16  ;;  %v9964_v31 = vpop.f32.mrb[38].mxu1 }
 0x27c   : > { %v3887_v22 = vshll.u32 %v9941_v39, 16  ;;  %v1906_v60 = vsel %vm9791_vm12, %v1901_v38, %v1905_v37  ;;  %v1929_v61 = vrot.slane %v1927_v51, 5  ;;  %v3880_v62 = vrot.slane %v3878_v53, 4  ;;  %v9969_v37 = vld [vmem:[#allocation2 + $0x88] sm:$0xf]  ;;  %v7692_v42 = vpop.f32.mrb[39].mxu1 }
 0x27d   : > { %v3891_v0 = vshrl.u32 %v9941_v39, 16  ;;  %v7012_v15 = vcombine.low %v1896_v48, %v1906_v60  ;;  %v1915_v58 = vrot.slane %v1914_v54, 4  ;;  %v1924_v3 = vor.u32 %v1923_v24, %v1919_v46  ;;  %v1659_v54 = vld [vmem:[#allocation2 + $0x8c] sm:$0x1]  ;;  %v9994_v42 = vld [vmem:[#allocation2 + $0xc4] sm:$0xf] }
 0x27e   : > { %v3883_v7 = vrot.slane %v3881_v56, 5  ;;  %v3889_v11 = vrot.slane %v3887_v22, 5  ;;  %v3897_v16 = vshll.u32 %v9946_v52, 16  ;;  %v3902_v17 = vshrl.u32 %v3559_v43, 16 }
 0x27f   : > { %v3893_v13 = vrot.slane %v3891_v0, 4  ;;  %7726 = vmatmul.mubr.bf16.gmra.mrb[56].mxu1 %v7012_v15  ;;  %v1920_v19 = vsel %vm9791_vm12, %v1915_v58, %v1919_v46  ;;  %v1925_v21 = vrot.slane %v1924_v3, 4  ;;  %v3905_v23 = vshll.u32 %v3559_v43, 16  ;;  %v9981_v3 = vld [vmem:[#allocation2 + $0x94] sm:$0xf] }
 0x280   : > { %v3884_v14 = vor.u32 %v3883_v7, %v3880_v62  ;;  %v3899_v27 = vrot.slane %v3897_v16, 5  ;;  %v3904_v28 = vrot.slane %v3902_v17, 4  ;;  %v3911_v29 = vshll.u32 %v9952_v10, 16 }
 0x281   : > { %v3894_v26 = vor.u32 %v3893_v13, %v3889_v11  ;;  %v1930_v33 = vsel %vm9791_vm12, %v1925_v21, %v1929_v61  ;;  %v3907_v35 = vrot.slane %v3905_v23, 5  ;;  %v3915_v36 = vshrl.u32 %v9952_v10, 16  ;;  %v9979_v61 = vld [vmem:[#allocation2 + $0x90] sm:$0xf]  ;;  %v9986_v21 = vld [vmem:[#allocation2 + $0x98] sm:$0x1] }
 0x282   : > { %v3885_v34 = vrot.slane %v3884_v14, 4  ;;  %v7013_v6 = vcombine.low %v1920_v19, %v1930_v33  ;;  %v3913_v47 = vrot.slane %v3911_v29, 5  ;;  %v3921_v48 = vshll.u32 %v9959_v12, 16  ;;  %11345 = vst [vmem:[#allocation30_spill] sm:$0xff] %v9986_v21  ;;  %v3562_v29 = vld [vmem:[#allocation2 + $0xc0] sm:$0xf] }
 0x283   : > { %v3895_v46 = vrot.slane %v3894_v26, 4  ;;  %v3908_v51 = vor.u32 %v3907_v35, %v3904_v28  ;;  %v3917_v53 = vrot.slane %v3915_v36, 4  ;;  %v1932_v24 = vshrl.u32 %v9962_v30, 16 }
 0x284   : > { %v3890_v38 = vsel %vm9791_vm12, %v3885_v34, %v3889_v11  ;;  %7729 = vmatprep.mubr.bf16.mxu1 %v7013_v6  ;;  %v3923_v22 = vrot.slane %v3921_v48, 5  ;;  %v1935_v43 = vshll.u32 %v9962_v30, 16  ;;  %v1941_v60 = vshll.u32 %v9969_v37, 16 }
 0x285   : > { %v3900_v56 = vsel %vm9791_vm12, %v3895_v46, %v3899_v27  ;;  %v3909_v0 = vrot.slane %v3908_v51, 4  ;;  %v3918_v15 = vor.u32 %v3917_v53, %v3913_v47  ;;  %v1934_v58 = vrot.slane %v1932_v24, 4 }
 0x286   : > { %v7128_v62 = vcombine.low %v3890_v38, %v3900_v56  ;;  %v1937_v7 = vrot.slane %v1935_v43, 5  ;;  %v1943_v11 = vrot.slane %v1941_v60, 5  ;;  %v1945_v13 = vshrl.u32 %v9969_v37, 16 }
 0x287   : > { %v1951_v16 = vshll.u32 %v1659_v54, 16  ;;  %v3914_v17 = vsel %vm9791_vm12, %v3909_v0, %v3913_v47  ;;  %v3919_v19 = vrot.slane %v3918_v15, 4  ;;  %v1956_v14 = vshrl.u32 %v9979_v61, 16 }
 0x288   : > { %7926 = vmatmul.mubr.bf16.gmra.mrb[24].mxu0 %v7128_v62  ;;  %v1959_v23 = vshll.u32 %v9979_v61, 16  ;;  %v1938_v25 = vor.u32 %v1937_v7, %v1934_v58  ;;  %v1947_v26 = vrot.slane %v1945_v13, 4  ;;  %v1965_v28 = vshll.u32 %v9981_v3, 16 }
 0x289   : > { %v1953_v27 = vrot.slane %v1951_v16, 5  ;;  %v3924_v33 = vsel %vm9791_vm12, %v3919_v19, %v3923_v22  ;;  %v1958_v34 = vrot.slane %v1956_v14, 4  ;;  %v1969_v36 = vshrl.u32 %v9981_v3, 16  ;;  %v9999_v22 = vld [vmem:[#allocation2 + $0xc8] sm:$0x1] }
 0x28a   : > { %v1961_v35 = vrot.slane %v1959_v23, 5  ;;  %v7129_v6 = vcombine.low %v3914_v17, %v3924_v33  ;;  %v1939_v46 = vrot.slane %v1938_v25, 4  ;;  %v1948_v47 = vor.u32 %v1947_v26, %v1943_v11  ;;  %v4271_v19 = vld [vmem:[#allocation2 + $0xc] sm:$0xe] }
 0x28b   : > { %v1967_v48 = vrot.slane %v1965_v28, 5  ;;  %v1971_v51 = vrot.slane %v1969_v36, 4  ;;  %v1975_v53 = vshll.u32 %v9986_v21, 16  ;;  %v3926_v54 = vshrl.u32 %v3562_v29, 16  ;;  %v8676_v36 = vld [vmem:[#allocation2 + $0x10] sm:$0xf] }
 0x28c   : > { %v1962_v38 = vor.u32 %v1961_v35, %v1958_v34  ;;  %7929 = vmatprep.mubr.bf16.mxu0 %v7129_v6  ;;  %v1944_v24 = vsel %vm9791_vm12, %v1939_v46, %v1943_v11  ;;  %v1949_v56 = vrot.slane %v1948_v47, 4  ;;  %v3929_v43 = vshll.u32 %v3562_v29, 16  ;;  %v10008_v29 = vld [vmem:[#allocation2 + $0x9c] sm:$0xf]  ;;  %v10016_v46 = vld [vmem:[#allocation2 + $0xa0] sm:$0xf] }
 0x28d   : > { %v3935_v60 = vshll.u32 %v9994_v42, 16  ;;  %v1972_v0 = vor.u32 %v1971_v51, %v1967_v48  ;;  %v1977_v15 = vrot.slane %v1975_v53, 5  ;;  %v3928_v58 = vrot.slane %v3926_v54, 4  ;;  %v8677_v51 = vld [vmem:[#allocation2 + $0x14] sm:$0x1] }
 0x28e   : > { %v1963_v62 = vrot.slane %v1962_v38, 4  ;;  %v1954_v7 = vsel %vm9791_vm12, %v1949_v56, %v1953_v27  ;;  %v3931_v13 = vrot.slane %v3929_v43, 5  ;;  %v3939_v17 = vshrl.u32 %v9994_v42, 16  ;;  %v10018_v54 = vld [vmem:[#allocation2 + $0xa4] sm:$0x1] }
 0x28f   : > { %v3937_v16 = vrot.slane %v3935_v60, 5  ;;  %v7014_v14 = vcombine.low %v1944_v24, %v1954_v7  ;;  %v1973_v23 = vrot.slane %v1972_v0, 4  ;;  %v3945_v25 = vshll.u32 %v9999_v22, 16  ;;  %11348 = vst [vmem:[#allocation31_spill] sm:$0xff] %v10018_v54  ;;  %v10028_v7 = vld [vmem:[#allocation2 + $0xa8] sm:$0xf] }
 0x290   : > { %v1968_v11 = vsel %vm9791_vm12, %v1963_v62, %v1967_v48  ;;  %v3932_v26 = vor.u32 %v3931_v13, %v3928_v58  ;;  %v3941_v28 = vrot.slane %v3939_v17, 4  ;;  %v7139_v35 = vrot.slane %v4271_v19, 9 }
 0x291   : > { %7730 = vmatmul.mubr.bf16.gmra.mrb[60].mxu1 %v7014_v14  ;;  %v1978_v27 = vsel %vm9791_vm12, %v1973_v23, %v1977_v15  ;;  %v3947_v33 = vrot.slane %v3945_v25, 5  ;;  %v4337_v6 = vrot.slane %v8676_v36, 5  ;;  %v4340_v53 = vrot.slane %v8677_v51, 5 }
 0x292   : > { %v7015_v47 = vcombine.low %v1968_v11, %v1978_v27  ;;  %v3933_v48 = vrot.slane %v3932_v26, 4  ;;  %v3942_v38 = vor.u32 %v3941_v28, %v3937_v16  ;;  %v1980_v43 = vshrl.u32 %v10008_v29, 16  ;;  %v10033_v11 = vld [vmem:[#allocation2 + $0xac] sm:$0xf]  ;;  %v10037_v28 = vld [vmem:[#allocation2 + $0xb0] sm:$0x1] }
 0x293   : > { %v4338_v24 = vsel %vm10012_vm15, %v7139_v35, %v4337_v6  ;;  %v4339_v56 = vrot.slane %v4337_v6, 4  ;;  %v1983_v60 = vshll.u32 %v10008_v29, 16  ;;  %v1989_v15 = vshll.u32 %v10016_v46, 16  ;;  %11349 = vst [vmem:[#allocation32_spill] sm:$0xff] %v10037_v28  ;;  %v4272_v27 = vld [vmem:[#allocation2 + $0x18] sm:$0xe] }
 0x294   : > { %7733 = vmatprep.mubr.bf16.mxu1 %v7015_v47  ;;  %v3938_v62 = vsel %vm9791_vm12, %v3933_v48, %v3937_v16  ;;  %v3943_v0 = vrot.slane %v3942_v38, 4  ;;  %v1993_v58 = vshrl.u32 %v10016_v46, 16  ;;  %v1982_v17 = vrot.slane %v1980_v43, 4 }
 0x295   : > { %v4341_v13 = vsel %vm10012_vm15, %v4339_v56, %v4340_v53  ;;  %v1985_v19 = vrot.slane %v1983_v60, 5  ;;  %v1999_v14 = vshll.u32 %v10018_v54, 16  ;;  %v1991_v25 = vrot.slane %v1989_v15, 5  ;;  %v4273_v60 = vld [vmem:[#allocation2 + $0x24] sm:$0xe] }
 0x296   : > { %v3948_v23 = vsel %vm9791_vm12, %v3943_v0, %v3947_v33  ;;  %v7155_v16 = vcombine.low %v4338_v24, %v4341_v13  ;;  %v1995_v26 = vrot.slane %v1993_v58, 4  ;;  %v2004_v47 = vshrl.u32 %v10028_v7, 16 }
 0x297   : > { %v7130_v35 = vcombine.low %v3938_v62, %v3948_v23  ;;  %v1986_v36 = vor.u32 %v1985_v19, %v1982_v17  ;;  %v2001_v6 = vrot.slane %v1999_v14, 5  ;;  %v2007_v38 = vshll.u32 %v10028_v7, 16  ;;  %v8678_v19 = vld [vmem:[#allocation2 + $0x1c] sm:$0xf]  ;;  %v8679_v23 = vld [vmem:[#allocation2 + $0x20] sm:$0x1] }
 0x298   : > { %v1996_v48 = vor.u32 %v1995_v26, %v1991_v25  ;;  %v2013_v51 = vshll.u32 %v10033_v11, 16  ;;  %v2017_v53 = vshrl.u32 %v10033_v11, 16  ;;  %v2006_v24 = vrot.slane %v2004_v47, 4 }
 0x299   : > { %7930 = vmatmul.mubr.bf16.gmra.mrb[28].mxu0 %v7130_v35  ;;  %v1987_v33 = vrot.slane %v1986_v36, 4  ;;  %v2023_v56 = vshll.u32 %v10037_v28, 16  ;;  %v7140_v43 = vrot.slane %v4272_v27, 9  ;;  %v2009_v0 = vrot.slane %v2007_v38, 5  ;;  %v10046_v35 = vld [vmem:[#allocation2 + $0xb4] sm:$0xf] }
 0x29a   : > { %7949 = vmatprep.mubr.bf16.mxu0 %v7155_v16  ;;  %v1997_v62 = vrot.slane %v1996_v48, 4  ;;  %v2015_v15 = vrot.slane %v2013_v51, 5  ;;  %v2019_v58 = vrot.slane %v2017_v53, 4  ;;  %v4344_v14 = vrot.slane %v8678_v19, 5  ;;  %v8680_v53 = vld [vmem:[#allocation2 + $0x28] sm:$0xf] }
 0x29b   : > { %v1992_v13 = vsel %vm9791_vm12, %v1987_v33, %v1991_v25  ;;  %v2025_v17 = vrot.slane %v2023_v56, 5  ;;  %v4347_v26 = vrot.slane %v8679_v23, 5  ;;  %v2010_v27 = vor.u32 %v2009_v0, %v2006_v24  ;;  %v8681_v19 = vld [vmem:[#allocation2 + $0x2c] sm:$0x1]  ;;  %v10052_v23 = vld [vmem:[#allocation2 + $0xb8] sm:$0xf] }
 0x29c   : > { %v2002_v36 = vsel %vm9791_vm12, %v1997_v62, %v2001_v6  ;;  %v2020_v47 = vor.u32 %v2019_v58, %v2015_v15  ;;  %v7141_v16 = vrot.slane %v4273_v60, 9  ;;  %v4345_v38 = vsel %vm10012_vm15, %v7140_v43, %v4344_v14 }
 0x29d   : > { %v7016_v48 = vcombine.low %v1992_v13, %v2002_v36  ;;  %v4346_v51 = vrot.slane %v4344_v14, 4  ;;  %v4351_v25 = vrot.slane %v8680_v53, 5  ;;  %v2011_v33 = vrot.slane %v2010_v27, 4  ;;  %v8605_v14 = vld [vmem:[#allocation11 + $0x188] sm:$0xff]   ;;  %v8682_v53 = vld [vmem:[#allocation11 + $0x180] sm:$0xff]  }
 0x29e   : > { %v2021_v56 = vrot.slane %v2020_v47, 4  ;;  %v4354_v28 = vrot.slane %v8681_v19, 5  ;;  %v2028_v54 = vshrl.u32 %v10046_v35, 16  ;;  %v2031_v43 = vshll.u32 %v10046_v35, 16  ;;  %v8609_v19 = vld [vmem:[#allocation11 + $0x190] sm:$0xff]  }
 0x29f   : > { %7734 = vmatmul.mubr.bf16.gmra.mrb[64].mxu1 %v7016_v48  ;;  %v4348_v6 = vsel %vm10012_vm15, %v4346_v51, %v4347_v26  ;;  %v4352_v24 = vsel %vm10012_vm15, %v7141_v16, %v4351_v25  ;;  %v4353_v60 = vrot.slane %v4351_v25, 4  ;;  %v2016_v62 = vsel %vm9791_vm12, %v2011_v33, %v2015_v15  ;;  %v10066_v26 = vld [vmem:[#allocation2 + $0xbc] sm:$0x1]  ;;  %v4274_v15 = vld [vmem:[#allocation2 + $0x30] sm:$0xe] }
 0x2a0   : > { %v2026_v0 = vsel %vm9791_vm12, %v2021_v56, %v2025_v17  ;;  %v7156_v58 = vcombine.low %v4345_v38, %v4348_v6  ;;  %v2030_v13 = vrot.slane %v2028_v54, 4  ;;  %11350 = vst [vmem:[#allocation33_spill] sm:$0xff] %v10066_v26  ;;  %v2033_v47 = vrot.slane %v2031_v43, 5  ;;  %v8683_v38 = vld [vmem:[#allocation2 + $0x34] sm:$0xf] }
 0x2a1   : > { %v7017_v36 = vcombine.low %v2016_v62, %v2026_v0  ;;  %v4355_v27 = vsel %vm10012_vm15, %v4353_v60, %v4354_v28  ;;  %v2037_v16 = vshll.u32 %v10052_v23, 16  ;;  %v2041_v51 = vshrl.u32 %v10052_v23, 16  ;;  %v4275_v33 = vld [vmem:[#allocation2 + $0x3c] sm:$0xe]  ;;  %v8685_v62 = vld [vmem:[#allocation2 + $0x40] sm:$0xf] }
 0x2a2   : > { %7950 = vmatmul.mubr.bf16.vlgmr.msra.gmra.mrb[0].mxu0 %v7156_v58  ;;  %v7157_v48 = vcombine.low %v4352_v24, %v4355_v27  ;;  %v2034_v17 = vor.u32 %v2033_v47, %v2030_v13  ;;  %v4358_v25 = vrot.slane %v8683_v38, 5  ;;  %v2047_v56 = vshll.u32 %v10066_v26, 16  ;;  %v8684_v24 = vld [vmem:[#allocation2 + $0x38] sm:$0x1] }
 0x2a3   : > { %7737 = vmatprep.mubr.bf16.mxu1 %v7017_v36  ;;  %7982 = vmatpush3.bf16.msra.mxu0 %v8682_v53  ;;  %v2039_v54 = vrot.slane %v2037_v16, 5  ;;  %v2043_v28 = vrot.slane %v2041_v51, 4  ;;  %v7142_v6 = vrot.slane %v4274_v15, 9  ;;  %v4361_v43 = vrot.slane %v8684_v24, 5  ;;  %v8687_v24 = vld [vmem:[#allocation2 + $0x4c] sm:$0xf] }
 0x2a4   : > { %7953 = vmatprep.mubr.bf16.mxu0 %v7157_v48  ;;  %7983 = vmatprep.subr.bf16.mxu0 %v8605_v14  ;;  %v4360_v60 = vrot.slane %v4358_v25, 4  ;;  %v4365_v0 = vrot.slane %v8685_v62, 5  ;;  %v2035_v58 = vrot.slane %v2034_v17, 4  ;;  %v7143_v27 = vrot.slane %v4275_v33, 9  ;;  %v8686_v48 = vld [vmem:[#allocation2 + $0x44] sm:$0x1] }
 0x2a5   : > { %v2044_v36 = vor.u32 %v2043_v28, %v2039_v54  ;;  %v4359_v13 = vsel %vm10012_vm15, %v7142_v6, %v4358_v25  ;;  %v4368_v51 = vrot.slane %v8686_v48, 5  ;;  %v2049_v15 = vrot.slane %v2047_v56, 5  ;;  %v8612_v62 = vld [vmem:[#allocation11 + $0x198] sm:$0xff]   ;;  %v8688_v17 = vld [vmem:[#allocation2] sm:$0xf] }
 0x2a6   : > { %v4362_v47 = vsel %vm10012_vm15, %v4360_v60, %v4361_v43  ;;  %v4367_v16 = vrot.slane %v4365_v0, 4  ;;  %v4372_v26 = vrot.slane %v8687_v24, 5  ;;  %v10075_v28 = vld [vmem:[#allocation2 + $0x4] sm:$0xf]  ;;  %v4366_v25 = vsel %vm10012_vm15, %v7143_v27, %v4365_v0  ;;  %v8690_v6 = vld [vmem:[#allocation2 + $0x58] sm:$0xf] }
 0x2a7   : > { %7984 = vmatpush3.bf16.msra.mxu0 %v8605_v14  ;;  %v2045_v53 = vrot.slane %v2044_v36, 4  ;;  %v7158_v38 = vcombine.low %v4359_v13, %v4362_v47  ;;  %v7027_v33 = vcombine.low %v8688_v17, %v10075_v28  ;;  %v4379_v60 = vrot.slane %v8690_v6, 5  ;;  %v4276_v13 = vld [vmem:[#allocation2 + $0x48] sm:$0xe]  ;;  %v8691_v24 = vld [vmem:[#allocation2 + $0x50] sm:$0x1] }
 0x2a8   : > { %7985 = vmatprep.subr.bf16.mxu0 %v8609_v19  ;;  %v4369_v14 = vsel %vm10012_vm15, %v4367_v16, %v4368_v51  ;;  %v2040_v56 = vsel %vm9791_vm12, %v2035_v58, %v2039_v54  ;;  %v4374_v47 = vrot.slane %v4372_v26, 4  ;;  %v4375_v17 = vrot.slane %v8691_v24, 5  ;;  %v4277_v0 = vld [vmem:[#allocation2 + $0x54] sm:$0xe]  ;;  %v8692_v16 = vld [vmem:[#allocation2 + $0x5c] sm:$0x1] }
 0x2a9   : > { %v2050_v43 = vsel %vm9791_vm12, %v2045_v53, %v2049_v15  ;;  %v7159_v36 = vcombine.low %v4366_v25, %v4369_v14  ;;  %v4381_v27 = vrot.slane %v4379_v60, 4  ;;  %v4382_v51 = vrot.slane %v8692_v16, 5  ;;  %v8615_v6 = vld [vmem:[#allocation11 + $0x1a0] sm:$0xff]   ;;  %v8693_v53 = vld [vmem:[#allocation2 + $0x64] sm:$0xf] }
 0x2aa   : > { %7954 = vmatmul.mubr.bf16.gmra.mrb[4].mxu0 %v7158_v38  ;;  %v7018_v48 = vcombine.low %v2040_v56, %v2050_v43  ;;  %v7144_v54 = vrot.slane %v4276_v13, 9  ;;  %v4376_v58 = vsel %vm10012_vm15, %v4374_v47, %v4375_v17  ;;  %v4386_v15 = vrot.slane %v8693_v53, 5  ;;  %v8618_v13 = vld [vmem:[#allocation11 + $0x1a8] sm:$0xff]   ;;  %v8695_v17 = vld [vmem:[#allocation2 + $0xc] sm:$0xf] }
 0x2ab   : > { %7986 = vmatpush3.bf16.msra.mxu0 %v8609_v19  ;;  %7957 = vmatprep.mubr.bf16.mxu0 %v7159_v36  ;;  %v7145_v38 = vrot.slane %v4277_v0, 9  ;;  %v4383_v25 = vsel %vm10012_vm15, %v4381_v27, %v4382_v51  ;;  %v8694_v19 = vld [vmem:[#allocation2 + $0x70] sm:$0xf]  ;;  %v8697_v16 = vld [vmem:[#allocation2 + $0x68] sm:$0x1]  ;;  %v8622_v51 = vld [vmem:[#allocation11 + $0x88] sm:$0xff]   ;;  %v7038_v63 = vcombine.low %v9962_v30, %v9969_v37  ;;  %v7041_v30 = vcombine.low %v10028_v7, %v10033_v11 }
 0x2ac   : > { %7987 = vmatprep.subr.bf16.mxu0 %v8612_v62  ;;  %7738 = vmatmul.mubr.bf16.gmra.mrb[68].mxu1 %v7018_v48  ;;  %v4393_v14 = vrot.slane %v8694_v19, 5  ;;  %v4373_v56 = vsel %vm10012_vm15, %v7144_v54, %v4372_v26  ;;  %v4388_v48 = vrot.slane %v4386_v15, 4  ;;  %v10094_v0 = vld [vmem:[#allocation2 + $0x10] sm:$0xf]  ;;  %v4389_v26 = vrot.slane %v8697_v16, 5  ;;  %v8623_v19 = vld [vmem:[#allocation11 + $0x1b0] sm:$0xff]  }
 0x2ad   : > { %7757 = vmatprep.mubr.bf16.mxu1 %v7027_v33  ;;  %v7160_v43 = vcombine.low %v4373_v56, %v4376_v58  ;;  %v4380_v36 = vsel %vm10012_vm15, %v7145_v38, %v4379_v60  ;;  %v4278_v33 = vld [vmem:[#allocation2 + $0x60] sm:$0xe]  ;;  %v7028_v27 = vcombine.low %v8695_v17, %v10094_v0  ;;  %v8698_v54 = vld [vmem:[#allocation2 + $0x18] sm:$0xf]  ;;  %v10097_v60 = vld [vmem:[#allocation2 + $0x1c] sm:$0xf] }
 0x2ae   : > { %v7161_v47 = vcombine.low %v4380_v36, %v4383_v25  ;;  %v4395_v24 = vrot.slane %v4393_v14, 4  ;;  %v7029_v58 = vcombine.low %v8698_v54, %v10097_v60  ;;  %v8700_v53 = vld [vmem:[#allocation2 + $0x74] sm:$0x1]  ;;  %v11289_v25 = vrot.slane %v9865_v44, 5  ;;  %v8701_v16 = vld [vmem:[#allocation2 + $0x24] sm:$0xf] }
 0x2af   : > { %7988 = vmatpush3.bf16.msra.mxu0 %v8612_v62  ;;  %v4279_v62 = vld [vmem:[#allocation2 + $0x6c] sm:$0xe]  ;;  %v4396_v38 = vrot.slane %v8700_v53, 5  ;;  %v7146_v56 = vrot.slane %v4278_v33, 9  ;;  %v10107_v54 = vld [vmem:[#allocation2 + $0x28] sm:$0xf] }
 0x2b0   : > { %7989 = vmatprep.subr.bf16.mxu0 %v8615_v6  ;;  %v7147_v36 = vrot.slane %v4279_v62, 9  ;;  %v7030_v53 = vcombine.low %v8701_v16, %v10107_v54  ;;  %v10110_v33 = vld [vmem:[#allocation2 + $0x34] sm:$0xf]  ;;  %v8625_v17 = vld [vmem:[#allocation11 + $0x90] sm:$0xff]   ;;  %v2720_v45 = vrot.slane %v10107_v54, 5 }
 0x2b1   : > { %v4285_v16 = vld [vmem:[#allocation2 + $0xb4] sm:$0xe] }
 0x2b2   : > { %7958 = vmatmul.mubr.bf16.gmra.mrb[8].mxu0 %v7160_v43  ;;  %v4390_v43 = vsel %vm10012_vm15, %v4388_v48, %v4389_v26  ;;  %v4387_v26 = vsel %vm10012_vm15, %v7146_v56, %v4386_v15  ;;  %v4403_v15 = vrot.slane %v9867_v49, 5  ;;  %v4281_v56 = vld [vmem:[#allocation2 + $0x84] sm:$0xe]  ;;  %v4438_v49 = vrot.slane %v9959_v12, 5 }
 0x2b3   : > { %7961 = vmatprep.mubr.bf16.mxu0 %v7161_v47  ;;  %7990 = vmatpush3.bf16.msra.mxu0 %v8615_v6  ;;  %v4397_v6 = vsel %vm10012_vm15, %v4395_v24, %v4396_v38  ;;  %v4280_v47 = vld [vmem:[#allocation2 + $0x78] sm:$0xe]  ;;  %v4284_v24 = vld [vmem:[#allocation2 + $0xa8] sm:$0xe]  ;;  %v7162_v62 = vcombine.low %v4387_v26, %v4390_v43  ;;  %v4428_v38 = vrot.slane %v9941_v39, 5  ;;  %v11351_v43 = vrot.slane %v9876_v1, 5 }
 0x2b4   : > { %7991 = vmatprep.subr.bf16.mxu0 %v8618_v13  ;;  %7758 = vmatmul.mubr.bf16.vlgmr.msra.gmra.mrb[40].mxu1 %v7028_v27  ;;  %v8703_v27 = vld [vmem:[#allocation2 + $0x30] sm:$0xf]  ;;  %v7148_v21 = vrot.slane %v4280_v47, 9  ;;  %v4410_v39 = vrot.slane %v9878_v2, 5  ;;  %v4286_v2 = vld [vmem:[#allocation2 + $0xc0] sm:$0xe] }
 0x2b5   : > { %7761 = vmatprep.mubr.bf16.mxu1 %v7029_v58  ;;  %7790 = vmatpush3.bf16.msra.mxu1 %v9863_v41  ;;  %v7031_v48 = vcombine.low %v8703_v27, %v10110_v33  ;;  %v4394_v41 = vsel %vm10012_vm15, %v7147_v36, %v4393_v14  ;;  %v4402_v58 = vrot.slane %v11289_v25, 4  ;;  %v4409_v14 = vrot.slane %v11351_v43, 4 }
 0x2b6   : > { %7791 = vmatprep.subr.bf16.mxu1 %v8622_v51  ;;  %v7163_v27 = vcombine.low %v4394_v41, %v4397_v6  ;;  %v7152_v36 = vrot.slane %v4284_v24, 9  ;;  %v4430_v26 = vrot.slane %v4428_v38, 4  ;;  %v4431_v25 = vrot.slane %v9946_v52, 5  ;;  %v8627_v41 = vld [vmem:[#allocation11 + $0x98] sm:$0xff]  }
 0x2b7   : > { %7992 = vmatpush3.bf16.msra.mxu0 %v8618_v13  ;;  %v4435_v13 = vrot.slane %v9952_v10, 5  ;;  %v7153_v6 = vrot.slane %v4285_v16, 9  ;;  %v4404_v10 = vsel %vm10012_vm15, %v4402_v58, %v4403_v15  ;;  %v7149_v58 = vrot.slane %v4281_v56, 9 }
 0x2b8   : > { %7993 = vmatprep.subr.bf16.mxu0 %v8623_v19  ;;  %v10136_v52 = vsel %vm10012_vm15, %v4430_v26, %v4431_v25  ;;  %v4442_v25 = vrot.slane %v9994_v42, 5  ;;  %v4445_v42 = vrot.slane %v9999_v22, 5  ;;  %v8705_v26 = vld [vmem:[#allocation2 + $0x3c] sm:$0xf] }
 0x2b9   : > { %7792 = vmatpush3.bf16.msra.mxu1 %v8622_v51  ;;  %v4437_v47 = vrot.slane %v4435_v13, 4  ;;  %v10132_v51 = vsel %vm10012_vm15, %v7152_v36, %v4428_v38  ;;  %v4411_v38 = vsel %vm10012_vm15, %v4409_v14, %v4410_v39  ;;  %v11353_v14 = vrot.slane %v9876_v1, 5  ;;  %v10176_v39 = vld [vmem:[#allocation2 + $0x40] sm:$0xf] }
 0x2ba   : > { %7962 = vmatmul.mubr.bf16.gmra.mrb[12].mxu0 %v7162_v62  ;;  %v4414_v62 = vrot.slane %v9896_v5, 5  ;;  %7793 = vmatprep.subr.bf16.mxu1 %v8625_v17  ;;  %v7168_v12 = vcombine.low %v10132_v51, %v10136_v52  ;;  %v10144_v5 = vsel %vm10012_vm15, %v7153_v6, %v4435_v13  ;;  %v7154_v13 = vrot.slane %v4286_v2, 9  ;;  %v8707_v2 = vld [vmem:[#allocation2 + $0x48] sm:$0xf] }
 0x2bb   : > { %7965 = vmatprep.mubr.bf16.mxu0 %v7163_v27  ;;  %7994 = vmatpush3.bf16.msra.mxu0 %v8623_v19  ;;  %v10138_v19 = vld [vmem:[#allocation11 + $0x1c0] sm:$0xff]   ;;  %v10148_v24 = vsel %vm10012_vm15, %v4437_v47, %v4438_v49  ;;  %v11352_v27 = vrot.slane %v9865_v44, 5  ;;  %v4444_v43 = vrot.slane %v4442_v25, 4  ;;  %v7032_v6 = vcombine.low %v8705_v26, %v10176_v39 }
 0x2bc   : > { %7995 = vmatprep.subr.bf16.mxu0 %v8628_v57  ;;  %7762 = vmatmul.mubr.bf16.gmra.mrb[44].mxu1 %v7030_v53  ;;  %v4421_v53 = vrot.slane %v9906_v32, 5  ;;  %v7169_v16 = vcombine.low %v10144_v5, %v10148_v24  ;;  %v4408_v32 = vsel %vm10012_vm15, %v7149_v58, %v11353_v14  ;;  %v4416_v44 = vrot.slane %v4414_v62, 4  ;;  %v4283_v49 = vld [vmem:[#allocation2 + $0x9c] sm:$0xe] }
 0x2bd   : > { %7765 = vmatprep.mubr.bf16.mxu1 %v7031_v48  ;;  %7794 = vmatpush3.bf16.msra.mxu1 %v8625_v17  ;;  %v4401_v15 = vsel %vm10012_vm15, %v7148_v21, %v11352_v27  ;;  %v8631_v48 = vld [vmem:[#allocation11 + $0xa0] sm:$0xff]   ;;  %v7165_v17 = vcombine.low %v4408_v32, %v4411_v38  ;;  %v10168_v21 = vsel %vm10012_vm15, %v7154_v13, %v4442_v25  ;;  %v4417_v47 = vrot.slane %v9900_v20, 5  ;;  %v10180_v25 = vld [vmem:[#allocation2 + $0x4c] sm:$0xf]  ;;  %v997_v13 = vld [vmem:[#allocation2 + $0xd4] sm:$0x1] }
 0x2be   : > { %7795 = vmatprep.subr.bf16.mxu1 %v8627_v41  ;;  %v7164_v56 = vcombine.low %v4401_v15, %v4404_v10  ;;  %v10172_v36 = vsel %vm10012_vm15, %v4444_v43, %v4445_v42  ;;  %v4423_v22 = vrot.slane %v4421_v53, 4  ;;  %v8633_v10 = vld [vmem:[#allocation11 + $0xa8] sm:$0xff]   ;;  %v7033_v58 = vcombine.low %v8707_v2, %v10180_v25  ;;  %v941_v38 = vld [vmem:[#allocation2 + $0xcc] sm:$0x1] }
 0x2bf   : > { %7996 = vmatpush3.bf16.msra.mxu0 %v8628_v57  ;;  %v4282_v57 = vld [vmem:[#allocation2 + $0x90] sm:$0xe]  ;;  %v7170_v1 = vcombine.low %v10168_v21, %v10172_v36  ;;  %v4418_v15 = vsel %vm10012_vm15, %v4416_v44, %v4417_v47  ;;  %v7151_v43 = vrot.slane %v4283_v49, 9  ;;  %v942_v32 = vsel %vm9520_vm3, 0, %v941_v38  ;;  %v8712_v2 = vld [vmem:[#allocation2 + $0x60] sm:$0xf] }
 0x2c0   : > { %8029 = vmatprep.subr.bf16.mxu0 %v10138_v19  ;;  %v7150_v27 = vrot.slane %v4282_v57, 9  ;;  %943 = vst [vmem:[#allocation2 + $0xcc] sm:$0x1] %v942_v32  ;;  %v2713_v5 = vrot.slane %v10097_v60, 5  ;;  %v2727_v24 = vrot.slane %v10110_v33, 5  ;;  %v7052_v33 = vrot.slane %v2647_v59, 9 }
 0x2c1   : > { %7796 = vmatpush3.bf16.msra.mxu1 %v8627_v41  ;;  %v4424_v41 = vrot.slane %v9911_v40, 5  ;;  %v8709_v40 = vld [vmem:[%s11250_s4] ss:$0 sm:$0xff]  ;;  %v4422_v44 = vsel %vm10012_vm15, %v7151_v43, %v4421_v53  ;;  %v8639_v53 = vld [vmem:[#allocation11 + $0xb8] sm:$0xff]  }
 0x2c2   : > { %7966 = vmatmul.mubr.bf16.gmra.mrb[16].mxu0 %v7164_v56  ;;  %7797 = vmatprep.subr.bf16.mxu1 %v8631_v48  ;;  %v4415_v42 = vsel %vm10012_vm15, %v7150_v27, %v4414_v62  ;;  %v8638_v56 = vld [vmem:[#allocation11 + $0xb0] sm:$0xff]   ;;  %v878_v14 = vadd.f32 %v8709_v40, %v9955_v9  ;;  %v998_v62 = vsel %vm9530_vm5, 0, %v997_v13  ;;  %v8710_v9 = vld [vmem:[#allocation2 + $0x54] sm:$0xf] }
 0x2c3   : > { %7969 = vmatprep.mubr.bf16.mxu0 %v7165_v17  ;;  %v4425_v20 = vsel %vm10012_vm15, %v4423_v22, %v4424_v41  ;;  %v7166_v17 = vcombine.low %v4415_v42, %v4418_v15  ;;  %999 = vst [vmem:[#allocation2 + $0xd4] sm:$0x1] %v998_v62  ;;  %v8636_v59 = vld [vmem:[#allocation2 + $0x30] sm:$0xff]  }
 0x2c4   : > { %7766 = vmatmul.mubr.bf16.gmra.mrb[48].mxu1 %v7032_v6  ;;  %v7167_v57 = vcombine.low %v4422_v44, %v4425_v20  ;;  %v885_v22 = vmul.f32 0.0, %v878_v14  ;;  %v10201_v6 = vld [vmem:[#allocation2 + $0x58] sm:$0xf]  ;;  %v7037_v44 = vcombine.low %v9927_v8, %v9932_v18  ;;  %v8714_v8 = vld [vmem:[#allocation2 + $0x14] sm:$0x1] }
 0x2c5   : > { %7769 = vmatprep.mubr.bf16.mxu1 %v7033_v58  ;;  %7798 = vmatpush3.bf16.msra.mxu1 %v8631_v48  ;;  %v881_v48 = vadd.f32 %v8709_v40, %v9964_v31  ;;  %v7034_v47 = vcombine.low %v8710_v9, %v10201_v6  ;;  %v10204_v31 = vld [vmem:[#allocation2 + $0x64] sm:$0xf]  ;;  %v2709_v18 = vrot.slane %v8714_v8, 5 }
 0x2c6   : > { %7799 = vmatprep.subr.bf16.mxu1 %v8633_v10  ;;  %v7319_v49 = vpack.c.bf16 %v885_v22, %v885_v22  ;;  %v7035_v4 = vcombine.low %v8712_v2, %v10204_v31  ;;  %v2649_v9 = vld [vmem:[#allocation2 + $0x24] sm:$0xe]  ;;  %v8716_v2 = vld [vmem:[#allocation2 + $0x20] sm:$0x1] }
 0x2c7   : > { %v886_v26 = vmul.f32 0.0, %v881_v48  ;;  %v1593_v13 = vld [vmem:[#allocation2 + $0xcc] sm:$0xf]  ;;  %v8629_v48 = vld [vmem:[#allocation2 + $0x18] sm:$0xff]  }
 0x2c8   : > { %v1573_v41 = vshrl.u32 %v7319_v49, 16  ;;  %v1576_v38 = vshll.u32 %v7319_v49, 16 }
 0x2c9   : > { %7800 = vmatpush3.bf16.msra.mxu1 %v8633_v10  ;;  %v7320_v58 = vpack.c.bf16 %v886_v26, %v886_v26  ;;  %v2715_v26 = vrot.slane %v2713_v5, 4 }
 0x2ca   : > { %7970 = vmatmul.mubr.bf16.gmra.mrb[20].mxu0 %v7166_v17  ;;  %7801 = vmatprep.subr.bf16.mxu1 %v8638_v56  ;;  %v1575_v15 = vrot.slane %v1573_v41, 7  ;;  %v1597_v40 = vld [vmem:[#allocation2 + $0xd4] sm:$0x1]  ;;  %v7036_v17 = vcombine.low %v9917_v50, %v9919_v55  ;;  %v2699_v50 = vrot.slane %v10075_v28, 5  ;;  %v2706_v55 = vrot.slane %v10094_v0, 5 }
 0x2cb   : > { %7973 = vmatprep.mubr.bf16.mxu0 %v7167_v57  ;;  %v1581_v10 = vshrl.u32 %v7320_v58, 16  ;;  %v1584_v27 = vshll.u32 %v7320_v58, 16  ;;  %v7039_v28 = vcombine.low %v9979_v61, %v9981_v3  ;;  %v7040_v0 = vcombine.low %v10008_v29, %v10016_v46  ;;  %v8715_v57 = vld [vmem:[#allocation2 + $0x8] sm:$0x1] }
 0x2cc   : > { %7770 = vmatmul.mubr.bf16.gmra.mrb[52].mxu1 %v7034_v47  ;;  %v1578_v20 = vor.u32 %v1576_v38, %v1575_v15  ;;  %v1579_v42 = vrot.slane %v1575_v15, 4  ;;  %v2701_v62 = vrot.slane %v2699_v50, 4  ;;  %v2702_v54 = vrot.slane %v8715_v57, 5 }
 0x2cd   : > { %7773 = vmatprep.mubr.bf16.mxu1 %v7035_v4  ;;  %7802 = vmatpush3.bf16.msra.mxu1 %v8638_v56  ;;  %v1583_v43 = vrot.slane %v1581_v10, 7  ;;  %v2708_v22 = vrot.slane %v2706_v55, 4  ;;  %v7042_v61 = vcombine.low %v10046_v35, %v10052_v23  ;;  %v2722_v47 = vrot.slane %v2720_v45, 4 }
 0x2ce   : > { %7803 = vmatprep.subr.bf16.mxu1 %v8639_v53  ;;  %v1594_v56 = vsel %vm9617_vm8, %v1578_v20, %v1593_v13  ;;  %v2716_v4 = vrot.slane %v8716_v2, 5  ;;  %v2729_v58 = vrot.slane %v2727_v24, 4  ;;  %v2734_v41 = vrot.slane %v10176_v39, 5  ;;  %v8718_v13 = vld [vmem:[#allocation2 + $0x38] sm:$0x1]  ;;  %v8643_v2 = vld [vmem:[#allocation11 + $0x1d0] sm:$0xff]  }
 0x2cf   : > { %v1586_v14 = vor.u32 %v1584_v27, %v1583_v43  ;;  %v1588_v32 = vrot.slane %v1583_v43, 4  ;;  %1595 = vst [vmem:[#allocation2 + $0xcc] sm:$0xf] %v1594_v56  ;;  %v10248_v36 = vsel %vm10012_vm15, %v7052_v33, %v2706_v55  ;;  %v2741_v10 = vrot.slane %v10180_v25, 5  ;;  %v8640_v55 = vld [vmem:[#allocation11 + $0x1c8] sm:$0xff]  }
 0x2d0   : > { %v10253_v27 = vsel %vm10012_vm15, %v2701_v62, %v2702_v54  ;;  %v10257_v39 = vsel %vm10012_vm15, %v2708_v22, %v2709_v18  ;;  %v10261_v15 = vsel %vm10012_vm15, %v2715_v26, %v2716_v4  ;;  %v2730_v43 = vrot.slane %v8718_v13, 5  ;;  %v8720_v22 = vld [vmem:[#allocation2 + $0x50] sm:$0x1]  ;;  %v8723_v13 = vld [vmem:[#allocation2 + $0x68] sm:$0x1] }
 0x2d1   : > { %7804 = vmatpush3.bf16.msra.mxu1 %v8639_v53  ;;  %v1587_v51 = vsel %vm9624_vm9, %v1579_v42, %v1586_v14  ;;  %v1598_v52 = vsel %vm9520_vm3, %v1588_v32, %v1597_v40  ;;  %v2650_v53 = vld [vmem:[#allocation2 + $0x30] sm:$0xe]  ;;  %v7054_v42 = vrot.slane %v2649_v9, 9  ;;  %v2651_v32 = vld [vmem:[#allocation2 + $0x3c] sm:$0xe]  ;;  %v2736_v56 = vrot.slane %v2734_v41, 4 }
 0x2d2   : > { %7974 = vmatmul.mubr.bf16.gmra.mrb[24].mxu0 %v7168_v12  ;;  %v2646_v12 = vld [vmem:[#allocation2] sm:$0xe]  ;;  %1596 = vst [vmem:[#allocation2 + $0xd0] sm:$0xf] %v1587_v51  ;;  %1599 = vst [vmem:[#allocation2 + $0xd4] sm:$0x1] %v1598_v52 }
 0x2d3   : > { %7977 = vmatprep.mubr.bf16.mxu0 %v7169_v16  ;;  %v7051_v60 = vrot.slane %v2646_v12, 9  ;;  %v2648_v16 = vld [vmem:[#allocation2 + $0x18] sm:$0xe]  ;;  %v7055_v14 = vrot.slane %v2650_v53, 9  ;;  %v2748_v51 = vrot.slane %v10201_v6, 5  ;;  %v2755_v52 = vrot.slane %v10204_v31, 5 }
 0x2d4   : > { %7774 = vmatmul.mubr.bf16.gmra.mrb[56].mxu1 %v7036_v17  ;;  %v7053_v49 = vrot.slane %v2648_v16, 9  ;;  %v10273_v17 = vsel %vm10012_vm15, %v2729_v58, %v2730_v43  ;;  %v8635_v12 = vld [vmem:[#allocation2 + $0x24] sm:$0xff]   ;;  %v2743_v18 = vrot.slane %v2741_v10, 4  ;;  %v10287_v6 = vsel %vm10012_vm15, %v7054_v42, %v2720_v45  ;;  %v5157_v45 = vld [vmem:[#allocation2 + $0x1c] sm:$0xf] }
 0x2d5   : > { %7777 = vmatprep.mubr.bf16.mxu1 %v7037_v44  ;;  %v10244_v21 = vsel %vm10012_vm15, %v7051_v60, %v2699_v50  ;;  %v2652_v44 = vld [vmem:[#allocation2 + $0x48] sm:$0xe]  ;;  %v8719_v60 = vld [vmem:[#allocation2 + $0x44] sm:$0x1]  ;;  %v2744_v26 = vrot.slane %v8720_v22, 5  ;;  %v2750_v33 = vrot.slane %v2748_v51, 4 }
 0x2d6   : > { %v10265_v20 = vsel %vm10012_vm15, %v7053_v49, %v2713_v5  ;;  %v7067_v50 = vcombine.low %v10244_v21, %v10253_v27  ;;  %v7068_v5 = vcombine.low %v10248_v36, %v10257_v39  ;;  %v2737_v16 = vrot.slane %v8719_v60, 5  ;;  %v2654_v9 = vld [vmem:[#allocation2 + $0x60] sm:$0xe]  ;;  %v10304_v53 = vld [vmem:[#allocation2 + $0x70] sm:$0xf]  ;;  %v8642_v22 = vld [vmem:[#allocation2 + $0x48] sm:$0xff]  }
 0x2d7   : > { %v7069_v8 = vcombine.low %v10265_v20, %v10261_v15  ;;  %v7057_v54 = vrot.slane %v2652_v44, 9  ;;  %v2762_v49 = vrot.slane %v10304_v53, 5  ;;  %v2758_v43 = vrot.slane %v8723_v13, 5  ;;  %v8724_v42 = vld [vmem:[#allocation2 + $0x7c] sm:$0xf]  ;;  %v8646_v60 = vld [vmem:[#allocation11 + $0x1d8] sm:$0xff]  }
 0x2d8   : > { %v5218_v44 = vshrl.u32 %v5157_v45, 16  ;;  %v5158_v31 = vld [vmem:[#allocation2 + $0x20] sm:$0x1]  ;;  %v10470_v13 = vld [vmem:[#allocation11 + $0x200] sm:$0xff]  }
 0x2d9   : > { %v10327_v29 = vsel %vm10012_vm15, %v7057_v54, %v2741_v10  ;;  %v2764_v10 = vrot.slane %v2762_v49, 4  ;;  %v5224_v53 = vshll.u32 %v5158_v31, 16 }
 0x2da   : > { %7978 = vmatmul.mubr.bf16.gmra.mrb[28].mxu0 %v7170_v1  ;;  %v8717_v1 = vld [vmem:[#allocation2 + $0x2c] sm:$0x1] }
 0x2db   : > { %7997 = vmatprep.mubr.bf16.mxu0 %v8629_v48  ;;  %v2723_v38 = vrot.slane %v8717_v1, 5  ;;  %v2653_v48 = vld [vmem:[#allocation2 + $0x54] sm:$0xe]  ;;  %v8722_v1 = vld [vmem:[#allocation2 + $0x5c] sm:$0x1] }
 0x2dc   : > { %7778 = vmatmul.mubr.bf16.gmra.mrb[60].mxu1 %v7038_v63  ;;  %v10291_v63 = vsel %vm10012_vm15, %v7055_v14, %v2727_v24  ;;  %v10300_v24 = vsel %vm10012_vm15, %v2736_v56, %v2737_v16  ;;  %v7058_v58 = vrot.slane %v2653_v48, 9  ;;  %v2769_v14 = vrot.slane %v8724_v42, 5  ;;  %v8726_v42 = vld [vmem:[#allocation2 + $0x80] sm:$0x1] }
 0x2dd   : > { %7781 = vmatprep.mubr.bf16.mxu1 %v7039_v28  ;;  %v10269_v40 = vsel %vm10012_vm15, %v2722_v47, %v2723_v38  ;;  %v7056_v28 = vrot.slane %v2651_v32, 9  ;;  %v7071_v57 = vcombine.low %v10291_v63, %v10273_v17  ;;  %v2757_v47 = vrot.slane %v2755_v52, 4  ;;  %v5156_v32 = vld [vmem:[#allocation2 + $0x18] sm:$0xf]  ;;  %v10495_v17 = vld [vmem:[#allocation2 + $0x44] sm:$0x1] }
 0x2de   : > { %v7070_v62 = vcombine.low %v10287_v6, %v10269_v40  ;;  %v2751_v38 = vrot.slane %v8722_v1, 5  ;;  %v5214_v56 = vshll.u32 %v5157_v45, 16  ;;  %v2783_v16 = vrot.slane %v9981_v3, 5  ;;  %v8655_v3 = vld [vmem:[#allocation11 + $0x1f0] sm:$0xff]   ;;  %11361 = vst [vmem:[#allocation29_spill] sm:$0xff] %v10495_v17 }
 0x2df   : > { %v10309_v4 = vsel %vm10012_vm15, %v7056_v28, %v2734_v41  ;;  %v10341_v25 = vsel %vm10012_vm15, %v2757_v47, %v2758_v43  ;;  %v8641_v28 = vld [vmem:[#allocation2 + $0x3c] sm:$0xff]   ;;  %v5205_v48 = vshrl.u32 %v5156_v32, 16  ;;  %v5208_v54 = vshll.u32 %v5156_v32, 16  ;;  %v8650_v6 = vld [vmem:[#allocation2 + $0x84] sm:$0xff]  }
 0x2e0   : > { %v5220_v47 = vrot.slane %v5218_v44, 4  ;;  %v2772_v32 = vrot.slane %v8726_v42, 5  ;;  %v2658_v44 = vld [vmem:[#allocation2 + $0x90] sm:$0xe] }
 0x2e2   : > { %7998 = vmatmul.mubr.bf16.vlgmr.msra.gmra.mrb[0].mxu0 %v8635_v12  ;;  %v7059_v12 = vrot.slane %v2654_v9, 9  ;;  %v10347_v9 = vrot.slane %v5214_v56, 5 }
 0x2e3   : > { %8030 = vmatpush3.bf16.msra.mxu0 %v10138_v19  ;;  %8001 = vmatprep.mubr.bf16.mxu0 %v8636_v59  ;;  %v10313_v19 = vsel %vm10012_vm15, %v2743_v18, %v2744_v26  ;;  %v2655_v18 = vld [vmem:[#allocation2 + $0x6c] sm:$0xe]  ;;  %v2656_v59 = vld [vmem:[#allocation2 + $0x78] sm:$0xe]  ;;  %v8725_v26 = vld [vmem:[#allocation2 + $0x74] sm:$0x1] }
 0x2e4   : > { %8031 = vmatprep.subr.bf16.mxu0 %v8640_v55  ;;  %7782 = vmatmul.mubr.bf16.gmra.mrb[64].mxu1 %v7040_v0  ;;  %v10331_v0 = vsel %vm10012_vm15, %v7058_v58, %v2748_v51  ;;  %v2657_v51 = vld [vmem:[#allocation2 + $0x84] sm:$0xe]  ;;  %v2765_v45 = vrot.slane %v8725_v26, 5  ;;  %v7060_v1 = vrot.slane %v2655_v18, 9  ;;  %v5207_v18 = vrot.slane %v5205_v48, 4 }
 0x2e5   : > { %7785 = vmatprep.mubr.bf16.mxu1 %v7041_v30  ;;  %v10337_v30 = vsel %vm10012_vm15, %v2750_v33, %v2751_v38  ;;  %v2771_v33 = vrot.slane %v2769_v14, 4  ;;  %v7061_v38 = vrot.slane %v2656_v59, 9  ;;  %v7062_v56 = vrot.slane %v2657_v51, 9  ;;  %v8727_v48 = vld [vmem:[#allocation2 + $0x8c] sm:$0x1]  ;;  %v11354_v26 = vld [vmem:[#allocation30_spill] sm:$0xff] }
 0x2e6   : > { %v10361_v43 = vsel %vm10012_vm15, %v2764_v10, %v2765_v45  ;;  %v5221_v59 = vor.u32 %v5220_v47, %v10347_v9  ;;  %v2790_v51 = vrot.slane %v10016_v46, 5  ;;  %v10382_v35 = vsel %vm10012_vm15, %v7060_v1, %v2762_v49  ;;  %v5159_v45 = vld [vmem:[#allocation2 + $0x24] sm:$0xf]  ;;  %v5160_v49 = vld [vmem:[#allocation2 + $0x28] sm:$0xf] }
 0x2e7   : > { %8032 = vmatpush3.bf16.msra.mxu0 %v8640_v55  ;;  %v2776_v55 = vrot.slane %v9969_v37, 5  ;;  %v10355_v37 = vsel %vm10012_vm15, %v7059_v12, %v2755_v52  ;;  %v2785_v12 = vrot.slane %v2783_v16, 4  ;;  %v10370_v10 = vsel %vm10012_vm15, %v2771_v33, %v2772_v32  ;;  %v8644_v33 = vld [vmem:[#allocation2 + $0x54] sm:$0xff]   ;;  %v2659_v32 = vld [vmem:[#allocation2 + $0x9c] sm:$0xe] }
 0x2e8   : > { %8033 = vmatprep.subr.bf16.mxu0 %v8643_v2  ;;  %v2786_v46 = vrot.slane %v11354_v26, 5  ;;  %v5222_v42 = vrot.slane %v5221_v59, 4  ;;  %v5229_v31 = vshrl.u32 %v5159_v45, 16  ;;  %v5242_v26 = vshrl.u32 %v5160_v49, 16  ;;  %v5171_v58 = vld [vmem:[#allocation2 + $0x54] sm:$0xf] }
 0x2e9   : > { %v2778_v52 = vrot.slane %v2776_v55, 4  ;;  %v10393_v27 = vsel %vm10012_vm15, %v7062_v56, %v2776_v55  ;;  %v2660_v55 = vld [vmem:[#allocation2 + $0xa8] sm:$0xe]  ;;  %v2792_v56 = vrot.slane %v2790_v51, 4  ;;  %v5328_v7 = vshll.u32 %v5171_v58, 16 }
 0x2ea   : > { %8002 = vmatmul.mubr.bf16.gmra.mrb[4].mxu0 %v8641_v28  ;;  %v8649_v28 = vld [vmem:[#allocation11 + $0x1e0] sm:$0xff]   ;;  %v7065_v21 = vrot.slane %v2660_v55, 9 }
 0x2eb   : > { %8005 = vmatprep.mubr.bf16.mxu0 %v8642_v22  ;;  %8034 = vmatpush3.bf16.msra.mxu0 %v8643_v2  ;;  %v5210_v2 = vrot.slane %v5208_v54, 5  ;;  %v2797_v22 = vrot.slane %v10033_v11, 5  ;;  %v2779_v54 = vrot.slane %v8727_v48, 5  ;;  %v8645_v11 = vld [vmem:[#allocation2 + $0x60] sm:$0xff]  }
 0x2ec   : > { %8035 = vmatprep.subr.bf16.mxu0 %v8646_v60  ;;  %7786 = vmatmul.mubr.bf16.gmra.mrb[68].mxu1 %v7042_v61  ;;  %v10386_v61 = vsel %vm10012_vm15, %v7061_v38, %v2769_v14  ;;  %v8652_v14 = vld [vmem:[#allocation11 + $0x1e8] sm:$0xff]  }
 0x2ed   : > { %7805 = vmatprep.mubr.bf16.mxu1 %v7067_v50  ;;  %v7063_v50 = vrot.slane %v2658_v44, 9  ;;  %v10399_v1 = vsel %vm10012_vm15, %v2778_v52, %v2779_v54  ;;  %v5211_v38 = vor.u32 %v5210_v2, %v5207_v18  ;;  %v2799_v44 = vrot.slane %v2797_v22, 4  ;;  %v11355_v2 = vld [vmem:[#allocation31_spill] sm:$0xff] }
 0x2ee   : > { %v5232_v52 = vshll.u32 %v5159_v45, 16  ;;  %v5238_v54 = vshll.u32 %v5160_v49, 16  ;;  %v5226_v18 = vrot.slane %v5224_v53, 5  ;;  %v2793_v59 = vrot.slane %v11355_v2, 5  ;;  %v5162_v49 = vld [vmem:[#allocation2 + $0x30] sm:$0xf] }
 0x2ef   : > { %8036 = vmatpush3.bf16.msra.mxu0 %v8646_v60  ;;  %v10403_v60 = vsel %vm10012_vm15, %v2785_v12, %v2786_v46  ;;  %v10409_v48 = vsel %vm10012_vm15, %v7063_v50, %v2783_v16  ;;  %v11356_v46 = vld [vmem:[#allocation32_spill] sm:$0xff]  ;;  %v5212_v50 = vrot.slane %v5211_v38, 4  ;;  %v7064_v45 = vrot.slane %v2659_v32, 9 }
 0x2f0   : > { %8037 = vmatprep.subr.bf16.mxu0 %v8649_v28  ;;  %v2800_v47 = vrot.slane %v11356_v46, 5  ;;  %v10424_v53 = vsel %vm10012_vm15, %v2792_v56, %v2793_v59  ;;  %v5231_v46 = vrot.slane %v5229_v31, 4  ;;  %v10430_v38 = vld [vmem:[#allocation2 + $0x34] sm:$0xf]  ;;  %v5234_v36 = vrot.slane %v5232_v52, 5 }
 0x2f1   : > { %11358 = vst [vmem:[#allocation30_spill] sm:$0xff] %v10430_v38  ;;  %v10435_v39 = vrot.slane %v5238_v54, 5  ;;  %v10441_v32 = vsel %vm10012_vm15, %v7064_v45, %v2790_v51  ;;  %v10447_v56 = vld [vmem:[#allocation2 + $0x38] sm:$0x1]  ;;  %v5253_v15 = vshrl.u32 %v5162_v49, 16  ;;  %v5256_v20 = vshll.u32 %v5162_v49, 16 }
 0x2f2   : > { %8006 = vmatmul.mubr.bf16.gmra.mrb[8].mxu0 %v8644_v33  ;;  %v5161_v33 = vld [vmem:[#allocation2 + $0x2c] sm:$0x1]  ;;  %v10428_v2 = vsel %vm10012_vm15, %v2799_v44, %v2800_v47  ;;  %v10445_v47 = vsel %vm10012_vm15, %v7065_v21, %v2797_v22  ;;  %11359 = vst [vmem:[#allocation31_spill] sm:$0xff] %v10447_v56  ;;  %v8658_v44 = vld [vmem:[#allocation11 + $0x1f8] sm:$0xff]   ;;  %v5217_v31 = vsel %vm9791_vm12, %v5212_v50, %v10347_v9  ;;  %v5262_v51 = vshll.u32 %v10430_v38, 16  ;;  %v8648_v21 = vld [vmem:[#allocation2 + $0x78] sm:$0xff]  }
 0x2f3   : > { %8009 = vmatprep.mubr.bf16.mxu0 %v8645_v11  ;;  %8038 = vmatpush3.bf16.msra.mxu0 %v8649_v28  ;;  %v5227_v11 = vsel %vm9791_vm12, %v5222_v42, %v5226_v18  ;;  %v5248_v55 = vshll.u32 %v5161_v33, 16  ;;  %v10437_v42 = vld [vmem:[#allocation2 + $0x40] sm:$0xf]  ;;  %v5266_v52 = vshrl.u32 %v10430_v38, 16  ;;  %v5165_v22 = vld [vmem:[#allocation2 + $0x3c] sm:$0xf]  ;;  %v5235_v9 = vor.u32 %v5234_v36, %v5231_v46 }
 0x2f4   : > { %8039 = vmatprep.subr.bf16.mxu0 %v8652_v14  ;;  %7806 = vmatmul.mubr.bf16.vlgmr.msra.gmra.mrb[40].mxu1 %v7068_v5  ;;  %v5244_v5 = vrot.slane %v5242_v26, 4  ;;  %v10456_v54 = vcombine.low %v5217_v31, %v5227_v11  ;;  %v5286_v18 = vshll.u32 %v10437_v42, 16  ;;  %v5290_v59 = vshrl.u32 %v10437_v42, 16  ;;  %v10462_v33 = vld [vmem:[#allocation2 + $0x4c] sm:$0xf] }
 0x2f5   : > { %7809 = vmatprep.mubr.bf16.mxu1 %v7069_v8  ;;  %v8647_v8 = vld [vmem:[#allocation2 + $0x6c] sm:$0xff]   ;;  %v10465_v45 = vrot.slane %v5248_v55, 5  ;;  %v5272_v49 = vshll.u32 %v10447_v56, 16  ;;  %v5255_v11 = vrot.slane %v5253_v15, 4  ;;  %v5258_v31 = vrot.slane %v5256_v20, 5 }
 0x2f6   : > { %v5245_v50 = vor.u32 %v5244_v5, %v10435_v39  ;;  %v10468_v26 = vld [vmem:[#allocation2 + $0xb4] sm:$0xe]  ;;  %v5277_v16 = vshrl.u32 %v5165_v22, 16  ;;  %v5280_v12 = vshll.u32 %v5165_v22, 16  ;;  %v5268_v46 = vrot.slane %v5266_v52, 4 }
 0x2f7   : > { %8040 = vmatpush3.bf16.msra.mxu0 %v8652_v14  ;;  %v5168_v14 = vld [vmem:[#allocation2 + $0x48] sm:$0xf]  ;;  %v5310_v36 = vshll.u32 %v10462_v33, 16  ;;  %v5314_v5 = vshrl.u32 %v10462_v33, 16  ;;  %v5292_v55 = vrot.slane %v5290_v59, 4  ;;  %v7066_v40 = vrot.slane %v10468_v26, 9 }
 0x2f8   : > { %8041 = vmatprep.subr.bf16.mxu0 %v8655_v3  ;;  %v5301_v15 = vshrl.u32 %v5168_v14, 16  ;;  %v5304_v20 = vshll.u32 %v5168_v14, 16  ;;  %v10481_v22 = vld [vmem:[#allocation2 + $0x58] sm:$0xf]  ;;  %v10488_v52 = vrot.slane %v5245_v50, 4  ;;  %v5279_v14 = vrot.slane %v5277_v16, 4 }
 0x2f9   : > { %11360 = vst [vmem:[#allocation32_spill] sm:$0xff] %v10481_v22  ;;  %v5282_v59 = vrot.slane %v5280_v12, 5  ;;  %v10497_v63 = vrot.slane %v5310_v36, 5  ;;  %v5338_v50 = vshrl.u32 %v10481_v22, 16  ;;  %v8651_v26 = vld [vmem:[#allocation2 + $0x90] sm:$0xff]  }
 0x2fa   : > { %8010 = vmatmul.mubr.bf16.gmra.mrb[12].mxu0 %v8647_v8  ;;  %v10472_v8 = vrot.slane %v5262_v51, 5  ;;  %v10486_v51 = vrot.slane %v5235_v9, 4  ;;  %v5334_v9 = vshll.u32 %v10481_v22, 16  ;;  %v5306_v16 = vrot.slane %v5304_v20, 5  ;;  %v10508_v36 = vld [vmem:[#allocation2 + $0x50] sm:$0x1] }
 0x2fb   : > { %8013 = vmatprep.mubr.bf16.mxu0 %v8648_v21  ;;  %8042 = vmatpush3.bf16.msra.mxu0 %v8655_v3  ;;  %v10479_v3 = vrot.slane %v5286_v18, 5  ;;  %v10490_v21 = vrot.slane %v5272_v49, 5  ;;  %v2804_v18 = vrot.slane %v10052_v23, 5  ;;  %v5303_v23 = vrot.slane %v5301_v15, 4  ;;  %v5174_v56 = vld [vmem:[#allocation2 + $0x60] sm:$0xf] }
 0x2fc   : > { %8043 = vmatprep.subr.bf16.mxu0 %v8658_v44  ;;  %7810 = vmatmul.mubr.bf16.gmra.mrb[44].mxu1 %v7070_v62  ;;  %v5259_v62 = vor.u32 %v5258_v31, %v5255_v11  ;;  %v5241_v12 = vsel %vm9791_vm12, %v10486_v51, %v10435_v39  ;;  %v11362_v11 = vld [vmem:[#allocation33_spill] sm:$0xff]  ;;  %v5283_v15 = vor.u32 %v5282_v59, %v5279_v14  ;;  %v5296_v20 = vshll.u32 %v10495_v17, 16  ;;  %v8731_v28 = vld [vmem:[#allocation2 + $0x2c] sm:$0x1] }
 0x2fd   : > { %7813 = vmatprep.mubr.bf16.mxu1 %v7071_v57  ;;  %v5316_v57 = vrot.slane %v5314_v5, 4  ;;  %v5293_v49 = vor.u32 %v5292_v55, %v10479_v3  ;;  %v2807_v31 = vrot.slane %v11362_v11, 5  ;;  %v5325_v5 = vshrl.u32 %v5171_v58, 16  ;;  %v10529_v17 = vld [vmem:[#allocation2 + $0x5c] sm:$0x1] }
 0x2fe   : > { %v2806_v55 = vrot.slane %v2804_v18, 4  ;;  %v5260_v41 = vrot.slane %v5259_v62, 4  ;;  %v10518_v51 = vrot.slane %v5334_v9, 5  ;;  %v5340_v11 = vrot.slane %v5338_v50, 4 }
 0x2ff   : > { %8044 = vmatpush3.bf16.msra.mxu0 %v8658_v44  ;;  %v5269_v44 = vor.u32 %v5268_v46, %v10472_v8  ;;  %v5251_v46 = vsel %vm9791_vm12, %v10488_v52, %v10465_v45  ;;  %v5317_v39 = vor.u32 %v5316_v57, %v10497_v63  ;;  %v11363_v58 = vcombine.low %v10309_v4, %v10300_v24 }
 0x300   : > { %8077 = vmatprep.subr.bf16.mxu0 %v10470_v13  ;;  %v5294_v38 = vrot.slane %v5293_v49, 4  ;;  %v5307_v45 = vor.u32 %v5306_v16, %v5303_v23  ;;  %v5320_v52 = vshll.u32 %v10508_v36, 16  ;;  %v11364_v14 = vcombine.low %v10327_v29, %v10313_v19  ;;  %v8654_v23 = vld [vmem:[#allocation2 + $0xa8] sm:$0xff]  }
 0x301   : > { %v5327_v62 = vrot.slane %v5325_v5, 4  ;;  %v5330_v59 = vrot.slane %v5328_v7, 5  ;;  %v5284_v50 = vrot.slane %v5283_v15, 4  ;;  %v5298_v22 = vrot.slane %v5296_v20, 5  ;;  %v5177_v20 = vld [vmem:[#allocation2 + $0x6c] sm:$0xf] }
 0x302   : > { %8014 = vmatmul.mubr.bf16.gmra.mrb[16].mxu0 %v8650_v6  ;;  %v10515_v6 = vld [vmem:[#allocation2 + $0x64] sm:$0xf]  ;;  %v5349_v24 = vshrl.u32 %v5174_v56, 16  ;;  %v5352_v4 = vshll.u32 %v5174_v56, 16  ;;  %v10533_v49 = vsel %vm10012_vm15, %v7066_v40, %v2804_v18  ;;  %v10537_v19 = vsel %vm10012_vm15, %v2806_v55, %v2807_v31 }
 0x303   : > { %8017 = vmatprep.mubr.bf16.mxu0 %v8651_v26  ;;  %v5270_v26 = vrot.slane %v5269_v44, 4  ;;  %v5358_v57 = vshll.u32 %v10515_v6, 16  ;;  %v5362_v9 = vshrl.u32 %v10515_v6, 16  ;;  %v8653_v44 = vld [vmem:[#allocation2 + $0x9c] sm:$0xff]   ;;  %v5318_v29 = vrot.slane %v5317_v39, 4 }
 0x304   : > { %7814 = vmatmul.mubr.bf16.gmra.mrb[48].mxu1 %v11363_v58  ;;  %v5341_v7 = vor.u32 %v5340_v11, %v10518_v51  ;;  %v5299_v56 = vsel %vm9791_vm12, %v5294_v38, %v5298_v22  ;;  %v5308_v5 = vrot.slane %v5307_v45, 4  ;;  %v5322_v15 = vrot.slane %v5320_v52, 5  ;;  %v10554_v38 = vld [vmem:[#allocation2 + $0x68] sm:$0x1]  ;;  %v10558_v45 = vld [vmem:[#allocation2 + $0x70] sm:$0xf] }
 0x305   : > { %7817 = vmatprep.mubr.bf16.mxu1 %v11364_v14  ;;  %v5275_v16 = vsel %vm9791_vm12, %v5270_v26, %v10490_v21  ;;  %v5331_v40 = vor.u32 %v5330_v59, %v5327_v62  ;;  %v5344_v18 = vshll.u32 %v10529_v17, 16  ;;  %v10546_v31 = vrot.slane %v5358_v57, 5 }
 0x306   : > { %v5364_v55 = vrot.slane %v5362_v9, 4  ;;  %v5265_v39 = vsel %vm9791_vm12, %v5260_v41, %v10472_v8  ;;  %v5289_v21 = vsel %vm9791_vm12, %v5284_v50, %v10479_v3  ;;  %v5351_v22 = vrot.slane %v5349_v24, 4 }
 0x307   : > { %v5354_v11 = vrot.slane %v5352_v4, 5  ;;  %v5323_v58 = vsel %vm9791_vm12, %v5318_v29, %v5322_v15  ;;  %v5342_v26 = vrot.slane %v5341_v7, 4  ;;  %v5373_v52 = vshrl.u32 %v5177_v20, 16  ;;  %v8657_v7 = vld [vmem:[#allocation2 + $0xc0] sm:$0xff]  }
 0x308   : > { %v5376_v14 = vshll.u32 %v5177_v20, 16  ;;  %v11365_v62 = vcombine.low %v10331_v0, %v10337_v30  ;;  %v10563_v41 = vcombine.low %v5241_v12, %v5251_v46  ;;  %v10565_v8 = vcombine.low %v5265_v39, %v5275_v16  ;;  %v5180_v12 = vld [vmem:[#allocation2 + $0x78] sm:$0xf]  ;;  %v10578_v46 = vld [vmem:[#allocation2 + $0x7c] sm:$0xf] }
 0x309   : > { %v10569_v59 = vcombine.low %v5289_v21, %v5299_v56  ;;  %v11366_v57 = vcombine.low %v10355_v37, %v10341_v25  ;;  %v5313_v9 = vsel %vm9791_vm12, %v5308_v5, %v10497_v63  ;;  %v5332_v50 = vrot.slane %v5331_v40, 4  ;;  %v10584_v25 = vld [vmem:[#allocation2 + $0x88] sm:$0xf]  ;;  %v8656_v37 = vld [vmem:[#allocation2 + $0xb4] sm:$0xff]  }
 0x30a   : > { %8018 = vmatmul.mubr.bf16.gmra.mrb[20].mxu0 %v8653_v44  ;;  %v5346_v0 = vrot.slane %v5344_v18, 5  ;;  %v5365_v30 = vor.u32 %v5364_v55, %v10546_v31  ;;  %v10580_v24 = vcombine.low %v5313_v9, %v5323_v58  ;;  %v5355_v4 = vor.u32 %v5354_v11, %v5351_v22  ;;  %v5183_v18 = vld [vmem:[#allocation2 + $0x84] sm:$0xf]  ;;  %v10594_v21 = vld [vmem:[#allocation2 + $0x74] sm:$0x1] }
 0x30b   : > { %8021 = vmatprep.mubr.bf16.mxu0 %v8654_v23  ;;  %v5368_v44 = vshll.u32 %v10554_v38, 16  ;;  %v5382_v29 = vshll.u32 %v10558_v45, 16  ;;  %v5375_v23 = vrot.slane %v5373_v52, 4  ;;  %v5378_v16 = vrot.slane %v5376_v14, 5 }
 0x30c   : > { %7818 = vmatmul.mubr.bf16.gmra.mrb[52].mxu1 %v11365_v62  ;;  %v5347_v63 = vsel %vm9791_vm12, %v5342_v26, %v5346_v0  ;;  %v5386_v56 = vshrl.u32 %v10558_v45, 16  ;;  %v5397_v5 = vshrl.u32 %v5180_v12, 16  ;;  %v5400_v15 = vshll.u32 %v5180_v12, 16  ;;  %v5186_v62 = vld [vmem:[#allocation2 + $0x90] sm:$0xf] }
 0x30d   : > { %7821 = vmatprep.mubr.bf16.mxu1 %v11366_v57  ;;  %v5406_v20 = vshll.u32 %v10578_v46, 16  ;;  %v5410_v40 = vshrl.u32 %v10578_v46, 16  ;;  %v5337_v55 = vsel %vm9791_vm12, %v5332_v50, %v10518_v51  ;;  %v5366_v39 = vrot.slane %v5365_v30, 4  ;;  %v10602_v51 = vld [vmem:[#allocation2 + $0x94] sm:$0xf] }
 0x30e   : > { %v5430_v22 = vshll.u32 %v10584_v25, 16  ;;  %v5434_v11 = vshrl.u32 %v10584_v25, 16  ;;  %v10598_v58 = vcombine.low %v5337_v55, %v5347_v63  ;;  %v5356_v26 = vrot.slane %v5355_v4, 4 }
 0x30f   : > { %v5370_v52 = vrot.slane %v5368_v44, 5  ;;  %v10600_v14 = vrot.slane %v5382_v29, 5  ;;  %v5379_v57 = vor.u32 %v5378_v16, %v5375_v23  ;;  %v5388_v9 = vrot.slane %v5386_v56, 4  ;;  %v10615_v23 = vld [vmem:[#allocation2 + $0x80] sm:$0x1] }
 0x310   : > { %v5421_v0 = vshrl.u32 %v5183_v18, 16  ;;  %v5424_v12 = vshll.u32 %v5183_v18, 16  ;;  %v11367_v50 = vcombine.low %v10382_v35, %v10361_v43  ;;  %v5399_v30 = vrot.slane %v5397_v5, 4  ;;  %v10619_v35 = vld [vmem:[#allocation2 + $0x8c] sm:$0x1] }
 0x311   : > { %v5412_v63 = vrot.slane %v5410_v40, 4  ;;  %v11368_v4 = vcombine.low %v10386_v61, %v10370_v10  ;;  %v5371_v44 = vsel %vm9791_vm12, %v5366_v39, %v5370_v52  ;;  %v5392_v29 = vshll.u32 %v10594_v21, 16  ;;  %v8659_v10 = vld [vmem:[#allocation2 + $0xcc] sm:$0xff]  }
 0x312   : > { %8022 = vmatmul.mubr.bf16.gmra.mrb[24].mxu0 %v8656_v37  ;;  %v5402_v37 = vrot.slane %v5400_v15, 5  ;;  %v10617_v16 = vrot.slane %v5430_v22, 5  ;;  %v5436_v43 = vrot.slane %v5434_v11, 4  ;;  %v5445_v56 = vshrl.u32 %v5186_v62, 16 }
 0x313   : > { %8025 = vmatprep.mubr.bf16.mxu0 %v8657_v7  ;;  %v10607_v7 = vrot.slane %v5406_v20, 5  ;;  %v5448_v5 = vshll.u32 %v5186_v62, 16  ;;  %v5454_v15 = vshll.u32 %v10602_v51, 16  ;;  %v5458_v20 = vshrl.u32 %v10602_v51, 16  ;;  %v10631_v62 = vld [vmem:[#allocation2 + $0xa0] sm:$0xf] }
 0x314   : > { %7822 = vmatmul.mubr.bf16.gmra.mrb[56].mxu1 %v11367_v50  ;;  %v5361_v61 = vsel %vm9791_vm12, %v5356_v26, %v10546_v31  ;;  %v10626_v40 = vrot.slane %v5379_v57, 4  ;;  %v5423_v18 = vrot.slane %v5421_v0, 4  ;;  %v5426_v55 = vrot.slane %v5424_v12, 5  ;;  %11369 = vst [vmem:[#allocation33_spill] sm:$0xff] %v10631_v62  ;;  %v5189_v57 = vld [vmem:[#allocation2 + $0x9c] sm:$0xf] }
 0x315   : > { %7825 = vmatprep.mubr.bf16.mxu1 %v11368_v4  ;;  %v5389_v39 = vor.u32 %v5388_v9, %v10600_v14  ;;  %v5403_v22 = vor.u32 %v5402_v37, %v5399_v30  ;;  %v5413_v11 = vor.u32 %v5412_v63, %v10607_v7  ;;  %v5416_v52 = vshll.u32 %v10615_v23, 16  ;;  %v10642_v37 = vld [vmem:[#allocation2 + $0xac] sm:$0xf] }
 0x316   : > { %v10633_v50 = vcombine.low %v5361_v61, %v5371_v44  ;;  %v10635_v4 = vrot.slane %v5392_v29, 5  ;;  %v5437_v31 = vor.u32 %v5436_v43, %v10617_v16  ;;  %v5440_v26 = vshll.u32 %v10619_v35, 16 }
 0x317   : > { %v5447_v9 = vrot.slane %v5445_v56, 4  ;;  %v5450_v0 = vrot.slane %v5448_v5, 5  ;;  %v10640_v12 = vrot.slane %v5454_v15, 5  ;;  %v5460_v30 = vrot.slane %v5458_v20, 4 }
 0x318   : > { %v5385_v63 = vsel %vm9791_vm12, %v10626_v40, %v10600_v14  ;;  %v5427_v44 = vor.u32 %v5426_v55, %v5423_v18  ;;  %v5478_v29 = vshll.u32 %v10631_v62, 16  ;;  %v5482_v43 = vshrl.u32 %v10631_v62, 16  ;;  %v5192_v18 = vld [vmem:[#allocation2 + $0xa8] sm:$0xf] }
 0x319   : > { %v5390_v56 = vrot.slane %v5389_v39, 4  ;;  %v5404_v5 = vrot.slane %v5403_v22, 4  ;;  %v5414_v15 = vrot.slane %v5413_v11, 4  ;;  %v5418_v20 = vrot.slane %v5416_v52, 5  ;;  %v10661_v39 = vld [vmem:[#allocation2 + $0xa4] sm:$0x1] }
 0x31a   : > { %8026 = vmatmul.mubr.bf16.gmra.mrb[28].mxu0 %v8659_v10  ;;  %v10653_v10 = vld [vmem:[#allocation2 + $0x98] sm:$0x1]  ;;  %v11371_v61 = vcombine.low %v10409_v48, %v10403_v60  ;;  %v5438_v14 = vrot.slane %v5437_v31, 4  ;;  %v5469_v40 = vshrl.u32 %v5189_v57, 16  ;;  %v5502_v55 = vshll.u32 %v10642_v37, 16  ;;  %v8661_v11 = vld [vmem:[#allocation11 + $0x208] sm:$0xff]  }
 0x31b   : > { %8045 = vmatprep.mubr.bf16.mxu0 %v10456_v54  ;;  %v11370_v54 = vcombine.low %v10393_v27, %v10399_v1  ;;  %v5506_v3 = vshrl.u32 %v10642_v37, 16  ;;  %v5442_v62 = vrot.slane %v5440_v26, 5  ;;  %v5451_v27 = vor.u32 %v5450_v0, %v5447_v9 }
 0x31c   : > { %v5461_v1 = vor.u32 %v5460_v30, %v10640_v12  ;;  %v5472_v22 = vshll.u32 %v5189_v57, 16  ;;  %v5428_v52 = vrot.slane %v5427_v44, 4  ;;  %v10664_v60 = vrot.slane %v5478_v29, 5 }
 0x31d   : > { %7826 = vmatmul.mubr.bf16.gmra.mrb[60].mxu1 %v11370_v54  ;;  %v5464_v54 = vshll.u32 %v10653_v10, 16  ;;  %v5484_v48 = vrot.slane %v5482_v43, 4  ;;  %v5395_v31 = vsel %vm9791_vm12, %v5390_v56, %v10635_v4  ;;  %v5419_v26 = vsel %vm9791_vm12, %v5414_v15, %v5418_v20  ;;  %v10678_v43 = vld [vmem:[#allocation2 + $0xb8] sm:$0xf] }
 0x31e   : > { %7829 = vmatprep.mubr.bf16.mxu1 %v11371_v61  ;;  %v5493_v9 = vshrl.u32 %v5192_v18, 16  ;;  %v5496_v0 = vshll.u32 %v5192_v18, 16  ;;  %v5443_v57 = vsel %vm9791_vm12, %v5438_v14, %v5442_v62  ;;  %v10674_v30 = vrot.slane %v5469_v40, 4  ;;  %v8662_v62 = vld [vmem:[#allocation11 + $0x210] sm:$0xff]   ;;  %v10698_v61 = vld [vmem:[#allocation2 + $0xb0] sm:$0x1] }
 0x31f   : > { %v10676_v44 = vrot.slane %v5502_v55, 5  ;;  %v5508_v29 = vrot.slane %v5506_v3, 4  ;;  %v10682_v4 = vrot.slane %v5451_v27, 4  ;;  %v10684_v56 = vrot.slane %v5461_v1, 4  ;;  %v10707_v55 = vld [vmem:[#allocation2 + $0xb4] sm:$0xf] }
 0x320   : > { %v10686_v15 = vrot.slane %v5472_v22, 5  ;;  %v5409_v3 = vsel %vm9791_vm12, %v5404_v5, %v10607_v7  ;;  %v10695_v20 = vrot.slane %v5464_v54, 5  ;;  %v11372_v14 = vcombine.low %v10441_v32, %v10424_v53  ;;  %v10721_v22 = vld [vmem:[#allocation2 + $0xc0] sm:$0xf] }
 0x321   : > { %v10703_v40 = vrot.slane %v5493_v9, 4  ;;  %v10705_v18 = vrot.slane %v5496_v0, 5  ;;  %v5526_v7 = vshll.u32 %v10678_v43, 16  ;;  %v11373_v5 = vcombine.low %v10445_v47, %v10428_v2  ;;  %v5915_v9 = vld [vmem:[#allocation2 + $0x54] sm:$0xe] }
 0x322   : > { %8046 = vmatmul.mubr.bf16.vlgmr.msra.gmra.mrb[0].mxu0 %v10563_v41  ;;  %v5488_v41 = vshll.u32 %v10661_v39, 16  ;;  %v10714_v27 = vcombine.low %v5385_v63, %v5395_v31  ;;  %v10716_v1 = vcombine.low %v5409_v3, %v5419_v26  ;;  %v5509_v32 = vor.u32 %v5508_v29, %v10676_v44  ;;  %v5914_v31 = vld [vmem:[#allocation2 + $0x48] sm:$0xe]  ;;  %v8663_v26 = vld [vmem:[#allocation11 + $0x218] sm:$0xff]  }
 0x323   : > { %8078 = vmatpush3.bf16.msra.mxu0 %v10470_v13  ;;  %8049 = vmatprep.mubr.bf16.mxu0 %v10565_v8  ;;  %v5433_v13 = vsel %vm9791_vm12, %v5428_v52, %v10617_v16  ;;  %v5485_v8 = vor.u32 %v5484_v48, %v10664_v60  ;;  %v5530_v16 = vshrl.u32 %v10678_v43, 16  ;;  %v10723_v52 = vld [vmem:[#allocation2 + $0xc4] sm:$0xf]  ;;  %v5913_v48 = vld [vmem:[#allocation2 + $0x3c] sm:$0xe]  ;;  %v10744_v3 = vrot.slane %v5526_v7, 5 }
 0x324   : > { %8079 = vmatprep.subr.bf16.mxu0 %v8661_v11  ;;  %v10718_v53 = vcombine.low %v5433_v13, %v5443_v57  ;;  %v10735_v63 = vrot.slane %v5488_v41, 5  ;;  %v5997_v41 = vrot.slane %v10437_v42, 5  ;;  %v6004_v0 = vrot.slane %v10462_v33, 5  ;;  %v8664_v42 = vld [vmem:[#allocation11 + $0x220] sm:$0xff]  }
 0x325   : > { %7830 = vmatmul.mubr.bf16.gmra.mrb[64].mxu1 %v11372_v14  ;;  %v10746_v13 = vrot.slane %v5530_v16, 4  ;;  %v10750_v14 = vrot.slane %v5509_v32, 4  ;;  %v11374_v16 = vld [vmem:[#allocation29_spill] sm:$0xff]  ;;  %v7231_v47 = vrot.slane %v5914_v31, 9  ;;  %v6007_v33 = vrot.slane %v10508_v36, 5 }
 0x326   : > { %7833 = vmatprep.mubr.bf16.mxu1 %v11373_v5  ;;  %v7230_v5 = vrot.slane %v5913_v48, 9  ;;  %v5999_v57 = vrot.slane %v5997_v41, 4  ;;  %v6000_v29 = vrot.slane %v11374_v16, 5  ;;  %v6006_v48 = vrot.slane %v6004_v0, 4 }
 0x327   : > { %8080 = vmatpush3.bf16.msra.mxu0 %v8661_v11  ;;  %v10737_v11 = vrot.slane %v5485_v8, 4  ;;  %v5916_v8 = vld [vmem:[#allocation2 + $0x60] sm:$0xe]  ;;  %v10772_v31 = vsel %vm10012_vm15, %v7231_v47, %v6004_v0  ;;  %v7232_v16 = vrot.slane %v5915_v9, 9  ;;  %v5919_v47 = vld [vmem:[#allocation2 + $0x84] sm:$0xe] }
 0x328   : > { %8081 = vmatprep.subr.bf16.mxu0 %v8662_v62  ;;  %v10760_v32 = vsel %vm10012_vm15, %v7230_v5, %v5997_v41  ;;  %v5917_v5 = vld [vmem:[#allocation2 + $0x6c] sm:$0xe]  ;;  %v10779_v7 = vsel %vm10012_vm15, %v6006_v48, %v6007_v33  ;;  %v7233_v9 = vrot.slane %v5916_v8, 9  ;;  %v6032_v8 = vrot.slane %v10578_v46, 5 }
 0x329   : > { %v7234_v33 = vrot.slane %v5917_v5, 9 }
 0x32a   : > { %8050 = vmatmul.mubr.bf16.gmra.mrb[4].mxu0 %v10569_v59  ;;  %v11376_v59 = vld [vmem:[#allocation32_spill] sm:$0xff] }
 0x32b   : > { %8053 = vmatprep.mubr.bf16.mxu0 %v10580_v24  ;;  %8082 = vmatpush3.bf16.msra.mxu0 %v8662_v62  ;;  %v11375_v24 = vcombine.low %v10533_v49, %v10537_v19  ;;  %v10768_v62 = vsel %vm10012_vm15, %v5999_v57, %v6000_v29  ;;  %v6011_v41 = vrot.slane %v11376_v59, 5  ;;  %v6014_v49 = vrot.slane %v10529_v17, 5  ;;  %v5918_v29 = vld [vmem:[#allocation2 + $0x78] sm:$0xe]  ;;  %v8665_v59 = vld [vmem:[#allocation11 + $0x228] sm:$0xff]  }
 0x32c   : > { %8083 = vmatprep.subr.bf16.mxu0 %v8663_v26  ;;  %v6018_v19 = vrot.slane %v10515_v6, 5  ;;  %v6021_v57 = vrot.slane %v10554_v38, 5  ;;  %v6025_v17 = vrot.slane %v10558_v45, 5  ;;  %v6028_v38 = vrot.slane %v10594_v21, 5 }
 0x32d   : > { %7834 = vmatmul.mubr.bf16.gmra.mrb[68].mxu1 %v11375_v24  ;;  %v6013_v0 = vrot.slane %v6011_v41, 4  ;;  %v10788_v24 = vsel %vm10012_vm15, %v7232_v16, %v6011_v41  ;;  %v7235_v5 = vrot.slane %v5918_v29, 9  ;;  %v5921_v29 = vld [vmem:[#allocation2 + $0x9c] sm:$0xe] }
 0x32e   : > { %v6020_v48 = vrot.slane %v6018_v19, 4  ;;  %v6027_v41 = vrot.slane %v6025_v17, 4  ;;  %v10813_v46 = vsel %vm10012_vm15, %v7234_v33, %v6025_v17  ;;  %v6042_v33 = vrot.slane %v10619_v35, 5  ;;  %v8667_v35 = vld [vmem:[#allocation11 + $0x238] sm:$0xff]  }
 0x32f   : > { %8084 = vmatpush3.bf16.msra.mxu0 %v8663_v26  ;;  %v10793_v6 = vsel %vm10012_vm15, %v6013_v0, %v6014_v49  ;;  %v10797_v26 = vsel %vm10012_vm15, %v7233_v9, %v6018_v19  ;;  %v6035_v49 = vrot.slane %v10615_v23, 5  ;;  %v5920_v19 = vld [vmem:[#allocation2 + $0x90] sm:$0xe]  ;;  %v8666_v0 = vld [vmem:[#allocation11 + $0x230] sm:$0xff]   ;;  %v6046_v17 = vrot.slane %v10602_v51, 5 }
 0x330   : > { %8085 = vmatprep.subr.bf16.mxu0 %v8664_v42  ;;  %v10806_v45 = vsel %vm10012_vm15, %v6020_v48, %v6021_v57  ;;  %v10818_v9 = vsel %vm10012_vm15, %v6027_v41, %v6028_v38  ;;  %v6039_v57 = vrot.slane %v10584_v25, 5  ;;  %v7237_v41 = vrot.slane %v5920_v19, 9  ;;  %v5922_v25 = vld [vmem:[#allocation2 + $0xa8] sm:$0xe]  ;;  %v5924_v38 = vld [vmem:[#allocation2 + $0xc0] sm:$0xe] }
 0x331   : > { %v6048_v48 = vrot.slane %v6046_v17, 4  ;;  %v11394_v34 = vcombine.low %v10813_v46, %v10818_v9  ;;  %v8671_v46 = vld [vmem:[#allocation12 + $0x18] sm:$0xff]   ;;  %v8672_v9 = vld [vmem:[#allocation12 + $0x20] sm:$0xff]  }
 0x332   : > { %8054 = vmatmul.mubr.bf16.gmra.mrb[8].mxu0 %v10598_v58  ;;  %v6034_v58 = vrot.slane %v6032_v8, 4  ;;  %v10847_v19 = vsel %vm10012_vm15, %v7237_v41, %v6046_v17  ;;  %v6063_v41 = vrot.slane %v10698_v61, 5 }
 0x333   : > { %8057 = vmatprep.mubr.bf16.mxu0 %v10633_v50  ;;  %8086 = vmatpush3.bf16.msra.mxu0 %v8664_v42  ;;  %v10822_v50 = vsel %vm10012_vm15, %v7235_v5, %v6032_v8  ;;  %v7236_v42 = vrot.slane %v5919_v47, 9  ;;  %v6041_v8 = vrot.slane %v6039_v57, 4  ;;  %v6049_v47 = vrot.slane %v10653_v10, 5 }
 0x334   : > { %8087 = vmatprep.subr.bf16.mxu0 %v8665_v59  ;;  %v10829_v23 = vsel %vm10012_vm15, %v6034_v58, %v6035_v49  ;;  %v7238_v58 = vrot.slane %v5921_v29, 9  ;;  %v11377_v49 = vld [vmem:[#allocation33_spill] sm:$0xff]  ;;  %v6056_v10 = vrot.slane %v10661_v39, 5  ;;  %v5925_v29 = vld [vmem:[#allocation2 + $0xcc] sm:$0xe] }
 0x335   : > { %v10838_v5 = vsel %vm10012_vm15, %v7236_v42, %v6039_v57  ;;  %v6053_v21 = vrot.slane %v11377_v49, 5  ;;  %v10843_v51 = vsel %vm10012_vm15, %v6041_v8, %v6042_v33  ;;  %v5923_v42 = vld [vmem:[#allocation2 + $0xb4] sm:$0xe]  ;;  %v10851_v57 = vld [vmem:[#allocation2 + $0xbc] sm:$0x1]  ;;  %v10857_v49 = vsel %vm10012_vm15, %v6048_v48, %v6049_v47 }
 0x336   : > { %v7239_v8 = vrot.slane %v5922_v25, 9  ;;  %v10868_v48 = vld [vmem:[#allocation2 + $0xc8] sm:$0x1]  ;;  %v10870_v47 = vld [vmem:[#allocation2 + $0xd4] sm:$0x1]  ;;  %v7240_v25 = vrot.slane %v5923_v42, 9 }
 0x337   : > { %8088 = vmatpush3.bf16.msra.mxu0 %v8665_v59  ;;  %v6060_v59 = vrot.slane %v10642_v37, 5  ;;  %v6055_v33 = vrot.slane %v6053_v21, 4  ;;  %v10864_v37 = vsel %vm10012_vm15, %v7238_v58, %v6053_v21  ;;  %v6067_v58 = vrot.slane %v10678_v43, 5 }
 0x338   : > { %8089 = vmatprep.subr.bf16.mxu0 %v8666_v0  ;;  %v6070_v17 = vrot.slane %v10851_v57, 5  ;;  %v7241_v42 = vrot.slane %v5924_v38, 9  ;;  %v7242_v16 = vrot.slane %v5925_v29, 9  ;;  %v6077_v36 = vrot.slane %v10868_v48, 5 }
 0x339   : > { %v6062_v39 = vrot.slane %v6060_v59, 4  ;;  %v10878_v21 = vsel %vm10012_vm15, %v7239_v8, %v6060_v59  ;;  %v6069_v8 = vrot.slane %v6067_v58, 4 }
 0x33a   : > { %8058 = vmatmul.mubr.bf16.gmra.mrb[12].mxu0 %v10714_v27  ;;  %v10874_v27 = vsel %vm10012_vm15, %v6055_v33, %v6056_v10  ;;  %v6074_v10 = vrot.slane %v10723_v52, 5  ;;  %v5202_v33 = vld [vmem:[#allocation2 + $0xd0] sm:$0xf] }
 0x33b   : > { %8061 = vmatprep.mubr.bf16.mxu0 %v10716_v1  ;;  %8090 = vmatpush3.bf16.msra.mxu0 %v8666_v0  ;;  %v10885_v0 = vsel %vm10012_vm15, %v6062_v39, %v6063_v41  ;;  %v6081_v54 = vrot.slane %v5202_v33, 5  ;;  %v6084_v1 = vrot.slane %v10870_v47, 5  ;;  %v5544_v39 = vshll.u32 %v10721_v22, 16 }
 0x33c   : > { %8091 = vmatprep.subr.bf16.mxu0 %v8667_v35  ;;  %v6076_v43 = vrot.slane %v6074_v10, 4  ;;  %v10896_v41 = vsel %vm10012_vm15, %v7240_v25, %v6067_v58  ;;  %v10900_v2 = vsel %vm10012_vm15, %v6069_v8, %v6070_v17  ;;  %v10904_v38 = vsel %vm10012_vm15, %v7241_v42, %v6074_v10 }
 0x33d   : > { %v7256_v29 = vcombine.low %v10896_v41, %v10900_v2  ;;  %v6083_v25 = vrot.slane %v6081_v54, 4  ;;  %v11378_v17 = vsel %vm9791_vm12, %v10684_v56, %v10695_v20  ;;  %v11379_v58 = vsel %vm9791_vm12, %v10682_v4, %v10640_v12 }
 0x33e   : > { %v10910_v59 = vsel %vm10012_vm15, %v6076_v43, %v6077_v36  ;;  %v7213_v10 = vcombine.low %v11379_v58, %v11378_v17  ;;  %v11380_v36 = vor.u32 %v10686_v15, %v10674_v30  ;;  %v11381_v42 = vshll.u32 %v10698_v61, 16  ;;  %v5201_v15 = vld [vmem:[#allocation2 + $0xcc] sm:$0xf] }
 0x33f   : > { %8092 = vmatpush3.bf16.msra.mxu0 %v8667_v35  ;;  %v10914_v35 = vsel %vm10012_vm15, %v7242_v16, %v6081_v54  ;;  %v5491_v56 = vsel %vm9791_vm12, %v10737_v11, %v10735_v63  ;;  %v11382_v12 = vshll.u32 %v10723_v52, 16  ;;  %v11383_v20 = vshrl.u32 %v10723_v52, 16 }
 0x340   : > { %v5476_v8 = vrot.slane %v11380_v36, 4  ;;  %v5514_v16 = vrot.slane %v11381_v42, 5  ;;  %v10944_v61 = vsel %vm10012_vm15, %v6083_v25, %v6084_v1  ;;  %v11385_v17 = vshrl.u32 %v10707_v55, 16 }
 0x341   : > { %v5552_v4 = vrot.slane %v11382_v12, 5  ;;  %v5556_v30 = vrot.slane %v11383_v20, 4  ;;  %v11386_v63 = vshll.u32 %v10707_v55, 16  ;;  %v5533_v1 = vor.u32 %v10746_v13, %v10744_v3 }
 0x342   : > { %8062 = vmatmul.mubr.bf16.gmra.mrb[16].mxu0 %v10718_v53  ;;  %v11384_v53 = vor.u32 %v10705_v18, %v10703_v40  ;;  %v5519_v58 = vrot.slane %v11385_v17, 4  ;;  %v5515_v36 = vsel %vm9791_vm12, %v10750_v14, %v5514_v16  ;;  %v11387_v25 = vshrl.u32 %v10721_v22, 16 }
 0x343   : > { %8065 = vmatprep.mubr.bf16.mxu0 %v7213_v10  ;;  %v5522_v11 = vrot.slane %v11386_v63, 5  ;;  %v5546_v18 = vrot.slane %v5544_v39, 5  ;;  %v5565_v10 = vshrl.u32 %v5201_v15, 16  ;;  %v5568_v42 = vshll.u32 %v5201_v15, 16 }
 0x344   : > { %v5500_v43 = vrot.slane %v11384_v53, 4  ;;  %v5543_v40 = vrot.slane %v11387_v25, 4  ;;  %v5574_v12 = vshll.u32 %v5202_v33, 16  ;;  %v5578_v20 = vshrl.u32 %v5202_v33, 16 }
 0x345   : > { %v5481_v55 = vsel %vm9791_vm12, %v5476_v8, %v10664_v60  ;;  %v5557_v53 = vor.u32 %v5556_v30, %v5552_v4  ;;  %v5523_v16 = vor.u32 %v5522_v11, %v5519_v58  ;;  %v5536_v13 = vshll.u32 %v10851_v57, 16  ;;  %v8728_v11 = vld [vmem:[#allocation2 + $0x1c] sm:$0xf] }
 0x346   : > { %v7214_v17 = vcombine.low %v5481_v55, %v5491_v56  ;;  %v5505_v14 = vsel %vm9791_vm12, %v5500_v43, %v10676_v44  ;;  %v5534_v63 = vrot.slane %v5533_v1, 4  ;;  %v5547_v39 = vor.u32 %v5546_v18, %v5543_v40 }
 0x347   : > { %v7215_v22 = vcombine.low %v5505_v14, %v5515_v36  ;;  %v5560_v15 = vshll.u32 %v10868_v48, 16  ;;  %v5567_v25 = vrot.slane %v5565_v10, 4  ;;  %v5570_v33 = vrot.slane %v5568_v42, 5 }
 0x348   : > { %v5576_v52 = vrot.slane %v5574_v12, 5  ;;  %v5580_v54 = vrot.slane %v5578_v20, 4  ;;  %v5558_v60 = vrot.slane %v5557_v53, 4  ;;  %v5524_v8 = vrot.slane %v5523_v16, 4  ;;  %v8729_v53 = vld [vmem:[#allocation2 + $0x20] sm:$0x1] }
 0x349   : > { %v5538_v56 = vrot.slane %v5536_v13, 5  ;;  %v5548_v30 = vrot.slane %v5547_v39, 4  ;;  %v5562_v55 = vrot.slane %v5560_v15, 5  ;;  %v5571_v57 = vor.u32 %v5570_v33, %v5567_v25  ;;  %v8730_v16 = vld [vmem:[#allocation2 + $0x28] sm:$0xf] }
 0x34a   : > { %8066 = vmatmul.mubr.bf16.gmra.mrb[20].mxu0 %v7214_v17  ;;  %v5581_v43 = vor.u32 %v5580_v54, %v5576_v52  ;;  %v5584_v58 = vshll.u32 %v10870_v47, 16  ;;  %v5976_v36 = vrot.slane %v8728_v11, 5  ;;  %v5529_v1 = vsel %vm9791_vm12, %v5524_v8, %v10744_v3  ;;  %v5910_v47 = vld [vmem:[#allocation2 + $0x18] sm:$0xe]  ;;  %v5911_v8 = vld [vmem:[#allocation2 + $0x24] sm:$0xe] }
 0x34b   : > { %8069 = vmatprep.mubr.bf16.mxu0 %v7215_v22  ;;  %v5539_v44 = vsel %vm9791_vm12, %v5534_v63, %v5538_v56  ;;  %v5563_v48 = vsel %vm9791_vm12, %v5558_v60, %v5562_v55  ;;  %v5553_v18 = vsel %vm9791_vm12, %v5548_v30, %v5552_v4  ;;  %v5572_v42 = vrot.slane %v5571_v57, 4  ;;  %v11388_v63 = vld [vmem:[#allocation30_spill] sm:$0xff]  ;;  %v5912_v30 = vld [vmem:[#allocation2 + $0x30] sm:$0xe]  ;;  %v11389_v55 = vld [vmem:[#allocation31_spill] sm:$0xff] }
 0x34c   : > { %v7216_v40 = vcombine.low %v5529_v1, %v5539_v44  ;;  %v7217_v10 = vcombine.low %v5553_v18, %v5563_v48  ;;  %v5582_v12 = vrot.slane %v5581_v43, 4  ;;  %v5586_v20 = vrot.slane %v5584_v58, 5 }
 0x34d   : > { %v5978_v54 = vrot.slane %v5976_v36, 4  ;;  %v5979_v17 = vrot.slane %v8729_v53, 5  ;;  %v5577_v14 = vsel %vm9791_vm12, %v5572_v42, %v5576_v52  ;;  %v5983_v13 = vrot.slane %v8730_v16, 5 }
 0x34e   : > { %v5587_v3 = vsel %vm9791_vm12, %v5582_v12, %v5586_v20  ;;  %v7227_v22 = vrot.slane %v5910_v47, 9  ;;  %v5990_v39 = vrot.slane %v11388_v63, 5  ;;  %v5986_v56 = vrot.slane %v8731_v28, 5 }
 0x34f   : > { %v5980_v4 = vsel %vm10012_vm15, %v5978_v54, %v5979_v17  ;;  %v7218_v15 = vcombine.low %v5577_v14, %v5587_v3  ;;  %v5985_v60 = vrot.slane %v5983_v13, 4  ;;  %v5993_v44 = vrot.slane %v11389_v55, 5 }
 0x350   : > { %v5977_v25 = vsel %vm10012_vm15, %v7227_v22, %v5976_v36  ;;  %v5992_v52 = vrot.slane %v5990_v39, 4  ;;  %v7228_v57 = vrot.slane %v5911_v8, 9  ;;  %v7229_v58 = vrot.slane %v5912_v30, 9 }
 0x351   : > { %v7243_v33 = vcombine.low %v5977_v25, %v5980_v4  ;;  %v5987_v43 = vsel %vm10012_vm15, %v5985_v60, %v5986_v56  ;;  %v11390_v18 = vcombine.low %v10760_v32, %v10768_v62  ;;  %v11392_v42 = vcombine.low %v10788_v24, %v10793_v6  ;;  %v8669_v24 = vld [vmem:[#allocation12 + $0x8] sm:$0xff]   ;;  %v8670_v6 = vld [vmem:[#allocation12 + $0x10] sm:$0xff]  }
 0x352   : > { %8070 = vmatmul.mubr.bf16.gmra.mrb[24].mxu0 %v7216_v40  ;;  %v5994_v48 = vsel %vm10012_vm15, %v5992_v52, %v5993_v44  ;;  %v5984_v11 = vsel %vm10012_vm15, %v7228_v57, %v5983_v13  ;;  %v5991_v1 = vsel %vm10012_vm15, %v7229_v58, %v5990_v39  ;;  %v11393_v12 = vcombine.low %v10797_v26, %v10806_v45 }
 0x353   : > { %8073 = vmatprep.mubr.bf16.mxu0 %v7217_v10  ;;  %v7244_v36 = vcombine.low %v5984_v11, %v5987_v43  ;;  %v7245_v40 = vcombine.low %v5991_v1, %v5994_v48  ;;  %v11391_v10 = vcombine.low %v10772_v31, %v10779_v7  ;;  %v11395_v32 = vcombine.low %v10822_v50, %v10829_v23  ;;  %v8668_v31 = vld [vmem:[#allocation12] sm:$0xff]   ;;  %v8673_v23 = vld [vmem:[#allocation12 + $0x28] sm:$0xff]  }
 0x354   : > { %v11396_v7 = vcombine.low %v10838_v5, %v10843_v51  ;;  %v11397_v62 = vcombine.low %v10847_v19, %v10857_v49  ;;  %8125 = vmatprep.subr.bf16.mxu1 %v8668_v31  ;;  %v11398_v26 = vcombine.low %v10864_v37, %v10874_v27  ;;  %v11399_v45 = vcombine.low %v10878_v21, %v10885_v0  ;;  %v8674_v5 = vld [vmem:[#allocation12 + $0x30] sm:$0xff]   ;;  %v8675_v19 = vld [vmem:[#allocation12 + $0x38] sm:$0xff]  }
 0x355   : > { %8126 = vmatpush3.bf16.msra.mxu1 %v8668_v31  ;;  %v11400_v50 = vcombine.low %v10904_v38, %v10910_v59  ;;  %v11401_v51 = vcombine.low %v10914_v35, %v10944_v61 }
 0x356   : > { %8127 = vmatprep.subr.bf16.mxu1 %v8669_v24 }
 0x359   : > { %8128 = vmatpush3.bf16.msra.mxu1 %v8669_v24 }
 0x35a   : > { %8074 = vmatmul.mubr.bf16.gmra.mrb[28].mxu0 %v7218_v15  ;;  %8129 = vmatprep.subr.bf16.mxu1 %v8670_v6 }
 0x35b   : > { %8093 = vmatprep.mubr.bf16.mxu0 %v7243_v33 }
 0x35d   : > { %8130 = vmatpush3.bf16.msra.mxu1 %v8670_v6 }
 0x35e   : > { %8131 = vmatprep.subr.bf16.mxu1 %v8671_v46 }
 0x361   : > { %8132 = vmatpush3.bf16.msra.mxu1 %v8671_v46 }
 0x362   : > { %8094 = vmatmul.mubr.bf16.vlgmr.msra.gmra.mrb[0].mxu0 %v7244_v36  ;;  %8133 = vmatprep.subr.bf16.mxu1 %v8672_v9 }
 0x363   : > { %8097 = vmatprep.mubr.bf16.mxu0 %v7245_v40 }
 0x365   : > { %8134 = vmatpush3.bf16.msra.mxu1 %v8672_v9 }
 0x366   : > { %8135 = vmatprep.subr.bf16.mxu1 %v8673_v23 }
 0x369   : > { %8136 = vmatpush3.bf16.msra.mxu1 %v8673_v23 }
 0x36a   : > { %8098 = vmatmul.mubr.bf16.gmra.mrb[4].mxu0 %v11390_v18  ;;  %8137 = vmatprep.subr.bf16.mxu1 %v8674_v5 }
 0x36b   : > { %8101 = vmatprep.mubr.bf16.mxu0 %v11391_v10 }
 0x36d   : > { %8138 = vmatpush3.bf16.msra.mxu1 %v8674_v5 }
 0x36e   : > { %8139 = vmatprep.subr.bf16.mxu1 %v8675_v19 }
 0x371   : > { %8140 = vmatpush3.bf16.msra.mxu1 %v8675_v19 }
 0x372   : > { %8102 = vmatmul.mubr.bf16.gmra.mrb[8].mxu0 %v11392_v42 }
 0x373   : > { %8105 = vmatprep.mubr.bf16.mxu0 %v11393_v12 }
 0x37a   : > { %8106 = vmatmul.mubr.bf16.gmra.mrb[12].mxu0 %v11394_v34 }
 0x37b   : > { %8109 = vmatprep.mubr.bf16.mxu0 %v11395_v32 }
 0x382   : > { %8110 = vmatmul.mubr.bf16.gmra.mrb[16].mxu0 %v11396_v7 }
 0x383   : > { %8113 = vmatprep.mubr.bf16.mxu0 %v11397_v62 }
 0x38a   : > { %8114 = vmatmul.mubr.bf16.gmra.mrb[20].mxu0 %v11398_v26 }
 0x38b   : > { %8117 = vmatprep.mubr.bf16.mxu0 %v11399_v45 }
 0x392   : > { %8118 = vmatmul.mubr.bf16.gmra.mrb[24].mxu0 %v7256_v29 }
 0x393   : > { %8121 = vmatprep.mubr.bf16.mxu0 %v11400_v50 }
 0x39a   : > { %8122 = vmatmul.mubr.bf16.gmra.mrb[28].mxu0 %v11401_v51 }
 0x3c7   : > { %v7807_v2 = vpop.f32.mrb[40].mxu1 }
 0x3c8   : > { %v2972_v49 = vpop.f32.mrb[41].mxu1 }
 0x3c9   : > { %v7808_v37 = vpop.f32.mrb[42].mxu1 }
 0x3ca   : > { %v2975_v27 = vpop.f32.mrb[43].mxu1 }
 0x3cf   : > { %v7811_v21 = vpop.f32.mrb[44].mxu1 }
 0x3d0   : > { %v2988_v0 = vpop.f32.mrb[45].mxu1 }
 0x3d1   : > { %v7812_v59 = vpop.f32.mrb[46].mxu1 }
 0x3d2   : > { %v2991_v41 = vpop.f32.mrb[47].mxu1 }
 0x3d7   : > { %v7815_v38 = vpop.f32.mrb[48].mxu1 }
 0x3d8   : > { %v3004_v29 = vpop.f32.mrb[49].mxu1 }
 0x3d9   : > { %v7816_v20 = vpop.f32.mrb[50].mxu1 }
 0x3da   : > { %v3007_v54 = vpop.f32.mrb[51].mxu1 }
 0x3df   : > { %v7819_v35 = vpop.f32.mrb[52].mxu1 }
 0x3e0   : > { %v3020_v61 = vpop.f32.mrb[53].mxu1 }
 0x3e1   : > { %v7820_v47 = vpop.f32.mrb[54].mxu1 }
 0x3e2   : > { %v3023_v53 = vpop.f32.mrb[55].mxu1 }
 0x3e7   : > { %v11037_v17 = vpop.f32.mrb[56].mxu1 }
 0x3e8   : > { %v11039_v14 = vpop.f32.mrb[57].mxu1 }
 0x3e9   : > { %v11041_v3 = vpop.f32.mrb[58].mxu1 }
 0x3ea   : > { %v11043_v16 = vpop.f32.mrb[59].mxu1 }
 0x3f0   : > { %v11045_v13 = vpop.f32.mrb[60].mxu1 }
 0x3f1   : > { %v11047_v22 = vpop.f32.mrb[61].mxu1 }
 0x3f2   : > { %v11049_v4 = vpop.f32.mrb[62].mxu1 }
 0x3f3   : > { %v11051_v63 = vpop.f32.mrb[63].mxu1 }
 0x3f8   : > { %v11053_v39 = vpop.f32.mrb[64].mxu1 }
 0x3f9   : > { %v11055_v15 = vpop.f32.mrb[65].mxu1 }
 0x3fa   : > { %v11057_v25 = vpop.f32.mrb[66].mxu1 }
 0x3fb   : > { %v11059_v33 = vpop.f32.mrb[67].mxu1 }
 0x400   : > { %v11061_v60 = vpop.f32.mrb[68].mxu1 }
 0x401   : > { %v11063_v8 = vpop.f32.mrb[69].mxu1 }
 0x402   : > { %v11065_v52 = vpop.f32.mrb[70].mxu1 }
 0x403   : > { %v11067_v28 = vpop.f32.mrb[71].mxu1 }
 0x435   : > { %v8095_v56 = vpop.f32.mrb[0].mxu0 }
 0x436   : > { %v8173_v30 = vadd.f32 %v8095_v56, %v7807_v2  ;;  %v6249_v55 = vpop.f32.mrb[1].mxu0 }
 0x437   : > { %v8174_v44 = vadd.f32 %v6249_v55, %v2972_v49  ;;  %v8096_v57 = vpop.f32.mrb[2].mxu0 }
 0x438   : > { %v8175_v43 = vadd.f32 %v8096_v57, %v7808_v37  ;;  %v6252_v58 = vpop.f32.mrb[3].mxu0 }
 0x439   : > { %v8176_v48 = vadd.f32 %v6252_v58, %v2975_v27 }
 0x43a   : > { %v6409_v11 = vpack.c.bf16 %v8175_v43, %v8173_v30 }
 0x43b   : > { %v6408_v36 = vpack.c.bf16 %v8176_v48, %v8174_v44 }
 0x43d   : > { %v8099_v1 = vpop.f32.mrb[4].mxu0  ;;  %8141 = vmatprep.mubr.bf16.mxu1 %v6408_v36 }
 0x43e   : > { %v8177_v40 = vadd.f32 %v8099_v1, %v7811_v21  ;;  %v6265_v18 = vpop.f32.mrb[5].mxu0  ;;  %8142 = vmatmul.mubr.bf16.vlgmr.msra.gmra.mrb[72].mxu1 %v6409_v11 }
 0x43f   : > { %v8178_v10 = vadd.f32 %v6265_v18, %v2988_v0  ;;  %v8100_v42 = vpop.f32.mrb[6].mxu0 }
 0x440   : > { %v8179_v12 = vadd.f32 %v8100_v42, %v7812_v59  ;;  %v6268_v34 = vpop.f32.mrb[7].mxu0 }
 0x441   : > { %v8180_v32 = vadd.f32 %v6268_v34, %v2991_v41 }
 0x442   : > { %v6411_v7 = vpack.c.bf16 %v8179_v12, %v8177_v40 }
 0x443   : > { %v6410_v62 = vpack.c.bf16 %v8180_v32, %v8178_v10 }
 0x445   : > { %v8103_v31 = vpop.f32.mrb[8].mxu0  ;;  %8145 = vmatprep.mubr.bf16.mxu1 %v6410_v62 }
 0x446   : > { %v8181_v24 = vadd.f32 %v8103_v31, %v7815_v38  ;;  %v6281_v6 = vpop.f32.mrb[9].mxu0  ;;  %8146 = vmatmul.mubr.bf16.gmra.mrb[76].mxu1 %v6411_v7 }
 0x447   : > { %v8182_v26 = vadd.f32 %v6281_v6, %v3004_v29  ;;  %v8104_v45 = vpop.f32.mrb[10].mxu0 }
 0x448   : > { %v8183_v46 = vadd.f32 %v8104_v45, %v7816_v20  ;;  %v6284_v9 = vpop.f32.mrb[11].mxu0 }
 0x449   : > { %v8184_v50 = vadd.f32 %v6284_v9, %v3007_v54  ;;  %v8733_v9 = vld [vmem:[%s9400_s8] sm:$0xff] }
 0x44a   : > { %v6413_v23 = vpack.c.bf16 %v8183_v46, %v8181_v24 }
 0x44b   : > { %v6412_v5 = vpack.c.bf16 %v8184_v50, %v8182_v26 }
 0x44d   : > { %v8107_v51 = vpop.f32.mrb[12].mxu0  ;;  %8149 = vmatprep.mubr.bf16.mxu1 %v6412_v5 }
 0x44e   : > { %v8185_v19 = vadd.f32 %v8107_v51, %v7819_v35  ;;  %v6297_v2 = vpop.f32.mrb[13].mxu0  ;;  %8150 = vmatmul.mubr.bf16.gmra.mrb[80].mxu1 %v6413_v23  ;;  %v8734_v51 = vld [vmem:[%s9400_s8 + $0x18] sm:$0xff] }
 0x44f   : > { %v8186_v49 = vadd.f32 %v6297_v2, %v3020_v61  ;;  %v8108_v37 = vpop.f32.mrb[14].mxu0 }
 0x450   : > { %v8187_v27 = vadd.f32 %v8108_v37, %v7820_v47  ;;  %v6300_v21 = vpop.f32.mrb[15].mxu0 }
 0x451   : > { %v8188_v0 = vadd.f32 %v6300_v21, %v3023_v53 }
 0x452   : > { %v6415_v59 = vpack.c.bf16 %v8187_v27, %v8185_v19 }
 0x453   : > { %v6414_v41 = vpack.c.bf16 %v8188_v0, %v8186_v49  ;;  %v8735_v49 = vld [vmem:[%s9400_s8 + $0x8] sm:$0xff] }
 0x455   : > { %v8111_v38 = vpop.f32.mrb[16].mxu0  ;;  %8153 = vmatprep.mubr.bf16.mxu1 %v6414_v41 }
 0x456   : > { %v8189_v29 = vadd.f32 %v8111_v38, %v11037_v17  ;;  %v6313_v20 = vpop.f32.mrb[17].mxu0  ;;  %8154 = vmatmul.mubr.bf16.gmra.mrb[84].mxu1 %v6415_v59 }
 0x457   : > { %v8190_v54 = vadd.f32 %v6313_v20, %v11039_v14  ;;  %v8112_v56 = vpop.f32.mrb[18].mxu0  ;;  %v8736_v20 = vld [vmem:[%s9400_s8 + $0x30] sm:$0xff] }
 0x458   : > { %v8191_v35 = vadd.f32 %v8112_v56, %v11041_v3  ;;  %v6316_v30 = vpop.f32.mrb[19].mxu0 }
 0x459   : > { %v8192_v61 = vadd.f32 %v6316_v30, %v11043_v16  ;;  %v8737_v30 = vld [vmem:[%s9400_s8 + $0x20] sm:$0xff] }
 0x45a   : > { %v6417_v55 = vpack.c.bf16 %v8191_v35, %v8189_v29 }
 0x45b   : > { %v6416_v47 = vpack.c.bf16 %v8192_v61, %v8190_v54 }
 0x45d   : > { %v8115_v44 = vpop.f32.mrb[20].mxu0  ;;  %8157 = vmatprep.mubr.bf16.mxu1 %v6416_v47 }
 0x45e   : > { %v8193_v53 = vadd.f32 %v8115_v44, %v11045_v13  ;;  %v6329_v57 = vpop.f32.mrb[21].mxu0  ;;  %8158 = vmatmul.mubr.bf16.gmra.mrb[88].mxu1 %v6417_v55  ;;  %v8738_v44 = vld [vmem:[%s9400_s8 + $0x38] sm:$0xff] }
 0x45f   : > { %v8194_v17 = vadd.f32 %v6329_v57, %v11047_v22  ;;  %v8116_v43 = vpop.f32.mrb[22].mxu0 }
 0x460   : > { %v8195_v58 = vadd.f32 %v8116_v43, %v11049_v4  ;;  %v6332_v14 = vpop.f32.mrb[23].mxu0 }
 0x461   : > { %v8196_v48 = vadd.f32 %v6332_v14, %v11051_v63 }
 0x462   : > { %v6419_v3 = vpack.c.bf16 %v8195_v58, %v8193_v53 }
 0x463   : > { %v6418_v11 = vpack.c.bf16 %v8196_v48, %v8194_v17  ;;  %v8739_v17 = vld [vmem:[%s9400_s8 + $0x28] sm:$0xff] }
 0x465   : > { %v8119_v36 = vpop.f32.mrb[24].mxu0  ;;  %8161 = vmatprep.mubr.bf16.mxu1 %v6418_v11 }
 0x466   : > { %v8197_v16 = vadd.f32 %v8119_v36, %v11053_v39  ;;  %v6345_v1 = vpop.f32.mrb[25].mxu0  ;;  %8162 = vmatmul.mubr.bf16.gmra.mrb[92].mxu1 %v6419_v3 }
 0x467   : > { %v8198_v13 = vadd.f32 %v6345_v1, %v11055_v15  ;;  %v8120_v40 = vpop.f32.mrb[26].mxu0  ;;  %v8740_v1 = vld [vmem:[%s9400_s8 + $0x50] sm:$0xff] }
 0x468   : > { %v8199_v18 = vadd.f32 %v8120_v40, %v11057_v25  ;;  %v6348_v22 = vpop.f32.mrb[27].mxu0 }
 0x469   : > { %v8200_v10 = vadd.f32 %v6348_v22, %v11059_v33  ;;  %v8741_v22 = vld [vmem:[%s9400_s8 + $0x40] sm:$0xff] }
 0x46a   : > { %v6421_v4 = vpack.c.bf16 %v8199_v18, %v8197_v16 }
 0x46b   : > { %v6420_v42 = vpack.c.bf16 %v8200_v10, %v8198_v13 }
 0x46d   : > { %v8123_v12 = vpop.f32.mrb[28].mxu0  ;;  %8165 = vmatprep.mubr.bf16.mxu1 %v6420_v42 }
 0x46e   : > { %v8201_v63 = vadd.f32 %v8123_v12, %v11061_v60  ;;  %v6361_v34 = vpop.f32.mrb[29].mxu0  ;;  %8166 = vmatmul.mubr.bf16.gmra.mrb[96].mxu1 %v6421_v4  ;;  %v11088_v60 = vld [vmem:[%s11402_s18] ss:$0 sm:$0xff]  ;;  %v8742_v12 = vld [vmem:[%s9400_s8 + $0x58] sm:$0xff] }
 0x46f   : > { %v8202_v39 = vadd.f32 %v6361_v34, %v11063_v8  ;;  %v8124_v32 = vpop.f32.mrb[30].mxu0 }
 0x470   : > { %v8203_v15 = vadd.f32 %v8124_v32, %v11065_v52  ;;  %v6364_v7 = vpop.f32.mrb[31].mxu0 }
 0x471   : > { %v8204_v25 = vadd.f32 %v6364_v7, %v11067_v28  ;;  %v8732_v28 = vld [vmem:[%s9400_s8 + $0x10] sm:$0xff] }
 0x472   : > { %v6423_v62 = vpack.c.bf16 %v8203_v15, %v8201_v63 }
 0x473   : > { %v6422_v33 = vpack.c.bf16 %v8204_v25, %v8202_v39  ;;  %v8743_v39 = vld [vmem:[%s9400_s8 + $0x48] sm:$0xff] }
 0x475   : > { %8169 = vmatprep.mubr.bf16.mxu1 %v6422_v33 }
 0x476   : > { %8170 = vmatmul.mubr.bf16.gmra.mrb[100].mxu1 %v6423_v62 }
 0x511   : > { %v8143_v31 = vpop.f32.mrb[72].mxu1 }
 0x512   : > { %v6538_v8 = vadd.f32 %v8143_v31, %v11088_v60  ;;  %v6529_v24 = vpop.f32.mrb[73].mxu1 }
 0x513   : > { %v6530_v52 = vadd.f32 %v11088_v60, %v6529_v24  ;;  %v8144_v6 = vpop.f32.mrb[74].mxu1  ;;  %v8744_v24 = vld [vmem:[%s9400_s8 + $0x70] sm:$0xff] }
 0x514   : > { %v6658_v26 = vadd.f32 %v8732_v28, %v6538_v8  ;;  %v6541_v45 = vadd.f32 %v8144_v6, %v11088_v60  ;;  %v6532_v46 = vpop.f32.mrb[75].mxu1 }
 0x515   : > { %v6656_v50 = vadd.f32 %v8733_v9, %v6530_v52  ;;  %v6533_v23 = vadd.f32 %v11088_v60, %v6532_v46 }
 0x516   : > { %v6690_v5 = vmax.f32 %v6658_v26, 0.0  ;;  %v6659_v19 = vadd.f32 %v8734_v51, %v6541_v45  ;;  %v8745_v26 = vld [vmem:[%s9400_s8 + $0x60] sm:$0xff]  ;;  %v8747_v51 = vld [vmem:[%s9400_s8 + $0x68] sm:$0xff] }
 0x517   : > { %v6688_v2 = vmax.f32 %v6656_v50, 0.0  ;;  %v6657_v37 = vadd.f32 %v8735_v49, %v6533_v23  ;;  %v8746_v50 = vld [vmem:[%s9400_s8 + $0x78] sm:$0xff] }
 0x518   : > { %6722 = vst [vmem:[%s11100_s1 + $0x10] sm:$0xff] %v6690_v5  ;;  %v6691_v27 = vmax.f32 %v6659_v19, 0.0 }
 0x519   : > { %6720 = vst [vmem:[%s11100_s1] sm:$0xff] %v6688_v2  ;;  %v6689_v21 = vmax.f32 %v6657_v37, 0.0  ;;  %v8147_v0 = vpop.f32.mrb[76].mxu1 }
 0x51a   : > { %6723 = vst [vmem:[%s11100_s1 + $0x18] sm:$0xff] %v6691_v27  ;;  %v6554_v59 = vadd.f32 %v8147_v0, %v11088_v60  ;;  %v6545_v41 = vpop.f32.mrb[77].mxu1 }
 0x51b   : > { %6721 = vst [vmem:[%s11100_s1 + $0x8] sm:$0xff] %v6689_v21  ;;  %v6546_v38 = vadd.f32 %v11088_v60, %v6545_v41  ;;  %v8148_v29 = vpop.f32.mrb[78].mxu1  ;;  %v8748_v41 = vld [vmem:[%s9400_s8 + $0x90] sm:$0xff] }
 0x51c   : > { %v6662_v54 = vadd.f32 %v8736_v20, %v6554_v59  ;;  %v6557_v56 = vadd.f32 %v8148_v29, %v11088_v60  ;;  %v6548_v35 = vpop.f32.mrb[79].mxu1 }
 0x51d   : > { %v6660_v61 = vadd.f32 %v8737_v30, %v6546_v38  ;;  %v6549_v55 = vadd.f32 %v11088_v60, %v6548_v35 }
 0x51e   : > { %v6694_v47 = vmax.f32 %v6662_v54, 0.0  ;;  %v6663_v53 = vadd.f32 %v8738_v44, %v6557_v56  ;;  %v8749_v54 = vld [vmem:[%s9400_s8 + $0x80] sm:$0xff]  ;;  %v8751_v44 = vld [vmem:[%s9400_s8 + $0x88] sm:$0xff] }
 0x51f   : > { %v6692_v57 = vmax.f32 %v6660_v61, 0.0  ;;  %v6661_v43 = vadd.f32 %v8739_v17, %v6549_v55  ;;  %v8750_v61 = vld [vmem:[%s9400_s8 + $0x98] sm:$0xff] }
 0x520   : > { %6726 = vst [vmem:[%s11100_s1 + $0x30] sm:$0xff] %v6694_v47  ;;  %v6695_v58 = vmax.f32 %v6663_v53, 0.0 }
 0x521   : > { %6724 = vst [vmem:[%s11100_s1 + $0x20] sm:$0xff] %v6692_v57  ;;  %v6693_v14 = vmax.f32 %v6661_v43, 0.0  ;;  %v8151_v48 = vpop.f32.mrb[80].mxu1 }
 0x522   : > { %6727 = vst [vmem:[%s11100_s1 + $0x38] sm:$0xff] %v6695_v58  ;;  %v6570_v3 = vadd.f32 %v8151_v48, %v11088_v60  ;;  %v6561_v11 = vpop.f32.mrb[81].mxu1 }
 0x523   : > { %6725 = vst [vmem:[%s11100_s1 + $0x28] sm:$0xff] %v6693_v14  ;;  %v6562_v36 = vadd.f32 %v11088_v60, %v6561_v11  ;;  %v8152_v16 = vpop.f32.mrb[82].mxu1  ;;  %v8752_v11 = vld [vmem:[%s9400_s8 + $0xb0] sm:$0xff] }
 0x524   : > { %v6666_v13 = vadd.f32 %v8740_v1, %v6570_v3  ;;  %v6573_v40 = vadd.f32 %v8152_v16, %v11088_v60  ;;  %v6564_v18 = vpop.f32.mrb[83].mxu1 }
 0x525   : > { %v6664_v10 = vadd.f32 %v8741_v22, %v6562_v36  ;;  %v6565_v4 = vadd.f32 %v11088_v60, %v6564_v18 }
 0x526   : > { %v6698_v42 = vmax.f32 %v6666_v13, 0.0  ;;  %v6667_v63 = vadd.f32 %v8742_v12, %v6573_v40  ;;  %v8753_v13 = vld [vmem:[%s9400_s8 + $0xa0] sm:$0xff]  ;;  %v8755_v12 = vld [vmem:[%s9400_s8 + $0xa8] sm:$0xff] }
 0x527   : > { %v6696_v34 = vmax.f32 %v6664_v10, 0.0  ;;  %v6665_v32 = vadd.f32 %v8743_v39, %v6565_v4  ;;  %v8754_v10 = vld [vmem:[%s9400_s8 + $0xb8] sm:$0xff] }
 0x528   : > { %6730 = vst [vmem:[%s11100_s1 + $0x50] sm:$0xff] %v6698_v42  ;;  %v6699_v15 = vmax.f32 %v6667_v63, 0.0 }
 0x529   : > { %6728 = vst [vmem:[%s11100_s1 + $0x40] sm:$0xff] %v6696_v34  ;;  %v6697_v7 = vmax.f32 %v6665_v32, 0.0  ;;  %v8155_v25 = vpop.f32.mrb[84].mxu1 }
 0x52a   : > { %6731 = vst [vmem:[%s11100_s1 + $0x58] sm:$0xff] %v6699_v15  ;;  %v6586_v62 = vadd.f32 %v8155_v25, %v11088_v60  ;;  %v6577_v33 = vpop.f32.mrb[85].mxu1 }
 0x52b   : > { %6729 = vst [vmem:[%s11100_s1 + $0x48] sm:$0xff] %v6697_v7  ;;  %v6578_v31 = vadd.f32 %v11088_v60, %v6577_v33  ;;  %v8156_v8 = vpop.f32.mrb[86].mxu1  ;;  %v8756_v33 = vld [vmem:[%s9400_s8 + $0xd0] sm:$0xff] }
 0x52c   : > { %v6670_v52 = vadd.f32 %v8744_v24, %v6586_v62  ;;  %v6589_v6 = vadd.f32 %v8156_v8, %v11088_v60  ;;  %v6580_v28 = vpop.f32.mrb[87].mxu1 }
 0x52d   : > { %v6668_v45 = vadd.f32 %v8745_v26, %v6578_v31  ;;  %v6581_v46 = vadd.f32 %v11088_v60, %v6580_v28 }
 0x52e   : > { %v6702_v9 = vmax.f32 %v6670_v52, 0.0  ;;  %v6671_v23 = vadd.f32 %v8746_v50, %v6589_v6  ;;  %v8757_v52 = vld [vmem:[%s9400_s8 + $0xc0] sm:$0xff]  ;;  %v8759_v50 = vld [vmem:[%s9400_s8 + $0xc8] sm:$0xff] }
 0x52f   : > { %v6700_v5 = vmax.f32 %v6668_v45, 0.0  ;;  %v6669_v19 = vadd.f32 %v8747_v51, %v6581_v46  ;;  %v8758_v45 = vld [vmem:[%s9400_s8 + $0xd8] sm:$0xff] }
 0x530   : > { %6734 = vst [vmem:[%s11100_s1 + $0x70] sm:$0xff] %v6702_v9  ;;  %v6703_v2 = vmax.f32 %v6671_v23, 0.0 }
 0x531   : > { %6732 = vst [vmem:[%s11100_s1 + $0x60] sm:$0xff] %v6700_v5  ;;  %v6701_v49 = vmax.f32 %v6669_v19, 0.0  ;;  %v8159_v37 = vpop.f32.mrb[88].mxu1 }
 0x532   : > { %6735 = vst [vmem:[%s11100_s1 + $0x78] sm:$0xff] %v6703_v2  ;;  %v6602_v27 = vadd.f32 %v8159_v37, %v11088_v60  ;;  %v6593_v21 = vpop.f32.mrb[89].mxu1 }
 0x533   : > { %6733 = vst [vmem:[%s11100_s1 + $0x68] sm:$0xff] %v6701_v49  ;;  %v6594_v0 = vadd.f32 %v11088_v60, %v6593_v21  ;;  %v8160_v59 = vpop.f32.mrb[90].mxu1  ;;  %v8760_v21 = vld [vmem:[%s9400_s8 + $0xf0] sm:$0xff] }
 0x534   : > { %v6674_v38 = vadd.f32 %v8748_v41, %v6602_v27  ;;  %v6605_v29 = vadd.f32 %v8160_v59, %v11088_v60  ;;  %v6596_v20 = vpop.f32.mrb[91].mxu1 }
 0x535   : > { %v6672_v56 = vadd.f32 %v8749_v54, %v6594_v0  ;;  %v6597_v35 = vadd.f32 %v11088_v60, %v6596_v20 }
 0x536   : > { %v6706_v30 = vmax.f32 %v6674_v38, 0.0  ;;  %v6675_v55 = vadd.f32 %v8750_v61, %v6605_v29  ;;  %v8761_v38 = vld [vmem:[%s9400_s8 + $0xe0] sm:$0xff]  ;;  %v8763_v61 = vld [vmem:[%s9400_s8 + $0xe8] sm:$0xff] }
 0x537   : > { %v6704_v47 = vmax.f32 %v6672_v56, 0.0  ;;  %v6673_v53 = vadd.f32 %v8751_v44, %v6597_v35  ;;  %v8762_v56 = vld [vmem:[%s9400_s8 + $0xf8] sm:$0xff]  ;;  %s9046_s8 = smov [#allocation14]  }
 0x538   : > { %6738 = vst [vmem:[%s11100_s1 + $0x90] sm:$0xff] %v6706_v30  ;;  %v6707_v57 = vmax.f32 %v6675_v55, 0.0  ;;  %s8942_s9 = sshll.u32 %s9046_s8, 4  ;;  %s8943_s9 = int_to_ptr.vmem [resolvable:$false] %s8942_s9 }
 0x539   : > { %6736 = vst [vmem:[%s11100_s1 + $0x80] sm:$0xff] %v6704_v47  ;;  %v6705_v17 = vmax.f32 %v6673_v53, 0.0  ;;  %v8163_v43 = vpop.f32.mrb[92].mxu1  ;;  %s8944_s17 = scalar_lea.vmem %s8943_s9, 8192  ;;  %p8945_p13 = scmp.lt.s32.totalorder %s11194_s23, %s8943_s9 }
 0x53a   : > { %6739 = vst [vmem:[%s11100_s1 + $0x98] sm:$0xff] %v6707_v57  ;;  %v6618_v58 = vadd.f32 %v8163_v43, %v11088_v60  ;;  %v6609_v14 = vpop.f32.mrb[93].mxu1  ;;  %p8946_p5 = scmp.lt.s32.totalorder %s8944_s17, %s8938_s15 }
 0x53b   : > { %6737 = vst [vmem:[%s11100_s1 + $0x88] sm:$0xff] %v6705_v17  ;;  %v6610_v48 = vadd.f32 %v11088_v60, %v6609_v14  ;;  %v8164_v3 = vpop.f32.mrb[94].mxu1 }
 0x53c   : > { %v6678_v36 = vadd.f32 %v8752_v11, %v6618_v58  ;;  %v6621_v16 = vadd.f32 %v8164_v3, %v11088_v60  ;;  %v6612_v1 = vpop.f32.mrb[95].mxu1  ;;  %p8947_p3 = por %p8946_p5, %p8945_p13 }
 0x53d   : > { %v6676_v40 = vadd.f32 %v8753_v13, %v6610_v48  ;;  %v6613_v18 = vadd.f32 %v11088_v60, %v6612_v1 }
 0x53e   : > { %v6710_v22 = vmax.f32 %v6678_v36, 0.0  ;;  %v6679_v4 = vadd.f32 %v8754_v10, %v6621_v16  ;;  %p8948_p6 = pnand %p8947_p3, %p8941_p8 }
 0x53f   : > { %v6708_v42 = vmax.f32 %v6676_v40, 0.0  ;;  %v6677_v63 = vadd.f32 %v8755_v12, %v6613_v18 }
 0x540   : > { %6742 = vst [vmem:[%s11100_s1 + $0xb0] sm:$0xff] %v6710_v22  ;;  %v6711_v34 = vmax.f32 %v6679_v4, 0.0 }
 0x541   : > { %6740 = vst [vmem:[%s11100_s1 + $0xa0] sm:$0xff] %v6708_v42  ;;  %v6709_v39 = vmax.f32 %v6677_v63, 0.0  ;;  %v8167_v32 = vpop.f32.mrb[96].mxu1 }
 0x542   : > { %6743 = vst [vmem:[%s11100_s1 + $0xb8] sm:$0xff] %v6711_v34  ;;  %v6634_v15 = vadd.f32 %v8167_v32, %v11088_v60  ;;  %v6625_v7 = vpop.f32.mrb[97].mxu1 }
 0x543   : > { %6741 = vst [vmem:[%s11100_s1 + $0xa8] sm:$0xff] %v6709_v39  ;;  %v6626_v25 = vadd.f32 %v11088_v60, %v6625_v7  ;;  %v8168_v62 = vpop.f32.mrb[98].mxu1 }
 0x544   : > { %v6682_v31 = vadd.f32 %v8756_v33, %v6634_v15  ;;  %v6637_v8 = vadd.f32 %v8168_v62, %v11088_v60  ;;  %v6628_v24 = vpop.f32.mrb[99].mxu1 }
 0x545   : > { %v6680_v6 = vadd.f32 %v8757_v52, %v6626_v25  ;;  %v6629_v28 = vadd.f32 %v11088_v60, %v6628_v24 }
 0x546   : > { %v6714_v26 = vmax.f32 %v6682_v31, 0.0  ;;  %v6683_v46 = vadd.f32 %v8758_v45, %v6637_v8 }
 0x547   : > { %v6712_v9 = vmax.f32 %v6680_v6, 0.0  ;;  %v6681_v23 = vadd.f32 %v8759_v50, %v6629_v28 }
 0x548   : > { %6746 = vst [vmem:[%s11100_s1 + $0xd0] sm:$0xff] %v6714_v26  ;;  %v6715_v5 = vmax.f32 %v6683_v46, 0.0 }
 0x549   : > { %6744 = vst [vmem:[%s11100_s1 + $0xc0] sm:$0xff] %v6712_v9  ;;  %v6713_v51 = vmax.f32 %v6681_v23, 0.0  ;;  %v8171_v19 = vpop.f32.mrb[100].mxu1 }
 0x54a   : > { %6747 = vst [vmem:[%s11100_s1 + $0xd8] sm:$0xff] %v6715_v5  ;;  %v6650_v2 = vadd.f32 %v8171_v19, %v11088_v60  ;;  %v6641_v49 = vpop.f32.mrb[101].mxu1 }
 0x54b   : > { %6745 = vst [vmem:[%s11100_s1 + $0xc8] sm:$0xff] %v6713_v51  ;;  %v6642_v37 = vadd.f32 %v11088_v60, %v6641_v49  ;;  %v8172_v27 = vpop.f32.mrb[102].mxu1 }
 0x54c   : > { %v6686_v0 = vadd.f32 %v8760_v21, %v6650_v2  ;;  %v6653_v59 = vadd.f32 %v8172_v27, %v11088_v60  ;;  %v6644_v41 = vpop.f32.mrb[103].mxu1 }
 0x54d   : > { %v6684_v29 = vadd.f32 %v8761_v38, %v6642_v37  ;;  %v6645_v20 = vadd.f32 %v11088_v60, %v6644_v41 }
 0x54e   : > { %v6718_v54 = vmax.f32 %v6686_v0, 0.0  ;;  %v6687_v35 = vadd.f32 %v8762_v56, %v6653_v59 }
 0x54f   : > { %v6716_v30 = vmax.f32 %v6684_v29, 0.0  ;;  %v6685_v55 = vadd.f32 %v8763_v61, %v6645_v20 }
 0x550   : > { %6750 = vst [vmem:[%s11100_s1 + $0xf0] sm:$0xff] %v6718_v54  ;;  %v6719_v47 = vmax.f32 %v6687_v35, 0.0 }
 0x551   : > { %6748 = vst [vmem:[%s11100_s1 + $0xe0] sm:$0xff] %v6716_v30  ;;  %v6717_v60 = vmax.f32 %v6685_v55, 0.0 }
 0x552   : > { %6751 = vst [vmem:[%s11100_s1 + $0xf8] sm:$0xff] %v6719_v47 }
 0x553   : > { %6749 = vst [vmem:[%s11100_s1 + $0xe8] sm:$0xff] %v6717_v60 }
 0x554   : > { %8951 = shalt.err (!%p8948_p6)
}
 0x555   : > { %s8952_s22 = scalar_lea.hbm %s11192_s13, 4096  ;;  %s8956_s11 = scalar_lea.hbm %s11405_s3, 8192 }
 0x556   : > { %p8953_p7 = scmp.ne.s32.totalorder %s11192_s13, %s8952_s22  ;;  %p8957_p4 = scmp.lt.u32.totalorder %s11192_s13, %s11405_s3 }
 0x557   : > { %p8958_p12 = scmp.lt.u32.totalorder %s8956_s11, %s8952_s22  ;;  %p8960_p11 = scmp.lt.u32.totalorder %s8952_s22, %s11192_s13 }
 0x558   : > { %p8954_p9 = pnand %p8953_p7, %p11406_p10 }
 0x559   : > { %p8959_p2 = por %p8958_p12, %p8957_p4 }
 0x55a   : > { %p8955_p0 = pneg %p8954_p9 }
 0x55b   : > { %p8961_p1 = por %p8960_p11, %p8959_p2 }
 0x55d   : > { %p8962_p8 = pnand %p8961_p1, %p8955_p0 }
 0x55f   : > { %8965 = shalt.err (!%p8962_p8)
}
 0x560   : > { %s9047_s20 = smov 128   ;;  %s9048_s29 = smov 8  }
 0x561   : > { %8447 = dma.vmem_to_hbm [thread:$0]  (%p11406_p10), %s11194_s23, 4096, %s11192_s13, %s6753_s16, %s9047_s20, %s9047_s20, %s9048_s29  }
 0x562 PF: > { %s11407_s21 = sld [smem:[#allocation20_spill]]  ;;  %s11408_s18 = sld [smem:[#allocation26_spill]] }
 0x563   : > { %s11409_s1 = sld [smem:[#allocation24_spill]] }
 0x568   : > { %s6784_s7 = sand.u32 1, %s11407_s21   ;;  %p11410_p13 = scmp.ne.s32.totalorder %s11408_s18, 0 }
 0x569   : > { %p11411_p5 = scmp.ge.s32.totalorder %s11409_s1, 2  ;;  %s6785_s10 = scalar_lea.sflag [#allocation5], %s6784_s7 }
 0x56b   : > { %p8470_p3 = pnand %p11411_p5, %p11410_p13 }
 0x56d   : > { %9007 = dma.done.wait (!%p8470_p3), %s6785_s10, 4096  }
 0x56e   : > { %9009 = vsyncadd (!%p8470_p3), %s6785_s10, 4294963200  ;;  %s29_s10 = sadd.s32 1, %s11409_s1   ;;  %s11412_s12 = sld [smem:[#allocation21_spill]] }
 0x56f   : > { %p26_p6 = scmp.ge.s32.totalorder %s29_s10, 4   ;;  %s11413_s29 = sld [smem:[#allocation28_spill]] }
 0x570   : > { %s11414_s30 = sld [smem:[#allocation23_spill]]  ;;  %s11415_s9 = sld [smem:[#allocation27_spill]] }
 0x571   : > { %s11416_s27 = smov %s9016_s28  ;;  %28 = sbr.rel (!%p26_p6) target bundleno = 15 (0xf), region = 144 }
 0x574   : > { %s11417_s28 = smov %s11412_s12 }
 0x578   :  { %6790 = vsyncpa [#allocation4], 1 }
 0x579   :  { %6792 = vsyncpa [#allocation4 + $0x1], 1 }
 0x57a   :  { %6793 = vsyncpa [#allocation7], 1 }
 0x57b   :  { %6795 = vsyncpa [#allocation7 + $0x1], 1 }
 0x57c   :  { %6796 = vsyncpa [#allocation10], 1 }
 0x57d   :  { %6797 = vsyncpa [#allocation13], 1 }
 0x57e   :  { %6798 = vsyncpa [#allocation5], 1 }
 0x57f   :  { %6800 = vsyncpa [#allocation5 + $0x1], 1 }

</bundles_post_ra>
